<compile_context>
chip_gen: v7x
topology: tpu7x:2x2x1
jax: 0.10.0
libtpu: 0.0.40
codegen_flags: <defaults>
</compile_context>

<pallas_src>
import functools

import jax
import jax.numpy as jnp
from jax import lax
from jax.experimental import pallas as pl
from jax.experimental.pallas import tpu as pltpu

LANE = 128      # out-channel (lane) padding granularity
TM = 256        # max M tile: multiple of 256 (v6e MXU) and 128 (v5e)
MAX_TK = 1024   # upper bound for the K (reduction) tile
VMEM_LIMIT = 32 * 1024 * 1024  # safe on v5e/v6e (128 MiB) and v7x (64 MiB)


def _round_up(v, m):
    return ((v + m - 1) // m) * m


def _pick_tk(K):
    """Largest K tile that is a multiple of 128, divides K and is <= MAX_TK."""
    if K % LANE != 0 or K <= MAX_TK:
        return K
    q = K // LANE
    best = 1
    for d in range(1, q + 1):
        if q % d == 0 and LANE * d <= MAX_TK:
            best = d
    return LANE * best


# ----------------------------------------------------------------------------
# Pallas kernels
# ----------------------------------------------------------------------------
def _mm_bias_act_kernel_ktiled(x_ref, w_ref, b_ref, o_ref, acc_ref, *, relu):
    """Grid = (M tiles, K tiles). f32 VMEM accumulator, bias+ReLU on last K step."""
    @pl.when(pl.program_id(1) == 0)
    def _init():
        acc_ref[...] = jnp.zeros_like(acc_ref)

    acc_ref[...] += jnp.dot(x_ref[...], w_ref[...],
                            preferred_element_type=jnp.float32)

    @pl.when(pl.program_id(1) == pl.num_programs(1) - 1)
    def _finalize():
        r = acc_ref[...] + b_ref[...]
        if relu:
            r = jnp.maximum(r, 0.0)
        o_ref[...] = r.astype(o_ref.dtype)


def _mm_bias_act_kernel_single(x_ref, w_ref, b_ref, o_ref, *, relu):
    """Grid = (M tiles,). Whole reduction in one MXU pass, no scratch / pl.when."""
    r = jnp.dot(x_ref[...], w_ref[...],
                preferred_element_type=jnp.float32) + b_ref[...]
    if relu:
        r = jnp.maximum(r, 0.0)
    o_ref[...] = r.astype(o_ref.dtype)


def _matmul_bias_act(patches, w2, b, *, relu, out_dtype):
    """(M, K) bf16 @ (K, Coutp) bf16 + bias, optional ReLU. Coutp must be a multiple of 128."""
    M, K = patches.shape
    K2, Coutp = w2.shape
    assert K == K2 and Coutp % LANE == 0

    # Adaptive M tile: small layers get one tile sized to M (rounded to the 8-sublane
    # granule); big layers use TM=256 tiles. No divisibility asserts — zero rows are
    # padded in and sliced off afterwards.
    if M <= TM:
        M_pad = _round_up(M, 8)
        tm = M_pad
    else:
        M_pad = _round_up(M, TM)
        tm = TM
    if M_pad != M:
        patches = jnp.pad(patches, ((0, M_pad - M), (0, 0)))

    TK = _pick_tk(K)
    nk = K // TK
    b2 = b.reshape(1, Coutp)

    out_itemsize = jnp.dtype(out_dtype).itemsize
    cost = pl.CostEstimate(
        flops=2 * M_pad * K * Coutp,
        transcendentals=0,
        bytes_accessed=int(M_pad * K * 2 + w2.size * 2 + b.size * 4
                           + M_pad * Coutp * out_itemsize))

    if nk == 1:
        out = pl.pallas_call(
            functools.partial(_mm_bias_act_kernel_single, relu=relu),
            out_shape=jax.ShapeDtypeStruct((M_pad, Coutp), out_dtype),
            grid_spec=pltpu.PrefetchScalarGridSpec(
                num_scalar_prefetch=0,
                grid=(M_pad // tm,),
                in_specs=[
                    pl.BlockSpec((tm, K), lambda i: (i, 0)),
                    pl.BlockSpec((K, Coutp), lambda i: (0, 0)),
                    pl.BlockSpec((1, Coutp), lambda i: (0, 0)),
                ],
                out_specs=pl.BlockSpec((tm, Coutp), lambda i: (i, 0)),
            ),
            compiler_params=pltpu.CompilerParams(
                dimension_semantics=("parallel",),
                vmem_limit_bytes=VMEM_LIMIT,
            ),
            cost_estimate=cost,
        )(patches, w2, b2)
    else:
        out = pl.pallas_call(
            functools.partial(_mm_bias_act_kernel_ktiled, relu=relu),
            out_shape=jax.ShapeDtypeStruct((M_pad, Coutp), out_dtype),
            grid_spec=pltpu.PrefetchScalarGridSpec(
                num_scalar_prefetch=0,
                grid=(M_pad // tm, nk),
                in_specs=[
                    pl.BlockSpec((tm, TK), lambda i, k: (i, k)),
                    pl.BlockSpec((TK, Coutp), lambda i, k: (k, 0)),
                    pl.BlockSpec((1, Coutp), lambda i, k: (0, 0)),
                ],
                out_specs=pl.BlockSpec((tm, Coutp), lambda i, k: (i, 0)),
                scratch_shapes=[pltpu.VMEM((tm, Coutp), jnp.float32)],
            ),
            compiler_params=pltpu.CompilerParams(
                dimension_semantics=("parallel", "arbitrary"),
                vmem_limit_bytes=VMEM_LIMIT,
            ),
            cost_estimate=cost,
        )(patches, w2, b2)
    return out[:M] if M_pad != M else out


# ----------------------------------------------------------------------------
# Glue: patch extraction and conv wrappers (NHWC, channel-padded bf16 activations)
# ----------------------------------------------------------------------------
def _extract_patches(x_pad, KH, KW, stride, Ho, Wo):
    # x_pad: (N, Hp, Wp, C) -> (N*Ho*Wo, KH*KW*C), patch column order (ky, kx, c)
    N, Hp, Wp, C = x_pad.shape
    cols = []
    for ky in range(KH):
        for kx in range(KW):
            sl = lax.slice(
                x_pad,
                (0, ky, kx, 0),
                (N, ky + (Ho - 1) * stride + 1, kx + (Wo - 1) * stride + 1, C),
                (1, stride, stride, 1),
            )
            cols.append(sl)  # (N, Ho, Wo, C)
    patches = jnp.stack(cols, axis=3)  # (N, Ho, Wo, KH*KW, C)
    return patches.reshape(N * Ho * Wo, KH * KW * C)


def conv2d(x, w_pt, b, *, stride=1, padding=1, relu=True, out_dtype=jnp.bfloat16):
    """x: (N,H,W,Cp) bf16 NHWC (Cp may exceed the real Cin with zero channels);
    w_pt: PyTorch Conv2d weight (Cout, Cin, KH, KW); b: (Cout,)."""
    N, H, W, Cp = x.shape
    Cout, Cin, KH, KW = w_pt.shape
    Coutp = _round_up(Cout, LANE)
    Ho = (H + 2 * padding - KH) // stride + 1
    Wo = (W + 2 * padding - KW) // stride + 1
    if padding:
        x = jnp.pad(x, ((0, 0), (padding, padding), (padding, padding), (0, 0)))
    if KH == 1 and KW == 1 and stride == 1:
        patches = x.reshape(N * Ho * Wo, Cp)          # 1x1 conv: no im2col
    else:
        patches = _extract_patches(x, KH, KW, stride, Ho, Wo)
    # Weight: pad Cin -> Cp (zero rows line up with zero activation channels) and
    # Cout -> Coutp (lane-dense stores), reorder to (ky, kx, cin) x cout.
    wpad = jnp.pad(w_pt, ((0, Coutp - Cout), (0, Cp - Cin), (0, 0), (0, 0)))
    w2 = jnp.transpose(wpad, (2, 3, 1, 0)).reshape(KH * KW * Cp, Coutp).astype(jnp.bfloat16)
    bpad = jnp.pad(b, (0, Coutp - Cout)).astype(jnp.float32)
    out = _matmul_bias_act(patches, w2, bpad, relu=relu, out_dtype=out_dtype)
    return out.reshape(N, Ho, Wo, Coutp)


# Sub-pixel decomposition of ConvTranspose2d(k=3, stride=2, padding=1, output_padding=1):
# output phase (py, px) at (i, j) uses taps (dy, dx) of the (bottom/right zero-padded)
# input with the PyTorch weight indices below; all four phases run as ONE 2x2 stride-1
# conv whose out-channels are the 4 phase blocks, followed by a pixel-shuffle.
_CT_TAPS = [(0, 0), (0, 1), (1, 0), (1, 1)]
_CT_PHASES = [(0, 0), (0, 1), (1, 0), (1, 1)]
_CT_MAP = {
    (0, 0): {(0, 0): (1, 1)},
    (0, 1): {(0, 0): (1, 2), (0, 1): (1, 0)},
    (1, 0): {(0, 0): (2, 1), (1, 0): (0, 1)},
    (1, 1): {(0, 0): (2, 2), (0, 1): (2, 0), (1, 0): (0, 2), (1, 1): (0, 0)},
}


def conv_transpose3_s2(parts, b, *, relu=True):
    """Fused ConvTranspose2d(3, stride=2, padding=1, output_padding=1) + ReLU, with the
    'cat' skip fused via weight splitting.
    parts: list of (x (N,H,W,Cp_i) bf16, w_part (Ci_real, Cout, 3, 3)); all x same N,H,W."""
    N, H, W, _ = parts[0][0].shape
    Cout = parts[0][1].shape[1]
    Coutp = _round_up(Cout, LANE)

    xin = parts[0][0] if len(parts) == 1 else jnp.concatenate([p[0] for p in parts], axis=-1)
    Cp_tot = xin.shape[-1]
    xp = jnp.pad(xin, ((0, 0), (0, 1), (0, 1), (0, 0)))        # pad bottom/right by 1
    patches = _extract_patches(xp, 2, 2, 1, H, W)              # (N*H*W, 4*Cp_tot)

    # Block weight: rows = (dy, dx, cin-padded), cols = [phase0 | phase1 | phase2 | phase3].
    w4 = jnp.zeros((2, 2, Cp_tot, 4 * Coutp), jnp.float32)
    base = 0
    for x_i, w_i in parts:
        Ci = w_i.shape[0]
        for (dy, dx) in _CT_TAPS:
            for p_idx, ph in enumerate(_CT_PHASES):
                m = _CT_MAP[ph].get((dy, dx))
                if m is None:
                    continue
                a, c = m
                w4 = w4.at[dy, dx, base:base + Ci,
                           p_idx * Coutp:p_idx * Coutp + Cout].set(w_i[:, :, a, c])
        base += x_i.shape[-1]
    w2 = w4.reshape(4 * Cp_tot, 4 * Coutp).astype(jnp.bfloat16)
    b4 = jnp.tile(jnp.pad(b, (0, Coutp - Cout)), 4).astype(jnp.float32)

    out = _matmul_bias_act(patches, w2, b4, relu=relu, out_dtype=jnp.bfloat16)
    # pixel shuffle: (N, H, W, py, px, C) -> (N, 2H, 2W, C)
    out = out.reshape(N, H, W, 2, 2, Coutp).transpose(0, 1, 3, 2, 4, 5)
    return out.reshape(N, 2 * H, 2 * W, Coutp)


# ----------------------------------------------------------------------------
# Deterministic parameter init (shapes follow the PyTorch module's __init__)
# ----------------------------------------------------------------------------
def _init_conv(key, cout, cin, k):
    kw, kb = jax.random.split(key)
    fan_in = cin * k * k
    w = jax.random.normal(kw, (cout, cin, k, k), jnp.float32) * (2.0 / fan_in) ** 0.5
    b = jax.random.normal(kb, (cout,), jnp.float32) * 0.01
    return w, b


def _init_convT(key, cin, cout, k):
    kw, kb = jax.random.split(key)
    fan_in = cin * k * k
    w = jax.random.normal(kw, (cin, cout, k, k), jnp.float32) * (2.0 / fan_in) ** 0.5
    b = jax.random.normal(kb, (cout,), jnp.float32) * 0.01
    return w, b


def init_unet_params(key, in_channels, out_channels,
                     channels=(64, 128, 256), first_out_channels=32):
    n_keys = 2 + len(channels) + 1 + len(channels) + 1
    keys = list(jax.random.split(key, n_keys))
    ki = iter(keys)
    p = {}
    p["first0"] = _init_conv(next(ki), first_out_channels, in_channels, 3)
    p["first1"] = _init_conv(next(ki), first_out_channels, first_out_channels, 3)
    cur = first_out_channels
    enc = []
    for c in channels:  # stride-2 Conv3+ReLU downsamplers
        enc.append(_init_conv(next(ki), c, cur, 3))
        cur = c
    p["encoder"] = enc
    p["middle"] = _init_conv(next(ki), cur, cur, 3)
    # decoder: ConvTranspose3(stride 2)+ReLU; skips concatenated on channels.
    # Channel counts follow the ACTUAL forward dataflow (decoder[2] sees a 64-ch skip).
    dec = [_init_convT(next(ki), cur, channels[-2], 3)]
    cur = channels[-2]
    skip_chs = list(channels[:-1])[::-1]         # [128, 64]
    out_chs = list(reversed(channels))[1:]       # [128, 64]
    for skip_c, out_c in zip(skip_chs, out_chs):
        dec.append(_init_convT(next(ki), cur + skip_c, out_c, 3))
        cur = out_c
    p["decoder"] = dec
    p["head"] = _init_conv(next(ki), out_channels, cur, 1)  # 1x1 conv, no act
    return p


# ----------------------------------------------------------------------------
# UNet forward (mirrors the PyTorch module's forward exactly)
# ----------------------------------------------------------------------------
def unet_forward(x_nchw, params):
    # NCHW -> NHWC, bf16 activations (channels land on the lane axis and stay padded
    # to multiples of 128 from the first conv onwards).
    x = jnp.transpose(x_nchw, (0, 2, 3, 1)).astype(jnp.bfloat16)

    # first (two Conv3+ReLU)
    w, b = params["first0"]
    x = conv2d(x, w, b, stride=1, padding=1, relu=True)
    w, b = params["first1"]
    x = conv2d(x, w, b, stride=1, padding=1, relu=True)

    skips = [x]
    enc = params["encoder"]
    for i, (w, b) in enumerate(enc):
        x = conv2d(x, w, b, stride=2, padding=1, relu=True)
        if i != len(enc) - 1:
            skips.insert(0, x)

    w, b = params["middle"]
    x = conv2d(x, w, b, stride=1, padding=1, relu=True)

    # decoder[0]: no skip
    w, b = params["decoder"][0]
    x = conv_transpose3_s2([(x, w)], b, relu=True)
    x_real = w.shape[1]
    # decoder[1:]: 'cat' skip fused by splitting the ConvTranspose weight along Cin.
    for (w, b), s in zip(params["decoder"][1:], skips):
        wx, ws = w[:x_real], w[x_real:]
        x = conv_transpose3_s2([(x, wx), (s, ws)], b, relu=True)
        x_real = w.shape[1]

    # head: 1x1 conv, no im2col, f32 output, slice real channels
    w, b = params["head"]
    out = conv2d(x, w, b, stride=1, padding=0, relu=False, out_dtype=jnp.float32)
    out = out[..., :w.shape[0]]
    return jnp.transpose(out, (0, 3, 1, 2)).astype(jnp.float32)


# ----------------------------------------------------------------------------
if __name__ == "__main__":
    key = jax.random.PRNGKey(0)
    kp, kx = jax.random.split(key)

    in_channels, out_channels = 4, 3
    N, H, W = 2, 16, 16

    params = init_unet_params(kp, in_channels, out_channels)
    x = jax.random.normal(kx, (N, in_channels, H, W), jnp.float32)

    fwd = jax.jit(unet_forward)
    y = fwd(x, params)
    jax.block_until_ready(y)
    assert y.shape == (N, out_channels, H, W), y.shape
    assert y.dtype == jnp.float32
    print("KERNEL_OK")
</pallas_src>

<mosaic_0001>
module attributes {stable_mosaic.version = 11 : i64} {
  func.func @_mm_bias_act_kernel_single(%arg0: i32, %arg1: memref<256x36xbf16, #tpu.memory_space<vmem>>, %arg2: memref<36x128xbf16, #tpu.memory_space<vmem>>, %arg3: memref<1x128xf32, #tpu.memory_space<vmem>>, %arg4: memref<256x128xbf16, #tpu.memory_space<vmem>>) attributes {dimension_semantics = [#tpu.dimension_semantics<parallel>], iteration_bounds = array<i64: 2>, scalar_prefetch = 0 : i64, scratch_operands = 0 : i64, tpu.core_type = #tpu.core_type<tc>, window_params = [{transform_indices = @transform_0, window_bounds = array<i64: 256, 36>}, {pipeline_mode = #tpu.pipeline_mode<synchronous>, transform_indices = @transform_1, window_bounds = array<i64: 36, 128>}, {pipeline_mode = #tpu.pipeline_mode<synchronous>, transform_indices = @transform_2, window_bounds = array<i64: 1, 128>}, {transform_indices = @transform_3, window_bounds = array<i64: 256, 128>}]} {
    %c0 = arith.constant 0 : index
    %c0_0 = arith.constant 0 : index
    %0 = vector.load %arg1[%c0, %c0_0] : memref<256x36xbf16, #tpu.memory_space<vmem>>, vector<256x36xbf16>
    %c0_1 = arith.constant 0 : index
    %c0_2 = arith.constant 0 : index
    %1 = vector.load %arg2[%c0_1, %c0_2] : memref<36x128xbf16, #tpu.memory_space<vmem>>, vector<36x128xbf16>
    %cst = arith.constant dense<0.000000e+00> : vector<256x128xf32>
    %2 = tpu.matmul %0, %1, %cst {dimension_numbers = #tpu.dot_dimension_numbers<[1], [0], [0], [1], [0, 0, 1, 1], [], []>} : vector<256x36xbf16>, vector<36x128xbf16>, vector<256x128xf32> -> vector<256x128xf32>
    %c0_3 = arith.constant 0 : index
    %c0_4 = arith.constant 0 : index
    %3 = vector.load %arg3[%c0_3, %c0_4] : memref<1x128xf32, #tpu.memory_space<vmem>>, vector<1x128xf32>
    %4 = vector.broadcast %3 : vector<1x128xf32> to vector<256x128xf32>
    %5 = arith.addf %2, %4 : vector<256x128xf32>
    %cst_5 = arith.constant 0.000000e+00 : f32
    %6 = vector.broadcast %cst_5 : f32 to vector<256x128xf32>
    %7 = arith.maximumf %5, %6 : vector<256x128xf32>
    %8 = arith.truncf %7 : vector<256x128xf32> to vector<256x128xbf16>
    %c0_6 = arith.constant 0 : index
    %c0_7 = arith.constant 0 : index
    %9 = vector.load %arg4[%c0_6, %c0_7] : memref<256x128xbf16, #tpu.memory_space<vmem>>, vector<256x128xbf16>
    tpu.vector_store %arg4[%c0_6, %c0_7], %8 {strides = array<i32>} : memref<256x128xbf16, #tpu.memory_space<vmem>>, vector<256x128xbf16>,
    return
  }
  func.func @transform_0(%arg0: i32) -> (i32, i32) {
    %c0_i32 = arith.constant 0 : i32
    %c0_i32_0 = arith.constant 0 : i32
    return %arg0, %c0_i32 : i32, i32
  }
  func.func @transform_1(%arg0: i32) -> (i32, i32) {
    %c0_i32 = arith.constant 0 : i32
    %c0_i32_0 = arith.constant 0 : i32
    %c0_i32_1 = arith.constant 0 : i32
    return %c0_i32, %c0_i32_0 : i32, i32
  }
  func.func @transform_2(%arg0: i32) -> (i32, i32) {
    %c0_i32 = arith.constant 0 : i32
    %c0_i32_0 = arith.constant 0 : i32
    %c0_i32_1 = arith.constant 0 : i32
    return %c0_i32, %c0_i32_0 : i32, i32
  }
  func.func @transform_3(%arg0: i32) -> (i32, i32) {
    %c0_i32 = arith.constant 0 : i32
    %c0_i32_0 = arith.constant 0 : i32
    return %arg0, %c0_i32 : i32, i32
  }
}

module attributes {stable_mosaic.version = 11 : i64} {
  func.func @_mm_bias_act_kernel_ktiled(%arg0: i32, %arg1: i32, %arg2: memref<256x384xbf16, #tpu.memory_space<vmem>>, %arg3: memref<384x128xbf16, #tpu.memory_space<vmem>>, %arg4: memref<1x128xf32, #tpu.memory_space<vmem>>, %arg5: memref<256x128xbf16, #tpu.memory_space<vmem>>, %arg6: memref<256x128xf32, #tpu.memory_space<vmem>>) attributes {dimension_semantics = [#tpu.dimension_semantics<parallel>, #tpu.dimension_semantics<arbitrary>], iteration_bounds = array<i64: 2, 3>, scalar_prefetch = 0 : i64, scratch_operands = 1 : i64, tpu.core_type = #tpu.core_type<tc>, window_params = [{transform_indices = @transform_0, window_bounds = array<i64: 256, 384>}, {transform_indices = @transform_1, window_bounds = array<i64: 384, 128>}, {pipeline_mode = #tpu.pipeline_mode<synchronous>, transform_indices = @transform_2, window_bounds = array<i64: 1, 128>}, {transform_indices = @transform_3, window_bounds = array<i64: 256, 128>}]} {
    %c0_i32 = arith.constant 0 : i32
    %0 = arith.cmpi eq, %arg1, %c0_i32 : i32
    %1 = arith.extui %0 : i1 to i32
    %c0_i32_0 = arith.constant 0 : i32
    %2 = arith.cmpi ne, %1, %c0_i32_0 : i32
    scf.if %2 {
      %cst_9 = arith.constant 0.000000e+00 : f32
      %12 = vector.broadcast %cst_9 : f32 to vector<256x128xf32>
      %c0_10 = arith.constant 0 : index
      %c0_11 = arith.constant 0 : index
      %13 = vector.load %arg6[%c0_10, %c0_11] : memref<256x128xf32, #tpu.memory_space<vmem>>, vector<256x128xf32>
      tpu.vector_store %arg6[%c0_10, %c0_11], %12 {strides = array<i32>} : memref<256x128xf32, #tpu.memory_space<vmem>>, vector<256x128xf32>,
    } else {
    }
    %c0 = arith.constant 0 : index
    %c0_1 = arith.constant 0 : index
    %3 = vector.load %arg6[%c0, %c0_1] : memref<256x128xf32, #tpu.memory_space<vmem>>, vector<256x128xf32>
    %c0_2 = arith.constant 0 : index
    %c0_3 = arith.constant 0 : index
    %4 = vector.load %arg2[%c0_2, %c0_3] : memref<256x384xbf16, #tpu.memory_space<vmem>>, vector<256x384xbf16>
    %c0_4 = arith.constant 0 : index
    %c0_5 = arith.constant 0 : index
    %5 = vector.load %arg3[%c0_4, %c0_5] : memref<384x128xbf16, #tpu.memory_space<vmem>>, vector<384x128xbf16>
    %cst = arith.constant dense<0.000000e+00> : vector<256x128xf32>
    %6 = tpu.matmul %4, %5, %cst {dimension_numbers = #tpu.dot_dimension_numbers<[1], [0], [0], [1], [0, 0, 1, 1], [], []>} : vector<256x384xbf16>, vector<384x128xbf16>, vector<256x128xf32> -> vector<256x128xf32>
    %7 = arith.addf %3, %6 : vector<256x128xf32>
    %c0_6 = arith.constant 0 : index
    %c0_7 = arith.constant 0 : index
    %8 = vector.load %arg6[%c0_6, %c0_7] : memref<256x128xf32, #tpu.memory_space<vmem>>, vector<256x128xf32>
    tpu.vector_store %arg6[%c0_6, %c0_7], %7 {strides = array<i32>} : memref<256x128xf32, #tpu.memory_space<vmem>>, vector<256x128xf32>,
    %c2_i32 = arith.constant 2 : i32
    %9 = arith.cmpi eq, %arg1, %c2_i32 : i32
    %10 = arith.extui %9 : i1 to i32
    %c0_i32_8 = arith.constant 0 : i32
    %11 = arith.cmpi ne, %10, %c0_i32_8 : i32
    scf.if %11 {
      %c0_9 = arith.constant 0 : index
      %c0_10 = arith.constant 0 : index
      %12 = vector.load %arg6[%c0_9, %c0_10] : memref<256x128xf32, #tpu.memory_space<vmem>>, vector<256x128xf32>
      %c0_11 = arith.constant 0 : index
      %c0_12 = arith.constant 0 : index
      %13 = vector.load %arg4[%c0_11, %c0_12] : memref<1x128xf32, #tpu.memory_space<vmem>>, vector<1x128xf32>
      %14 = vector.broadcast %13 : vector<1x128xf32> to vector<256x128xf32>
      %15 = arith.addf %12, %14 : vector<256x128xf32>
      %cst_13 = arith.constant 0.000000e+00 : f32
      %16 = vector.broadcast %cst_13 : f32 to vector<256x128xf32>
      %17 = arith.maximumf %15, %16 : vector<256x128xf32>
      %18 = arith.truncf %17 : vector<256x128xf32> to vector<256x128xbf16>
      %c0_14 = arith.constant 0 : index
      %c0_15 = arith.constant 0 : index
      %19 = vector.load %arg5[%c0_14, %c0_15] : memref<256x128xbf16, #tpu.memory_space<vmem>>, vector<256x128xbf16>
      tpu.vector_store %arg5[%c0_14, %c0_15], %18 {strides = array<i32>} : memref<256x128xbf16, #tpu.memory_space<vmem>>, vector<256x128xbf16>,
    } else {
    }
    return
  }
  func.func @transform_0(%arg0: i32, %arg1: i32) -> (i32, i32) {
    %c0_i32 = arith.constant 0 : i32
    return %arg0, %arg1 : i32, i32
  }
  func.func @transform_1(%arg0: i32, %arg1: i32) -> (i32, i32) {
    %c0_i32 = arith.constant 0 : i32
    %c0_i32_0 = arith.constant 0 : i32
    return %arg1, %c0_i32 : i32, i32
  }
  func.func @transform_2(%arg0: i32, %arg1: i32) -> (i32, i32) {
    %c0_i32 = arith.constant 0 : i32
    %c0_i32_0 = arith.constant 0 : i32
    %c0_i32_1 = arith.constant 0 : i32
    return %c0_i32, %c0_i32_0 : i32, i32
  }
  func.func @transform_3(%arg0: i32, %arg1: i32) -> (i32, i32) {
    %c0_i32 = arith.constant 0 : i32
    %c0_i32_0 = arith.constant 0 : i32
    return %arg0, %c0_i32 : i32, i32
  }
}

module attributes {stable_mosaic.version = 11 : i64} {
  func.func @_mm_bias_act_kernel_ktiled(%arg0: i32, %arg1: i32, %arg2: memref<128x384xbf16, #tpu.memory_space<vmem>>, %arg3: memref<384x128xbf16, #tpu.memory_space<vmem>>, %arg4: memref<1x128xf32, #tpu.memory_space<vmem>>, %arg5: memref<128x128xbf16, #tpu.memory_space<vmem>>, %arg6: memref<128x128xf32, #tpu.memory_space<vmem>>) attributes {dimension_semantics = [#tpu.dimension_semantics<parallel>, #tpu.dimension_semantics<arbitrary>], iteration_bounds = array<i64: 1, 3>, scalar_prefetch = 0 : i64, scratch_operands = 1 : i64, tpu.core_type = #tpu.core_type<tc>, window_params = [{transform_indices = @transform_0, window_bounds = array<i64: 128, 384>}, {transform_indices = @transform_1, window_bounds = array<i64: 384, 128>}, {pipeline_mode = #tpu.pipeline_mode<synchronous>, transform_indices = @transform_2, window_bounds = array<i64: 1, 128>}, {transform_indices = @transform_3, window_bounds = array<i64: 128, 128>}]} {
    %c0_i32 = arith.constant 0 : i32
    %0 = arith.cmpi eq, %arg1, %c0_i32 : i32
    %1 = arith.extui %0 : i1 to i32
    %c0_i32_0 = arith.constant 0 : i32
    %2 = arith.cmpi ne, %1, %c0_i32_0 : i32
    scf.if %2 {
      %cst_9 = arith.constant 0.000000e+00 : f32
      %12 = vector.broadcast %cst_9 : f32 to vector<128x128xf32>
      %c0_10 = arith.constant 0 : index
      %c0_11 = arith.constant 0 : index
      %13 = vector.load %arg6[%c0_10, %c0_11] : memref<128x128xf32, #tpu.memory_space<vmem>>, vector<128x128xf32>
      tpu.vector_store %arg6[%c0_10, %c0_11], %12 {strides = array<i32>} : memref<128x128xf32, #tpu.memory_space<vmem>>, vector<128x128xf32>,
    } else {
    }
    %c0 = arith.constant 0 : index
    %c0_1 = arith.constant 0 : index
    %3 = vector.load %arg6[%c0, %c0_1] : memref<128x128xf32, #tpu.memory_space<vmem>>, vector<128x128xf32>
    %c0_2 = arith.constant 0 : index
    %c0_3 = arith.constant 0 : index
    %4 = vector.load %arg2[%c0_2, %c0_3] : memref<128x384xbf16, #tpu.memory_space<vmem>>, vector<128x384xbf16>
    %c0_4 = arith.constant 0 : index
    %c0_5 = arith.constant 0 : index
    %5 = vector.load %arg3[%c0_4, %c0_5] : memref<384x128xbf16, #tpu.memory_space<vmem>>, vector<384x128xbf16>
    %cst = arith.constant dense<0.000000e+00> : vector<128x128xf32>
    %6 = tpu.matmul %4, %5, %cst {dimension_numbers = #tpu.dot_dimension_numbers<[1], [0], [0], [1], [0, 0, 1, 1], [], []>} : vector<128x384xbf16>, vector<384x128xbf16>, vector<128x128xf32> -> vector<128x128xf32>
    %7 = arith.addf %3, %6 : vector<128x128xf32>
    %c0_6 = arith.constant 0 : index
    %c0_7 = arith.constant 0 : index
    %8 = vector.load %arg6[%c0_6, %c0_7] : memref<128x128xf32, #tpu.memory_space<vmem>>, vector<128x128xf32>
    tpu.vector_store %arg6[%c0_6, %c0_7], %7 {strides = array<i32>} : memref<128x128xf32, #tpu.memory_space<vmem>>, vector<128x128xf32>,
    %c2_i32 = arith.constant 2 : i32
    %9 = arith.cmpi eq, %arg1, %c2_i32 : i32
    %10 = arith.extui %9 : i1 to i32
    %c0_i32_8 = arith.constant 0 : i32
    %11 = arith.cmpi ne, %10, %c0_i32_8 : i32
    scf.if %11 {
      %c0_9 = arith.constant 0 : index
      %c0_10 = arith.constant 0 : index
      %12 = vector.load %arg6[%c0_9, %c0_10] : memref<128x128xf32, #tpu.memory_space<vmem>>, vector<128x128xf32>
      %c0_11 = arith.constant 0 : index
      %c0_12 = arith.constant 0 : index
      %13 = vector.load %arg4[%c0_11, %c0_12] : memref<1x128xf32, #tpu.memory_space<vmem>>, vector<1x128xf32>
      %14 = vector.broadcast %13 : vector<1x128xf32> to vector<128x128xf32>
      %15 = arith.addf %12, %14 : vector<128x128xf32>
      %cst_13 = arith.constant 0.000000e+00 : f32
      %16 = vector.broadcast %cst_13 : f32 to vector<128x128xf32>
      %17 = arith.maximumf %15, %16 : vector<128x128xf32>
      %18 = arith.truncf %17 : vector<128x128xf32> to vector<128x128xbf16>
      %c0_14 = arith.constant 0 : index
      %c0_15 = arith.constant 0 : index
      %19 = vector.load %arg5[%c0_14, %c0_15] : memref<128x128xbf16, #tpu.memory_space<vmem>>, vector<128x128xbf16>
      tpu.vector_store %arg5[%c0_14, %c0_15], %18 {strides = array<i32>} : memref<128x128xbf16, #tpu.memory_space<vmem>>, vector<128x128xbf16>,
    } else {
    }
    return
  }
  func.func @transform_0(%arg0: i32, %arg1: i32) -> (i32, i32) {
    %c0_i32 = arith.constant 0 : i32
    return %arg0, %arg1 : i32, i32
  }
  func.func @transform_1(%arg0: i32, %arg1: i32) -> (i32, i32) {
    %c0_i32 = arith.constant 0 : i32
    %c0_i32_0 = arith.constant 0 : i32
    return %arg1, %c0_i32 : i32, i32
  }
  func.func @transform_2(%arg0: i32, %arg1: i32) -> (i32, i32) {
    %c0_i32 = arith.constant 0 : i32
    %c0_i32_0 = arith.constant 0 : i32
    %c0_i32_1 = arith.constant 0 : i32
    return %c0_i32, %c0_i32_0 : i32, i32
  }
  func.func @transform_3(%arg0: i32, %arg1: i32) -> (i32, i32) {
    %c0_i32 = arith.constant 0 : i32
    %c0_i32_0 = arith.constant 0 : i32
    return %arg0, %c0_i32 : i32, i32
  }
}

module attributes {stable_mosaic.version = 11 : i64} {
  func.func @_mm_bias_act_kernel_ktiled(%arg0: i32, %arg1: i32, %arg2: memref<32x384xbf16, #tpu.memory_space<vmem>>, %arg3: memref<384x128xbf16, #tpu.memory_space<vmem>>, %arg4: memref<1x128xf32, #tpu.memory_space<vmem>>, %arg5: memref<32x128xbf16, #tpu.memory_space<vmem>>, %arg6: memref<32x128xf32, #tpu.memory_space<vmem>>) attributes {dimension_semantics = [#tpu.dimension_semantics<parallel>, #tpu.dimension_semantics<arbitrary>], iteration_bounds = array<i64: 1, 3>, scalar_prefetch = 0 : i64, scratch_operands = 1 : i64, tpu.core_type = #tpu.core_type<tc>, window_params = [{transform_indices = @transform_0, window_bounds = array<i64: 32, 384>}, {transform_indices = @transform_1, window_bounds = array<i64: 384, 128>}, {pipeline_mode = #tpu.pipeline_mode<synchronous>, transform_indices = @transform_2, window_bounds = array<i64: 1, 128>}, {transform_indices = @transform_3, window_bounds = array<i64: 32, 128>}]} {
    %c0_i32 = arith.constant 0 : i32
    %0 = arith.cmpi eq, %arg1, %c0_i32 : i32
    %1 = arith.extui %0 : i1 to i32
    %c0_i32_0 = arith.constant 0 : i32
    %2 = arith.cmpi ne, %1, %c0_i32_0 : i32
    scf.if %2 {
      %cst_9 = arith.constant 0.000000e+00 : f32
      %12 = vector.broadcast %cst_9 : f32 to vector<32x128xf32>
      %c0_10 = arith.constant 0 : index
      %c0_11 = arith.constant 0 : index
      %13 = vector.load %arg6[%c0_10, %c0_11] : memref<32x128xf32, #tpu.memory_space<vmem>>, vector<32x128xf32>
      tpu.vector_store %arg6[%c0_10, %c0_11], %12 {strides = array<i32>} : memref<32x128xf32, #tpu.memory_space<vmem>>, vector<32x128xf32>,
    } else {
    }
    %c0 = arith.constant 0 : index
    %c0_1 = arith.constant 0 : index
    %3 = vector.load %arg6[%c0, %c0_1] : memref<32x128xf32, #tpu.memory_space<vmem>>, vector<32x128xf32>
    %c0_2 = arith.constant 0 : index
    %c0_3 = arith.constant 0 : index
    %4 = vector.load %arg2[%c0_2, %c0_3] : memref<32x384xbf16, #tpu.memory_space<vmem>>, vector<32x384xbf16>
    %c0_4 = arith.constant 0 : index
    %c0_5 = arith.constant 0 : index
    %5 = vector.load %arg3[%c0_4, %c0_5] : memref<384x128xbf16, #tpu.memory_space<vmem>>, vector<384x128xbf16>
    %cst = arith.constant dense<0.000000e+00> : vector<32x128xf32>
    %6 = tpu.matmul %4, %5, %cst {dimension_numbers = #tpu.dot_dimension_numbers<[1], [0], [0], [1], [0, 0, 1, 1], [], []>} : vector<32x384xbf16>, vector<384x128xbf16>, vector<32x128xf32> -> vector<32x128xf32>
    %7 = arith.addf %3, %6 : vector<32x128xf32>
    %c0_6 = arith.constant 0 : index
    %c0_7 = arith.constant 0 : index
    %8 = vector.load %arg6[%c0_6, %c0_7] : memref<32x128xf32, #tpu.memory_space<vmem>>, vector<32x128xf32>
    tpu.vector_store %arg6[%c0_6, %c0_7], %7 {strides = array<i32>} : memref<32x128xf32, #tpu.memory_space<vmem>>, vector<32x128xf32>,
    %c2_i32 = arith.constant 2 : i32
    %9 = arith.cmpi eq, %arg1, %c2_i32 : i32
    %10 = arith.extui %9 : i1 to i32
    %c0_i32_8 = arith.constant 0 : i32
    %11 = arith.cmpi ne, %10, %c0_i32_8 : i32
    scf.if %11 {
      %c0_9 = arith.constant 0 : index
      %c0_10 = arith.constant 0 : index
      %12 = vector.load %arg6[%c0_9, %c0_10] : memref<32x128xf32, #tpu.memory_space<vmem>>, vector<32x128xf32>
      %c0_11 = arith.constant 0 : index
      %c0_12 = arith.constant 0 : index
      %13 = vector.load %arg4[%c0_11, %c0_12] : memref<1x128xf32, #tpu.memory_space<vmem>>, vector<1x128xf32>
      %14 = vector.broadcast %13 : vector<1x128xf32> to vector<32x128xf32>
      %15 = arith.addf %12, %14 : vector<32x128xf32>
      %cst_13 = arith.constant 0.000000e+00 : f32
      %16 = vector.broadcast %cst_13 : f32 to vector<32x128xf32>
      %17 = arith.maximumf %15, %16 : vector<32x128xf32>
      %18 = arith.truncf %17 : vector<32x128xf32> to vector<32x128xbf16>
      %c0_14 = arith.constant 0 : index
      %c0_15 = arith.constant 0 : index
      %19 = vector.load %arg5[%c0_14, %c0_15] : memref<32x128xbf16, #tpu.memory_space<vmem>>, vector<32x128xbf16>
      tpu.vector_store %arg5[%c0_14, %c0_15], %18 {strides = array<i32>} : memref<32x128xbf16, #tpu.memory_space<vmem>>, vector<32x128xbf16>,
    } else {
    }
    return
  }
  func.func @transform_0(%arg0: i32, %arg1: i32) -> (i32, i32) {
    %c0_i32 = arith.constant 0 : i32
    return %arg0, %arg1 : i32, i32
  }
  func.func @transform_1(%arg0: i32, %arg1: i32) -> (i32, i32) {
    %c0_i32 = arith.constant 0 : i32
    %c0_i32_0 = arith.constant 0 : i32
    return %arg1, %c0_i32 : i32, i32
  }
  func.func @transform_2(%arg0: i32, %arg1: i32) -> (i32, i32) {
    %c0_i32 = arith.constant 0 : i32
    %c0_i32_0 = arith.constant 0 : i32
    %c0_i32_1 = arith.constant 0 : i32
    return %c0_i32, %c0_i32_0 : i32, i32
  }
  func.func @transform_3(%arg0: i32, %arg1: i32) -> (i32, i32) {
    %c0_i32 = arith.constant 0 : i32
    %c0_i32_0 = arith.constant 0 : i32
    return %arg0, %c0_i32 : i32, i32
  }
}

module attributes {stable_mosaic.version = 11 : i64} {
  func.func @_mm_bias_act_kernel_ktiled(%arg0: i32, %arg1: i32, %arg2: memref<8x384xbf16, #tpu.memory_space<vmem>>, %arg3: memref<384x256xbf16, #tpu.memory_space<vmem>>, %arg4: memref<1x256xf32, #tpu.memory_space<vmem>>, %arg5: memref<8x256xbf16, #tpu.memory_space<vmem>>, %arg6: memref<8x256xf32, #tpu.memory_space<vmem>>) attributes {dimension_semantics = [#tpu.dimension_semantics<parallel>, #tpu.dimension_semantics<arbitrary>], iteration_bounds = array<i64: 1, 3>, scalar_prefetch = 0 : i64, scratch_operands = 1 : i64, tpu.core_type = #tpu.core_type<tc>, window_params = [{transform_indices = @transform_0, window_bounds = array<i64: 8, 384>}, {transform_indices = @transform_1, window_bounds = array<i64: 384, 256>}, {pipeline_mode = #tpu.pipeline_mode<synchronous>, transform_indices = @transform_2, window_bounds = array<i64: 1, 256>}, {transform_indices = @transform_3, window_bounds = array<i64: 8, 256>}]} {
    %c0_i32 = arith.constant 0 : i32
    %0 = arith.cmpi eq, %arg1, %c0_i32 : i32
    %1 = arith.extui %0 : i1 to i32
    %c0_i32_0 = arith.constant 0 : i32
    %2 = arith.cmpi ne, %1, %c0_i32_0 : i32
    scf.if %2 {
      %cst_9 = arith.constant 0.000000e+00 : f32
      %12 = vector.broadcast %cst_9 : f32 to vector<8x256xf32>
      %c0_10 = arith.constant 0 : index
      %c0_11 = arith.constant 0 : index
      %13 = vector.load %arg6[%c0_10, %c0_11] : memref<8x256xf32, #tpu.memory_space<vmem>>, vector<8x256xf32>
      tpu.vector_store %arg6[%c0_10, %c0_11], %12 {strides = array<i32>} : memref<8x256xf32, #tpu.memory_space<vmem>>, vector<8x256xf32>,
    } else {
    }
    %c0 = arith.constant 0 : index
    %c0_1 = arith.constant 0 : index
    %3 = vector.load %arg6[%c0, %c0_1] : memref<8x256xf32, #tpu.memory_space<vmem>>, vector<8x256xf32>
    %c0_2 = arith.constant 0 : index
    %c0_3 = arith.constant 0 : index
    %4 = vector.load %arg2[%c0_2, %c0_3] : memref<8x384xbf16, #tpu.memory_space<vmem>>, vector<8x384xbf16>
    %c0_4 = arith.constant 0 : index
    %c0_5 = arith.constant 0 : index
    %5 = vector.load %arg3[%c0_4, %c0_5] : memref<384x256xbf16, #tpu.memory_space<vmem>>, vector<384x256xbf16>
    %cst = arith.constant dense<0.000000e+00> : vector<8x256xf32>
    %6 = tpu.matmul %4, %5, %cst {dimension_numbers = #tpu.dot_dimension_numbers<[1], [0], [0], [1], [0, 0, 1, 1], [], []>} : vector<8x384xbf16>, vector<384x256xbf16>, vector<8x256xf32> -> vector<8x256xf32>
    %7 = arith.addf %3, %6 : vector<8x256xf32>
    %c0_6 = arith.constant 0 : index
    %c0_7 = arith.constant 0 : index
    %8 = vector.load %arg6[%c0_6, %c0_7] : memref<8x256xf32, #tpu.memory_space<vmem>>, vector<8x256xf32>
    tpu.vector_store %arg6[%c0_6, %c0_7], %7 {strides = array<i32>} : memref<8x256xf32, #tpu.memory_space<vmem>>, vector<8x256xf32>,
    %c2_i32 = arith.constant 2 : i32
    %9 = arith.cmpi eq, %arg1, %c2_i32 : i32
    %10 = arith.extui %9 : i1 to i32
    %c0_i32_8 = arith.constant 0 : i32
    %11 = arith.cmpi ne, %10, %c0_i32_8 : i32
    scf.if %11 {
      %c0_9 = arith.constant 0 : index
      %c0_10 = arith.constant 0 : index
      %12 = vector.load %arg6[%c0_9, %c0_10] : memref<8x256xf32, #tpu.memory_space<vmem>>, vector<8x256xf32>
      %c0_11 = arith.constant 0 : index
      %c0_12 = arith.constant 0 : index
      %13 = vector.load %arg4[%c0_11, %c0_12] : memref<1x256xf32, #tpu.memory_space<vmem>>, vector<1x256xf32>
      %14 = vector.broadcast %13 : vector<1x256xf32> to vector<8x256xf32>
      %15 = arith.addf %12, %14 : vector<8x256xf32>
      %cst_13 = arith.constant 0.000000e+00 : f32
      %16 = vector.broadcast %cst_13 : f32 to vector<8x256xf32>
      %17 = arith.maximumf %15, %16 : vector<8x256xf32>
      %18 = arith.truncf %17 : vector<8x256xf32> to vector<8x256xbf16>
      %c0_14 = arith.constant 0 : index
      %c0_15 = arith.constant 0 : index
      %19 = vector.load %arg5[%c0_14, %c0_15] : memref<8x256xbf16, #tpu.memory_space<vmem>>, vector<8x256xbf16>
      tpu.vector_store %arg5[%c0_14, %c0_15], %18 {strides = array<i32>} : memref<8x256xbf16, #tpu.memory_space<vmem>>, vector<8x256xbf16>,
    } else {
    }
    return
  }
  func.func @transform_0(%arg0: i32, %arg1: i32) -> (i32, i32) {
    %c0_i32 = arith.constant 0 : i32
    return %arg0, %arg1 : i32, i32
  }
  func.func @transform_1(%arg0: i32, %arg1: i32) -> (i32, i32) {
    %c0_i32 = arith.constant 0 : i32
    %c0_i32_0 = arith.constant 0 : i32
    return %arg1, %c0_i32 : i32, i32
  }
  func.func @transform_2(%arg0: i32, %arg1: i32) -> (i32, i32) {
    %c0_i32 = arith.constant 0 : i32
    %c0_i32_0 = arith.constant 0 : i32
    %c0_i32_1 = arith.constant 0 : i32
    return %c0_i32, %c0_i32_0 : i32, i32
  }
  func.func @transform_3(%arg0: i32, %arg1: i32) -> (i32, i32) {
    %c0_i32 = arith.constant 0 : i32
    %c0_i32_0 = arith.constant 0 : i32
    return %arg0, %c0_i32 : i32, i32
  }
}

module attributes {stable_mosaic.version = 11 : i64} {
  func.func @_mm_bias_act_kernel_ktiled(%arg0: i32, %arg1: i32, %arg2: memref<8x768xbf16, #tpu.memory_space<vmem>>, %arg3: memref<768x256xbf16, #tpu.memory_space<vmem>>, %arg4: memref<1x256xf32, #tpu.memory_space<vmem>>, %arg5: memref<8x256xbf16, #tpu.memory_space<vmem>>, %arg6: memref<8x256xf32, #tpu.memory_space<vmem>>) attributes {dimension_semantics = [#tpu.dimension_semantics<parallel>, #tpu.dimension_semantics<arbitrary>], iteration_bounds = array<i64: 1, 3>, scalar_prefetch = 0 : i64, scratch_operands = 1 : i64, tpu.core_type = #tpu.core_type<tc>, window_params = [{transform_indices = @transform_0, window_bounds = array<i64: 8, 768>}, {transform_indices = @transform_1, window_bounds = array<i64: 768, 256>}, {pipeline_mode = #tpu.pipeline_mode<synchronous>, transform_indices = @transform_2, window_bounds = array<i64: 1, 256>}, {transform_indices = @transform_3, window_bounds = array<i64: 8, 256>}]} {
    %c0_i32 = arith.constant 0 : i32
    %0 = arith.cmpi eq, %arg1, %c0_i32 : i32
    %1 = arith.extui %0 : i1 to i32
    %c0_i32_0 = arith.constant 0 : i32
    %2 = arith.cmpi ne, %1, %c0_i32_0 : i32
    scf.if %2 {
      %cst_9 = arith.constant 0.000000e+00 : f32
      %12 = vector.broadcast %cst_9 : f32 to vector<8x256xf32>
      %c0_10 = arith.constant 0 : index
      %c0_11 = arith.constant 0 : index
      %13 = vector.load %arg6[%c0_10, %c0_11] : memref<8x256xf32, #tpu.memory_space<vmem>>, vector<8x256xf32>
      tpu.vector_store %arg6[%c0_10, %c0_11], %12 {strides = array<i32>} : memref<8x256xf32, #tpu.memory_space<vmem>>, vector<8x256xf32>,
    } else {
    }
    %c0 = arith.constant 0 : index
    %c0_1 = arith.constant 0 : index
    %3 = vector.load %arg6[%c0, %c0_1] : memref<8x256xf32, #tpu.memory_space<vmem>>, vector<8x256xf32>
    %c0_2 = arith.constant 0 : index
    %c0_3 = arith.constant 0 : index
    %4 = vector.load %arg2[%c0_2, %c0_3] : memref<8x768xbf16, #tpu.memory_space<vmem>>, vector<8x768xbf16>
    %c0_4 = arith.constant 0 : index
    %c0_5 = arith.constant 0 : index
    %5 = vector.load %arg3[%c0_4, %c0_5] : memref<768x256xbf16, #tpu.memory_space<vmem>>, vector<768x256xbf16>
    %cst = arith.constant dense<0.000000e+00> : vector<8x256xf32>
    %6 = tpu.matmul %4, %5, %cst {dimension_numbers = #tpu.dot_dimension_numbers<[1], [0], [0], [1], [0, 0, 1, 1], [], []>} : vector<8x768xbf16>, vector<768x256xbf16>, vector<8x256xf32> -> vector<8x256xf32>
    %7 = arith.addf %3, %6 : vector<8x256xf32>
    %c0_6 = arith.constant 0 : index
    %c0_7 = arith.constant 0 : index
    %8 = vector.load %arg6[%c0_6, %c0_7] : memref<8x256xf32, #tpu.memory_space<vmem>>, vector<8x256xf32>
    tpu.vector_store %arg6[%c0_6, %c0_7], %7 {strides = array<i32>} : memref<8x256xf32, #tpu.memory_space<vmem>>, vector<8x256xf32>,
    %c2_i32 = arith.constant 2 : i32
    %9 = arith.cmpi eq, %arg1, %c2_i32 : i32
    %10 = arith.extui %9 : i1 to i32
    %c0_i32_8 = arith.constant 0 : i32
    %11 = arith.cmpi ne, %10, %c0_i32_8 : i32
    scf.if %11 {
      %c0_9 = arith.constant 0 : index
      %c0_10 = arith.constant 0 : index
      %12 = vector.load %arg6[%c0_9, %c0_10] : memref<8x256xf32, #tpu.memory_space<vmem>>, vector<8x256xf32>
      %c0_11 = arith.constant 0 : index
      %c0_12 = arith.constant 0 : index
      %13 = vector.load %arg4[%c0_11, %c0_12] : memref<1x256xf32, #tpu.memory_space<vmem>>, vector<1x256xf32>
      %14 = vector.broadcast %13 : vector<1x256xf32> to vector<8x256xf32>
      %15 = arith.addf %12, %14 : vector<8x256xf32>
      %cst_13 = arith.constant 0.000000e+00 : f32
      %16 = vector.broadcast %cst_13 : f32 to vector<8x256xf32>
      %17 = arith.maximumf %15, %16 : vector<8x256xf32>
      %18 = arith.truncf %17 : vector<8x256xf32> to vector<8x256xbf16>
      %c0_14 = arith.constant 0 : index
      %c0_15 = arith.constant 0 : index
      %19 = vector.load %arg5[%c0_14, %c0_15] : memref<8x256xbf16, #tpu.memory_space<vmem>>, vector<8x256xbf16>
      tpu.vector_store %arg5[%c0_14, %c0_15], %18 {strides = array<i32>} : memref<8x256xbf16, #tpu.memory_space<vmem>>, vector<8x256xbf16>,
    } else {
    }
    return
  }
  func.func @transform_0(%arg0: i32, %arg1: i32) -> (i32, i32) {
    %c0_i32 = arith.constant 0 : i32
    return %arg0, %arg1 : i32, i32
  }
  func.func @transform_1(%arg0: i32, %arg1: i32) -> (i32, i32) {
    %c0_i32 = arith.constant 0 : i32
    %c0_i32_0 = arith.constant 0 : i32
    return %arg1, %c0_i32 : i32, i32
  }
  func.func @transform_2(%arg0: i32, %arg1: i32) -> (i32, i32) {
    %c0_i32 = arith.constant 0 : i32
    %c0_i32_0 = arith.constant 0 : i32
    %c0_i32_1 = arith.constant 0 : i32
    return %c0_i32, %c0_i32_0 : i32, i32
  }
  func.func @transform_3(%arg0: i32, %arg1: i32) -> (i32, i32) {
    %c0_i32 = arith.constant 0 : i32
    %c0_i32_0 = arith.constant 0 : i32
    return %arg0, %c0_i32 : i32, i32
  }
}

module attributes {stable_mosaic.version = 11 : i64} {
  func.func @_mm_bias_act_kernel_single(%arg0: i32, %arg1: memref<8x1024xbf16, #tpu.memory_space<vmem>>, %arg2: memref<1024x512xbf16, #tpu.memory_space<vmem>>, %arg3: memref<1x512xf32, #tpu.memory_space<vmem>>, %arg4: memref<8x512xbf16, #tpu.memory_space<vmem>>) attributes {dimension_semantics = [#tpu.dimension_semantics<parallel>], iteration_bounds = array<i64: 1>, scalar_prefetch = 0 : i64, scratch_operands = 0 : i64, tpu.core_type = #tpu.core_type<tc>, window_params = [{transform_indices = @transform_0, window_bounds = array<i64: 8, 1024>}, {pipeline_mode = #tpu.pipeline_mode<synchronous>, transform_indices = @transform_1, window_bounds = array<i64: 1024, 512>}, {pipeline_mode = #tpu.pipeline_mode<synchronous>, transform_indices = @transform_2, window_bounds = array<i64: 1, 512>}, {transform_indices = @transform_3, window_bounds = array<i64: 8, 512>}]} {
    %c0 = arith.constant 0 : index
    %c0_0 = arith.constant 0 : index
    %0 = vector.load %arg1[%c0, %c0_0] : memref<8x1024xbf16, #tpu.memory_space<vmem>>, vector<8x1024xbf16>
    %c0_1 = arith.constant 0 : index
    %c0_2 = arith.constant 0 : index
    %1 = vector.load %arg2[%c0_1, %c0_2] : memref<1024x512xbf16, #tpu.memory_space<vmem>>, vector<1024x512xbf16>
    %cst = arith.constant dense<0.000000e+00> : vector<8x512xf32>
    %2 = tpu.matmul %0, %1, %cst {dimension_numbers = #tpu.dot_dimension_numbers<[1], [0], [0], [1], [0, 0, 1, 1], [], []>} : vector<8x1024xbf16>, vector<1024x512xbf16>, vector<8x512xf32> -> vector<8x512xf32>
    %c0_3 = arith.constant 0 : index
    %c0_4 = arith.constant 0 : index
    %3 = vector.load %arg3[%c0_3, %c0_4] : memref<1x512xf32, #tpu.memory_space<vmem>>, vector<1x512xf32>
    %4 = vector.broadcast %3 : vector<1x512xf32> to vector<8x512xf32>
    %5 = arith.addf %2, %4 : vector<8x512xf32>
    %cst_5 = arith.constant 0.000000e+00 : f32
    %6 = vector.broadcast %cst_5 : f32 to vector<8x512xf32>
    %7 = arith.maximumf %5, %6 : vector<8x512xf32>
    %8 = arith.truncf %7 : vector<8x512xf32> to vector<8x512xbf16>
    %c0_6 = arith.constant 0 : index
    %c0_7 = arith.constant 0 : index
    %9 = vector.load %arg4[%c0_6, %c0_7] : memref<8x512xbf16, #tpu.memory_space<vmem>>, vector<8x512xbf16>
    tpu.vector_store %arg4[%c0_6, %c0_7], %8 {strides = array<i32>} : memref<8x512xbf16, #tpu.memory_space<vmem>>, vector<8x512xbf16>,
    return
  }
  func.func @transform_0(%arg0: i32) -> (i32, i32) {
    %c0_i32 = arith.constant 0 : i32
    %c0_i32_0 = arith.constant 0 : i32
    return %arg0, %c0_i32 : i32, i32
  }
  func.func @transform_1(%arg0: i32) -> (i32, i32) {
    %c0_i32 = arith.constant 0 : i32
    %c0_i32_0 = arith.constant 0 : i32
    %c0_i32_1 = arith.constant 0 : i32
    return %c0_i32, %c0_i32_0 : i32, i32
  }
  func.func @transform_2(%arg0: i32) -> (i32, i32) {
    %c0_i32 = arith.constant 0 : i32
    %c0_i32_0 = arith.constant 0 : i32
    %c0_i32_1 = arith.constant 0 : i32
    return %c0_i32, %c0_i32_0 : i32, i32
  }
  func.func @transform_3(%arg0: i32) -> (i32, i32) {
    %c0_i32 = arith.constant 0 : i32
    %c0_i32_0 = arith.constant 0 : i32
    return %arg0, %c0_i32 : i32, i32
  }
}

module attributes {stable_mosaic.version = 11 : i64} {
  func.func @_mm_bias_act_kernel_single(%arg0: i32, %arg1: memref<32x1024xbf16, #tpu.memory_space<vmem>>, %arg2: memref<1024x512xbf16, #tpu.memory_space<vmem>>, %arg3: memref<1x512xf32, #tpu.memory_space<vmem>>, %arg4: memref<32x512xbf16, #tpu.memory_space<vmem>>) attributes {dimension_semantics = [#tpu.dimension_semantics<parallel>], iteration_bounds = array<i64: 1>, scalar_prefetch = 0 : i64, scratch_operands = 0 : i64, tpu.core_type = #tpu.core_type<tc>, window_params = [{transform_indices = @transform_0, window_bounds = array<i64: 32, 1024>}, {pipeline_mode = #tpu.pipeline_mode<synchronous>, transform_indices = @transform_1, window_bounds = array<i64: 1024, 512>}, {pipeline_mode = #tpu.pipeline_mode<synchronous>, transform_indices = @transform_2, window_bounds = array<i64: 1, 512>}, {transform_indices = @transform_3, window_bounds = array<i64: 32, 512>}]} {
    %c0 = arith.constant 0 : index
    %c0_0 = arith.constant 0 : index
    %0 = vector.load %arg1[%c0, %c0_0] : memref<32x1024xbf16, #tpu.memory_space<vmem>>, vector<32x1024xbf16>
    %c0_1 = arith.constant 0 : index
    %c0_2 = arith.constant 0 : index
    %1 = vector.load %arg2[%c0_1, %c0_2] : memref<1024x512xbf16, #tpu.memory_space<vmem>>, vector<1024x512xbf16>
    %cst = arith.constant dense<0.000000e+00> : vector<32x512xf32>
    %2 = tpu.matmul %0, %1, %cst {dimension_numbers = #tpu.dot_dimension_numbers<[1], [0], [0], [1], [0, 0, 1, 1], [], []>} : vector<32x1024xbf16>, vector<1024x512xbf16>, vector<32x512xf32> -> vector<32x512xf32>
    %c0_3 = arith.constant 0 : index
    %c0_4 = arith.constant 0 : index
    %3 = vector.load %arg3[%c0_3, %c0_4] : memref<1x512xf32, #tpu.memory_space<vmem>>, vector<1x512xf32>
    %4 = vector.broadcast %3 : vector<1x512xf32> to vector<32x512xf32>
    %5 = arith.addf %2, %4 : vector<32x512xf32>
    %cst_5 = arith.constant 0.000000e+00 : f32
    %6 = vector.broadcast %cst_5 : f32 to vector<32x512xf32>
    %7 = arith.maximumf %5, %6 : vector<32x512xf32>
    %8 = arith.truncf %7 : vector<32x512xf32> to vector<32x512xbf16>
    %c0_6 = arith.constant 0 : index
    %c0_7 = arith.constant 0 : index
    %9 = vector.load %arg4[%c0_6, %c0_7] : memref<32x512xbf16, #tpu.memory_space<vmem>>, vector<32x512xbf16>
    tpu.vector_store %arg4[%c0_6, %c0_7], %8 {strides = array<i32>} : memref<32x512xbf16, #tpu.memory_space<vmem>>, vector<32x512xbf16>,
    return
  }
  func.func @transform_0(%arg0: i32) -> (i32, i32) {
    %c0_i32 = arith.constant 0 : i32
    %c0_i32_0 = arith.constant 0 : i32
    return %arg0, %c0_i32 : i32, i32
  }
  func.func @transform_1(%arg0: i32) -> (i32, i32) {
    %c0_i32 = arith.constant 0 : i32
    %c0_i32_0 = arith.constant 0 : i32
    %c0_i32_1 = arith.constant 0 : i32
    return %c0_i32, %c0_i32_0 : i32, i32
  }
  func.func @transform_2(%arg0: i32) -> (i32, i32) {
    %c0_i32 = arith.constant 0 : i32
    %c0_i32_0 = arith.constant 0 : i32
    %c0_i32_1 = arith.constant 0 : i32
    return %c0_i32, %c0_i32_0 : i32, i32
  }
  func.func @transform_3(%arg0: i32) -> (i32, i32) {
    %c0_i32 = arith.constant 0 : i32
    %c0_i32_0 = arith.constant 0 : i32
    return %arg0, %c0_i32 : i32, i32
  }
}

module attributes {stable_mosaic.version = 11 : i64} {
  func.func @_mm_bias_act_kernel_single(%arg0: i32, %arg1: memref<128x1024xbf16, #tpu.memory_space<vmem>>, %arg2: memref<1024x512xbf16, #tpu.memory_space<vmem>>, %arg3: memref<1x512xf32, #tpu.memory_space<vmem>>, %arg4: memref<128x512xbf16, #tpu.memory_space<vmem>>) attributes {dimension_semantics = [#tpu.dimension_semantics<parallel>], iteration_bounds = array<i64: 1>, scalar_prefetch = 0 : i64, scratch_operands = 0 : i64, tpu.core_type = #tpu.core_type<tc>, window_params = [{transform_indices = @transform_0, window_bounds = array<i64: 128, 1024>}, {pipeline_mode = #tpu.pipeline_mode<synchronous>, transform_indices = @transform_1, window_bounds = array<i64: 1024, 512>}, {pipeline_mode = #tpu.pipeline_mode<synchronous>, transform_indices = @transform_2, window_bounds = array<i64: 1, 512>}, {transform_indices = @transform_3, window_bounds = array<i64: 128, 512>}]} {
    %c0 = arith.constant 0 : index
    %c0_0 = arith.constant 0 : index
    %0 = vector.load %arg1[%c0, %c0_0] : memref<128x1024xbf16, #tpu.memory_space<vmem>>, vector<128x1024xbf16>
    %c0_1 = arith.constant 0 : index
    %c0_2 = arith.constant 0 : index
    %1 = vector.load %arg2[%c0_1, %c0_2] : memref<1024x512xbf16, #tpu.memory_space<vmem>>, vector<1024x512xbf16>
    %cst = arith.constant dense<0.000000e+00> : vector<128x512xf32>
    %2 = tpu.matmul %0, %1, %cst {dimension_numbers = #tpu.dot_dimension_numbers<[1], [0], [0], [1], [0, 0, 1, 1], [], []>} : vector<128x1024xbf16>, vector<1024x512xbf16>, vector<128x512xf32> -> vector<128x512xf32>
    %c0_3 = arith.constant 0 : index
    %c0_4 = arith.constant 0 : index
    %3 = vector.load %arg3[%c0_3, %c0_4] : memref<1x512xf32, #tpu.memory_space<vmem>>, vector<1x512xf32>
    %4 = vector.broadcast %3 : vector<1x512xf32> to vector<128x512xf32>
    %5 = arith.addf %2, %4 : vector<128x512xf32>
    %cst_5 = arith.constant 0.000000e+00 : f32
    %6 = vector.broadcast %cst_5 : f32 to vector<128x512xf32>
    %7 = arith.maximumf %5, %6 : vector<128x512xf32>
    %8 = arith.truncf %7 : vector<128x512xf32> to vector<128x512xbf16>
    %c0_6 = arith.constant 0 : index
    %c0_7 = arith.constant 0 : index
    %9 = vector.load %arg4[%c0_6, %c0_7] : memref<128x512xbf16, #tpu.memory_space<vmem>>, vector<128x512xbf16>
    tpu.vector_store %arg4[%c0_6, %c0_7], %8 {strides = array<i32>} : memref<128x512xbf16, #tpu.memory_space<vmem>>, vector<128x512xbf16>,
    return
  }
  func.func @transform_0(%arg0: i32) -> (i32, i32) {
    %c0_i32 = arith.constant 0 : i32
    %c0_i32_0 = arith.constant 0 : i32
    return %arg0, %c0_i32 : i32, i32
  }
  func.func @transform_1(%arg0: i32) -> (i32, i32) {
    %c0_i32 = arith.constant 0 : i32
    %c0_i32_0 = arith.constant 0 : i32
    %c0_i32_1 = arith.constant 0 : i32
    return %c0_i32, %c0_i32_0 : i32, i32
  }
  func.func @transform_2(%arg0: i32) -> (i32, i32) {
    %c0_i32 = arith.constant 0 : i32
    %c0_i32_0 = arith.constant 0 : i32
    %c0_i32_1 = arith.constant 0 : i32
    return %c0_i32, %c0_i32_0 : i32, i32
  }
  func.func @transform_3(%arg0: i32) -> (i32, i32) {
    %c0_i32 = arith.constant 0 : i32
    %c0_i32_0 = arith.constant 0 : i32
    return %arg0, %c0_i32 : i32, i32
  }
}

module attributes {stable_mosaic.version = 11 : i64} {
  func.func @_mm_bias_act_kernel_single(%arg0: i32, %arg1: memref<256x128xbf16, #tpu.memory_space<vmem>>, %arg2: memref<128x128xbf16, #tpu.memory_space<vmem>>, %arg3: memref<1x128xf32, #tpu.memory_space<vmem>>, %arg4: memref<256x128xf32, #tpu.memory_space<vmem>>) attributes {dimension_semantics = [#tpu.dimension_semantics<parallel>], iteration_bounds = array<i64: 2>, scalar_prefetch = 0 : i64, scratch_operands = 0 : i64, tpu.core_type = #tpu.core_type<tc>, window_params = [{transform_indices = @transform_0, window_bounds = array<i64: 256, 128>}, {pipeline_mode = #tpu.pipeline_mode<synchronous>, transform_indices = @transform_1, window_bounds = array<i64: 128, 128>}, {pipeline_mode = #tpu.pipeline_mode<synchronous>, transform_indices = @transform_2, window_bounds = array<i64: 1, 128>}, {transform_indices = @transform_3, window_bounds = array<i64: 256, 128>}]} {
    %c0 = arith.constant 0 : index
    %c0_0 = arith.constant 0 : index
    %0 = vector.load %arg1[%c0, %c0_0] : memref<256x128xbf16, #tpu.memory_space<vmem>>, vector<256x128xbf16>
    %c0_1 = arith.constant 0 : index
    %c0_2 = arith.constant 0 : index
    %1 = vector.load %arg2[%c0_1, %c0_2] : memref<128x128xbf16, #tpu.memory_space<vmem>>, vector<128x128xbf16>
    %cst = arith.constant dense<0.000000e+00> : vector<256x128xf32>
    %2 = tpu.matmul %0, %1, %cst {dimension_numbers = #tpu.dot_dimension_numbers<[1], [0], [0], [1], [0, 0, 1, 1], [], []>} : vector<256x128xbf16>, vector<128x128xbf16>, vector<256x128xf32> -> vector<256x128xf32>
    %c0_3 = arith.constant 0 : index
    %c0_4 = arith.constant 0 : index
    %3 = vector.load %arg3[%c0_3, %c0_4] : memref<1x128xf32, #tpu.memory_space<vmem>>, vector<1x128xf32>
    %4 = vector.broadcast %3 : vector<1x128xf32> to vector<256x128xf32>
    %5 = arith.addf %2, %4 : vector<256x128xf32>
    %c0_5 = arith.constant 0 : index
    %c0_6 = arith.constant 0 : index
    %6 = vector.load %arg4[%c0_5, %c0_6] : memref<256x128xf32, #tpu.memory_space<vmem>>, vector<256x128xf32>
    tpu.vector_store %arg4[%c0_5, %c0_6], %5 {strides = array<i32>} : memref<256x128xf32, #tpu.memory_space<vmem>>, vector<256x128xf32>,
    return
  }
  func.func @transform_0(%arg0: i32) -> (i32, i32) {
    %c0_i32 = arith.constant 0 : i32
    %c0_i32_0 = arith.constant 0 : i32
    return %arg0, %c0_i32 : i32, i32
  }
  func.func @transform_1(%arg0: i32) -> (i32, i32) {
    %c0_i32 = arith.constant 0 : i32
    %c0_i32_0 = arith.constant 0 : i32
    %c0_i32_1 = arith.constant 0 : i32
    return %c0_i32, %c0_i32_0 : i32, i32
  }
  func.func @transform_2(%arg0: i32) -> (i32, i32) {
    %c0_i32 = arith.constant 0 : i32
    %c0_i32_0 = arith.constant 0 : i32
    %c0_i32_1 = arith.constant 0 : i32
    return %c0_i32, %c0_i32_0 : i32, i32
  }
  func.func @transform_3(%arg0: i32) -> (i32, i32) {
    %c0_i32 = arith.constant 0 : i32
    %c0_i32_0 = arith.constant 0 : i32
    return %arg0, %c0_i32 : i32, i32
  }
}

</mosaic_0001>

<bundles_post_ra>
// kernel: unet_forward.10
= control target key start
LH: loop header
LB: loop body
LE: loop exit
PB: predicated region body
PF: predicated region fallthrough
CT: control target
= control target key end

     0   :  { %s1102_s12 = smov 0   ;;  %s1224_s0 = inlined_call_operand.vmem [shape: bf16[512,36], index: 0, kind: input, shape index: {}]   ;;  %s1225_s1 = inlined_call_operand.vmem [shape: bf16[36,128], index: 1, kind: input, shape index: {}]   ;;  %s1226_s2 = inlined_call_operand.vmem [shape: f32[1,128], index: 2, kind: input, shape index: {}]   ;;  %s1227_s3 = inlined_call_operand.vmem [shape: bf16[512,128], index: 3, kind: output, shape index: {}]  }
   0x1 LB: > { %s776_s13 = sadd.s32 4294967295, %s1080_s12   ;;  %p780_p0 = scmp.ge.s32.totalorder %s1080_s12, 1  ;;  %s1080_s12 = sphi %s1102_s12, %s13_s12  }
   0x2   : > { %p138_p1 = scmp.lt.s32.totalorder %s1080_s12, 3 }
   0x4   : > { %p139_p2 = pnand %p780_p0, %p138_p1 }
   0x5   : > { %v1055_v0 = vld [vmem:[%s1225_s1] sm:$0xff] (!%p139_p2)   ;;  %v1056_v1 = vld [vmem:[%s1225_s1 + $0x8] sm:$0xff] (!%p139_p2)   ;;  %s781_s18 = sshll.u32 (!%p139_p2), %s776_s13, 5  ;;  %v1057_v2 = vld [vmem:[%s1225_s1 + $0x10] ss:$0 sps:$4 sm:$0x33] (!%p139_p2)  }
   0x6   : > { %142 = sbr.rel (%p139_p2) target bundleno = 265 (0x109), region = 32  ;;  %1001 = vmatprep.subr.bf16.mxu0 (!%p139_p2), %v1055_v0  ;;  %1039 = vmatprep.subr.bf16.mxu1 (!%p139_p2), %v1055_v0  ;;  %p163_p3 = scmp.lt.s32.totalorder (!%p139_p2), %s781_s18, 63  ;;  %vm363_vm0 = vcmask (!%p139_p2), 1041408   ;;  %vm314_vm1 = vcmask (!%p139_p2), 293888   ;;  %v1164_v20 = vld [vmem:[%s1226_s2] ss:$0 sm:$0xff] (!%p139_p2) }
   0x7   : > { %1002 = vmatpush3.bf16.msra.mxu0 (!%p139_p2), %v1055_v0  ;;  %1042 = vmatpush3.bf16.msra.mxu1 (!%p139_p2), %v1055_v0  ;;  %v365_v3 = vsel (!%p139_p2), %vm363_vm0, %v1057_v2, 0 }
   0x8   : > { %1003 = vmatprep.subr.bf16.mxu0 (!%p139_p2), %v1056_v1  ;;  %1040 = vmatprep.subr.bf16.mxu1 (!%p139_p2), %v1056_v1 }
   0xb   : > { %1004 = vmatpush3.bf16.msra.mxu0 (!%p139_p2), %v1056_v1  ;;  %1043 = vmatpush3.bf16.msra.mxu1 (!%p139_p2), %v1056_v1 }
   0xc   : > { %1045 = vmatprep.subr.msk.bf16.mxu0 (!%p139_p2), %vm363_vm0, %v1057_v2  ;;  %1046 = vmatprep.subr.msk.bf16.mxu1 (!%p139_p2), %vm363_vm0, %v1057_v2 }
   0xd   : > { %s1229_s18 = smov (!%p163_p3, %s781_s18), 63 }
   0xe   : > { %s782_s21 = sshll.u32 %s1229_s18, 2 }
   0xf   : > { %s1127_s24 = scalar_lea.vmem %s1224_s0, %s782_s21  ;;  %1006 = vmatpush3.bf16.msra.mxu0 %v365_v3  ;;  %1044 = vmatpush3.bf16.msra.mxu1 %v365_v3  ;;  %s1179_s29 = scalar_lea.vmem %s1227_s3, %s782_s21 }
  0x10   : > { %v1058_v4 = vld [vmem:[%s1127_s24] sm:$0xff]   ;;  %v1060_v6 = vld [vmem:[%s1127_s24 + $0x8] sm:$0xff]   ;;  %v1062_v8 = vld [vmem:[%s1127_s24 + $0x10] sm:$0xff]  }
  0x11   : > { %v1059_v5 = vld [vmem:[%s1127_s24 + $0x40] sm:$0xff]   ;;  %1007 = vmatprep.mubr.msk.bf16.mxu0 %vm314_vm1, %v1058_v4  ;;  %v1061_v7 = vld [vmem:[%s1127_s24 + $0x48] sm:$0xff]   ;;  %v1063_v9 = vld [vmem:[%s1127_s24 + $0x50] sm:$0xff]  }
  0x12   : > { %1023 = vmatprep.mubr.msk.bf16.mxu1 %vm314_vm1, %v1059_v5  ;;  %1008 = vmatmul.mubr.msk.bf16.vlgmr.msra.gmra.mrb[0].mxu0 %vm314_vm1, %v1060_v6  ;;  %v1064_v10 = vld [vmem:[%s1127_s24 + $0x18] sm:$0xff]   ;;  %v1066_v12 = vld [vmem:[%s1127_s24 + $0x20] sm:$0xff]   ;;  %v1068_v14 = vld [vmem:[%s1127_s24 + $0x28] sm:$0xff]  }
  0x13   : > { %1024 = vmatmul.mubr.msk.bf16.vlgmr.msra.gmra.mrb[0].mxu1 %vm314_vm1, %v1061_v7  ;;  %1011 = vmatprep.mubr.msk.bf16.mxu0 %vm314_vm1, %v1062_v8  ;;  %v1065_v11 = vld [vmem:[%s1127_s24 + $0x58] sm:$0xff]   ;;  %v1067_v13 = vld [vmem:[%s1127_s24 + $0x60] sm:$0xff]   ;;  %v1069_v15 = vld [vmem:[%s1127_s24 + $0x68] sm:$0xff]  }
  0x14   : > { %1027 = vmatprep.mubr.msk.bf16.mxu1 %vm314_vm1, %v1063_v9  ;;  %v1070_v16 = vld [vmem:[%s1127_s24 + $0x30] sm:$0xff]   ;;  %v1072_v18 = vld [vmem:[%s1127_s24 + $0x38] sm:$0xff]  }
  0x15   : > { %v1071_v17 = vld [vmem:[%s1127_s24 + $0x70] sm:$0xff]   ;;  %v1073_v19 = vld [vmem:[%s1127_s24 + $0x78] sm:$0xff]  }
  0x1a   : > { %1012 = vmatmul.mubr.msk.bf16.gmra.mrb[4].mxu0 %vm314_vm1, %v1064_v10 }
  0x1b   : > { %1028 = vmatmul.mubr.msk.bf16.gmra.mrb[4].mxu1 %vm314_vm1, %v1065_v11  ;;  %1015 = vmatprep.mubr.msk.bf16.mxu0 %vm314_vm1, %v1066_v12 }
  0x1c   : > { %1031 = vmatprep.mubr.msk.bf16.mxu1 %vm314_vm1, %v1067_v13 }
  0x22   : > { %1016 = vmatmul.mubr.msk.bf16.gmra.mrb[8].mxu0 %vm314_vm1, %v1068_v14 }
  0x23   : > { %1032 = vmatmul.mubr.msk.bf16.gmra.mrb[8].mxu1 %vm314_vm1, %v1069_v15  ;;  %1019 = vmatprep.mubr.msk.bf16.mxu0 %vm314_vm1, %v1070_v16 }
  0x24   : > { %1035 = vmatprep.mubr.msk.bf16.mxu1 %vm314_vm1, %v1071_v17 }
  0x2a   : > { %1020 = vmatmul.mubr.msk.bf16.gmra.mrb[12].mxu0 %vm314_vm1, %v1072_v18 }
  0x2b   : > { %1036 = vmatmul.mubr.msk.bf16.gmra.mrb[12].mxu1 %vm314_vm1, %v1073_v19 }
  0xe5   : > { %v1009_v21 = vpop.f32.mrb[0].mxu0 }
  0xe6   : > { %v1025_v22 = vpop.f32.mrb[0].mxu1  ;;  %v410_v23 = vadd.f32 %v1009_v21, %v1164_v20  ;;  %v401_v25 = vpop.f32.mrb[1].mxu0 }
  0xe7   : > { %v474_v24 = vadd.f32 %v1025_v22, %v1164_v20  ;;  %v465_v26 = vpop.f32.mrb[1].mxu1  ;;  %v402_v27 = vadd.f32 %v1164_v20, %v401_v25  ;;  %v1010_v29 = vpop.f32.mrb[2].mxu0 }
  0xe8   : > { %v466_v28 = vadd.f32 %v1164_v20, %v465_v26  ;;  %v1026_v30 = vpop.f32.mrb[2].mxu1  ;;  %v413_v31 = vadd.f32 %v1010_v29, %v1164_v20  ;;  %v404_v33 = vpop.f32.mrb[3].mxu0  ;;  %v530_v37 = vmax.f32 %v410_v23, 0.0 }
  0xe9   : > { %v477_v32 = vadd.f32 %v1026_v30, %v1164_v20  ;;  %v468_v34 = vpop.f32.mrb[3].mxu1  ;;  %v405_v35 = vadd.f32 %v1164_v20, %v404_v33  ;;  %v546_v38 = vmax.f32 %v474_v24, 0.0  ;;  %v528_v41 = vmax.f32 %v402_v27, 0.0 }
  0xea   : > { %v469_v36 = vadd.f32 %v1164_v20, %v468_v34  ;;  %v531_v39 = vmax.f32 %v413_v31, 0.0  ;;  %v544_v42 = vmax.f32 %v466_v28, 0.0 }
  0xeb   : > { %v547_v40 = vmax.f32 %v477_v32, 0.0  ;;  %v529_v43 = vmax.f32 %v405_v35, 0.0 }
  0xec   : > { %v545_v44 = vmax.f32 %v469_v36, 0.0  ;;  %v895_v45 = vpack.c.bf16 %v531_v39, %v530_v37 }
  0xed   : > { %v935_v46 = vpack.c.bf16 %v547_v40, %v546_v38  ;;  %v890_v47 = vpack.c.bf16 %v529_v43, %v528_v41  ;;  %v1013_v49 = vpop.f32.mrb[4].mxu0 }
  0xee   : > { %v930_v48 = vpack.c.bf16 %v545_v44, %v544_v42  ;;  %v1029_v50 = vpop.f32.mrb[4].mxu1  ;;  %967 = vst [vmem:[%s1179_s29 + $0x8] sm:$0xff] %v895_v45   ;;  %v426_v51 = vadd.f32 %v1013_v49, %v1164_v20  ;;  %v417_v53 = vpop.f32.mrb[5].mxu0 }
  0xef   : > { %975 = vst [vmem:[%s1179_s29 + $0x48] sm:$0xff] %v935_v46   ;;  %v490_v52 = vadd.f32 %v1029_v50, %v1164_v20  ;;  %v481_v54 = vpop.f32.mrb[5].mxu1  ;;  %891 = vst [vmem:[%s1179_s29] sm:$0xff] %v890_v47   ;;  %v418_v55 = vadd.f32 %v1164_v20, %v417_v53  ;;  %v1014_v57 = vpop.f32.mrb[6].mxu0 }
  0xf0   : > { %974 = vst [vmem:[%s1179_s29 + $0x40] sm:$0xff] %v930_v48   ;;  %v482_v56 = vadd.f32 %v1164_v20, %v481_v54  ;;  %v1030_v58 = vpop.f32.mrb[6].mxu1  ;;  %v429_v59 = vadd.f32 %v1014_v57, %v1164_v20  ;;  %v420_v61 = vpop.f32.mrb[7].mxu0  ;;  %v534_v1 = vmax.f32 %v426_v51, 0.0 }
  0xf1   : > { %v493_v60 = vadd.f32 %v1030_v58, %v1164_v20  ;;  %v484_v62 = vpop.f32.mrb[7].mxu1  ;;  %v421_v63 = vadd.f32 %v1164_v20, %v420_v61  ;;  %v550_v2 = vmax.f32 %v490_v52, 0.0  ;;  %v532_v5 = vmax.f32 %v418_v55, 0.0 }
  0xf2   : > { %v485_v0 = vadd.f32 %v1164_v20, %v484_v62  ;;  %v535_v3 = vmax.f32 %v429_v59, 0.0  ;;  %v548_v6 = vmax.f32 %v482_v56, 0.0 }
  0xf3   : > { %v551_v4 = vmax.f32 %v493_v60, 0.0  ;;  %v533_v7 = vmax.f32 %v421_v63, 0.0 }
  0xf4   : > { %v549_v8 = vmax.f32 %v485_v0, 0.0  ;;  %v905_v9 = vpack.c.bf16 %v535_v3, %v534_v1 }
  0xf5   : > { %v945_v10 = vpack.c.bf16 %v551_v4, %v550_v2  ;;  %v900_v11 = vpack.c.bf16 %v533_v7, %v532_v5  ;;  %v1017_v13 = vpop.f32.mrb[8].mxu0 }
  0xf6   : > { %v940_v12 = vpack.c.bf16 %v549_v8, %v548_v6  ;;  %v1033_v14 = vpop.f32.mrb[8].mxu1  ;;  %969 = vst [vmem:[%s1179_s29 + $0x18] sm:$0xff] %v905_v9   ;;  %v442_v15 = vadd.f32 %v1017_v13, %v1164_v20  ;;  %v433_v17 = vpop.f32.mrb[9].mxu0 }
  0xf7   : > { %977 = vst [vmem:[%s1179_s29 + $0x58] sm:$0xff] %v945_v10   ;;  %v506_v16 = vadd.f32 %v1033_v14, %v1164_v20  ;;  %v497_v18 = vpop.f32.mrb[9].mxu1  ;;  %968 = vst [vmem:[%s1179_s29 + $0x10] sm:$0xff] %v900_v11   ;;  %v434_v19 = vadd.f32 %v1164_v20, %v433_v17  ;;  %v1018_v22 = vpop.f32.mrb[10].mxu0 }
  0xf8   : > { %976 = vst [vmem:[%s1179_s29 + $0x50] sm:$0xff] %v940_v12   ;;  %v498_v21 = vadd.f32 %v1164_v20, %v497_v18  ;;  %v1034_v23 = vpop.f32.mrb[10].mxu1  ;;  %v445_v24 = vadd.f32 %v1018_v22, %v1164_v20  ;;  %v436_v26 = vpop.f32.mrb[11].mxu0  ;;  %v538_v30 = vmax.f32 %v442_v15, 0.0 }
  0xf9   : > { %v509_v25 = vadd.f32 %v1034_v23, %v1164_v20  ;;  %v500_v27 = vpop.f32.mrb[11].mxu1  ;;  %v437_v28 = vadd.f32 %v1164_v20, %v436_v26  ;;  %v554_v31 = vmax.f32 %v506_v16, 0.0  ;;  %v536_v34 = vmax.f32 %v434_v19, 0.0 }
  0xfa   : > { %v501_v29 = vadd.f32 %v1164_v20, %v500_v27  ;;  %v539_v32 = vmax.f32 %v445_v24, 0.0  ;;  %v552_v35 = vmax.f32 %v498_v21, 0.0 }
  0xfb   : > { %v555_v33 = vmax.f32 %v509_v25, 0.0  ;;  %v537_v36 = vmax.f32 %v437_v28, 0.0 }
  0xfc   : > { %v553_v37 = vmax.f32 %v501_v29, 0.0  ;;  %v915_v38 = vpack.c.bf16 %v539_v32, %v538_v30 }
  0xfd   : > { %v955_v39 = vpack.c.bf16 %v555_v33, %v554_v31  ;;  %v910_v40 = vpack.c.bf16 %v537_v36, %v536_v34  ;;  %v1021_v42 = vpop.f32.mrb[12].mxu0 }
  0xfe   : > { %v950_v41 = vpack.c.bf16 %v553_v37, %v552_v35  ;;  %v1037_v43 = vpop.f32.mrb[12].mxu1  ;;  %971 = vst [vmem:[%s1179_s29 + $0x28] sm:$0xff] %v915_v38   ;;  %v458_v44 = vadd.f32 %v1021_v42, %v1164_v20  ;;  %v449_v46 = vpop.f32.mrb[13].mxu0 }
  0xff   : > { %979 = vst [vmem:[%s1179_s29 + $0x68] sm:$0xff] %v955_v39   ;;  %v522_v45 = vadd.f32 %v1037_v43, %v1164_v20  ;;  %v513_v47 = vpop.f32.mrb[13].mxu1  ;;  %970 = vst [vmem:[%s1179_s29 + $0x20] sm:$0xff] %v910_v40   ;;  %v450_v48 = vadd.f32 %v1164_v20, %v449_v46  ;;  %v1022_v50 = vpop.f32.mrb[14].mxu0 }
 0x100   : > { %978 = vst [vmem:[%s1179_s29 + $0x60] sm:$0xff] %v950_v41   ;;  %v514_v49 = vadd.f32 %v1164_v20, %v513_v47  ;;  %v1038_v51 = vpop.f32.mrb[14].mxu1  ;;  %v461_v52 = vadd.f32 %v1022_v50, %v1164_v20  ;;  %v452_v54 = vpop.f32.mrb[15].mxu0  ;;  %v542_v58 = vmax.f32 %v458_v44, 0.0 }
 0x101   : > { %v525_v53 = vadd.f32 %v1038_v51, %v1164_v20  ;;  %v516_v55 = vpop.f32.mrb[15].mxu1  ;;  %v453_v56 = vadd.f32 %v1164_v20, %v452_v54  ;;  %v558_v59 = vmax.f32 %v522_v45, 0.0  ;;  %v540_v62 = vmax.f32 %v450_v48, 0.0 }
 0x102   : > { %v517_v57 = vadd.f32 %v1164_v20, %v516_v55  ;;  %v543_v60 = vmax.f32 %v461_v52, 0.0  ;;  %v556_v63 = vmax.f32 %v514_v49, 0.0 }
 0x103   : > { %v559_v61 = vmax.f32 %v525_v53, 0.0  ;;  %v541_v0 = vmax.f32 %v453_v56, 0.0 }
 0x104   : > { %v557_v1 = vmax.f32 %v517_v57, 0.0  ;;  %v925_v2 = vpack.c.bf16 %v543_v60, %v542_v58 }
 0x105   : > { %v965_v3 = vpack.c.bf16 %v559_v61, %v558_v59  ;;  %v920_v4 = vpack.c.bf16 %v541_v0, %v540_v62 }
 0x106   : > { %v960_v5 = vpack.c.bf16 %v557_v1, %v556_v63  ;;  %973 = vst [vmem:[%s1179_s29 + $0x38] sm:$0xff] %v925_v2  }
 0x107   : > { %981 = vst [vmem:[%s1179_s29 + $0x78] sm:$0xff] %v965_v3   ;;  %972 = vst [vmem:[%s1179_s29 + $0x30] sm:$0xff] %v920_v4  }
 0x108   : > { %980 = vst [vmem:[%s1179_s29 + $0x70] sm:$0xff] %v960_v5  }
 0x109 PF: > { %s13_s12 = sadd.s32 1, %s1080_s12  }
 0x10a   : > { %p10_p4 = scmp.ge.s32.totalorder %s13_s12, 4  }
 0x10c   :  { %12 = sbr.rel (!%p10_p4) target bundleno = 1 (0x1), region = 62 }

// kernel: unet_forward.11
= control target key start
LH: loop header
LB: loop body
LE: loop exit
PB: predicated region body
PF: predicated region fallthrough
CT: control target
= control target key end

     0   :  { %s2431_s12 = smov 0   ;;  %s2433_s13 = smov 0   ;;  %s2818_s0 = inlined_call_operand.vmem [shape: bf16[512,1152], index: 0, kind: input, shape index: {}]   ;;  %s2819_s1 = inlined_call_operand.vmem [shape: bf16[1152,128], index: 1, kind: input, shape index: {}]   ;;  %s2820_s2 = inlined_call_operand.vmem [shape: f32[1,128], index: 2, kind: input, shape index: {}]   ;;  %s2821_s3 = inlined_call_operand.vmem [shape: bf16[512,128], index: 3, kind: output, shape index: {}]  }
   0x1   :  { %s2435_s14 = smov 0   ;;  %s2437_s15 = smov 0  }
   0x2   :  { %s2439_s16 = smov 0   ;;  %s2441_s17 = smov 0  }
   0x3   :  { %s2443_s18 = smov 0  }
   0x4 LB: > { %s22_s19 = sadd.s32 1, %s2400_s16  ;;  %s25_s20 = sadd.s32 1, %s2404_s17  ;;  %s2408_s18 = sphi %s2443_s18, %s13_s18   ;;  %s2404_s17 = sphi %s2441_s17, %s2827_s17   ;;  %s2400_s16 = sphi %s2439_s16, %s2826_s16   ;;  %s2396_s15 = sphi %s2437_s15, %s2825_s15   ;;  %s2392_s14 = sphi %s2435_s14, %s2824_s14   ;;  %s2388_s13 = sphi %s2433_s13, %s2823_s13   ;;  %s2384_s12 = sphi %s2431_s12, %s2822_s12  }
   0x5   : > { %p23_p0 = scmp.ge.s32.totalorder %s22_s19, 3  ;;  %p41_p1 = scmp.ne.s32.totalorder %s2388_s13, %s2384_s12 }
   0x6   : > { %p42_p2 = scmp.eq.s32.totalorder %s2408_s18, 0  ;;  %s34_s24 = sadd.s32 1, %s2388_s13 }
   0x7   : > { %s2829_s19 = smov (%p23_p0, %s22_s19), 0  ;;  %s2831_s20 = smov (!%p23_p0, %s25_s20), %s2404_s17 }
   0x8   : > { %p43_p3 = por %p42_p2, %p41_p1  ;;  %p27_p4 = scmp.ge.s32.totalorder %s2831_s20, 2 }
   0x9   : > { %s30_s21 = ssub.s32 %s2400_s16, %s2829_s19  ;;  %p1698_p6 = scmp.ge.s32.totalorder %s2408_s18, 6 }
   0xa   : > { %s2833_s20 = smov (%p27_p4, %s2831_s20), 0 }
   0xb   : > { %s29_s22 = ssub.s32 %s2404_s17, %s2833_s20  ;;  %143 = sbr.rel (%p1698_p6) target bundleno = 64 (0x40), region = 20 }
   0xc   : > { %s31_s23 = sor.u32 %s30_s21, %s29_s22 }
   0xd   : > { %p32_p5 = scmp.eq.s32.totalorder %s31_s23, 0 }
   0xf   : > { %s2482_s25 = scalar_select %p32_p5, %s2388_s13, %s34_s24  }
  0x12   : > { %146 = sbr.rel (!%p43_p3) target bundleno = 64 (0x40), region = 24  ;;  %s148_s26 = sand.u32 (%p43_p3), 1, %s2388_s13  }
  0x13   : > { %s152_s27 = smul.u32 (%p43_p3), 3, %s2400_s16 }
  0x14   : > { %s2206_s28 = smul.u32 (%p43_p3), 384, %s148_s26 }
  0x15   : > { %s2207_s29 = smul.u32 (%p43_p3), 288, %s2404_s17 }
  0x16   : > { %s2496_s8 = scalar_lea.vmem (%p43_p3), [#allocation3], %s2206_s28 }
  0x17   : > { %s154_s30 = sadd.s32 (%p43_p3), %s2207_s29, %s152_s27 }
  0x18   : > { %s1701_s4 = sshll.u32 (%p43_p3), %s154_s30, 2 }
  0x19   : > { %s2491_s7 = scalar_lea.vmem %s2818_s0, %s1701_s4 }
  0x1a   : > { %v171_v0 = vld [vmem:[%s2491_s7] sm:$0xff]  ;;  %v175_v2 = vld [vmem:[%s2491_s7 + $0x48] sm:$0xff]  ;;  %v179_v4 = vld [vmem:[%s2491_s7 + $0x90] sm:$0xff] }
  0x1b   : > { %v173_v1 = vld [vmem:[%s2491_s7 + $0x24] sm:$0xff]  ;;  %172 = vst [vmem:[%s2496_s8] sm:$0xff] %v171_v0  ;;  %176 = vst [vmem:[%s2496_s8 + $0x18] sm:$0xff] %v175_v2  ;;  %v177_v3 = vld [vmem:[%s2491_s7 + $0x6c] sm:$0xff] }
  0x1c   : > { %174 = vst [vmem:[%s2496_s8 + $0xc] sm:$0xff] %v173_v1  ;;  %v181_v5 = vld [vmem:[%s2491_s7 + $0xb4] sm:$0xff]  ;;  %178 = vst [vmem:[%s2496_s8 + $0x24] sm:$0xff] %v177_v3  ;;  %v185_v7 = vld [vmem:[%s2491_s7 + $0xfc] sm:$0xff] }
  0x1d   : > { %180 = vst [vmem:[%s2496_s8 + $0x30] sm:$0xff] %v179_v4  ;;  %182 = vst [vmem:[%s2496_s8 + $0x3c] sm:$0xff] %v181_v5  ;;  %v183_v6 = vld [vmem:[%s2491_s7 + $0xd8] sm:$0xff]  ;;  %v187_v8 = vld [vmem:[%s2491_s7 + $0x120] sm:$0xff] }
  0x1e   : > { %184 = vst [vmem:[%s2496_s8 + $0x48] sm:$0xff] %v183_v6  ;;  %186 = vst [vmem:[%s2496_s8 + $0x54] sm:$0xff] %v185_v7  ;;  %v189_v9 = vld [vmem:[%s2491_s7 + $0x144] sm:$0xff]  ;;  %v193_v11 = vld [vmem:[%s2491_s7 + $0x18c] sm:$0xff] }
  0x1f   : > { %188 = vst [vmem:[%s2496_s8 + $0x60] sm:$0xff] %v187_v8  ;;  %v191_v10 = vld [vmem:[%s2491_s7 + $0x168] sm:$0xff]  ;;  %190 = vst [vmem:[%s2496_s8 + $0x6c] sm:$0xff] %v189_v9  ;;  %v195_v12 = vld [vmem:[%s2491_s7 + $0x1b0] sm:$0xff] }
  0x20   : > { %192 = vst [vmem:[%s2496_s8 + $0x78] sm:$0xff] %v191_v10  ;;  %194 = vst [vmem:[%s2496_s8 + $0x84] sm:$0xff] %v193_v11  ;;  %v197_v13 = vld [vmem:[%s2491_s7 + $0x1d4] sm:$0xff]  ;;  %v201_v15 = vld [vmem:[%s2491_s7 + $0x21c] sm:$0xff] }
  0x21   : > { %v199_v14 = vld [vmem:[%s2491_s7 + $0x1f8] sm:$0xff]  ;;  %196 = vst [vmem:[%s2496_s8 + $0x90] sm:$0xff] %v195_v12  ;;  %198 = vst [vmem:[%s2496_s8 + $0x9c] sm:$0xff] %v197_v13  ;;  %v203_v16 = vld [vmem:[%s2491_s7 + $0x240] sm:$0xff] }
  0x22   : > { %200 = vst [vmem:[%s2496_s8 + $0xa8] sm:$0xff] %v199_v14  ;;  %v205_v17 = vld [vmem:[%s2491_s7 + $0x264] sm:$0xff]  ;;  %202 = vst [vmem:[%s2496_s8 + $0xb4] sm:$0xff] %v201_v15  ;;  %v209_v19 = vld [vmem:[%s2491_s7 + $0x2ac] sm:$0xff] }
  0x23   : > { %204 = vst [vmem:[%s2496_s8 + $0xc0] sm:$0xff] %v203_v16  ;;  %206 = vst [vmem:[%s2496_s8 + $0xcc] sm:$0xff] %v205_v17  ;;  %v207_v18 = vld [vmem:[%s2491_s7 + $0x288] sm:$0xff]  ;;  %v211_v20 = vld [vmem:[%s2491_s7 + $0x2d0] sm:$0xff] }
  0x24   : > { %208 = vst [vmem:[%s2496_s8 + $0xd8] sm:$0xff] %v207_v18  ;;  %210 = vst [vmem:[%s2496_s8 + $0xe4] sm:$0xff] %v209_v19  ;;  %v213_v21 = vld [vmem:[%s2491_s7 + $0x2f4] sm:$0xff]  ;;  %v217_v23 = vld [vmem:[%s2491_s7 + $0x33c] sm:$0xff] }
  0x25   : > { %212 = vst [vmem:[%s2496_s8 + $0xf0] sm:$0xff] %v211_v20  ;;  %v215_v22 = vld [vmem:[%s2491_s7 + $0x318] sm:$0xff]  ;;  %214 = vst [vmem:[%s2496_s8 + $0xfc] sm:$0xff] %v213_v21  ;;  %v219_v24 = vld [vmem:[%s2491_s7 + $0x360] sm:$0xff] }
  0x26   : > { %216 = vst [vmem:[%s2496_s8 + $0x108] sm:$0xff] %v215_v22  ;;  %218 = vst [vmem:[%s2496_s8 + $0x114] sm:$0xff] %v217_v23  ;;  %v221_v25 = vld [vmem:[%s2491_s7 + $0x384] sm:$0xff]  ;;  %v225_v27 = vld [vmem:[%s2491_s7 + $0x3cc] sm:$0xff] }
  0x27   : > { %v223_v26 = vld [vmem:[%s2491_s7 + $0x3a8] sm:$0xff]  ;;  %220 = vst [vmem:[%s2496_s8 + $0x120] sm:$0xff] %v219_v24  ;;  %222 = vst [vmem:[%s2496_s8 + $0x12c] sm:$0xff] %v221_v25  ;;  %v227_v28 = vld [vmem:[%s2491_s7 + $0x3f0] sm:$0xff] }
  0x28   : > { %224 = vst [vmem:[%s2496_s8 + $0x138] sm:$0xff] %v223_v26  ;;  %v229_v29 = vld [vmem:[%s2491_s7 + $0x414] sm:$0xff]  ;;  %226 = vst [vmem:[%s2496_s8 + $0x144] sm:$0xff] %v225_v27  ;;  %v233_v31 = vld [vmem:[%s2491_s7 + $0x45c] sm:$0xff] }
  0x29   : > { %228 = vst [vmem:[%s2496_s8 + $0x150] sm:$0xff] %v227_v28  ;;  %230 = vst [vmem:[%s2496_s8 + $0x15c] sm:$0xff] %v229_v29  ;;  %v231_v30 = vld [vmem:[%s2491_s7 + $0x438] sm:$0xff]  ;;  %v1702_v32 = vld [vmem:[%s2491_s7 + $0x8] sm:$0xf] }
  0x2a   : > { %232 = vst [vmem:[%s2496_s8 + $0x168] sm:$0xff] %v231_v30  ;;  %234 = vst [vmem:[%s2496_s8 + $0x174] sm:$0xff] %v233_v31  ;;  %v1704_v33 = vld [vmem:[%s2491_s7 + $0x2c] sm:$0xf]  ;;  %v1706_v34 = vld [vmem:[%s2491_s7 + $0x50] sm:$0xf] }
  0x2b   : > { %1703 = vst [vmem:[%s2496_s8 + $0x8] sm:$0xf] %v1702_v32  ;;  %v1708_v35 = vld [vmem:[%s2491_s7 + $0x74] sm:$0xf]  ;;  %1705 = vst [vmem:[%s2496_s8 + $0x14] sm:$0xf] %v1704_v33 }
  0x2c   : > { %1707 = vst [vmem:[%s2496_s8 + $0x20] sm:$0xf] %v1706_v34  ;;  %1709 = vst [vmem:[%s2496_s8 + $0x2c] sm:$0xf] %v1708_v35  ;;  %v1710_v36 = vld [vmem:[%s2491_s7 + $0x98] sm:$0xf] }
  0x2d   : > { %v1712_v37 = vld [vmem:[%s2491_s7 + $0xbc] sm:$0xf]  ;;  %v1714_v38 = vld [vmem:[%s2491_s7 + $0xe0] sm:$0xf]  ;;  %1711 = vst [vmem:[%s2496_s8 + $0x38] sm:$0xf] %v1710_v36 }
  0x2e   : > { %1713 = vst [vmem:[%s2496_s8 + $0x44] sm:$0xf] %v1712_v37  ;;  %1715 = vst [vmem:[%s2496_s8 + $0x50] sm:$0xf] %v1714_v38  ;;  %v1716_v39 = vld [vmem:[%s2491_s7 + $0x104] sm:$0xf] }
  0x2f   : > { %v1718_v40 = vld [vmem:[%s2491_s7 + $0x128] sm:$0xf]  ;;  %v1720_v41 = vld [vmem:[%s2491_s7 + $0x14c] sm:$0xf]  ;;  %1717 = vst [vmem:[%s2496_s8 + $0x5c] sm:$0xf] %v1716_v39 }
  0x30   : > { %1719 = vst [vmem:[%s2496_s8 + $0x68] sm:$0xf] %v1718_v40  ;;  %1721 = vst [vmem:[%s2496_s8 + $0x74] sm:$0xf] %v1720_v41  ;;  %v1722_v42 = vld [vmem:[%s2491_s7 + $0x170] sm:$0xf] }
  0x31   : > { %v1724_v43 = vld [vmem:[%s2491_s7 + $0x194] sm:$0xf]  ;;  %v1726_v44 = vld [vmem:[%s2491_s7 + $0x1b8] sm:$0xf]  ;;  %1723 = vst [vmem:[%s2496_s8 + $0x80] sm:$0xf] %v1722_v42 }
  0x32   : > { %1725 = vst [vmem:[%s2496_s8 + $0x8c] sm:$0xf] %v1724_v43  ;;  %1727 = vst [vmem:[%s2496_s8 + $0x98] sm:$0xf] %v1726_v44  ;;  %v1728_v45 = vld [vmem:[%s2491_s7 + $0x1dc] sm:$0xf] }
  0x33   : > { %v1730_v46 = vld [vmem:[%s2491_s7 + $0x200] sm:$0xf]  ;;  %v1732_v47 = vld [vmem:[%s2491_s7 + $0x224] sm:$0xf]  ;;  %1729 = vst [vmem:[%s2496_s8 + $0xa4] sm:$0xf] %v1728_v45 }
  0x34   : > { %1731 = vst [vmem:[%s2496_s8 + $0xb0] sm:$0xf] %v1730_v46  ;;  %1733 = vst [vmem:[%s2496_s8 + $0xbc] sm:$0xf] %v1732_v47  ;;  %v1734_v48 = vld [vmem:[%s2491_s7 + $0x248] sm:$0xf] }
  0x35   : > { %v1736_v49 = vld [vmem:[%s2491_s7 + $0x26c] sm:$0xf]  ;;  %v1738_v50 = vld [vmem:[%s2491_s7 + $0x290] sm:$0xf]  ;;  %1735 = vst [vmem:[%s2496_s8 + $0xc8] sm:$0xf] %v1734_v48 }
  0x36   : > { %1737 = vst [vmem:[%s2496_s8 + $0xd4] sm:$0xf] %v1736_v49  ;;  %1739 = vst [vmem:[%s2496_s8 + $0xe0] sm:$0xf] %v1738_v50  ;;  %v1740_v51 = vld [vmem:[%s2491_s7 + $0x2b4] sm:$0xf] }
  0x37   : > { %v1742_v52 = vld [vmem:[%s2491_s7 + $0x2d8] sm:$0xf]  ;;  %v1744_v53 = vld [vmem:[%s2491_s7 + $0x2fc] sm:$0xf]  ;;  %1741 = vst [vmem:[%s2496_s8 + $0xec] sm:$0xf] %v1740_v51 }
  0x38   : > { %1743 = vst [vmem:[%s2496_s8 + $0xf8] sm:$0xf] %v1742_v52  ;;  %1745 = vst [vmem:[%s2496_s8 + $0x104] sm:$0xf] %v1744_v53  ;;  %v1746_v54 = vld [vmem:[%s2491_s7 + $0x320] sm:$0xf] }
  0x39   : > { %v1748_v55 = vld [vmem:[%s2491_s7 + $0x344] sm:$0xf]  ;;  %v1750_v56 = vld [vmem:[%s2491_s7 + $0x368] sm:$0xf]  ;;  %1747 = vst [vmem:[%s2496_s8 + $0x110] sm:$0xf] %v1746_v54 }
  0x3a   : > { %1749 = vst [vmem:[%s2496_s8 + $0x11c] sm:$0xf] %v1748_v55  ;;  %1751 = vst [vmem:[%s2496_s8 + $0x128] sm:$0xf] %v1750_v56  ;;  %v1752_v57 = vld [vmem:[%s2491_s7 + $0x38c] sm:$0xf] }
  0x3b   : > { %v1754_v58 = vld [vmem:[%s2491_s7 + $0x3b0] sm:$0xf]  ;;  %v1756_v59 = vld [vmem:[%s2491_s7 + $0x3d4] sm:$0xf]  ;;  %1753 = vst [vmem:[%s2496_s8 + $0x134] sm:$0xf] %v1752_v57 }
  0x3c   : > { %1755 = vst [vmem:[%s2496_s8 + $0x140] sm:$0xf] %v1754_v58  ;;  %1757 = vst [vmem:[%s2496_s8 + $0x14c] sm:$0xf] %v1756_v59  ;;  %v1758_v60 = vld [vmem:[%s2491_s7 + $0x3f8] sm:$0xf] }
  0x3d   : > { %v1760_v61 = vld [vmem:[%s2491_s7 + $0x41c] sm:$0xf]  ;;  %v1762_v62 = vld [vmem:[%s2491_s7 + $0x440] sm:$0xf]  ;;  %1759 = vst [vmem:[%s2496_s8 + $0x158] sm:$0xf] %v1758_v60 }
  0x3e   : > { %1761 = vst [vmem:[%s2496_s8 + $0x164] sm:$0xf] %v1760_v61  ;;  %1763 = vst [vmem:[%s2496_s8 + $0x170] sm:$0xf] %v1762_v62  ;;  %v1764_v63 = vld [vmem:[%s2491_s7 + $0x464] sm:$0xf] }
  0x3f   : > { %1765 = vst [vmem:[%s2496_s8 + $0x17c] sm:$0xf] %v1764_v63 }
  0x40 PF: > { %p1766_p7 = scmp.ge.s32.totalorder %s2408_s18, 1  ;;  %p319_p8 = scmp.lt.s32.totalorder %s2408_s18, 7 }
  0x42   : > { %p320_p9 = pnand %p1766_p7, %p319_p8 }
  0x43   : > { %s326_s9 = sand.u32 (!%p320_p9), 1, %s2384_s12   ;;  %s356_s10 = smul.u32 (!%p320_p9), 48, %s2392_s14 }
  0x44   : > { %323 = sbr.rel (%p320_p9) target bundleno = 456 (0x1c8), region = 54  ;;  %s1768_s21 = sshll.u32 (!%p320_p9), %s2396_s15, 5 }
  0x45   : > { %s2208_s11 = smul.u32 (!%p320_p9), 384, %s326_s9  ;;  %p357_p10 = scmp.lt.s32.totalorder (!%p320_p9), %s356_s10, 143 }
  0x46   : > { %p363_p11 = scmp.lt.s32.totalorder (!%p320_p9), %s1768_s21, 63  ;;  %p1770_p12 = scmp.ne.s32.totalorder (!%p320_p9), %s2392_s14, 0 }
  0x47   : > { %s2638_s12 = scalar_lea.vmem (!%p320_p9), [#allocation3], %s2208_s11 }
  0x4b   : > { %s2835_s10 = smov (!%p357_p10, %s356_s10), 143  ;;  %s2837_s21 = smov (!%p363_p11, %s1768_s21), 63 }
  0x4c   : > { %s1767_s22 = sshll.u32 %s2835_s10, 2  ;;  %s1769_s27 = sshll.u32 %s2837_s21, 2  ;;  %v2410_v0 = vmov (!%p1770_p12), 0.0  }
  0x4d   : > { %s2631_s26 = scalar_lea.vmem %s2819_s1, %s1767_s22  ;;  %s2636_s30 = scalar_lea.vmem %s2821_s3, %s1769_s27  ;;  %373 = vst [vmem:[#allocation2] sm:$0xff] (!%p1770_p12), %v2410_v0  ;;  %374 = vst [vmem:[#allocation2 + $0x8] sm:$0xff] (!%p1770_p12), %v2410_v0 }
  0x4e   : > { %372 = sbr.rel (%p1770_p12) target bundleno = 93 (0x5d), region = 62  ;;  %375 = vst [vmem:[#allocation2 + $0x10] sm:$0xff] (!%p1770_p12), %v2410_v0  ;;  %376 = vst [vmem:[#allocation2 + $0x18] sm:$0xff] (!%p1770_p12), %v2410_v0 }
  0x4f   : > { %377 = vst [vmem:[#allocation2 + $0x20] sm:$0xff] (!%p1770_p12), %v2410_v0  ;;  %378 = vst [vmem:[#allocation2 + $0x28] sm:$0xff] (!%p1770_p12), %v2410_v0 }
  0x50   : > { %379 = vst [vmem:[#allocation2 + $0x30] sm:$0xff] (!%p1770_p12), %v2410_v0  ;;  %380 = vst [vmem:[#allocation2 + $0x38] sm:$0xff] (!%p1770_p12), %v2410_v0 }
  0x51   : > { %381 = vst [vmem:[#allocation2 + $0x40] sm:$0xff] (!%p1770_p12), %v2410_v0  ;;  %382 = vst [vmem:[#allocation2 + $0x48] sm:$0xff] (!%p1770_p12), %v2410_v0 }
  0x52   : > { %383 = vst [vmem:[#allocation2 + $0x50] sm:$0xff] (!%p1770_p12), %v2410_v0  ;;  %384 = vst [vmem:[#allocation2 + $0x58] sm:$0xff] (!%p1770_p12), %v2410_v0 }
  0x53   : > { %385 = vst [vmem:[#allocation2 + $0x60] sm:$0xff] (!%p1770_p12), %v2410_v0  ;;  %386 = vst [vmem:[#allocation2 + $0x68] sm:$0xff] (!%p1770_p12), %v2410_v0 }
  0x54   : > { %387 = vst [vmem:[#allocation2 + $0x70] sm:$0xff] (!%p1770_p12), %v2410_v0  ;;  %388 = vst [vmem:[#allocation2 + $0x78] sm:$0xff] (!%p1770_p12), %v2410_v0 }
  0x55   : > { %389 = vst [vmem:[#allocation2 + $0x80] sm:$0xff] %v2410_v0  ;;  %390 = vst [vmem:[#allocation2 + $0x88] sm:$0xff] %v2410_v0 }
  0x56   : > { %391 = vst [vmem:[#allocation2 + $0x90] sm:$0xff] %v2410_v0  ;;  %392 = vst [vmem:[#allocation2 + $0x98] sm:$0xff] %v2410_v0 }
  0x57   : > { %393 = vst [vmem:[#allocation2 + $0xa0] sm:$0xff] %v2410_v0  ;;  %394 = vst [vmem:[#allocation2 + $0xa8] sm:$0xff] %v2410_v0 }
  0x58   : > { %395 = vst [vmem:[#allocation2 + $0xb0] sm:$0xff] %v2410_v0  ;;  %396 = vst [vmem:[#allocation2 + $0xb8] sm:$0xff] %v2410_v0 }
  0x59   : > { %397 = vst [vmem:[#allocation2 + $0xc0] sm:$0xff] %v2410_v0  ;;  %398 = vst [vmem:[#allocation2 + $0xc8] sm:$0xff] %v2410_v0 }
  0x5a   : > { %399 = vst [vmem:[#allocation2 + $0xd0] sm:$0xff] %v2410_v0  ;;  %400 = vst [vmem:[#allocation2 + $0xd8] sm:$0xff] %v2410_v0 }
  0x5b   : > { %401 = vst [vmem:[#allocation2 + $0xe0] sm:$0xff] %v2410_v0  ;;  %402 = vst [vmem:[#allocation2 + $0xe8] sm:$0xff] %v2410_v0 }
  0x5c   : > { %403 = vst [vmem:[#allocation2 + $0xf0] sm:$0xff] %v2410_v0  ;;  %404 = vst [vmem:[#allocation2 + $0xf8] sm:$0xff] %v2410_v0 }
  0x5d PF: > { %v2266_v1 = vld [vmem:[%s2631_s26 + $0x40] sm:$0xff]   ;;  %v2268_v3 = vld [vmem:[%s2631_s26 + $0x48] sm:$0xff]   ;;  %v2270_v5 = vld [vmem:[%s2631_s26 + $0x50] sm:$0xff]   ;;  %p1843_p13 = scmp.ne.s32.totalorder %s2392_s14, 2 }
  0x5e   : > { %v2267_v2 = vld [vmem:[%s2631_s26] sm:$0xff]   ;;  %2006 = vmatprep.subr.bf16.mxu0 %v2266_v1  ;;  %2190 = vmatprep.subr.bf16.mxu1 %v2266_v1  ;;  %v2269_v4 = vld [vmem:[%s2631_s26 + $0x8] sm:$0xff]   ;;  %v2271_v6 = vld [vmem:[%s2631_s26 + $0x10] sm:$0xff]  }
  0x5f   : > { %2007 = vmatpush3.bf16.msra.mxu0 %v2267_v2  ;;  %2198 = vmatpush3.bf16.msra.mxu1 %v2267_v2  ;;  %v2272_v7 = vld [vmem:[%s2631_s26 + $0x58] sm:$0xff]   ;;  %v2274_v9 = vld [vmem:[%s2631_s26 + $0x60] sm:$0xff]   ;;  %v2276_v11 = vld [vmem:[%s2631_s26 + $0x68] sm:$0xff]  }
  0x60   : > { %2008 = vmatprep.subr.bf16.mxu0 %v2268_v3  ;;  %2191 = vmatprep.subr.bf16.mxu1 %v2268_v3  ;;  %v2273_v8 = vld [vmem:[%s2631_s26 + $0x18] sm:$0xff]   ;;  %v2275_v10 = vld [vmem:[%s2631_s26 + $0x20] sm:$0xff]   ;;  %v2277_v14 = vld [vmem:[%s2631_s26 + $0x28] sm:$0xff]  }
  0x61   : > { %v2284_v12 = vld [vmem:[%s2638_s12 + $0x4] ss:$12 sps:$4 sm:$0xff]   ;;  %v2280_v17 = vld [vmem:[%s2631_s26 + $0x78] sm:$0xff]   ;;  %v2282_v20 = vld [vmem:[%s2638_s12] ss:$12 sps:$4 sm:$0xff]  }
  0x62   : > { %v2287_v13 = vld [vmem:[%s2638_s12 + $0x124] ss:$12 sps:$4 sm:$0xff]   ;;  %981 = vmatprep.mubr.bf16.mxu0 %v2284_v12  ;;  %v2281_v18 = vld [vmem:[%s2631_s26 + $0x38] sm:$0xff]   ;;  %v2285_v21 = vld [vmem:[%s2638_s12 + $0x120] ss:$12 sps:$4 sm:$0xff]  }
  0x63   : > { %2009 = vmatpush3.bf16.msra.mxu0 %v2269_v4  ;;  %2199 = vmatpush3.bf16.msra.mxu1 %v2269_v4  ;;  %v2278_v15 = vld [vmem:[%s2631_s26 + $0x70] sm:$0xff]   ;;  %v2288_v19 = vld [vmem:[%s2631_s26 + $0x80] sm:$0xff]   ;;  %v2290_v22 = vld [vmem:[%s2638_s12 + $0x1c] ss:$12 sps:$4 sm:$0xff]  }
  0x64   : > { %2010 = vmatprep.subr.bf16.mxu0 %v2270_v5  ;;  %2192 = vmatprep.subr.bf16.mxu1 %v2270_v5  ;;  %v2279_v16 = vld [vmem:[%s2631_s26 + $0x30] sm:$0xff]   ;;  %v2289_v23 = vld [vmem:[%s2631_s26 + $0x88] sm:$0xff]   ;;  %v2294_v25 = vld [vmem:[%s2638_s12 + $0x18] ss:$12 sps:$4 sm:$0xff]  }
  0x65   : > { %1077 = vmatprep.mubr.bf16.mxu1 %v2287_v13  ;;  %v2292_v24 = vld [vmem:[%s2638_s12 + $0x13c] ss:$12 sps:$4 sm:$0xff]   ;;  %v2296_v26 = vld [vmem:[%s2631_s26 + $0x90] sm:$0xff]   ;;  %v2295_v27 = vld [vmem:[%s2638_s12 + $0x138] ss:$12 sps:$4 sm:$0xff]  }
  0x66   : > { %v2297_v28 = vld [vmem:[%s2631_s26 + $0x98] sm:$0xff]   ;;  %v2298_v29 = vld [vmem:[%s2638_s12 + $0x34] ss:$12 sps:$4 sm:$0xff]   ;;  %v2305_v34 = vld [vmem:[%s2631_s26 + $0xa8] sm:$0xff]  }
  0x67   : > { %2011 = vmatpush3.bf16.msra.mxu0 %v2271_v6  ;;  %2200 = vmatpush3.bf16.msra.mxu1 %v2271_v6  ;;  %v2300_v30 = vld [vmem:[%s2638_s12 + $0x154] ss:$12 sps:$4 sm:$0xff]   ;;  %v2302_v32 = vld [vmem:[%s2638_s12 + $0x30] ss:$12 sps:$4 sm:$0xff]   ;;  %v2306_v35 = vld [vmem:[%s2638_s12 + $0x4c] ss:$12 sps:$4 sm:$0xff]  }
  0x68   : > { %2012 = vmatprep.subr.bf16.mxu0 %v2272_v7  ;;  %2193 = vmatprep.subr.bf16.mxu1 %v2272_v7  ;;  %v2304_v31 = vld [vmem:[%s2631_s26 + $0xa0] sm:$0xff]   ;;  %v2303_v33 = vld [vmem:[%s2638_s12 + $0x150] ss:$12 sps:$4 sm:$0xff]   ;;  %v2308_v36 = vld [vmem:[%s2638_s12 + $0x16c] ss:$12 sps:$4 sm:$0xff]  }
  0x69   : > { %v2312_v37 = vld [vmem:[%s2631_s26 + $0xb0] sm:$0xff]   ;;  %v2313_v41 = vld [vmem:[%s2631_s26 + $0xb8] sm:$0xff]   ;;  %v2317_v43 = vld [vmem:[%s2638_s12 + $0x60] ss:$12 sps:$4 sm:$0xff]  }
  0x6a   : > { %v2310_v38 = vld [vmem:[%s2638_s12 + $0x48] ss:$12 sps:$4 sm:$0xff]   ;;  %v2314_v40 = vld [vmem:[%s2638_s12 + $0x64] ss:$12 sps:$4 sm:$0xff]   ;;  %v2318_v44 = vld [vmem:[%s2638_s12 + $0x20] ss:$12 sps:$4 sm:$0xff]  }
  0x6b   : > { %2013 = vmatpush3.bf16.msra.mxu0 %v2273_v8  ;;  %2201 = vmatpush3.bf16.msra.mxu1 %v2273_v8  ;;  %v2311_v39 = vld [vmem:[%s2638_s12 + $0x168] ss:$12 sps:$4 sm:$0xff]   ;;  %v2321_v46 = vld [vmem:[%s2638_s12 + $0x38] ss:$12 sps:$4 sm:$0xff]   ;;  %v2323_v48 = vld [vmem:[%s2638_s12 + $0x50] ss:$12 sps:$4 sm:$0xff]  }
  0x6c   : > { %2014 = vmatprep.subr.bf16.mxu0 %v2274_v9  ;;  %2194 = vmatprep.subr.bf16.mxu1 %v2274_v9  ;;  %v2316_v42 = vld [vmem:[%s2638_s12 + $0x8] ss:$12 sps:$4 sm:$0xff]   ;;  %v2322_v47 = vld [vmem:[%s2638_s12 + $0x78] ss:$12 sps:$4 sm:$0xff]   ;;  %v2327_v51 = vld [vmem:[%s2638_s12 + $0x90] ss:$12 sps:$4 sm:$0xff]  }
  0x6d   : > { %v2319_v45 = vld [vmem:[%s2638_s12 + $0x7c] ss:$12 sps:$4 sm:$0xff]   ;;  %v2324_v49 = vld [vmem:[%s2638_s12 + $0x94] ss:$12 sps:$4 sm:$0xff]   ;;  %v2329_v53 = vld [vmem:[%s2638_s12 + $0xac] ss:$12 sps:$4 sm:$0xff]  }
  0x6e   : > { %v2326_v50 = vld [vmem:[%s2638_s12 + $0x68] ss:$12 sps:$4 sm:$0xff]   ;;  %v2328_v52 = vld [vmem:[%s2638_s12 + $0x80] ss:$12 sps:$4 sm:$0xff]   ;;  %v2331_v54 = vld [vmem:[%s2638_s12 + $0x98] ss:$12 sps:$4 sm:$0xff]  }
  0x6f   : > { %2015 = vmatpush3.bf16.msra.mxu0 %v2275_v10  ;;  %2202 = vmatpush3.bf16.msra.mxu1 %v2275_v10  ;;  %v2332_v55 = vld [vmem:[%s2638_s12 + $0xa8] ss:$12 sps:$4 sm:$0xff]   ;;  %v2333_v56 = vld [vmem:[%s2638_s12 + $0xb0] ss:$12 sps:$4 sm:$0xff]   ;;  %v2337_v59 = vld [vmem:[%s2638_s12 + $0xc0] ss:$12 sps:$4 sm:$0xff]  }
  0x70   : > { %2016 = vmatprep.subr.bf16.mxu0 %v2276_v11  ;;  %2195 = vmatprep.subr.bf16.mxu1 %v2276_v11  ;;  %v2334_v57 = vld [vmem:[%s2638_s12 + $0xc4] ss:$12 sps:$4 sm:$0xff]   ;;  %v2336_v58 = vld [vmem:[%s2638_s12 + $0xc8] ss:$12 sps:$4 sm:$0xff]   ;;  %v2338_v60 = vld [vmem:[%s2638_s12 + $0xe0] ss:$12 sps:$4 sm:$0xff]  }
  0x71   : > { %v2339_v61 = vld [vmem:[%s2638_s12 + $0xdc] ss:$12 sps:$4 sm:$0xff]   ;;  %v2341_v62 = vld [vmem:[%s2638_s12 + $0xf8] ss:$12 sps:$4 sm:$0xff]   ;;  %v2344_v1 = vld [vmem:[%s2638_s12 + $0xf4] ss:$12 sps:$4 sm:$0xff]  }
  0x72   : > { %v2342_v63 = vld [vmem:[%s2638_s12 + $0xd8] ss:$12 sps:$4 sm:$0xff]   ;;  %v2343_v0 = vld [vmem:[%s2638_s12 + $0x110] ss:$12 sps:$4 sm:$0xff]   ;;  %v2346_v2 = vld [vmem:[%s2638_s12 + $0x128] ss:$12 sps:$4 sm:$0xff]  }
  0x73   : > { %2017 = vmatpush3.bf16.msra.mxu0 %v2277_v14  ;;  %2203 = vmatpush3.bf16.msra.mxu1 %v2277_v14  ;;  %v2347_v3 = vld [vmem:[%s2638_s12 + $0xf0] ss:$12 sps:$4 sm:$0xff]   ;;  %v2348_v4 = vld [vmem:[%s2638_s12 + $0x140] ss:$12 sps:$4 sm:$0xff]   ;;  %v2351_v6 = vld [vmem:[%s2638_s12 + $0x158] ss:$12 sps:$4 sm:$0xff]  }
  0x74   : > { %2018 = vmatprep.subr.bf16.mxu0 %v2278_v15  ;;  %2196 = vmatprep.subr.bf16.mxu1 %v2278_v15  ;;  %v2349_v5 = vld [vmem:[%s2638_s12 + $0x10c] ss:$12 sps:$4 sm:$0xff]   ;;  %v2352_v7 = vld [vmem:[%s2638_s12 + $0x108] ss:$12 sps:$4 sm:$0xff]   ;;  %v2353_v8 = vld [vmem:[%s2638_s12 + $0x170] ss:$12 sps:$4 sm:$0xff]  }
  0x77   : > { %2019 = vmatpush3.bf16.msra.mxu0 %v2279_v16  ;;  %2204 = vmatpush3.bf16.msra.mxu1 %v2279_v16 }
  0x78   : > { %2020 = vmatprep.subr.bf16.mxu0 %v2280_v17  ;;  %2197 = vmatprep.subr.bf16.mxu1 %v2280_v17 }
  0x7b   : > { %2021 = vmatpush3.bf16.msra.mxu0 %v2281_v18  ;;  %2205 = vmatpush3.bf16.msra.mxu1 %v2281_v18 }
  0x7c   : > { %2142 = vmatprep.subr.bf16.mxu1 %v2288_v19 }
  0x7e   : > { %982 = vmatmul.mubr.bf16.vlgmr.msra.gmra.mrb[0].mxu0 %v2282_v20  ;;  %1078 = vmatmul.mubr.bf16.vlgmr.msra.gmra.mrb[0].mxu1 %v2285_v21 }
  0x7f   : > { %2143 = vmatpush3.bf16.msra.mxu1 %v2288_v19  ;;  %989 = vmatprep.mubr.bf16.mxu0 %v2290_v22 }
  0x80   : > { %2144 = vmatprep.subr.bf16.mxu1 %v2289_v23  ;;  %1085 = vmatprep.mubr.bf16.mxu1 %v2292_v24 }
  0x83   : > { %2145 = vmatpush3.bf16.msra.mxu1 %v2289_v23 }
  0x84   : > { %2146 = vmatprep.subr.bf16.mxu1 %v2296_v26 }
  0x86   : > { %990 = vmatmul.mubr.bf16.gmra.mrb[4].mxu0 %v2294_v25  ;;  %1086 = vmatmul.mubr.bf16.gmra.mrb[4].mxu1 %v2295_v27 }
  0x87   : > { %2147 = vmatpush3.bf16.msra.mxu1 %v2296_v26  ;;  %997 = vmatprep.mubr.bf16.mxu0 %v2298_v29 }
  0x88   : > { %2148 = vmatprep.subr.bf16.mxu1 %v2297_v28  ;;  %1093 = vmatprep.mubr.bf16.mxu1 %v2300_v30 }
  0x8b   : > { %2149 = vmatpush3.bf16.msra.mxu1 %v2297_v28 }
  0x8c   : > { %2150 = vmatprep.subr.bf16.mxu1 %v2304_v31 }
  0x8e   : > { %998 = vmatmul.mubr.bf16.gmra.mrb[8].mxu0 %v2302_v32  ;;  %1094 = vmatmul.mubr.bf16.gmra.mrb[8].mxu1 %v2303_v33 }
  0x8f   : > { %2151 = vmatpush3.bf16.msra.mxu1 %v2304_v31  ;;  %1005 = vmatprep.mubr.bf16.mxu0 %v2306_v35 }
  0x90   : > { %2152 = vmatprep.subr.bf16.mxu1 %v2305_v34  ;;  %1101 = vmatprep.mubr.bf16.mxu1 %v2308_v36 }
  0x93   : > { %2153 = vmatpush3.bf16.msra.mxu1 %v2305_v34 }
  0x94   : > { %2154 = vmatprep.subr.bf16.mxu1 %v2312_v37 }
  0x96   : > { %1006 = vmatmul.mubr.bf16.gmra.mrb[12].mxu0 %v2310_v38  ;;  %1102 = vmatmul.mubr.bf16.gmra.mrb[12].mxu1 %v2311_v39 }
  0x97   : > { %2155 = vmatpush3.bf16.msra.mxu1 %v2312_v37  ;;  %1013 = vmatprep.mubr.bf16.mxu0 %v2314_v40 }
  0x98   : > { %2156 = vmatprep.subr.bf16.mxu1 %v2313_v41  ;;  %2158 = vmatprep.mubr.bf16.mxu1 %v2316_v42 }
  0x9b   : > { %2157 = vmatpush3.bf16.msra.mxu1 %v2313_v41 }
  0x9e   : > { %1014 = vmatmul.mubr.bf16.gmra.mrb[16].mxu0 %v2317_v43  ;;  %2159 = vmatmul.mubr.bf16.vlgmr.msra.gmra.mrb[16].mxu1 %v2318_v44 }
  0x9f   : > { %1021 = vmatprep.mubr.bf16.mxu0 %v2319_v45  ;;  %2162 = vmatprep.mubr.bf16.mxu1 %v2321_v46 }
  0xa6   : > { %1022 = vmatmul.mubr.bf16.gmra.mrb[20].mxu0 %v2322_v47  ;;  %2163 = vmatmul.mubr.bf16.gmra.mrb[20].mxu1 %v2323_v48 }
  0xa7   : > { %1029 = vmatprep.mubr.bf16.mxu0 %v2324_v49  ;;  %2166 = vmatprep.mubr.bf16.mxu1 %v2326_v50 }
  0xae   : > { %1030 = vmatmul.mubr.bf16.gmra.mrb[24].mxu0 %v2327_v51  ;;  %2167 = vmatmul.mubr.bf16.gmra.mrb[24].mxu1 %v2328_v52 }
  0xaf   : > { %1037 = vmatprep.mubr.bf16.mxu0 %v2329_v53  ;;  %2170 = vmatprep.mubr.bf16.mxu1 %v2331_v54 }
  0xb6   : > { %1038 = vmatmul.mubr.bf16.gmra.mrb[28].mxu0 %v2332_v55  ;;  %2171 = vmatmul.mubr.bf16.gmra.mrb[28].mxu1 %v2333_v56 }
  0xb7   : > { %1045 = vmatprep.mubr.bf16.mxu0 %v2334_v57  ;;  %2174 = vmatprep.mubr.bf16.mxu1 %v2336_v58  ;;  %v407_v58 = vld [vmem:[#allocation2 + $0x10] sm:$0xff] }
  0xbe   : > { %1046 = vmatmul.mubr.bf16.gmra.mrb[32].mxu0 %v2337_v59  ;;  %2175 = vmatmul.mubr.bf16.gmra.mrb[32].mxu1 %v2338_v60 }
  0xbf   : > { %1053 = vmatprep.mubr.bf16.mxu0 %v2339_v61  ;;  %2178 = vmatprep.mubr.bf16.mxu1 %v2341_v62  ;;  %v405_v62 = vld [vmem:[#allocation2] sm:$0xff] }
  0xc6   : > { %1054 = vmatmul.mubr.bf16.gmra.mrb[36].mxu0 %v2342_v63  ;;  %2179 = vmatmul.mubr.bf16.gmra.mrb[36].mxu1 %v2343_v0 }
  0xc7   : > { %1061 = vmatprep.mubr.bf16.mxu0 %v2344_v1  ;;  %2182 = vmatprep.mubr.bf16.mxu1 %v2346_v2 }
  0xce   : > { %1062 = vmatmul.mubr.bf16.gmra.mrb[40].mxu0 %v2347_v3  ;;  %2183 = vmatmul.mubr.bf16.gmra.mrb[40].mxu1 %v2348_v4  ;;  %v408_v3 = vld [vmem:[#allocation2 + $0x18] sm:$0xff] }
  0xcf   : > { %1069 = vmatprep.mubr.bf16.mxu0 %v2349_v5  ;;  %2186 = vmatprep.mubr.bf16.mxu1 %v2351_v6 }
  0xd6   : > { %1070 = vmatmul.mubr.bf16.gmra.mrb[44].mxu0 %v2352_v7  ;;  %2187 = vmatmul.mubr.bf16.gmra.mrb[44].mxu1 %v2353_v8  ;;  %v406_v8 = vld [vmem:[#allocation2 + $0x8] sm:$0xff] }
 0x151   : > { %v2022_v9 = vpop.f32.mrb[0].mxu0  ;;  %v2094_v10 = vpop.f32.mrb[0].mxu1 }
 0x152   : > { %v2023_v11 = vpop.f32.mrb[1].mxu0  ;;  %v2095_v12 = vpop.f32.mrb[1].mxu1 }
 0x153   : > { %v2024_v13 = vadd.f32 %v2023_v11, %v2022_v9  ;;  %v2713_v14 = vadd.f32 %v2095_v12, %v2094_v10  ;;  %v2025_v15 = vpop.f32.mrb[2].mxu0  ;;  %v2097_v16 = vpop.f32.mrb[2].mxu1 }
 0x154   : > { %v2026_v17 = vpop.f32.mrb[3].mxu0  ;;  %v2098_v18 = vpop.f32.mrb[3].mxu1 }
 0x155   : > { %v2027_v19 = vadd.f32 %v2026_v17, %v2025_v15  ;;  %v2715_v20 = vadd.f32 %v2098_v18, %v2097_v16  ;;  %v411_v18 = vld [vmem:[#allocation2 + $0x30] sm:$0xff] }
 0x159   : > { %v2028_v21 = vpop.f32.mrb[4].mxu0  ;;  %v2100_v22 = vpop.f32.mrb[4].mxu1 }
 0x15a   : > { %v2029_v23 = vpop.f32.mrb[5].mxu0  ;;  %v2101_v24 = vpop.f32.mrb[5].mxu1 }
 0x15b   : > { %v2030_v25 = vadd.f32 %v2029_v23, %v2028_v21  ;;  %v2717_v26 = vadd.f32 %v2101_v24, %v2100_v22  ;;  %v2031_v27 = vpop.f32.mrb[6].mxu0  ;;  %v2103_v28 = vpop.f32.mrb[6].mxu1  ;;  %v409_v23 = vld [vmem:[#allocation2 + $0x20] sm:$0xff] }
 0x15c   : > { %v2032_v29 = vpop.f32.mrb[7].mxu0  ;;  %v2104_v30 = vpop.f32.mrb[7].mxu1 }
 0x15d   : > { %v2033_v31 = vadd.f32 %v2032_v29, %v2031_v27  ;;  %v2719_v32 = vadd.f32 %v2104_v30, %v2103_v28  ;;  %v412_v29 = vld [vmem:[#allocation2 + $0x38] sm:$0xff] }
 0x161   : > { %v2034_v33 = vpop.f32.mrb[8].mxu0  ;;  %v2106_v34 = vpop.f32.mrb[8].mxu1 }
 0x162   : > { %v2035_v35 = vpop.f32.mrb[9].mxu0  ;;  %v2107_v36 = vpop.f32.mrb[9].mxu1 }
 0x163   : > { %v2036_v37 = vadd.f32 %v2035_v35, %v2034_v33  ;;  %v2721_v38 = vadd.f32 %v2107_v36, %v2106_v34  ;;  %v2037_v39 = vpop.f32.mrb[10].mxu0  ;;  %v2109_v40 = vpop.f32.mrb[10].mxu1  ;;  %v410_v34 = vld [vmem:[#allocation2 + $0x28] sm:$0xff] }
 0x164   : > { %v2038_v41 = vpop.f32.mrb[11].mxu0  ;;  %v2110_v42 = vpop.f32.mrb[11].mxu1 }
 0x165   : > { %v2039_v43 = vadd.f32 %v2038_v41, %v2037_v39  ;;  %v2723_v44 = vadd.f32 %v2110_v42, %v2109_v40 }
 0x169   : > { %v2040_v45 = vpop.f32.mrb[12].mxu0  ;;  %v2112_v46 = vpop.f32.mrb[12].mxu1 }
 0x16a   : > { %v2041_v47 = vpop.f32.mrb[13].mxu0  ;;  %v2113_v48 = vpop.f32.mrb[13].mxu1 }
 0x16b   : > { %v2042_v49 = vadd.f32 %v2041_v47, %v2040_v45  ;;  %v2725_v50 = vadd.f32 %v2113_v48, %v2112_v46  ;;  %v2043_v51 = vpop.f32.mrb[14].mxu0  ;;  %v2115_v52 = vpop.f32.mrb[14].mxu1  ;;  %v415_v46 = vld [vmem:[#allocation2 + $0x50] sm:$0xff] }
 0x16c   : > { %v2044_v53 = vpop.f32.mrb[15].mxu0  ;;  %v2116_v54 = vpop.f32.mrb[15].mxu1 }
 0x16d   : > { %v2045_v55 = vadd.f32 %v2044_v53, %v2043_v51  ;;  %v2727_v56 = vadd.f32 %v2116_v54, %v2115_v52 }
 0x171   : > { %v2046_v57 = vpop.f32.mrb[16].mxu0  ;;  %v2160_v59 = vpop.f32.mrb[16].mxu1 }
 0x172   : > { %v1153_v60 = vadd.f32 %v2160_v59, %v2030_v25  ;;  %v2047_v61 = vpop.f32.mrb[17].mxu0  ;;  %v1144_v63 = vpop.f32.mrb[17].mxu1 }
 0x173   : > { %v2048_v0 = vadd.f32 %v2047_v61, %v2046_v57  ;;  %v1145_v1 = vadd.f32 %v2024_v13, %v1144_v63  ;;  %v2049_v2 = vpop.f32.mrb[18].mxu0  ;;  %v2161_v4 = vpop.f32.mrb[18].mxu1 }
 0x174   : > { %v1273_v5 = vadd.f32 %v1153_v60, %v407_v58  ;;  %v1156_v6 = vadd.f32 %v2161_v4, %v2033_v31  ;;  %v2050_v7 = vpop.f32.mrb[19].mxu0  ;;  %v1147_v9 = vpop.f32.mrb[19].mxu1  ;;  %v414_v60 = vld [vmem:[#allocation2 + $0x48] sm:$0xff] }
 0x175   : > { %v1271_v10 = vadd.f32 %v1145_v1, %v405_v62  ;;  %v2051_v11 = vadd.f32 %v2050_v7, %v2049_v2  ;;  %v1148_v12 = vadd.f32 %v2027_v19, %v1147_v9 }
 0x176   : > { %1305 = vst [vmem:[#allocation2 + $0x10] sm:$0xff] %v1273_v5  ;;  %v1274_v15 = vadd.f32 %v1156_v6, %v408_v3  ;;  %v417_v6 = vld [vmem:[#allocation2 + $0x60] sm:$0xff] }
 0x177   : > { %1303 = vst [vmem:[#allocation2] sm:$0xff] %v1271_v10  ;;  %v1272_v16 = vadd.f32 %v1148_v12, %v406_v8 }
 0x178   : > { %1306 = vst [vmem:[#allocation2 + $0x18] sm:$0xff] %v1274_v15  ;;  %v419_v15 = vld [vmem:[#allocation2 + $0x70] sm:$0xff] }
 0x179   : > { %1304 = vst [vmem:[#allocation2 + $0x8] sm:$0xff] %v1272_v16  ;;  %v2052_v17 = vpop.f32.mrb[20].mxu0  ;;  %v2164_v13 = vpop.f32.mrb[20].mxu1 }
 0x17a   : > { %v1169_v21 = vadd.f32 %v2164_v13, %v2042_v49  ;;  %v2053_v22 = vpop.f32.mrb[21].mxu0  ;;  %v1160_v24 = vpop.f32.mrb[21].mxu1  ;;  %v413_v49 = vld [vmem:[#allocation2 + $0x40] sm:$0xff] }
 0x17b   : > { %v2054_v25 = vadd.f32 %v2053_v22, %v2052_v17  ;;  %v1161_v27 = vadd.f32 %v2036_v37, %v1160_v24  ;;  %v2055_v28 = vpop.f32.mrb[22].mxu0  ;;  %v2165_v30 = vpop.f32.mrb[22].mxu1  ;;  %v418_v17 = vld [vmem:[#allocation2 + $0x68] sm:$0xff] }
 0x17c   : > { %v1277_v31 = vadd.f32 %v1169_v21, %v411_v18  ;;  %v1172_v19 = vadd.f32 %v2165_v30, %v2045_v55  ;;  %v2056_v33 = vpop.f32.mrb[23].mxu0  ;;  %v1163_v35 = vpop.f32.mrb[23].mxu1  ;;  %v416_v55 = vld [vmem:[#allocation2 + $0x58] sm:$0xff] }
 0x17d   : > { %v1275_v36 = vadd.f32 %v1161_v27, %v409_v23  ;;  %v2057_v39 = vadd.f32 %v2056_v33, %v2055_v28  ;;  %v1164_v40 = vadd.f32 %v2039_v43, %v1163_v35  ;;  %v420_v23 = vld [vmem:[#allocation2 + $0x78] sm:$0xff] }
 0x17e   : > { %1309 = vst [vmem:[#allocation2 + $0x30] sm:$0xff] %v1277_v31  ;;  %v1278_v41 = vadd.f32 %v1172_v19, %v412_v29 }
 0x17f   : > { %1307 = vst [vmem:[#allocation2 + $0x20] sm:$0xff] %v1275_v36  ;;  %v1276_v42 = vadd.f32 %v1164_v40, %v410_v34  ;;  %v421_v36 = vld [vmem:[#allocation2 + $0x80] sm:$0xff] }
 0x180   : > { %1310 = vst [vmem:[#allocation2 + $0x38] sm:$0xff] %v1278_v41 }
 0x181   : > { %1308 = vst [vmem:[#allocation2 + $0x28] sm:$0xff] %v1276_v42  ;;  %v2058_v45 = vpop.f32.mrb[24].mxu0  ;;  %v2168_v37 = vpop.f32.mrb[24].mxu1 }
 0x182   : > { %v1185_v47 = vadd.f32 %v2168_v37, %v2054_v25  ;;  %v2059_v48 = vpop.f32.mrb[25].mxu0  ;;  %v1176_v51 = vpop.f32.mrb[25].mxu1 }
 0x183   : > { %v2060_v52 = vadd.f32 %v2059_v48, %v2058_v45  ;;  %v1177_v53 = vadd.f32 %v2048_v0, %v1176_v51  ;;  %v2061_v54 = vpop.f32.mrb[26].mxu0  ;;  %v2169_v57 = vpop.f32.mrb[26].mxu1  ;;  %v422_v45 = vld [vmem:[#allocation2 + $0x88] sm:$0xff] }
 0x184   : > { %v1281_v58 = vadd.f32 %v1185_v47, %v415_v46  ;;  %v1188_v43 = vadd.f32 %v2169_v57, %v2057_v39  ;;  %v2062_v59 = vpop.f32.mrb[27].mxu0  ;;  %v1179_v61 = vpop.f32.mrb[27].mxu1  ;;  %v423_v57 = vld [vmem:[#allocation2 + $0x90] sm:$0xff] }
 0x185   : > { %v1279_v62 = vadd.f32 %v1177_v53, %v413_v49  ;;  %v2063_v63 = vadd.f32 %v2062_v59, %v2061_v54  ;;  %v1180_v1 = vadd.f32 %v2051_v11, %v1179_v61  ;;  %v424_v61 = vld [vmem:[#allocation2 + $0x98] sm:$0xff] }
 0x186   : > { %1313 = vst [vmem:[#allocation2 + $0x50] sm:$0xff] %v1281_v58  ;;  %v1282_v2 = vadd.f32 %v1188_v43, %v416_v55 }
 0x187   : > { %1311 = vst [vmem:[#allocation2 + $0x40] sm:$0xff] %v1279_v62  ;;  %v1280_v3 = vadd.f32 %v1180_v1, %v414_v60 }
 0x188   : > { %1314 = vst [vmem:[#allocation2 + $0x58] sm:$0xff] %v1282_v2 }
 0x189   : > { %1312 = vst [vmem:[#allocation2 + $0x48] sm:$0xff] %v1280_v3  ;;  %v2064_v4 = vpop.f32.mrb[28].mxu0  ;;  %v2172_v5 = vpop.f32.mrb[28].mxu1  ;;  %v431_v3 = vld [vmem:[#allocation2 + $0xd0] sm:$0xff] }
 0x18a   : > { %v2065_v0 = vpop.f32.mrb[29].mxu0  ;;  %v1192_v7 = vpop.f32.mrb[29].mxu1 }
 0x18b   : > { %v2066_v8 = vadd.f32 %v2065_v0, %v2064_v4  ;;  %v1193_v9 = vadd.f32 %v2060_v52, %v1192_v7  ;;  %v2067_v10 = vpop.f32.mrb[30].mxu0  ;;  %v2173_v12 = vpop.f32.mrb[30].mxu1 }
 0x18c   : > { %v2068_v16 = vpop.f32.mrb[31].mxu0  ;;  %v1195_v18 = vpop.f32.mrb[31].mxu1 }
 0x18d   : > { %v1201_v11 = vadd.f32 %v2172_v5, %v2066_v8  ;;  %v1283_v13 = vadd.f32 %v1193_v9, %v417_v6  ;;  %v2069_v21 = vadd.f32 %v2068_v16, %v2067_v10  ;;  %v1196_v22 = vadd.f32 %v2063_v63, %v1195_v18  ;;  %v429_v6 = vld [vmem:[#allocation2 + $0xc0] sm:$0xff] }
 0x18f   : > { %v1285_v24 = vadd.f32 %v1201_v11, %v419_v15  ;;  %1315 = vst [vmem:[#allocation2 + $0x60] sm:$0xff] %v1283_v13  ;;  %v1204_v25 = vadd.f32 %v2173_v12, %v2069_v21  ;;  %v1284_v27 = vadd.f32 %v1196_v22, %v418_v17  ;;  %v432_v12 = vld [vmem:[#allocation2 + $0xd8] sm:$0xff]  ;;  %v425_v17 = vld [vmem:[#allocation2 + $0xa0] sm:$0xff]  ;;  %v430_v13 = vld [vmem:[#allocation2 + $0xc8] sm:$0xff] }
 0x191   : > { %1317 = vst [vmem:[#allocation2 + $0x70] sm:$0xff] %v1285_v24  ;;  %v1286_v28 = vadd.f32 %v1204_v25, %v420_v23  ;;  %1316 = vst [vmem:[#allocation2 + $0x68] sm:$0xff] %v1284_v27  ;;  %v2070_v29 = vpop.f32.mrb[32].mxu0  ;;  %v2176_v30 = vpop.f32.mrb[32].mxu1  ;;  %v426_v27 = vld [vmem:[#allocation2 + $0xa8] sm:$0xff] }
 0x192   : > { %v2071_v31 = vpop.f32.mrb[33].mxu0  ;;  %v1208_v19 = vpop.f32.mrb[33].mxu1 }
 0x193   : > { %1318 = vst [vmem:[#allocation2 + $0x78] sm:$0xff] %v1286_v28  ;;  %v2072_v33 = vadd.f32 %v2071_v31, %v2070_v29  ;;  %v2073_v34 = vpop.f32.mrb[34].mxu0  ;;  %v2177_v35 = vpop.f32.mrb[34].mxu1  ;;  %v435_v31 = vld [vmem:[#allocation2 + $0xf0] sm:$0xff] }
 0x194   : > { %v2074_v39 = vpop.f32.mrb[35].mxu0  ;;  %v1211_v40 = vpop.f32.mrb[35].mxu1 }
 0x195   : > { %v1209_v41 = vadd.f32 %v2072_v33, %v1208_v19  ;;  %v2075_v42 = vadd.f32 %v2074_v39, %v2073_v34 }
 0x197   : > { %v1287_v46 = vadd.f32 %v1209_v41, %v421_v36  ;;  %v1212_v37 = vadd.f32 %v2075_v42, %v1211_v40  ;;  %v436_v41 = vld [vmem:[#allocation2 + $0xf8] sm:$0xff] }
 0x199   : > { %1319 = vst [vmem:[#allocation2 + $0x80] sm:$0xff] %v1287_v46  ;;  %v1288_v47 = vadd.f32 %v1212_v37, %v422_v45  ;;  %v2076_v48 = vpop.f32.mrb[36].mxu0  ;;  %v2729_v49 = vpop.f32.mrb[36].mxu1  ;;  %v427_v46 = vld [vmem:[#allocation2 + $0xb0] sm:$0xff] }
 0x19a   : > { %v2077_v51 = vpop.f32.mrb[37].mxu0  ;;  %v1224_v52 = vpop.f32.mrb[37].mxu1 }
 0x19b   : > { %1320 = vst [vmem:[#allocation2 + $0x88] sm:$0xff] %v1288_v47  ;;  %v2078_v53 = vadd.f32 %v2077_v51, %v2076_v48  ;;  %v2079_v54 = vpop.f32.mrb[38].mxu0  ;;  %v2731_v55 = vpop.f32.mrb[38].mxu1  ;;  %v434_v48 = vld [vmem:[#allocation2 + $0xe8] sm:$0xff] }
 0x19c   : > { %v2080_v58 = vpop.f32.mrb[39].mxu0  ;;  %v1227_v43 = vpop.f32.mrb[39].mxu1 }
 0x19d   : > { %v1217_v59 = vadd.f32 %v2176_v30, %v2078_v53  ;;  %v2081_v60 = vadd.f32 %v2080_v58, %v2079_v54  ;;  %v428_v58 = vld [vmem:[#allocation2 + $0xb8] sm:$0xff] }
 0x19f   : > { %v1289_v62 = vadd.f32 %v1217_v59, %v423_v57  ;;  %v1220_v63 = vadd.f32 %v2177_v35, %v2081_v60  ;;  %v433_v35 = vld [vmem:[#allocation2 + $0xe0] sm:$0xff]  ;;  %v1340_v60 = vld [vmem:[#allocation2 + $0x8] sm:$0xff] (!%p1843_p13) }
 0x1a1   : > { %1321 = vst [vmem:[#allocation2 + $0x90] sm:$0xff] %v1289_v62  ;;  %v1290_v1 = vadd.f32 %v1220_v63, %v424_v61  ;;  %v2082_v2 = vpop.f32.mrb[40].mxu0  ;;  %v2184_v4 = vpop.f32.mrb[40].mxu1  ;;  %v1341_v62 = vld [vmem:[#allocation2 + $0x10] sm:$0xff] (!%p1843_p13)  ;;  %v1342_v63 = vld [vmem:[#allocation2 + $0x18] sm:$0xff] (!%p1843_p13) }
 0x1a2   : > { %v1249_v5 = vadd.f32 %v2184_v4, %v2717_v26  ;;  %v2083_v0 = vpop.f32.mrb[41].mxu0  ;;  %v1240_v7 = vpop.f32.mrb[41].mxu1  ;;  %v1344_v4 = vld [vmem:[#allocation2 + $0x28] sm:$0xff] (!%p1843_p13) }
 0x1a3   : > { %1322 = vst [vmem:[#allocation2 + $0x98] sm:$0xff] %v1290_v1  ;;  %v2084_v8 = vadd.f32 %v2083_v0, %v2082_v2  ;;  %v1241_v9 = vadd.f32 %v2713_v14, %v1240_v7  ;;  %v2085_v10 = vpop.f32.mrb[42].mxu0  ;;  %v2185_v15 = vpop.f32.mrb[42].mxu1  ;;  %v1343_v1 = vld [vmem:[#allocation2 + $0x20] sm:$0xff] (!%p1843_p13)  ;;  %v1345_v0 = vld [vmem:[#allocation2 + $0x30] sm:$0xff] (!%p1843_p13) }
 0x1a4   : > { %v1297_v16 = vadd.f32 %v1249_v5, %v431_v3  ;;  %v1252_v18 = vadd.f32 %v2185_v15, %v2719_v32  ;;  %v2086_v11 = vpop.f32.mrb[43].mxu0  ;;  %v1243_v21 = vpop.f32.mrb[43].mxu1  ;;  %v1348_v15 = vld [vmem:[#allocation2 + $0x48] sm:$0xff] (!%p1843_p13) }
 0x1a5   : > { %v1225_v22 = vadd.f32 %v2084_v8, %v1224_v52  ;;  %v1295_v23 = vadd.f32 %v1241_v9, %v429_v6  ;;  %v2087_v26 = vadd.f32 %v2086_v11, %v2085_v10  ;;  %v1244_v24 = vadd.f32 %v2715_v20, %v1243_v21  ;;  %v1346_v6 = vld [vmem:[#allocation2 + $0x38] sm:$0xff] (!%p1843_p13) }
 0x1a6   : > { %1329 = vst [vmem:[#allocation2 + $0xd0] sm:$0xff] %v1297_v16  ;;  %v1298_v25 = vadd.f32 %v1252_v18, %v432_v12  ;;  %v1347_v12 = vld [vmem:[#allocation2 + $0x40] sm:$0xff] (!%p1843_p13)  ;;  %v1349_v16 = vld [vmem:[#allocation2 + $0x50] sm:$0xff] (!%p1843_p13)  ;;  %v1350_v21 = vld [vmem:[#allocation2 + $0x58] sm:$0xff] (!%p1843_p13) }
 0x1a7   : > { %v1291_v28 = vadd.f32 %v1225_v22, %v425_v17  ;;  %1327 = vst [vmem:[#allocation2 + $0xc0] sm:$0xff] %v1295_v23  ;;  %v1228_v14 = vadd.f32 %v2087_v26, %v1227_v43  ;;  %v1296_v29 = vadd.f32 %v1244_v24, %v430_v13  ;;  %v1351_v22 = vld [vmem:[#allocation2 + $0x60] sm:$0xff] (!%p1843_p13) }
 0x1a8   : > { %1330 = vst [vmem:[#allocation2 + $0xd8] sm:$0xff] %v1298_v25 }
 0x1a9   : > { %1323 = vst [vmem:[#allocation2 + $0xa0] sm:$0xff] %v1291_v28  ;;  %v1292_v30 = vadd.f32 %v1228_v14, %v426_v27  ;;  %1328 = vst [vmem:[#allocation2 + $0xc8] sm:$0xff] %v1296_v29  ;;  %v2088_v32 = vpop.f32.mrb[44].mxu0  ;;  %v2188_v19 = vpop.f32.mrb[44].mxu1  ;;  %v1352_v27 = vld [vmem:[#allocation2 + $0x68] sm:$0xff] (!%p1843_p13) }
 0x1aa   : > { %v1265_v33 = vadd.f32 %v2188_v19, %v2725_v50  ;;  %v2089_v34 = vpop.f32.mrb[45].mxu0  ;;  %v1256_v36 = vpop.f32.mrb[45].mxu1 }
 0x1ab   : > { %1324 = vst [vmem:[#allocation2 + $0xa8] sm:$0xff] %v1292_v30  ;;  %v2090_v20 = vadd.f32 %v2089_v34, %v2088_v32  ;;  %v1257_v39 = vadd.f32 %v2721_v38, %v1256_v36  ;;  %v2091_v40 = vpop.f32.mrb[46].mxu0  ;;  %v2189_v42 = vpop.f32.mrb[46].mxu1  ;;  %v1353_v32 = vld [vmem:[#allocation2 + $0x70] sm:$0xff] (!%p1843_p13)  ;;  %v1355_v36 = vld [vmem:[#allocation2 + $0x80] sm:$0xff] (!%p1843_p13) }
 0x1ac   : > { %v1301_v45 = vadd.f32 %v1265_v33, %v435_v31  ;;  %v1268_v37 = vadd.f32 %v2189_v42, %v2727_v56  ;;  %v2092_v47 = vpop.f32.mrb[47].mxu0  ;;  %v1259_v51 = vpop.f32.mrb[47].mxu1  ;;  %v1354_v31 = vld [vmem:[#allocation2 + $0x78] sm:$0xff] (!%p1843_p13) }
 0x1ad   : > { %v1233_v52 = vadd.f32 %v2729_v49, %v2090_v20  ;;  %v1299_v50 = vadd.f32 %v1257_v39, %v433_v35  ;;  %v2093_v53 = vadd.f32 %v2092_v47, %v2091_v40  ;;  %v1260_v54 = vadd.f32 %v2723_v44, %v1259_v51  ;;  %1338 = sbr.rel (%p1843_p13) target bundleno = 456 (0x1c8), region = 66  ;;  %v1339_v49 = vld [vmem:[#allocation2] sm:$0xff] (!%p1843_p13)  ;;  %v1356_v20 = vld [vmem:[#allocation2 + $0x88] sm:$0xff] (!%p1843_p13)  ;;  %v1358_v51 = vld [vmem:[#allocation2 + $0x98] sm:$0xff] (!%p1843_p13) }
 0x1ae   : > { %1333 = vst [vmem:[#allocation2 + $0xf0] sm:$0xff] %v1301_v45  ;;  %v1302_v57 = vadd.f32 %v1268_v37, %v436_v41  ;;  %v2747_v44 = vld [vmem:[%s2820_s2] ss:$0 sm:$0xff] (!%p1843_p13)  ;;  %v1357_v45 = vld [vmem:[#allocation2 + $0x90] sm:$0xff] (!%p1843_p13) }
 0x1af   : > { %v1293_v38 = vadd.f32 %v1233_v52, %v427_v46  ;;  %1331 = vst [vmem:[#allocation2 + $0xe0] sm:$0xff] %v1299_v50  ;;  %v1236_v43 = vadd.f32 %v2731_v55, %v2093_v53  ;;  %v1300_v59 = vadd.f32 %v1260_v54, %v434_v48  ;;  %v1378_v61 = vadd.f32 (!%p1843_p13), %v2747_v44, %v1339_v49 }
 0x1b0   : > { %1334 = vst [vmem:[#allocation2 + $0xf8] sm:$0xff] %v1302_v57  ;;  %v1379_v55 = vadd.f32 (!%p1843_p13), %v2747_v44, %v1340_v60  ;;  %v1380_v2 = vadd.f32 (!%p1843_p13), %v2747_v44, %v1341_v62  ;;  %v1381_v3 = vadd.f32 (!%p1843_p13), %v2747_v44, %v1342_v63  ;;  %v1382_v5 = vadd.f32 (!%p1843_p13), %v2747_v44, %v1343_v1  ;;  %v1359_v57 = vld [vmem:[#allocation2 + $0xa0] sm:$0xff] (!%p1843_p13) }
 0x1b1   : > { %1325 = vst [vmem:[#allocation2 + $0xb0] sm:$0xff] %v1293_v38  ;;  %v1294_v56 = vadd.f32 %v1236_v43, %v428_v58  ;;  %1332 = vst [vmem:[#allocation2 + $0xe8] sm:$0xff] %v1300_v59  ;;  %v1410_v7 = vmax.f32 (!%p1843_p13), %v1378_v61, 0.0  ;;  %v1383_v9 = vadd.f32 (!%p1843_p13), %v2747_v44, %v1344_v4  ;;  %v1384_v10 = vadd.f32 (!%p1843_p13), %v2747_v44, %v1345_v0  ;;  %v1363_v1 = vld [vmem:[#allocation2 + $0xc0] sm:$0xff] (!%p1843_p13) }
 0x1b2   : > { %v1411_v8 = vmax.f32 (!%p1843_p13), %v1379_v55, 0.0  ;;  %v1412_v17 = vmax.f32 (!%p1843_p13), %v1380_v2, 0.0  ;;  %v1413_v18 = vmax.f32 (!%p1843_p13), %v1381_v3, 0.0  ;;  %v1414_v11 = vmax.f32 (!%p1843_p13), %v1382_v5, 0.0  ;;  %v1360_v58 = vld [vmem:[#allocation2 + $0xa8] sm:$0xff] (!%p1843_p13) }
 0x1b3   : > { %1326 = vst [vmem:[#allocation2 + $0xb8] sm:$0xff] %v1294_v56  ;;  %v1385_v13 = vadd.f32 (!%p1843_p13), %v2747_v44, %v1346_v6  ;;  %v1415_v26 = vmax.f32 (!%p1843_p13), %v1383_v9, 0.0  ;;  %v1416_v24 = vmax.f32 (!%p1843_p13), %v1384_v10, 0.0  ;;  %v1386_v25 = vadd.f32 (!%p1843_p13), %v2747_v44, %v1347_v12  ;;  %v1364_v2 = vld [vmem:[#allocation2 + $0xc8] sm:$0xff] (!%p1843_p13)  ;;  %v1365_v6 = vld [vmem:[#allocation2 + $0xd0] sm:$0xff] (!%p1843_p13)  ;;  %v1366_v12 = vld [vmem:[#allocation2 + $0xd8] sm:$0xff] (!%p1843_p13) }
 0x1b4   : > { %v1914_v23 = vpack.c.bf16 %v1411_v8, %v1410_v7  ;;  %v1919_v28 = vpack.c.bf16 %v1413_v18, %v1412_v17  ;;  %v1387_v29 = vadd.f32 %v2747_v44, %v1348_v15  ;;  %v1388_v30 = vadd.f32 %v2747_v44, %v1349_v16 }
 0x1b5   : > { %v1417_v14 = vmax.f32 %v1385_v13, 0.0  ;;  %v1924_v19 = vpack.c.bf16 %v1415_v26, %v1414_v11  ;;  %v1418_v33 = vmax.f32 %v1386_v25, 0.0  ;;  %v1389_v34 = vadd.f32 %v2747_v44, %v1350_v21 }
 0x1b6   : > { %1915 = vst [vmem:[%s2636_s30] sm:$0xff] %v1914_v23   ;;  %v1390_v35 = vadd.f32 %v2747_v44, %v1351_v22  ;;  %1991 = vst [vmem:[%s2636_s30 + $0x8] sm:$0xff] %v1919_v28   ;;  %v1419_v40 = vmax.f32 %v1387_v29, 0.0  ;;  %v1420_v41 = vmax.f32 %v1388_v30, 0.0  ;;  %v1391_v42 = vadd.f32 %v2747_v44, %v1352_v27  ;;  %v1367_v11 = vld [vmem:[#allocation2 + $0xe0] sm:$0xff] }
 0x1b7   : > { %v1929_v39 = vpack.c.bf16 %v1417_v14, %v1416_v24  ;;  %1992 = vst [vmem:[%s2636_s30 + $0x10] sm:$0xff] %v1924_v19   ;;  %v1421_v46 = vmax.f32 %v1389_v34, 0.0  ;;  %v1392_v47 = vadd.f32 %v2747_v44, %v1353_v32  ;;  %v1393_v48 = vadd.f32 %v2747_v44, %v1354_v31  ;;  %v1369_v24 = vld [vmem:[#allocation2 + $0xf0] sm:$0xff]  ;;  %v1370_v25 = vld [vmem:[#allocation2 + $0xf8] sm:$0xff] }
 0x1b8   : > { %v1422_v37 = vmax.f32 %v1390_v35, 0.0  ;;  %v1934_v52 = vpack.c.bf16 %v1419_v40, %v1418_v33  ;;  %v1423_v50 = vmax.f32 %v1391_v42, 0.0  ;;  %v1394_v53 = vadd.f32 %v2747_v44, %v1355_v36  ;;  %v1361_v49 = vld [vmem:[#allocation2 + $0xb0] sm:$0xff]  ;;  %v1368_v13 = vld [vmem:[#allocation2 + $0xe8] sm:$0xff] }
 0x1b9   : > { %1993 = vst [vmem:[%s2636_s30 + $0x18] sm:$0xff] %v1929_v39   ;;  %v1395_v54 = vadd.f32 %v2747_v44, %v1356_v20  ;;  %v1939_v38 = vpack.c.bf16 %v1421_v46, %v1420_v41  ;;  %v1424_v43 = vmax.f32 %v1392_v47, 0.0  ;;  %v1425_v59 = vmax.f32 %v1393_v48, 0.0 }
 0x1ba   : > { %v1396_v56 = vadd.f32 %v2747_v44, %v1357_v45  ;;  %v1362_v60 = vld [vmem:[#allocation2 + $0xb8] sm:$0xff]  ;;  %1994 = vst [vmem:[%s2636_s30 + $0x20] sm:$0xff] %v1934_v52   ;;  %v1944_v61 = vpack.c.bf16 %v1423_v50, %v1422_v37  ;;  %v1426_v55 = vmax.f32 %v1394_v53, 0.0  ;;  %v1397_v63 = vadd.f32 %v2747_v44, %v1358_v51 }
 0x1bb   : > { %v1427_v62 = vmax.f32 %v1395_v54, 0.0  ;;  %1995 = vst [vmem:[%s2636_s30 + $0x28] sm:$0xff] %v1939_v38   ;;  %v1949_v3 = vpack.c.bf16 %v1425_v59, %v1424_v43  ;;  %v1398_v5 = vadd.f32 %v2747_v44, %v1359_v57  ;;  %v1399_v0 = vadd.f32 %v2747_v44, %v1360_v58 }
 0x1bc   : > { %v1428_v4 = vmax.f32 %v1396_v56, 0.0  ;;  %1996 = vst [vmem:[%s2636_s30 + $0x30] sm:$0xff] %v1944_v61   ;;  %v1429_v8 = vmax.f32 %v1397_v63, 0.0  ;;  %v1400_v9 = vadd.f32 %v2747_v44, %v1361_v49  ;;  %v1401_v10 = vadd.f32 %v2747_v44, %v1362_v60 }
 0x1bd   : > { %v1954_v7 = vpack.c.bf16 %v1427_v62, %v1426_v55  ;;  %1997 = vst [vmem:[%s2636_s30 + $0x38] sm:$0xff] %v1949_v3   ;;  %v1430_v15 = vmax.f32 %v1398_v5, 0.0  ;;  %v1431_v16 = vmax.f32 %v1399_v0, 0.0  ;;  %v1402_v17 = vadd.f32 %v2747_v44, %v1363_v1 }
 0x1be   : > { %v1403_v18 = vadd.f32 %v2747_v44, %v1364_v2  ;;  %v1959_v21 = vpack.c.bf16 %v1429_v8, %v1428_v4  ;;  %v1432_v22 = vmax.f32 %v1400_v9, 0.0  ;;  %v1433_v23 = vmax.f32 %v1401_v10, 0.0 }
 0x1bf   : > { %1998 = vst [vmem:[%s2636_s30 + $0x40] sm:$0xff] %v1954_v7   ;;  %v1404_v26 = vadd.f32 %v2747_v44, %v1365_v6  ;;  %v1964_v27 = vpack.c.bf16 %v1431_v16, %v1430_v15  ;;  %v1434_v28 = vmax.f32 %v1402_v17, 0.0  ;;  %v1405_v29 = vadd.f32 %v2747_v44, %v1366_v12 }
 0x1c0   : > { %v1435_v14 = vmax.f32 %v1403_v18, 0.0  ;;  %1999 = vst [vmem:[%s2636_s30 + $0x48] sm:$0xff] %v1959_v21   ;;  %v1969_v30 = vpack.c.bf16 %v1433_v23, %v1432_v22  ;;  %v1406_v31 = vadd.f32 %v2747_v44, %v1367_v11  ;;  %v1407_v19 = vadd.f32 %v2747_v44, %v1368_v13 }
 0x1c1   : > { %v1436_v32 = vmax.f32 %v1404_v26, 0.0  ;;  %2000 = vst [vmem:[%s2636_s30 + $0x50] sm:$0xff] %v1964_v27   ;;  %v1437_v34 = vmax.f32 %v1405_v29, 0.0  ;;  %v1408_v35 = vadd.f32 %v2747_v44, %v1369_v24  ;;  %v1409_v36 = vadd.f32 %v2747_v44, %v1370_v25 }
 0x1c2   : > { %v1974_v33 = vpack.c.bf16 %v1435_v14, %v1434_v28  ;;  %2001 = vst [vmem:[%s2636_s30 + $0x58] sm:$0xff] %v1969_v30   ;;  %v1438_v20 = vmax.f32 %v1406_v31, 0.0  ;;  %v1439_v39 = vmax.f32 %v1407_v19, 0.0 }
 0x1c3   : > { %v1979_v40 = vpack.c.bf16 %v1437_v34, %v1436_v32  ;;  %v1440_v41 = vmax.f32 %v1408_v35, 0.0  ;;  %v1441_v42 = vmax.f32 %v1409_v36, 0.0 }
 0x1c4   : > { %2002 = vst [vmem:[%s2636_s30 + $0x60] sm:$0xff] %v1974_v33   ;;  %v1984_v45 = vpack.c.bf16 %v1439_v39, %v1438_v20 }
 0x1c5   : > { %2003 = vst [vmem:[%s2636_s30 + $0x68] sm:$0xff] %v1979_v40   ;;  %v1989_v46 = vpack.c.bf16 %v1441_v42, %v1440_v41 }
 0x1c6   : > { %2004 = vst [vmem:[%s2636_s30 + $0x70] sm:$0xff] %v1984_v45  }
 0x1c7   : > { %2005 = vst [vmem:[%s2636_s30 + $0x78] sm:$0xff] %v1989_v46  }
 0x1c8 PF: > { %s13_s18 = sadd.s32 1, %s2408_s18   ;;  %s2822_s12 = smov %s2388_s13 }
 0x1c9   : > { %p10_p0 = scmp.ge.s32.totalorder %s13_s18, 8   ;;  %s2823_s13 = smov %s2482_s25 }
 0x1ca   : > { %s2824_s14 = smov %s2400_s16  ;;  %s2825_s15 = smov %s2404_s17 }
 0x1cb   : > { %s2826_s16 = smov %s2829_s19  ;;  %s2827_s17 = smov %s2833_s20 }
 0x1cc   :  { %12 = sbr.rel (!%p10_p0) target bundleno = 4 (0x4), region = 110 }

// kernel: unet_forward.12
= control target key start
LH: loop header
LB: loop body
LE: loop exit
PB: predicated region body
PF: predicated region fallthrough
CT: control target
= control target key end

     0   :  { %s1590_s12 = smov 0   ;;  %s1592_s13 = smov 0   ;;  %s1804_s0 = inlined_call_operand.vmem [shape: bf16[128,1152], index: 0, kind: input, shape index: {}]   ;;  %s1805_s1 = inlined_call_operand.vmem [shape: bf16[1152,128], index: 1, kind: input, shape index: {}]   ;;  %s1806_s2 = inlined_call_operand.vmem [shape: f32[1,128], index: 2, kind: input, shape index: {}]   ;;  %s1807_s3 = inlined_call_operand.vmem [shape: bf16[128,128], index: 3, kind: output, shape index: {}]  }
   0x1   :  { %s1594_s14 = smov 0   ;;  %s1596_s15 = smov 0  }
   0x2   :  { %s1598_s16 = smov 0  }
   0x3 LB: > { %s22_s17 = sadd.s32 1, %s1563_s15  ;;  %p41_p1 = scmp.ne.s32.totalorder %s1555_s13, %s1551_s12  ;;  %s1567_s16 = sphi %s1598_s16, %s13_s16   ;;  %s1563_s15 = sphi %s1596_s15, %s1811_s15   ;;  %s1559_s14 = sphi %s1594_s14, %s1810_s14   ;;  %s1555_s13 = sphi %s1592_s13, %s1809_s13   ;;  %s1551_s12 = sphi %s1590_s12, %s1808_s12  }
   0x4   : > { %p23_p0 = scmp.ge.s32.totalorder %s22_s17, 3  ;;  %p42_p2 = scmp.eq.s32.totalorder %s1567_s16, 0 }
   0x5   : > { %s34_s19 = sadd.s32 1, %s1555_s13  ;;  %p1147_p5 = scmp.ge.s32.totalorder %s1567_s16, 3 }
   0x6   : > { %s1813_s17 = smov (%p23_p0, %s22_s17), 0  ;;  %p43_p3 = por %p42_p2, %p41_p1 }
   0x7   : > { %s30_s18 = ssub.s32 %s1563_s15, %s1813_s17  ;;  %143 = sbr.rel (%p1147_p5) target bundleno = 37 (0x25), region = 20 }
   0x8   : > { %p32_p4 = scmp.eq.s32.totalorder %s30_s18, 0 }
   0xa   : > { %s1625_s20 = scalar_select %p32_p4, %s1555_s13, %s34_s19  }
   0xe   : > { %146 = sbr.rel (!%p43_p3) target bundleno = 37 (0x25), region = 24  ;;  %s148_s21 = sand.u32 (%p43_p3), 1, %s1555_s13  }
   0xf   : > { %s1254_s22 = smul.u32 (%p43_p3), 12, %s1563_s15 }
  0x10   : > { %s1430_s23 = smul.u32 (%p43_p3), 192, %s148_s21 }
  0x11   : > { %s1633_s26 = scalar_lea.vmem (%p43_p3), %s1804_s0, %s1254_s22 }
  0x12   : > { %v171_v0 = vld [vmem:[%s1633_s26] sm:$0xff] (%p43_p3)  ;;  %v175_v2 = vld [vmem:[%s1633_s26 + $0x48] sm:$0xff] (%p43_p3)  ;;  %s1638_s27 = scalar_lea.vmem (%p43_p3), [#allocation3], %s1430_s23  ;;  %v179_v4 = vld [vmem:[%s1633_s26 + $0x90] sm:$0xff] (%p43_p3) }
  0x13   : > { %v173_v1 = vld [vmem:[%s1633_s26 + $0x24] sm:$0xff] (%p43_p3)  ;;  %172 = vst [vmem:[%s1638_s27] sm:$0xff] (%p43_p3), %v171_v0  ;;  %176 = vst [vmem:[%s1638_s27 + $0x18] sm:$0xff] (%p43_p3), %v175_v2  ;;  %v177_v3 = vld [vmem:[%s1633_s26 + $0x6c] sm:$0xff] (%p43_p3) }
  0x14   : > { %174 = vst [vmem:[%s1638_s27 + $0xc] sm:$0xff] (%p43_p3), %v173_v1  ;;  %v181_v5 = vld [vmem:[%s1633_s26 + $0xb4] sm:$0xff] (%p43_p3)  ;;  %178 = vst [vmem:[%s1638_s27 + $0x24] sm:$0xff] (%p43_p3), %v177_v3  ;;  %v185_v7 = vld [vmem:[%s1633_s26 + $0xfc] sm:$0xff] (%p43_p3) }
  0x15   : > { %180 = vst [vmem:[%s1638_s27 + $0x30] sm:$0xff] %v179_v4  ;;  %182 = vst [vmem:[%s1638_s27 + $0x3c] sm:$0xff] %v181_v5  ;;  %v183_v6 = vld [vmem:[%s1633_s26 + $0xd8] sm:$0xff]  ;;  %v187_v8 = vld [vmem:[%s1633_s26 + $0x120] sm:$0xff] }
  0x16   : > { %184 = vst [vmem:[%s1638_s27 + $0x48] sm:$0xff] %v183_v6  ;;  %186 = vst [vmem:[%s1638_s27 + $0x54] sm:$0xff] %v185_v7  ;;  %v189_v9 = vld [vmem:[%s1633_s26 + $0x144] sm:$0xff]  ;;  %v193_v11 = vld [vmem:[%s1633_s26 + $0x18c] sm:$0xff] }
  0x17   : > { %188 = vst [vmem:[%s1638_s27 + $0x60] sm:$0xff] %v187_v8  ;;  %v191_v10 = vld [vmem:[%s1633_s26 + $0x168] sm:$0xff]  ;;  %190 = vst [vmem:[%s1638_s27 + $0x6c] sm:$0xff] %v189_v9  ;;  %v195_v12 = vld [vmem:[%s1633_s26 + $0x1b0] sm:$0xff] }
  0x18   : > { %192 = vst [vmem:[%s1638_s27 + $0x78] sm:$0xff] %v191_v10  ;;  %194 = vst [vmem:[%s1638_s27 + $0x84] sm:$0xff] %v193_v11  ;;  %v197_v13 = vld [vmem:[%s1633_s26 + $0x1d4] sm:$0xff]  ;;  %v201_v15 = vld [vmem:[%s1633_s26 + $0x21c] sm:$0xff] }
  0x19   : > { %v199_v14 = vld [vmem:[%s1633_s26 + $0x1f8] sm:$0xff]  ;;  %196 = vst [vmem:[%s1638_s27 + $0x90] sm:$0xff] %v195_v12  ;;  %198 = vst [vmem:[%s1638_s27 + $0x9c] sm:$0xff] %v197_v13  ;;  %v1149_v16 = vld [vmem:[%s1633_s26 + $0x8] sm:$0xf] }
  0x1a   : > { %200 = vst [vmem:[%s1638_s27 + $0xa8] sm:$0xff] %v199_v14  ;;  %v1151_v17 = vld [vmem:[%s1633_s26 + $0x2c] sm:$0xf]  ;;  %202 = vst [vmem:[%s1638_s27 + $0xb4] sm:$0xff] %v201_v15  ;;  %v1153_v18 = vld [vmem:[%s1633_s26 + $0x50] sm:$0xf] }
  0x1b   : > { %1150 = vst [vmem:[%s1638_s27 + $0x8] sm:$0xf] %v1149_v16  ;;  %1152 = vst [vmem:[%s1638_s27 + $0x14] sm:$0xf] %v1151_v17  ;;  %v1155_v19 = vld [vmem:[%s1633_s26 + $0x74] sm:$0xf] }
  0x1c   : > { %v1157_v20 = vld [vmem:[%s1633_s26 + $0x98] sm:$0xf]  ;;  %1154 = vst [vmem:[%s1638_s27 + $0x20] sm:$0xf] %v1153_v18  ;;  %1156 = vst [vmem:[%s1638_s27 + $0x2c] sm:$0xf] %v1155_v19 }
  0x1d   : > { %1158 = vst [vmem:[%s1638_s27 + $0x38] sm:$0xf] %v1157_v20  ;;  %v1159_v21 = vld [vmem:[%s1633_s26 + $0xbc] sm:$0xf]  ;;  %v1161_v22 = vld [vmem:[%s1633_s26 + $0xe0] sm:$0xf] }
  0x1e   : > { %v1163_v23 = vld [vmem:[%s1633_s26 + $0x104] sm:$0xf]  ;;  %1160 = vst [vmem:[%s1638_s27 + $0x44] sm:$0xf] %v1159_v21  ;;  %1162 = vst [vmem:[%s1638_s27 + $0x50] sm:$0xf] %v1161_v22 }
  0x1f   : > { %1164 = vst [vmem:[%s1638_s27 + $0x5c] sm:$0xf] %v1163_v23  ;;  %v1165_v24 = vld [vmem:[%s1633_s26 + $0x128] sm:$0xf]  ;;  %v1167_v25 = vld [vmem:[%s1633_s26 + $0x14c] sm:$0xf] }
  0x20   : > { %v1169_v26 = vld [vmem:[%s1633_s26 + $0x170] sm:$0xf]  ;;  %1166 = vst [vmem:[%s1638_s27 + $0x68] sm:$0xf] %v1165_v24  ;;  %1168 = vst [vmem:[%s1638_s27 + $0x74] sm:$0xf] %v1167_v25 }
  0x21   : > { %1170 = vst [vmem:[%s1638_s27 + $0x80] sm:$0xf] %v1169_v26  ;;  %v1171_v27 = vld [vmem:[%s1633_s26 + $0x194] sm:$0xf]  ;;  %v1173_v28 = vld [vmem:[%s1633_s26 + $0x1b8] sm:$0xf] }
  0x22   : > { %v1175_v29 = vld [vmem:[%s1633_s26 + $0x1dc] sm:$0xf]  ;;  %1172 = vst [vmem:[%s1638_s27 + $0x8c] sm:$0xf] %v1171_v27  ;;  %1174 = vst [vmem:[%s1638_s27 + $0x98] sm:$0xf] %v1173_v28 }
  0x23   : > { %1176 = vst [vmem:[%s1638_s27 + $0xa4] sm:$0xf] %v1175_v29  ;;  %v1177_v30 = vld [vmem:[%s1633_s26 + $0x200] sm:$0xf]  ;;  %v1179_v31 = vld [vmem:[%s1633_s26 + $0x224] sm:$0xf] }
  0x24   : > { %1178 = vst [vmem:[%s1638_s27 + $0xb0] sm:$0xf] %v1177_v30  ;;  %1180 = vst [vmem:[%s1638_s27 + $0xbc] sm:$0xf] %v1179_v31 }
  0x25 PF: > { %p1181_p6 = scmp.ge.s32.totalorder %s1567_s16, 1  ;;  %p255_p7 = scmp.lt.s32.totalorder %s1567_s16, 4 }
  0x27   : > { %p256_p8 = pnand %p1181_p6, %p255_p7 }
  0x28   : > { %s262_s28 = sand.u32 (!%p256_p8), 1, %s1551_s12   ;;  %s292_s29 = smul.u32 (!%p256_p8), 48, %s1559_s14 }
  0x29   : > { %259 = sbr.rel (%p256_p8) target bundleno = 383 (0x17f), region = 54  ;;  %p1183_p10 = scmp.ne.s32.totalorder (!%p256_p8), %s1559_s14, 0 }
  0x2a   : > { %s1431_s30 = smul.u32 (!%p256_p8), 192, %s262_s28  ;;  %p293_p9 = scmp.lt.s32.totalorder (!%p256_p8), %s292_s29, 143 }
  0x2c   : > { %s1710_s8 = scalar_lea.vmem (!%p256_p8), [#allocation3], %s1431_s30 }
  0x30   : > { %s1815_s29 = smov (!%p293_p9, %s292_s29), 143  ;;  %308 = sbr.rel (%p1183_p10) target bundleno = 58 (0x3a), region = 62 }
  0x31   : > { %s1182_s4 = sshll.u32 %s1815_s29, 2  ;;  %v1569_v32 = vmov (!%p1183_p10), 0.0  }
  0x32   : > { %s1708_s7 = scalar_lea.vmem %s1805_s1, %s1182_s4  ;;  %309 = vst [vmem:[#allocation2] sm:$0xff] (!%p1183_p10), %v1569_v32  ;;  %310 = vst [vmem:[#allocation2 + $0x8] sm:$0xff] (!%p1183_p10), %v1569_v32 }
  0x33   : > { %311 = vst [vmem:[#allocation2 + $0x10] sm:$0xff] (!%p1183_p10), %v1569_v32  ;;  %312 = vst [vmem:[#allocation2 + $0x18] sm:$0xff] (!%p1183_p10), %v1569_v32 }
  0x34   : > { %313 = vst [vmem:[#allocation2 + $0x20] sm:$0xff] (!%p1183_p10), %v1569_v32  ;;  %314 = vst [vmem:[#allocation2 + $0x28] sm:$0xff] (!%p1183_p10), %v1569_v32 }
  0x35   : > { %315 = vst [vmem:[#allocation2 + $0x30] sm:$0xff] (!%p1183_p10), %v1569_v32  ;;  %316 = vst [vmem:[#allocation2 + $0x38] sm:$0xff] (!%p1183_p10), %v1569_v32 }
  0x36   : > { %317 = vst [vmem:[#allocation2 + $0x40] sm:$0xff] (!%p1183_p10), %v1569_v32  ;;  %318 = vst [vmem:[#allocation2 + $0x48] sm:$0xff] (!%p1183_p10), %v1569_v32 }
  0x37   : > { %319 = vst [vmem:[#allocation2 + $0x50] sm:$0xff] %v1569_v32  ;;  %320 = vst [vmem:[#allocation2 + $0x58] sm:$0xff] %v1569_v32 }
  0x38   : > { %321 = vst [vmem:[#allocation2 + $0x60] sm:$0xff] %v1569_v32  ;;  %322 = vst [vmem:[#allocation2 + $0x68] sm:$0xff] %v1569_v32 }
  0x39   : > { %323 = vst [vmem:[#allocation2 + $0x70] sm:$0xff] %v1569_v32  ;;  %324 = vst [vmem:[#allocation2 + $0x78] sm:$0xff] %v1569_v32 }
  0x3a PF: > { %v1473_v33 = vld [vmem:[%s1708_s7 + $0x40] sm:$0xff]   ;;  %v1476_v36 = vld [vmem:[%s1708_s7 + $0x48] sm:$0xff]   ;;  %v1479_v39 = vld [vmem:[%s1708_s7 + $0x50] sm:$0xff]   ;;  %p1232_p11 = scmp.ne.s32.totalorder %s1559_s14, 2 }
  0x3b   : > { %v1474_v34 = vld [vmem:[%s1708_s7] sm:$0xff]   ;;  %1318 = vmatprep.subr.bf16.mxu0 %v1473_v33  ;;  %v1477_v37 = vld [vmem:[%s1708_s7 + $0x8] sm:$0xff]   ;;  %v1480_v40 = vld [vmem:[%s1708_s7 + $0x10] sm:$0xff]  }
  0x3c   : > { %v1475_v35 = vld [vmem:[%s1708_s7 + $0x80] sm:$0xff]   ;;  %1319 = vmatpush3.bf16.msra.mxu0 %v1474_v34  ;;  %v1478_v38 = vld [vmem:[%s1708_s7 + $0x88] sm:$0xff]   ;;  %v1481_v41 = vld [vmem:[%s1708_s7 + $0x90] sm:$0xff]  }
  0x3d   : > { %1398 = vmatprep.subr.bf16.mxu1 %v1475_v35  ;;  %1320 = vmatprep.subr.bf16.mxu0 %v1476_v36  ;;  %v1482_v42 = vld [vmem:[%s1708_s7 + $0x58] sm:$0xff]   ;;  %v1485_v45 = vld [vmem:[%s1708_s7 + $0x60] sm:$0xff]   ;;  %v1488_v48 = vld [vmem:[%s1708_s7 + $0x68] sm:$0xff]  }
  0x3e   : > { %1399 = vmatpush3.bf16.msra.mxu1 %v1475_v35  ;;  %v1483_v43 = vld [vmem:[%s1708_s7 + $0x18] sm:$0xff]   ;;  %v1487_v46 = vld [vmem:[%s1708_s7 + $0xa0] sm:$0xff]   ;;  %v1490_v49 = vld [vmem:[%s1708_s7 + $0xa8] sm:$0xff]  }
  0x3f   : > { %1400 = vmatprep.subr.bf16.mxu1 %v1478_v38  ;;  %v1484_v44 = vld [vmem:[%s1708_s7 + $0x98] sm:$0xff]   ;;  %v1486_v47 = vld [vmem:[%s1708_s7 + $0x20] sm:$0xff]   ;;  %v1489_v50 = vld [vmem:[%s1708_s7 + $0x28] sm:$0xff]  }
  0x40   : > { %1321 = vmatpush3.bf16.msra.mxu0 %v1477_v37  ;;  %v1491_v51 = vld [vmem:[%s1708_s7 + $0x70] sm:$0xff]   ;;  %v1494_v54 = vld [vmem:[%s1708_s7 + $0x78] sm:$0xff]   ;;  %v1497_v59 = vld [vmem:[%s1710_s8] ss:$12 sps:$4 sm:$0xff]  }
  0x41   : > { %1322 = vmatprep.subr.bf16.mxu0 %v1479_v39  ;;  %v1492_v52 = vld [vmem:[%s1708_s7 + $0x30] sm:$0xff]   ;;  %v1496_v55 = vld [vmem:[%s1708_s7 + $0xb8] sm:$0xff]   ;;  %v1501_v61 = vld [vmem:[%s1710_s8 + $0x20] ss:$12 sps:$4 sm:$0xff]  }
  0x42   : > { %1401 = vmatpush3.bf16.msra.mxu1 %v1478_v38  ;;  %v1493_v53 = vld [vmem:[%s1708_s7 + $0xb0] sm:$0xff]   ;;  %v1495_v58 = vld [vmem:[%s1708_s7 + $0x38] sm:$0xff]   ;;  %v1517_v5 = vld [vmem:[%s1710_s8 + $0x80] ss:$12 sps:$4 sm:$0xff]  }
  0x43   : > { %1402 = vmatprep.subr.bf16.mxu1 %v1481_v41  ;;  %v1499_v56 = vld [vmem:[%s1710_s8 + $0x4] ss:$12 sps:$4 sm:$0xff]   ;;  %v1500_v57 = vld [vmem:[%s1710_s8 + $0x8] ss:$12 sps:$4 sm:$0xff]   ;;  %v1510_v4 = vld [vmem:[%s1710_s8 + $0x4c] ss:$12 sps:$4 sm:$0xff]  }
  0x44   : > { %1323 = vmatpush3.bf16.msra.mxu0 %v1480_v40  ;;  %725 = vmatprep.mubr.bf16.mxu0 %v1499_v56  ;;  %v1502_v60 = vld [vmem:[%s1710_s8 + $0x1c] ss:$12 sps:$4 sm:$0xff]   ;;  %v1508_v62 = vld [vmem:[%s1710_s8 + $0x38] ss:$12 sps:$4 sm:$0xff]   ;;  %v1505_v0 = vld [vmem:[%s1710_s8 + $0x34] ss:$12 sps:$4 sm:$0xff]  }
  0x45   : > { %1324 = vmatprep.subr.bf16.mxu0 %v1482_v42  ;;  %1414 = vmatprep.mubr.bf16.mxu1 %v1500_v57  ;;  %v1504_v63 = vld [vmem:[%s1710_s8 + $0x18] ss:$12 sps:$4 sm:$0xff]   ;;  %v1509_v1 = vld [vmem:[%s1710_s8 + $0x50] ss:$12 sps:$4 sm:$0xff]   ;;  %v1516_v2 = vld [vmem:[%s1710_s8 + $0x68] ss:$12 sps:$4 sm:$0xff]  }
  0x46   : > { %1403 = vmatpush3.bf16.msra.mxu1 %v1481_v41  ;;  %v1507_v3 = vld [vmem:[%s1710_s8 + $0x30] ss:$12 sps:$4 sm:$0xff]   ;;  %v1524_v6 = vld [vmem:[%s1710_s8 + $0x98] ss:$12 sps:$4 sm:$0xff]   ;;  %v1512_v7 = vld [vmem:[%s1710_s8 + $0x48] ss:$12 sps:$4 sm:$0xff]  }
  0x47   : > { %1404 = vmatprep.subr.bf16.mxu1 %v1484_v44  ;;  %v1513_v8 = vld [vmem:[%s1710_s8 + $0x64] ss:$12 sps:$4 sm:$0xff]   ;;  %v1515_v10 = vld [vmem:[%s1710_s8 + $0x60] ss:$12 sps:$4 sm:$0xff]   ;;  %v1518_v11 = vld [vmem:[%s1710_s8 + $0x7c] ss:$12 sps:$4 sm:$0xff]  }
  0x48   : > { %1325 = vmatpush3.bf16.msra.mxu0 %v1483_v43  ;;  %v1525_v9 = vld [vmem:[%s1710_s8 + $0xb0] ss:$12 sps:$4 sm:$0xff]   ;;  %v1520_v12 = vld [vmem:[%s1710_s8 + $0x78] ss:$12 sps:$4 sm:$0xff]   ;;  %v1521_v13 = vld [vmem:[%s1710_s8 + $0x94] ss:$12 sps:$4 sm:$0xff]  }
  0x49   : > { %1326 = vmatprep.subr.bf16.mxu0 %v1485_v45  ;;  %v1523_v14 = vld [vmem:[%s1710_s8 + $0x90] ss:$12 sps:$4 sm:$0xff]   ;;  %v1526_v15 = vld [vmem:[%s1710_s8 + $0xac] ss:$12 sps:$4 sm:$0xff]   ;;  %v1528_v16 = vld [vmem:[%s1710_s8 + $0xa8] ss:$12 sps:$4 sm:$0xff]  }
  0x4a   : > { %1405 = vmatpush3.bf16.msra.mxu1 %v1484_v44  ;;  %v325_v23 = vld [vmem:[#allocation2] sm:$0xff]  ;;  %v326_v28 = vld [vmem:[#allocation2 + $0x8] sm:$0xff]  ;;  %v327_v38 = vld [vmem:[#allocation2 + $0x10] sm:$0xff] }
  0x4b   : > { %1406 = vmatprep.subr.bf16.mxu1 %v1487_v46  ;;  %v328_v44 = vld [vmem:[#allocation2 + $0x18] sm:$0xff] }
  0x4c   : > { %1327 = vmatpush3.bf16.msra.mxu0 %v1486_v47 }
  0x4d   : > { %1328 = vmatprep.subr.bf16.mxu0 %v1488_v48 }
  0x4e   : > { %1407 = vmatpush3.bf16.msra.mxu1 %v1487_v46 }
  0x4f   : > { %1408 = vmatprep.subr.bf16.mxu1 %v1490_v49 }
  0x50   : > { %1329 = vmatpush3.bf16.msra.mxu0 %v1489_v50 }
  0x51   : > { %1330 = vmatprep.subr.bf16.mxu0 %v1491_v51 }
  0x52   : > { %1409 = vmatpush3.bf16.msra.mxu1 %v1490_v49 }
  0x53   : > { %1410 = vmatprep.subr.bf16.mxu1 %v1493_v53 }
  0x54   : > { %1331 = vmatpush3.bf16.msra.mxu0 %v1492_v52 }
  0x55   : > { %1332 = vmatprep.subr.bf16.mxu0 %v1494_v54 }
  0x56   : > { %1411 = vmatpush3.bf16.msra.mxu1 %v1493_v53 }
  0x57   : > { %1412 = vmatprep.subr.bf16.mxu1 %v1496_v55 }
  0x58   : > { %1333 = vmatpush3.bf16.msra.mxu0 %v1495_v58 }
  0x5a   : > { %1413 = vmatpush3.bf16.msra.mxu1 %v1496_v55  ;;  %v329_v55 = vld [vmem:[#allocation2 + $0x20] sm:$0xff] }
  0x5b   : > { %726 = vmatmul.mubr.bf16.vlgmr.msra.gmra.mrb[0].mxu0 %v1497_v59 }
  0x5c   : > { %733 = vmatprep.mubr.bf16.mxu0 %v1502_v60  ;;  %v330_v60 = vld [vmem:[#allocation2 + $0x28] sm:$0xff] }
  0x5d   : > { %1415 = vmatmul.mubr.bf16.vlgmr.msra.gmra.mrb[0].mxu1 %v1501_v61 }
  0x5e   : > { %1418 = vmatprep.mubr.bf16.mxu1 %v1508_v62 }
  0x63   : > { %734 = vmatmul.mubr.bf16.gmra.mrb[4].mxu0 %v1504_v63 }
  0x64   : > { %741 = vmatprep.mubr.bf16.mxu0 %v1505_v0 }
  0x65   : > { %1419 = vmatmul.mubr.bf16.gmra.mrb[4].mxu1 %v1509_v1 }
  0x66   : > { %1422 = vmatprep.mubr.bf16.mxu1 %v1516_v2 }
  0x6b   : > { %742 = vmatmul.mubr.bf16.gmra.mrb[8].mxu0 %v1507_v3 }
  0x6c   : > { %749 = vmatprep.mubr.bf16.mxu0 %v1510_v4 }
  0x6d   : > { %1423 = vmatmul.mubr.bf16.gmra.mrb[8].mxu1 %v1517_v5 }
  0x6e   : > { %1426 = vmatprep.mubr.bf16.mxu1 %v1524_v6  ;;  %v331_v6 = vld [vmem:[#allocation2 + $0x30] sm:$0xff] }
  0x73   : > { %750 = vmatmul.mubr.bf16.gmra.mrb[12].mxu0 %v1512_v7 }
  0x74   : > { %757 = vmatprep.mubr.bf16.mxu0 %v1513_v8 }
  0x75   : > { %1427 = vmatmul.mubr.bf16.gmra.mrb[12].mxu1 %v1525_v9 }
  0x7b   : > { %758 = vmatmul.mubr.bf16.gmra.mrb[16].mxu0 %v1515_v10 }
  0x7c   : > { %765 = vmatprep.mubr.bf16.mxu0 %v1518_v11 }
  0x83   : > { %766 = vmatmul.mubr.bf16.gmra.mrb[20].mxu0 %v1520_v12  ;;  %v332_v12 = vld [vmem:[#allocation2 + $0x38] sm:$0xff] }
  0x84   : > { %773 = vmatprep.mubr.bf16.mxu0 %v1521_v13 }
  0x8b   : > { %774 = vmatmul.mubr.bf16.gmra.mrb[24].mxu0 %v1523_v14 }
  0x8c   : > { %781 = vmatprep.mubr.bf16.mxu0 %v1526_v15 }
  0x93   : > { %782 = vmatmul.mubr.bf16.gmra.mrb[28].mxu0 %v1528_v16 }
 0x12e   : > { %v1334_v17 = vpop.f32.mrb[0].mxu0 }
 0x12f   : > { %v1335_v18 = vpop.f32.mrb[1].mxu0 }
 0x130   : > { %v1336_v19 = vadd.f32 %v1335_v18, %v1334_v17  ;;  %v1337_v20 = vpop.f32.mrb[2].mxu0  ;;  %v1416_v21 = vpop.f32.mrb[0].mxu1 }
 0x131   : > { %v1338_v22 = vpop.f32.mrb[3].mxu0  ;;  %v824_v24 = vpop.f32.mrb[1].mxu1 }
 0x132   : > { %v1339_v25 = vadd.f32 %v1338_v22, %v1337_v20  ;;  %v825_v26 = vadd.f32 %v1336_v19, %v824_v24  ;;  %v1417_v27 = vpop.f32.mrb[2].mxu1  ;;  %v333_v22 = vld [vmem:[#allocation2 + $0x40] sm:$0xff] }
 0x133   : > { %v827_v29 = vpop.f32.mrb[3].mxu1 }
 0x134   : > { %v887_v30 = vadd.f32 %v825_v26, %v325_v23  ;;  %v828_v31 = vadd.f32 %v1339_v25, %v827_v29  ;;  %v334_v25 = vld [vmem:[#allocation2 + $0x48] sm:$0xff] }
 0x136   : > { %903 = vst [vmem:[#allocation2] sm:$0xff] %v887_v30  ;;  %v888_v32 = vadd.f32 %v828_v31, %v326_v28  ;;  %v1340_v33 = vpop.f32.mrb[4].mxu0 }
 0x137   : > { %v1341_v34 = vpop.f32.mrb[5].mxu0 }
 0x138   : > { %904 = vst [vmem:[#allocation2 + $0x8] sm:$0xff] %v888_v32  ;;  %v1342_v35 = vadd.f32 %v1341_v34, %v1340_v33  ;;  %v1343_v36 = vpop.f32.mrb[6].mxu0  ;;  %v1420_v37 = vpop.f32.mrb[4].mxu1  ;;  %v335_v33 = vld [vmem:[#allocation2 + $0x50] sm:$0xff] }
 0x139   : > { %v1344_v39 = vpop.f32.mrb[7].mxu0  ;;  %v840_v40 = vpop.f32.mrb[5].mxu1 }
 0x13a   : > { %v833_v41 = vadd.f32 %v1416_v21, %v1342_v35  ;;  %v1345_v42 = vadd.f32 %v1344_v39, %v1343_v36  ;;  %v1421_v43 = vpop.f32.mrb[6].mxu1 }
 0x13b   : > { %v843_v45 = vpop.f32.mrb[7].mxu1 }
 0x13c   : > { %v889_v46 = vadd.f32 %v833_v41, %v327_v38  ;;  %v836_v47 = vadd.f32 %v1417_v27, %v1345_v42 }
 0x13e   : > { %905 = vst [vmem:[#allocation2 + $0x10] sm:$0xff] %v889_v46  ;;  %v890_v48 = vadd.f32 %v836_v47, %v328_v44  ;;  %v1346_v49 = vpop.f32.mrb[8].mxu0  ;;  %v337_v46 = vld [vmem:[#allocation2 + $0x60] sm:$0xff] }
 0x13f   : > { %v1347_v50 = vpop.f32.mrb[9].mxu0 }
 0x140   : > { %906 = vst [vmem:[#allocation2 + $0x18] sm:$0xff] %v890_v48  ;;  %v1348_v51 = vadd.f32 %v1347_v50, %v1346_v49  ;;  %v1349_v52 = vpop.f32.mrb[10].mxu0  ;;  %v1424_v53 = vpop.f32.mrb[8].mxu1  ;;  %v338_v49 = vld [vmem:[#allocation2 + $0x68] sm:$0xff] }
 0x141   : > { %v1350_v54 = vpop.f32.mrb[11].mxu0  ;;  %v856_v56 = vpop.f32.mrb[9].mxu1 }
 0x142   : > { %v1351_v57 = vadd.f32 %v1350_v54, %v1349_v52  ;;  %v841_v58 = vadd.f32 %v1348_v51, %v840_v40  ;;  %v1425_v59 = vpop.f32.mrb[10].mxu1 }
 0x143   : > { %v859_v61 = vpop.f32.mrb[11].mxu1 }
 0x144   : > { %v891_v62 = vadd.f32 %v841_v58, %v329_v55  ;;  %v844_v63 = vadd.f32 %v1351_v57, %v843_v45  ;;  %v339_v57 = vld [vmem:[#allocation2 + $0x70] sm:$0xff] }
 0x146   : > { %907 = vst [vmem:[#allocation2 + $0x20] sm:$0xff] %v891_v62  ;;  %v892_v0 = vadd.f32 %v844_v63, %v330_v60  ;;  %v1352_v1 = vpop.f32.mrb[12].mxu0 }
 0x147   : > { %v1353_v2 = vpop.f32.mrb[13].mxu0 }
 0x148   : > { %908 = vst [vmem:[#allocation2 + $0x28] sm:$0xff] %v892_v0  ;;  %v1354_v3 = vadd.f32 %v1353_v2, %v1352_v1  ;;  %v1355_v4 = vpop.f32.mrb[14].mxu0  ;;  %v1428_v5 = vpop.f32.mrb[12].mxu1  ;;  %v923_v1 = vld [vmem:[#allocation2] sm:$0xff] (!%p1232_p11)  ;;  %v924_v2 = vld [vmem:[#allocation2 + $0x8] sm:$0xff] (!%p1232_p11) }
 0x149   : > { %v1356_v7 = vpop.f32.mrb[15].mxu0  ;;  %v872_v8 = vpop.f32.mrb[13].mxu1 }
 0x14a   : > { %v849_v9 = vadd.f32 %v1420_v37, %v1354_v3  ;;  %v1357_v10 = vadd.f32 %v1356_v7, %v1355_v4  ;;  %v1429_v11 = vpop.f32.mrb[14].mxu1  ;;  %v336_v37 = vld [vmem:[#allocation2 + $0x58] sm:$0xff]  ;;  %v1233_v3 = vld [vmem:[%s1806_s2] ss:$0 sm:$0xff] (!%p1232_p11)  ;;  %v925_v7 = vld [vmem:[#allocation2 + $0x10] sm:$0xff] (!%p1232_p11) }
 0x14b   : > { %v875_v13 = vpop.f32.mrb[15].mxu1  ;;  %v946_v4 = vadd.f32 (!%p1232_p11), %v1233_v3, %v923_v1 }
 0x14c   : > { %v893_v14 = vadd.f32 %v849_v9, %v331_v6  ;;  %v852_v15 = vadd.f32 %v1421_v43, %v1357_v10  ;;  %v947_v6 = vadd.f32 (!%p1232_p11), %v1233_v3, %v924_v2  ;;  %v948_v9 = vadd.f32 (!%p1232_p11), %v1233_v3, %v925_v7 }
 0x14e   : > { %909 = vst [vmem:[#allocation2 + $0x30] sm:$0xff] %v893_v14  ;;  %v894_v16 = vadd.f32 %v852_v15, %v332_v12  ;;  %v1358_v17 = vpop.f32.mrb[16].mxu0  ;;  %v962_v15 = vmax.f32 (!%p1232_p11), %v946_v4, 0.0 }
 0x14f   : > { %v1359_v18 = vpop.f32.mrb[17].mxu0 }
 0x150   : > { %910 = vst [vmem:[#allocation2 + $0x38] sm:$0xff] %v894_v16  ;;  %v1360_v19 = vadd.f32 %v1359_v18, %v1358_v17  ;;  %v1361_v20 = vpop.f32.mrb[18].mxu0  ;;  %v963_v16 = vmax.f32 (!%p1232_p11), %v947_v6, 0.0 }
 0x151   : > { %v1362_v21 = vpop.f32.mrb[19].mxu0 }
 0x152   : > { %v1363_v23 = vadd.f32 %v1362_v21, %v1361_v20  ;;  %v857_v24 = vadd.f32 %v1360_v19, %v856_v56 }
 0x154   : > { %v895_v26 = vadd.f32 %v857_v24, %v333_v22  ;;  %v860_v27 = vadd.f32 %v1363_v23, %v859_v61  ;;  %v340_v61 = vld [vmem:[#allocation2 + $0x78] sm:$0xff]  ;;  %v964_v22 = vmax.f32 (!%p1232_p11), %v948_v9, 0.0 }
 0x156   : > { %911 = vst [vmem:[#allocation2 + $0x40] sm:$0xff] %v895_v26  ;;  %v896_v28 = vadd.f32 %v860_v27, %v334_v25  ;;  %v1364_v29 = vpop.f32.mrb[20].mxu0 }
 0x157   : > { %v1365_v30 = vpop.f32.mrb[21].mxu0  ;;  %v930_v14 = vld [vmem:[#allocation2 + $0x38] sm:$0xff] (!%p1232_p11) }
 0x158   : > { %912 = vst [vmem:[#allocation2 + $0x48] sm:$0xff] %v896_v28  ;;  %v1366_v31 = vadd.f32 %v1365_v30, %v1364_v29  ;;  %v1367_v32 = vpop.f32.mrb[22].mxu0  ;;  %v953_v25 = vadd.f32 (!%p1232_p11), %v1233_v3, %v930_v14  ;;  %v1274_v28 = vpack.c.bf16 (!%p1232_p11), %v963_v16, %v962_v15 }
 0x159   : > { %v1368_v34 = vpop.f32.mrb[23].mxu0 }
 0x15a   : > { %v865_v35 = vadd.f32 %v1424_v53, %v1366_v31  ;;  %v1369_v36 = vadd.f32 %v1368_v34, %v1367_v32  ;;  %v969_v34 = vmax.f32 (!%p1232_p11), %v953_v25, 0.0  ;;  %1275 = vst [vmem:[%s1807_s3] sm:$0xff] (!%p1232_p11), %v1274_v28  }
 0x15c   : > { %v897_v38 = vadd.f32 %v865_v35, %v335_v33  ;;  %v868_v39 = vadd.f32 %v1425_v59, %v1369_v36 }
 0x15d   : > { %v931_v19 = vld [vmem:[#allocation2 + $0x40] sm:$0xff] (!%p1232_p11) }
 0x15e   : > { %913 = vst [vmem:[#allocation2 + $0x50] sm:$0xff] %v897_v38  ;;  %v898_v40 = vadd.f32 %v868_v39, %v336_v37  ;;  %v1370_v41 = vpop.f32.mrb[24].mxu0  ;;  %v954_v31 = vadd.f32 (!%p1232_p11), %v1233_v3, %v931_v19 }
 0x15f   : > { %v1371_v42 = vpop.f32.mrb[25].mxu0  ;;  %v932_v20 = vld [vmem:[#allocation2 + $0x48] sm:$0xff] (!%p1232_p11) }
 0x160   : > { %914 = vst [vmem:[#allocation2 + $0x58] sm:$0xff] %v898_v40  ;;  %v1372_v43 = vadd.f32 %v1371_v42, %v1370_v41  ;;  %v1373_v44 = vpop.f32.mrb[26].mxu0  ;;  %v955_v35 = vadd.f32 (!%p1232_p11), %v1233_v3, %v932_v20  ;;  %v970_v40 = vmax.f32 (!%p1232_p11), %v954_v31, 0.0 }
 0x161   : > { %v1374_v45 = vpop.f32.mrb[27].mxu0 }
 0x162   : > { %v1375_v47 = vadd.f32 %v1374_v45, %v1373_v44  ;;  %v873_v48 = vadd.f32 %v1372_v43, %v872_v8  ;;  %v927_v8 = vld [vmem:[#allocation2 + $0x20] sm:$0xff] (!%p1232_p11)  ;;  %v971_v44 = vmax.f32 (!%p1232_p11), %v955_v35, 0.0 }
 0x163   : > { %v950_v12 = vadd.f32 (!%p1232_p11), %v1233_v3, %v927_v8 }
 0x164   : > { %v899_v50 = vadd.f32 %v873_v48, %v337_v46  ;;  %v876_v51 = vadd.f32 %v1375_v47, %v875_v13  ;;  %v929_v13 = vld [vmem:[#allocation2 + $0x30] sm:$0xff] (!%p1232_p11) }
 0x165   : > { %v952_v18 = vadd.f32 (!%p1232_p11), %v1233_v3, %v929_v13  ;;  %v933_v21 = vld [vmem:[#allocation2 + $0x50] sm:$0xff] (!%p1232_p11)  ;;  %v966_v24 = vmax.f32 (!%p1232_p11), %v950_v12, 0.0 }
 0x166   : > { %915 = vst [vmem:[#allocation2 + $0x60] sm:$0xff] %v899_v50  ;;  %v900_v52 = vadd.f32 %v876_v51, %v338_v49  ;;  %v1376_v53 = vpop.f32.mrb[28].mxu0  ;;  %v956_v36 = vadd.f32 (!%p1232_p11), %v1233_v3, %v933_v21  ;;  %v1294_v51 = vpack.c.bf16 (!%p1232_p11), %v971_v44, %v970_v40 }
 0x167   : > { %v1377_v54 = vpop.f32.mrb[29].mxu0  ;;  %v934_v26 = vld [vmem:[#allocation2 + $0x58] sm:$0xff] (!%p1232_p11)  ;;  %v968_v30 = vmax.f32 (!%p1232_p11), %v952_v18, 0.0 }
 0x168   : > { %916 = vst [vmem:[#allocation2 + $0x68] sm:$0xff] %v900_v52  ;;  %v1378_v55 = vadd.f32 %v1377_v54, %v1376_v53  ;;  %v1379_v56 = vpop.f32.mrb[30].mxu0  ;;  %v957_v41 = vadd.f32 (!%p1232_p11), %v1233_v3, %v934_v26  ;;  %v972_v45 = vmax.f32 (!%p1232_p11), %v956_v36, 0.0  ;;  %1314 = vst [vmem:[%s1807_s3 + $0x20] sm:$0xff] (!%p1232_p11), %v1294_v51  }
 0x169   : > { %v1380_v58 = vpop.f32.mrb[31].mxu0  ;;  %v1289_v43 = vpack.c.bf16 (!%p1232_p11), %v969_v34, %v968_v30 }
 0x16a   : > { %v881_v59 = vadd.f32 %v1428_v5, %v1378_v55  ;;  %v1381_v60 = vadd.f32 %v1380_v58, %v1379_v56  ;;  %922 = sbr.rel (%p1232_p11) target bundleno = 383 (0x17f), region = 66  ;;  %v926_v5 = vld [vmem:[#allocation2 + $0x18] sm:$0xff] (!%p1232_p11)  ;;  %v973_v47 = vmax.f32 (!%p1232_p11), %v957_v41, 0.0 }
 0x16b   : > { %v949_v10 = vadd.f32 (!%p1232_p11), %v1233_v3, %v926_v5  ;;  %1313 = vst [vmem:[%s1807_s3 + $0x18] sm:$0xff] (!%p1232_p11), %v1289_v43  }
 0x16c   : > { %v901_v62 = vadd.f32 %v881_v59, %v339_v57  ;;  %v884_v63 = vadd.f32 %v1429_v11, %v1381_v60  ;;  %v928_v11 = vld [vmem:[#allocation2 + $0x28] sm:$0xff] (!%p1232_p11)  ;;  %v1299_v53 = vpack.c.bf16 (!%p1232_p11), %v973_v47, %v972_v45 }
 0x16d   : > { %v951_v17 = vadd.f32 (!%p1232_p11), %v1233_v3, %v928_v11  ;;  %v965_v23 = vmax.f32 (!%p1232_p11), %v949_v10, 0.0  ;;  %v935_v27 = vld [vmem:[#allocation2 + $0x60] sm:$0xff] (!%p1232_p11) }
 0x16e   : > { %917 = vst [vmem:[#allocation2 + $0x70] sm:$0xff] %v901_v62  ;;  %v902_v0 = vadd.f32 %v884_v63, %v340_v61  ;;  %v958_v42 = vadd.f32 (!%p1232_p11), %v1233_v3, %v935_v27  ;;  %1315 = vst [vmem:[%s1807_s3 + $0x28] sm:$0xff] (!%p1232_p11), %v1299_v53  }
 0x16f   : > { %v967_v29 = vmax.f32 (!%p1232_p11), %v951_v17, 0.0  ;;  %v936_v32 = vld [vmem:[#allocation2 + $0x68] sm:$0xff] (!%p1232_p11)  ;;  %v1279_v33 = vpack.c.bf16 (!%p1232_p11), %v965_v23, %v964_v22 }
 0x170   : > { %918 = vst [vmem:[#allocation2 + $0x78] sm:$0xff] %v902_v0  ;;  %v959_v46 = vadd.f32 (!%p1232_p11), %v1233_v3, %v936_v32  ;;  %v974_v48 = vmax.f32 (!%p1232_p11), %v958_v42, 0.0 }
 0x171   : > { %v1284_v39 = vpack.c.bf16 %v967_v29, %v966_v24  ;;  %1311 = vst [vmem:[%s1807_s3 + $0x8] sm:$0xff] %v1279_v33  }
 0x172   : > { %v975_v52 = vmax.f32 %v959_v46, 0.0 }
 0x173   : > { %1312 = vst [vmem:[%s1807_s3 + $0x10] sm:$0xff] %v1284_v39  }
 0x174   : > { %v1304_v56 = vpack.c.bf16 %v975_v52, %v974_v48 }
 0x175   : > { %v937_v37 = vld [vmem:[#allocation2 + $0x70] sm:$0xff] }
 0x176   : > { %v960_v49 = vadd.f32 %v1233_v3, %v937_v37  ;;  %1316 = vst [vmem:[%s1807_s3 + $0x30] sm:$0xff] %v1304_v56  }
 0x177   : > { %v938_v38 = vld [vmem:[#allocation2 + $0x78] sm:$0xff] }
 0x178   : > { %v961_v50 = vadd.f32 %v1233_v3, %v938_v38  ;;  %v976_v54 = vmax.f32 %v960_v49, 0.0 }
 0x17a   : > { %v977_v55 = vmax.f32 %v961_v50, 0.0 }
 0x17c   : > { %v1309_v57 = vpack.c.bf16 %v977_v55, %v976_v54 }
 0x17e   : > { %1317 = vst [vmem:[%s1807_s3 + $0x38] sm:$0xff] %v1309_v57  }
 0x17f PF: > { %s13_s16 = sadd.s32 1, %s1567_s16   ;;  %s1808_s12 = smov %s1555_s13 }
 0x180   : > { %p10_p12 = scmp.ge.s32.totalorder %s13_s16, 5   ;;  %s1809_s13 = smov %s1625_s20 }
 0x181   : > { %s1810_s14 = smov %s1563_s15  ;;  %s1811_s15 = smov %s1813_s17 }
 0x182   :  { %12 = sbr.rel (!%p10_p12) target bundleno = 3 (0x3), region = 110 }

// kernel: unet_forward.13
= control target key start
LH: loop header
LB: loop body
LE: loop exit
PB: predicated region body
PF: predicated region fallthrough
CT: control target
= control target key end

     0   :  { %s1002_s12 = smov 0   ;;  %s1004_s13 = smov 0   ;;  %s1112_s0 = inlined_call_operand.vmem [shape: bf16[32,1152], index: 0, kind: input, shape index: {}]   ;;  %s1113_s1 = inlined_call_operand.vmem [shape: bf16[1152,128], index: 1, kind: input, shape index: {}]   ;;  %s1114_s2 = inlined_call_operand.vmem [shape: f32[1,128], index: 2, kind: input, shape index: {}]   ;;  %s1115_s3 = inlined_call_operand.vmem [shape: bf16[32,128], index: 3, kind: output, shape index: {}]  }
   0x1   :  { %s1006_s14 = smov 0   ;;  %s1008_s15 = smov 0  }
   0x2   :  { %s1010_s16 = smov 0  }
   0x3 LB: > { %s22_s17 = sadd.s32 1, %s975_s15  ;;  %p41_p1 = scmp.ne.s32.totalorder %s967_s13, %s963_s12  ;;  %s979_s16 = sphi %s1010_s16, %s13_s16   ;;  %s975_s15 = sphi %s1008_s15, %s1119_s15   ;;  %s971_s14 = sphi %s1006_s14, %s1118_s14   ;;  %s967_s13 = sphi %s1004_s13, %s1117_s13   ;;  %s963_s12 = sphi %s1002_s12, %s1116_s12  }
   0x4   : > { %p23_p0 = scmp.ge.s32.totalorder %s22_s17, 3  ;;  %p42_p2 = scmp.eq.s32.totalorder %s979_s16, 0 }
   0x5   : > { %s34_s19 = sadd.s32 1, %s967_s13  ;;  %p739_p5 = scmp.ge.s32.totalorder %s979_s16, 3 }
   0x6   : > { %s1121_s17 = smov (%p23_p0, %s22_s17), 0  ;;  %p43_p3 = por %p42_p2, %p41_p1 }
   0x7   : > { %s30_s18 = ssub.s32 %s975_s15, %s1121_s17  ;;  %143 = sbr.rel (%p739_p5) target bundleno = 23 (0x17), region = 20 }
   0x8   : > { %p32_p4 = scmp.eq.s32.totalorder %s30_s18, 0 }
   0xa   : > { %s1037_s20 = scalar_select %p32_p4, %s967_s13, %s34_s19  }
   0xe   : > { %146 = sbr.rel (!%p43_p3) target bundleno = 23 (0x17), region = 24  ;;  %s148_s21 = sand.u32 (%p43_p3), 1, %s967_s13  }
   0xf   : > { %s792_s22 = smul.u32 (%p43_p3), 12, %s975_s15 }
  0x10   : > { %s866_s23 = smul.u32 (%p43_p3), 48, %s148_s21 }
  0x11   : > { %s156_s26 = scalar_lea.vmem (%p43_p3), %s1112_s0, %s792_s22 }
  0x12   : > { %v171_v0 = vld [vmem:[%s156_s26] sm:$0xff] (%p43_p3)  ;;  %v175_v2 = vld [vmem:[%s156_s26 + $0x48] sm:$0xff] (%p43_p3)  ;;  %s150_s27 = scalar_lea.vmem (%p43_p3), [#allocation3], %s866_s23  ;;  %v745_v6 = vld [vmem:[%s156_s26 + $0x50] sm:$0xf] (%p43_p3) }
  0x13   : > { %v173_v1 = vld [vmem:[%s156_s26 + $0x24] sm:$0xff] (%p43_p3)  ;;  %172 = vst [vmem:[%s150_s27] sm:$0xff] (%p43_p3), %v171_v0  ;;  %176 = vst [vmem:[%s150_s27 + $0x18] sm:$0xff] (%p43_p3), %v175_v2  ;;  %v177_v3 = vld [vmem:[%s156_s26 + $0x6c] sm:$0xff] (%p43_p3) }
  0x14   : > { %174 = vst [vmem:[%s150_s27 + $0xc] sm:$0xff] (%p43_p3), %v173_v1  ;;  %v741_v4 = vld [vmem:[%s156_s26 + $0x8] sm:$0xf] (%p43_p3)  ;;  %v743_v5 = vld [vmem:[%s156_s26 + $0x2c] sm:$0xf] (%p43_p3)  ;;  %178 = vst [vmem:[%s150_s27 + $0x24] sm:$0xff] (%p43_p3), %v177_v3 }
  0x15   : > { %742 = vst [vmem:[%s150_s27 + $0x8] sm:$0xf] %v741_v4  ;;  %744 = vst [vmem:[%s150_s27 + $0x14] sm:$0xf] %v743_v5  ;;  %v747_v7 = vld [vmem:[%s156_s26 + $0x74] sm:$0xf] }
  0x16   : > { %746 = vst [vmem:[%s150_s27 + $0x20] sm:$0xf] %v745_v6  ;;  %748 = vst [vmem:[%s150_s27 + $0x2c] sm:$0xf] %v747_v7 }
  0x17 PF: > { %p749_p6 = scmp.ge.s32.totalorder %s979_s16, 1  ;;  %p207_p7 = scmp.lt.s32.totalorder %s979_s16, 4 }
  0x19   : > { %p208_p8 = pnand %p749_p6, %p207_p7 }
  0x1a   : > { %s214_s28 = sand.u32 (!%p208_p8), 1, %s963_s12   ;;  %s244_s29 = smul.u32 (!%p208_p8), 48, %s971_s14 }
  0x1b   : > { %211 = sbr.rel (%p208_p8) target bundleno = 318 (0x13e), region = 54  ;;  %p751_p10 = scmp.ne.s32.totalorder (!%p208_p8), %s971_s14, 0 }
  0x1c   : > { %s867_s30 = smul.u32 (!%p208_p8), 48, %s214_s28  ;;  %p245_p9 = scmp.lt.s32.totalorder (!%p208_p8), %s244_s29, 143 }
  0x1e   : > { %s1054_s8 = scalar_lea.vmem (!%p208_p8), [#allocation3], %s867_s30 }
  0x22   : > { %s1123_s29 = smov (!%p245_p9, %s244_s29), 143  ;;  %260 = sbr.rel (%p751_p10) target bundleno = 41 (0x29), region = 62 }
  0x23   : > { %s750_s4 = sshll.u32 %s1123_s29, 2  ;;  %v981_v8 = vmov (!%p751_p10), 0.0  }
  0x24   : > { %s1052_s7 = scalar_lea.vmem %s1113_s1, %s750_s4  ;;  %261 = vst [vmem:[#allocation2] sm:$0xff] (!%p751_p10), %v981_v8  ;;  %262 = vst [vmem:[#allocation2 + $0x8] sm:$0xff] (!%p751_p10), %v981_v8 }
  0x25   : > { %263 = vst [vmem:[#allocation2 + $0x10] sm:$0xff] (!%p751_p10), %v981_v8  ;;  %264 = vst [vmem:[#allocation2 + $0x18] sm:$0xff] (!%p751_p10), %v981_v8 }
  0x29 PF: > { %v909_v9 = vld [vmem:[%s1052_s7 + $0x40] sm:$0xff]   ;;  %v912_v12 = vld [vmem:[%s1052_s7 + $0x48] sm:$0xff]   ;;  %v915_v15 = vld [vmem:[%s1052_s7 + $0x50] sm:$0xff]   ;;  %p782_p11 = scmp.ne.s32.totalorder %s971_s14, 2 }
  0x2a   : > { %v910_v10 = vld [vmem:[%s1052_s7] sm:$0xff]   ;;  %808 = vmatprep.subr.bf16.mxu0 %v909_v9  ;;  %v913_v13 = vld [vmem:[%s1052_s7 + $0x8] sm:$0xff]   ;;  %v916_v16 = vld [vmem:[%s1052_s7 + $0x10] sm:$0xff]  }
  0x2b   : > { %v911_v11 = vld [vmem:[%s1052_s7 + $0x80] sm:$0xff]   ;;  %809 = vmatpush3.bf16.msra.mxu0 %v910_v10  ;;  %v914_v14 = vld [vmem:[%s1052_s7 + $0x88] sm:$0xff]   ;;  %v917_v17 = vld [vmem:[%s1052_s7 + $0x90] sm:$0xff]  }
  0x2c   : > { %846 = vmatprep.subr.bf16.mxu1 %v911_v11  ;;  %810 = vmatprep.subr.bf16.mxu0 %v912_v12  ;;  %v918_v18 = vld [vmem:[%s1052_s7 + $0x58] sm:$0xff]   ;;  %v921_v21 = vld [vmem:[%s1052_s7 + $0x60] sm:$0xff]   ;;  %v924_v24 = vld [vmem:[%s1052_s7 + $0x68] sm:$0xff]  }
  0x2d   : > { %847 = vmatpush3.bf16.msra.mxu1 %v911_v11  ;;  %v919_v19 = vld [vmem:[%s1052_s7 + $0x18] sm:$0xff]   ;;  %v923_v22 = vld [vmem:[%s1052_s7 + $0xa0] sm:$0xff]   ;;  %v926_v25 = vld [vmem:[%s1052_s7 + $0xa8] sm:$0xff]  }
  0x2e   : > { %848 = vmatprep.subr.bf16.mxu1 %v914_v14  ;;  %v920_v20 = vld [vmem:[%s1052_s7 + $0x98] sm:$0xff]   ;;  %v922_v23 = vld [vmem:[%s1052_s7 + $0x20] sm:$0xff]   ;;  %v925_v26 = vld [vmem:[%s1052_s7 + $0x28] sm:$0xff]  }
  0x2f   : > { %811 = vmatpush3.bf16.msra.mxu0 %v913_v13  ;;  %v927_v27 = vld [vmem:[%s1052_s7 + $0x70] sm:$0xff]   ;;  %v930_v30 = vld [vmem:[%s1052_s7 + $0x78] sm:$0xff]   ;;  %v265_v45 = vld [vmem:[#allocation2] sm:$0xff] }
  0x30   : > { %812 = vmatprep.subr.bf16.mxu0 %v915_v15  ;;  %v928_v28 = vld [vmem:[%s1052_s7 + $0x30] sm:$0xff]   ;;  %v932_v31 = vld [vmem:[%s1052_s7 + $0xb8] sm:$0xff]   ;;  %v266_v50 = vld [vmem:[#allocation2 + $0x8] sm:$0xff] }
  0x31   : > { %849 = vmatpush3.bf16.msra.mxu1 %v914_v14  ;;  %v929_v29 = vld [vmem:[%s1052_s7 + $0xb0] sm:$0xff]   ;;  %v931_v34 = vld [vmem:[%s1052_s7 + $0x38] sm:$0xff]   ;;  %v783_v5 = vld [vmem:[%s1114_s2] ss:$0 sm:$0xff] (!%p782_p11) }
  0x32   : > { %850 = vmatprep.subr.bf16.mxu1 %v917_v17  ;;  %v935_v32 = vld [vmem:[%s1054_s8 + $0x4] ss:$12 sps:$4 sm:$0xff]   ;;  %v936_v33 = vld [vmem:[%s1054_s8 + $0x8] ss:$12 sps:$4 sm:$0xff]   ;;  %v933_v35 = vld [vmem:[%s1054_s8] ss:$12 sps:$4 sm:$0xff]  }
  0x33   : > { %813 = vmatpush3.bf16.msra.mxu0 %v916_v16  ;;  %533 = vmatprep.mubr.bf16.mxu0 %v935_v32  ;;  %v938_v36 = vld [vmem:[%s1054_s8 + $0x1c] ss:$12 sps:$4 sm:$0xff]   ;;  %v937_v37 = vld [vmem:[%s1054_s8 + $0x20] ss:$12 sps:$4 sm:$0xff]   ;;  %v940_v38 = vld [vmem:[%s1054_s8 + $0x18] ss:$12 sps:$4 sm:$0xff]  }
  0x34   : > { %814 = vmatprep.subr.bf16.mxu0 %v918_v18  ;;  %862 = vmatprep.mubr.bf16.mxu1 %v936_v33  ;;  %v267_v59 = vld [vmem:[#allocation2 + $0x10] sm:$0xff]  ;;  %v268_v63 = vld [vmem:[#allocation2 + $0x18] sm:$0xff] }
  0x35   : > { %851 = vmatpush3.bf16.msra.mxu1 %v917_v17 }
  0x36   : > { %852 = vmatprep.subr.bf16.mxu1 %v920_v20 }
  0x37   : > { %815 = vmatpush3.bf16.msra.mxu0 %v919_v19 }
  0x38   : > { %816 = vmatprep.subr.bf16.mxu0 %v921_v21 }
  0x39   : > { %853 = vmatpush3.bf16.msra.mxu1 %v920_v20 }
  0x3a   : > { %854 = vmatprep.subr.bf16.mxu1 %v923_v22 }
  0x3b   : > { %817 = vmatpush3.bf16.msra.mxu0 %v922_v23 }
  0x3c   : > { %818 = vmatprep.subr.bf16.mxu0 %v924_v24 }
  0x3d   : > { %855 = vmatpush3.bf16.msra.mxu1 %v923_v22 }
  0x3e   : > { %856 = vmatprep.subr.bf16.mxu1 %v926_v25 }
  0x3f   : > { %819 = vmatpush3.bf16.msra.mxu0 %v925_v26 }
  0x40   : > { %820 = vmatprep.subr.bf16.mxu0 %v927_v27 }
  0x41   : > { %857 = vmatpush3.bf16.msra.mxu1 %v926_v25 }
  0x42   : > { %858 = vmatprep.subr.bf16.mxu1 %v929_v29 }
  0x43   : > { %821 = vmatpush3.bf16.msra.mxu0 %v928_v28 }
  0x44   : > { %822 = vmatprep.subr.bf16.mxu0 %v930_v30 }
  0x45   : > { %859 = vmatpush3.bf16.msra.mxu1 %v929_v29 }
  0x46   : > { %860 = vmatprep.subr.bf16.mxu1 %v932_v31 }
  0x47   : > { %823 = vmatpush3.bf16.msra.mxu0 %v931_v34 }
  0x49   : > { %861 = vmatpush3.bf16.msra.mxu1 %v932_v31 }
  0x4a   : > { %534 = vmatmul.mubr.bf16.vlgmr.msra.gmra.mrb[0].mxu0 %v933_v35 }
  0x4b   : > { %541 = vmatprep.mubr.bf16.mxu0 %v938_v36 }
  0x4c   : > { %863 = vmatmul.mubr.bf16.vlgmr.msra.gmra.mrb[0].mxu1 %v937_v37 }
  0x52   : > { %542 = vmatmul.mubr.bf16.gmra.mrb[4].mxu0 %v940_v38 }
 0x11d   : > { %v824_v39 = vpop.f32.mrb[0].mxu0 }
 0x11e   : > { %v825_v40 = vpop.f32.mrb[1].mxu0 }
 0x11f   : > { %v826_v41 = vadd.f32 %v825_v40, %v824_v39  ;;  %v827_v42 = vpop.f32.mrb[2].mxu0  ;;  %v864_v43 = vpop.f32.mrb[0].mxu1 }
 0x120   : > { %v828_v44 = vpop.f32.mrb[3].mxu0  ;;  %v584_v46 = vpop.f32.mrb[1].mxu1 }
 0x121   : > { %v829_v47 = vadd.f32 %v828_v44, %v827_v42  ;;  %v585_v48 = vadd.f32 %v826_v41, %v584_v46  ;;  %v865_v49 = vpop.f32.mrb[2].mxu1 }
 0x122   : > { %v587_v51 = vpop.f32.mrb[3].mxu1 }
 0x123   : > { %v599_v52 = vadd.f32 %v585_v48, %v265_v45  ;;  %v588_v53 = vadd.f32 %v829_v47, %v587_v51 }
 0x125   : > { %603 = vst [vmem:[#allocation2] sm:$0xff] %v599_v52  ;;  %v600_v54 = vadd.f32 %v588_v53, %v266_v50  ;;  %v830_v55 = vpop.f32.mrb[4].mxu0 }
 0x126   : > { %v831_v56 = vpop.f32.mrb[5].mxu0 }
 0x127   : > { %604 = vst [vmem:[#allocation2 + $0x8] sm:$0xff] %v600_v54  ;;  %v832_v57 = vadd.f32 %v831_v56, %v830_v55  ;;  %v833_v58 = vpop.f32.mrb[6].mxu0 }
 0x128   : > { %v834_v60 = vpop.f32.mrb[7].mxu0 }
 0x129   : > { %v593_v61 = vadd.f32 %v864_v43, %v832_v57  ;;  %v835_v62 = vadd.f32 %v834_v60, %v833_v58  ;;  %610 = sbr.rel (%p782_p11) target bundleno = 318 (0x13e), region = 66 }
 0x12b   : > { %v601_v0 = vadd.f32 %v593_v61, %v267_v59  ;;  %v596_v1 = vadd.f32 %v865_v49, %v835_v62 }
 0x12c   : > { %v611_v3 = vld [vmem:[#allocation2] sm:$0xff] (!%p782_p11) }
 0x12d   : > { %605 = vst [vmem:[#allocation2 + $0x10] sm:$0xff] %v601_v0  ;;  %v602_v2 = vadd.f32 %v596_v1, %v268_v63  ;;  %v622_v6 = vadd.f32 (!%p782_p11), %v783_v5, %v611_v3 }
 0x12e   : > { %v612_v4 = vld [vmem:[#allocation2 + $0x8] sm:$0xff] (!%p782_p11) }
 0x12f   : > { %606 = vst [vmem:[#allocation2 + $0x18] sm:$0xff] %v602_v2  ;;  %v623_v7 = vadd.f32 (!%p782_p11), %v783_v5, %v612_v4  ;;  %v626_v12 = vmax.f32 (!%p782_p11), %v622_v6, 0.0 }
 0x131   : > { %v627_v13 = vmax.f32 %v623_v7, 0.0 }
 0x133   : > { %v800_v16 = vpack.c.bf16 %v627_v13, %v626_v12 }
 0x134   : > { %v613_v8 = vld [vmem:[#allocation2 + $0x10] sm:$0xff] }
 0x135   : > { %v624_v10 = vadd.f32 %v783_v5, %v613_v8  ;;  %801 = vst [vmem:[%s1115_s3] sm:$0xff] %v800_v16  }
 0x136   : > { %v614_v9 = vld [vmem:[#allocation2 + $0x18] sm:$0xff] }
 0x137   : > { %v625_v11 = vadd.f32 %v783_v5, %v614_v9  ;;  %v628_v14 = vmax.f32 %v624_v10, 0.0 }
 0x139   : > { %v629_v15 = vmax.f32 %v625_v11, 0.0 }
 0x13b   : > { %v805_v17 = vpack.c.bf16 %v629_v15, %v628_v14 }
 0x13d   : > { %807 = vst [vmem:[%s1115_s3 + $0x8] sm:$0xff] %v805_v17  }
 0x13e PF: > { %s13_s16 = sadd.s32 1, %s979_s16   ;;  %s1116_s12 = smov %s967_s13 }
 0x13f   : > { %p10_p12 = scmp.ge.s32.totalorder %s13_s16, 5   ;;  %s1117_s13 = smov %s1037_s20 }
 0x140   : > { %s1118_s14 = smov %s975_s15  ;;  %s1119_s15 = smov %s1121_s17 }
 0x141   :  { %12 = sbr.rel (!%p10_p12) target bundleno = 3 (0x3), region = 110 }

// kernel: unet_forward.14
= control target key start
LH: loop header
LB: loop body
LE: loop exit
PB: predicated region body
PF: predicated region fallthrough
CT: control target
= control target key end

     0   :  { %s943_s12 = smov 0   ;;  %s945_s13 = smov 0   ;;  %s1042_s0 = inlined_call_operand.vmem [shape: bf16[8,1152], index: 0, kind: input, shape index: {}]   ;;  %s1043_s1 = inlined_call_operand.vmem [shape: bf16[1152,256], index: 1, kind: input, shape index: {}]   ;;  %s1044_s2 = inlined_call_operand.vmem [shape: f32[1,256], index: 2, kind: input, shape index: {}]   ;;  %s1045_s3 = inlined_call_operand.vmem [shape: bf16[8,256], index: 3, kind: output, shape index: {}]  }
   0x1   :  { %s947_s14 = smov 0  }
   0x2 LB: > { %s22_s15 = sadd.s32 1, %s915_s13  ;;  %p733_p0 = scmp.ge.s32.totalorder %s919_s14, 1  ;;  %s919_s14 = sphi %s947_s14, %s13_s14   ;;  %s915_s13 = sphi %s945_s13, %s1047_s13   ;;  %s911_s12 = sphi %s943_s12, %s1046_s12  }
   0x3   : > { %p23_p1 = scmp.ge.s32.totalorder %s22_s15, 3  ;;  %p168_p2 = scmp.lt.s32.totalorder %s919_s14, 4 }
   0x5   : > { %s1049_s15 = smov (%p23_p1, %s22_s15), 0  ;;  %p169_p3 = pnand %p733_p0, %p168_p2 }
   0x6   : > { %s202_s16 = smul.u32 (!%p169_p3), 3, %s911_s12  ;;  %p737_p6 = scmp.ne.s32.totalorder (!%p169_p3), %s911_s12, 0 }
   0x7   : > { %172 = sbr.rel (%p169_p3) target bundleno = 321 (0x141), region = 32 }
   0x8   : > { %s212_s17 = smul.u32 (!%p169_p3), 48, %s911_s12  ;;  %p205_p4 = scmp.lt.s32.totalorder (!%p169_p3), %s202_s16, 8 }
   0xa   : > { %p213_p5 = scmp.lt.s32.totalorder (!%p169_p3), %s212_s17, 143 }
   0xe   : > { %s1051_s16 = smov (!%p205_p4, %s202_s16), 8  ;;  %s1053_s17 = smov (!%p213_p5, %s212_s17), 143 }
   0xf   : > { %s734_s18 = sshll.u32 %s1051_s16, 2  ;;  %s794_s22 = sshll.u32 %s1053_s17, 3  ;;  %v921_v0 = vmov (!%p737_p6), 0.0  }
  0x10   : > { %s968_s21 = scalar_lea.vmem %s1042_s0, %s734_s18  ;;  %s973_s25 = scalar_lea.vmem %s1043_s1, %s794_s22  ;;  %229 = vst [vmem:[#allocation2] sm:$0xff] (!%p737_p6), %v921_v0  ;;  %230 = vst [vmem:[#allocation2 + $0x8] sm:$0xff] (!%p737_p6), %v921_v0 }
  0x11   : > { %228 = sbr.rel (%p737_p6) target bundleno = 24 (0x18), region = 36 }
  0x18 PF: > { %v822_v1 = vld [vmem:[%s973_s25 + $0x4] ss:$8 sps:$4 sm:$0xff]   ;;  %v824_v2 = vld [vmem:[%s973_s25] ss:$8 sps:$4 sm:$0xff]   ;;  %v922_v3 = vmov 0   ;;  %p789_p7 = scmp.ne.s32.totalorder %s911_s12, 2 }
  0x19   : > { %607 = vmatprep.mubr.bf16.mxu1 %v922_v3  ;;  %534 = vmatprep.subr.bf16.mxu0 %v822_v1  ;;  %v825_v4 = vld [vmem:[%s973_s25 + $0x14] ss:$8 sps:$4 sm:$0xff]   ;;  %v827_v5 = vld [vmem:[%s973_s25 + $0x10] ss:$8 sps:$4 sm:$0xff]   ;;  %v828_v6 = vld [vmem:[%s973_s25 + $0x24] ss:$8 sps:$4 sm:$0xff]  }
  0x1a   : > { %535 = vmatpush1.bf16.msra.mxu0 %v824_v2  ;;  %v830_v7 = vld [vmem:[%s973_s25 + $0x20] ss:$8 sps:$4 sm:$0xff]   ;;  %v831_v8 = vld [vmem:[%s973_s25 + $0x34] ss:$8 sps:$4 sm:$0xff]   ;;  %v833_v9 = vld [vmem:[%s973_s25 + $0x30] ss:$8 sps:$4 sm:$0xff]  }
  0x1b   : > { %536 = vmatprep.subr.bf16.mxu0 %v825_v4  ;;  %v846_v10 = vld [vmem:[%s973_s25 + $0x104] ss:$8 sps:$4 sm:$0xff]   ;;  %v848_v11 = vld [vmem:[%s973_s25 + $0x100] ss:$8 sps:$4 sm:$0xff]   ;;  %v852_v13 = vld [vmem:[%s973_s25 + $0x114] ss:$8 sps:$4 sm:$0xff]   ;;  %v628_v4 = vlaneseq (!%p789_p7) }
  0x1c   : > { %v834_v12 = vld [vmem:[%s973_s25 + $0x44] ss:$8 sps:$4 sm:$0xff]   ;;  %575 = vmatprep.subr.bf16.mxu1 %v846_v10  ;;  %v854_v14 = vld [vmem:[%s973_s25 + $0x110] ss:$8 sps:$4 sm:$0xff]   ;;  %v836_v15 = vld [vmem:[%s973_s25 + $0x40] ss:$8 sps:$4 sm:$0xff]  }
  0x1d   : > { %576 = vmatpush1.bf16.msra.mxu1 %v848_v11  ;;  %v837_v16 = vld [vmem:[%s973_s25 + $0x54] ss:$8 sps:$4 sm:$0xff]   ;;  %v858_v17 = vld [vmem:[%s973_s25 + $0x124] ss:$8 sps:$4 sm:$0xff]   ;;  %v860_v18 = vld [vmem:[%s973_s25 + $0x120] ss:$8 sps:$4 sm:$0xff]  }
  0x1e   : > { %537 = vmatpush1.bf16.msra.mxu0 %v827_v5  ;;  %577 = vmatprep.subr.bf16.mxu1 %v852_v13  ;;  %v839_v19 = vld [vmem:[%s973_s25 + $0x50] ss:$8 sps:$4 sm:$0xff]   ;;  %v864_v20 = vld [vmem:[%s973_s25 + $0x134] ss:$8 sps:$4 sm:$0xff]   ;;  %v840_v21 = vld [vmem:[%s973_s25 + $0x64] ss:$8 sps:$4 sm:$0xff]  }
  0x1f   : > { %538 = vmatprep.subr.bf16.mxu0 %v828_v6  ;;  %v866_v22 = vld [vmem:[%s973_s25 + $0x130] ss:$8 sps:$4 sm:$0xff]   ;;  %v842_v23 = vld [vmem:[%s973_s25 + $0x60] ss:$8 sps:$4 sm:$0xff]   ;;  %v870_v24 = vld [vmem:[%s973_s25 + $0x144] ss:$8 sps:$4 sm:$0xff]  }
  0x20   : > { %v843_v25 = vld [vmem:[%s973_s25 + $0x74] ss:$8 sps:$4 sm:$0xff]   ;;  %v872_v26 = vld [vmem:[%s973_s25 + $0x140] ss:$8 sps:$4 sm:$0xff]   ;;  %v845_v27 = vld [vmem:[%s973_s25 + $0x70] ss:$8 sps:$4 sm:$0xff]  }
  0x21   : > { %578 = vmatpush1.bf16.msra.mxu1 %v854_v14  ;;  %v876_v28 = vld [vmem:[%s973_s25 + $0x154] ss:$8 sps:$4 sm:$0xff]   ;;  %v849_v29 = vld [vmem:[%s973_s25 + $0x84] ss:$8 sps:$4 sm:$0xff]   ;;  %v878_v30 = vld [vmem:[%s973_s25 + $0x150] ss:$8 sps:$4 sm:$0xff]  }
  0x22   : > { %539 = vmatpush1.bf16.msra.mxu0 %v830_v7  ;;  %579 = vmatprep.subr.bf16.mxu1 %v858_v17  ;;  %v851_v31 = vld [vmem:[%s973_s25 + $0x80] ss:$8 sps:$4 sm:$0xff]   ;;  %v882_v32 = vld [vmem:[%s973_s25 + $0x164] ss:$8 sps:$4 sm:$0xff]   ;;  %v855_v33 = vld [vmem:[%s973_s25 + $0x94] ss:$8 sps:$4 sm:$0xff]  }
  0x23   : > { %540 = vmatprep.subr.bf16.mxu0 %v831_v8  ;;  %v233_v34 = vld [vmem:[%s968_s21] sm:$0xff]  ;;  %v857_v37 = vld [vmem:[%s973_s25 + $0x90] ss:$8 sps:$4 sm:$0xff]   ;;  %v888_v38 = vld [vmem:[%s973_s25 + $0x174] ss:$8 sps:$4 sm:$0xff]   ;;  %v629_v5 = vshrl.u32 (!%p789_p7), %v628_v4, 7 }
  0x24   : > { %v739_v35 = vcombine.high %v233_v34, %v233_v34  ;;  %v884_v36 = vld [vmem:[%s973_s25 + $0x160] ss:$8 sps:$4 sm:$0xff]   ;;  %v861_v39 = vld [vmem:[%s973_s25 + $0xa4] ss:$8 sps:$4 sm:$0xff]   ;;  %v890_v40 = vld [vmem:[%s973_s25 + $0x170] ss:$8 sps:$4 sm:$0xff]   ;;  %v738_v53 = vcombine.low %v233_v34, %v233_v34 }
  0x25   : > { %580 = vmatpush1.bf16.msra.mxu1 %v860_v18  ;;  %v863_v41 = vld [vmem:[%s973_s25 + $0xa0] ss:$8 sps:$4 sm:$0xff]   ;;  %v867_v42 = vld [vmem:[%s973_s25 + $0xb4] ss:$8 sps:$4 sm:$0xff]   ;;  %v869_v44 = vld [vmem:[%s973_s25 + $0xb0] ss:$8 sps:$4 sm:$0xff]  }
  0x26   : > { %541 = vmatpush1.bf16.msra.mxu0 %v833_v9  ;;  %581 = vmatprep.subr.bf16.mxu1 %v864_v20  ;;  %v894_v43 = vld [vmem:[%s968_s21 + $0x8] ss:$0 sps:$4 sm:$0xff]   ;;  %v873_v45 = vld [vmem:[%s973_s25 + $0xc4] ss:$8 sps:$4 sm:$0xff]   ;;  %v879_v47 = vld [vmem:[%s973_s25 + $0xd4] ss:$8 sps:$4 sm:$0xff]  }
  0x27   : > { %542 = vmatprep.subr.bf16.mxu0 %v834_v12  ;;  %566 = vmatprep.mubr.bf16.mxu0 %v739_v35  ;;  %v875_v46 = vld [vmem:[%s973_s25 + $0xc0] ss:$8 sps:$4 sm:$0xff]   ;;  %v881_v48 = vld [vmem:[%s973_s25 + $0xd0] ss:$8 sps:$4 sm:$0xff]   ;;  %v885_v49 = vld [vmem:[%s973_s25 + $0xe4] ss:$8 sps:$4 sm:$0xff]  }
  0x28   : > { %v887_v50 = vld [vmem:[%s973_s25 + $0xe0] ss:$8 sps:$4 sm:$0xff]   ;;  %v891_v51 = vld [vmem:[%s973_s25 + $0xf4] ss:$8 sps:$4 sm:$0xff]   ;;  %v893_v52 = vld [vmem:[%s973_s25 + $0xf0] ss:$8 sps:$4 sm:$0xff]  }
  0x29   : > { %582 = vmatpush1.bf16.msra.mxu1 %v866_v22  ;;  %v231_v58 = vld [vmem:[#allocation2] sm:$0xff]  ;;  %v232_v61 = vld [vmem:[#allocation2 + $0x8] sm:$0xff]  ;;  %v630_v7 = vsub.s32 (!%p789_p7), 0, %v629_v5  ;;  %v634_v8 = vsub.s32 (!%p789_p7), 1, %v629_v5 }
  0x2a   : > { %543 = vmatpush1.bf16.msra.mxu0 %v836_v15  ;;  %583 = vmatprep.subr.bf16.mxu1 %v870_v24  ;;  %v626_v6 = vld [vmem:[%s1044_s2] sm:$0x3] (!%p789_p7) }
  0x2b   : > { %544 = vmatprep.subr.bf16.mxu0 %v837_v16  ;;  %v631_v11 = vrot.slane (!%p789_p7), %v626_v6, %v630_v7  ;;  %v635_v12 = vrot.slane (!%p789_p7), %v626_v6, %v634_v8 }
  0x2d   : > { %584 = vmatpush1.bf16.msra.mxu1 %v872_v26 }
  0x2e   : > { %545 = vmatpush1.bf16.msra.mxu0 %v839_v19  ;;  %585 = vmatprep.subr.bf16.mxu1 %v876_v28 }
  0x2f   : > { %546 = vmatprep.subr.bf16.mxu0 %v840_v21 }
  0x31   : > { %586 = vmatpush1.bf16.msra.mxu1 %v878_v30 }
  0x32   : > { %547 = vmatpush1.bf16.msra.mxu0 %v842_v23  ;;  %587 = vmatprep.subr.bf16.mxu1 %v882_v32 }
  0x33   : > { %548 = vmatprep.subr.bf16.mxu0 %v843_v25 }
  0x35   : > { %588 = vmatpush1.bf16.msra.mxu1 %v884_v36 }
  0x36   : > { %549 = vmatpush1.bf16.msra.mxu0 %v845_v27  ;;  %589 = vmatprep.subr.bf16.mxu1 %v888_v38 }
  0x37   : > { %550 = vmatprep.subr.bf16.mxu0 %v849_v29 }
  0x39   : > { %590 = vmatpush1.bf16.msra.mxu1 %v890_v40 }
  0x3a   : > { %551 = vmatpush1.bf16.msra.mxu0 %v851_v31 }
  0x3b   : > { %552 = vmatprep.subr.bf16.mxu0 %v855_v33 }
  0x3c   : > { %608 = vmatmul.mubr.bf16.vlgmr.msra.gmra.mrb[0].mxu1 %v894_v43 }
  0x3e   : > { %553 = vmatpush1.bf16.msra.mxu0 %v857_v37 }
  0x3f   : > { %554 = vmatprep.subr.bf16.mxu0 %v861_v39 }
  0x42   : > { %555 = vmatpush1.bf16.msra.mxu0 %v863_v41 }
  0x43   : > { %556 = vmatprep.subr.bf16.mxu0 %v867_v42 }
  0x46   : > { %557 = vmatpush1.bf16.msra.mxu0 %v869_v44 }
  0x47   : > { %558 = vmatprep.subr.bf16.mxu0 %v873_v45 }
  0x4a   : > { %559 = vmatpush1.bf16.msra.mxu0 %v875_v46 }
  0x4b   : > { %560 = vmatprep.subr.bf16.mxu0 %v879_v47 }
  0x4e   : > { %561 = vmatpush1.bf16.msra.mxu0 %v881_v48 }
  0x4f   : > { %562 = vmatprep.subr.bf16.mxu0 %v885_v49 }
  0x52   : > { %563 = vmatpush1.bf16.msra.mxu0 %v887_v50 }
  0x53   : > { %564 = vmatprep.subr.bf16.mxu0 %v891_v51 }
  0x56   : > { %565 = vmatpush1.bf16.msra.mxu0 %v893_v52 }
  0x59   : > { %567 = vmatmul.mubr.bf16.vlgmr.msra.gmra.mrb[0].mxu0 %v738_v53 }
 0x10f   : > { %v609_v54 = vpop.f32.mrb[0].mxu1 }
 0x110   : > { %v611_v55 = vpop.f32.mrb[1].mxu1 }
 0x111   : > { %v613_v56 = vpop.f32.mrb[2].mxu1 }
 0x112   : > { %v614_v57 = vpop.f32.mrb[3].mxu1 }
 0x12c   : > { %v568_v59 = vpop.f32.mrb[0].mxu0  ;;  %623 = sbr.rel (%p789_p7) target bundleno = 321 (0x141), region = 40 }
 0x12d   : > { %v610_v60 = vadd.f32 %v609_v54, %v568_v59  ;;  %v570_v62 = vpop.f32.mrb[1].mxu0 }
 0x12e   : > { %v612_v63 = vadd.f32 %v611_v55, %v570_v62  ;;  %v572_v0 = vpop.f32.mrb[2].mxu0 }
 0x12f   : > { %v616_v1 = vadd.f32 %v610_v60, %v231_v58  ;;  %v573_v2 = vpop.f32.mrb[3].mxu0 }
 0x130   : > { %v617_v3 = vadd.f32 %v612_v63, %v232_v61 }
 0x131   : > { %618 = vst [vmem:[#allocation2] sm:$0xff] %v616_v1 }
 0x132   : > { %619 = vst [vmem:[#allocation2 + $0x8] sm:$0xff] %v617_v3 }
 0x138   : > { %v624_v9 = vld [vmem:[#allocation2] sm:$0xff] }
 0x139   : > { %v625_v10 = vld [vmem:[#allocation2 + $0x8] sm:$0xff]  ;;  %v638_v13 = vadd.f32 %v631_v11, %v624_v9 }
 0x13a   : > { %v639_v14 = vadd.f32 %v635_v12, %v625_v10 }
 0x13b   : > { %v640_v15 = vmax.f32 %v638_v13, 0.0 }
 0x13c   : > { %v641_v16 = vmax.f32 %v639_v14, 0.0 }
 0x13e   : > { %v795_v17 = vpack.c.bf16 %v641_v16, %v640_v15 }
 0x140   : > { %650 = vst [vmem:[%s1045_s3] sm:$0xff] %v795_v17 }
 0x141 PF: > { %s13_s14 = sadd.s32 1, %s919_s14   ;;  %s1046_s12 = smov %s915_s13 }
 0x142   : > { %p10_p8 = scmp.ge.s32.totalorder %s13_s14, 5   ;;  %s1047_s13 = smov %s1049_s15 }
 0x144   :  { %12 = sbr.rel (!%p10_p8) target bundleno = 2 (0x2), region = 73 }

// kernel: unet_forward.15
= control target key start
LH: loop header
LB: loop body
LE: loop exit
PB: predicated region body
PF: predicated region fallthrough
CT: control target
= control target key end

     0   :  { %s1406_s12 = smov 0   ;;  %s1408_s13 = smov 0   ;;  %s1560_s0 = inlined_call_operand.vmem [shape: bf16[8,2304], index: 0, kind: input, shape index: {}]   ;;  %s1561_s1 = inlined_call_operand.vmem [shape: bf16[2304,256], index: 1, kind: input, shape index: {}]   ;;  %s1562_s2 = inlined_call_operand.vmem [shape: f32[1,256], index: 2, kind: input, shape index: {}]   ;;  %s1563_s3 = inlined_call_operand.vmem [shape: bf16[8,256], index: 3, kind: output, shape index: {}]  }
   0x1   :  { %s1410_s14 = smov 0  }
   0x2 LB: > { %s22_s15 = sadd.s32 1, %s1379_s13  ;;  %p1072_p0 = scmp.ge.s32.totalorder %s1383_s14, 1  ;;  %s1383_s14 = sphi %s1410_s14, %s13_s14   ;;  %s1379_s13 = sphi %s1408_s13, %s1565_s13   ;;  %s1375_s12 = sphi %s1406_s12, %s1564_s12  }
   0x3   : > { %p23_p1 = scmp.ge.s32.totalorder %s22_s15, 3  ;;  %p168_p2 = scmp.lt.s32.totalorder %s1383_s14, 4 }
   0x5   : > { %s1567_s15 = smov (%p23_p1, %s22_s15), 0  ;;  %p169_p3 = pnand %p1072_p0, %p168_p2 }
   0x6   : > { %s202_s16 = smul.u32 (!%p169_p3), 6, %s1375_s12  ;;  %p1076_p6 = scmp.ne.s32.totalorder (!%p169_p3), %s1375_s12, 0 }
   0x7   : > { %172 = sbr.rel (%p169_p3) target bundleno = 385 (0x181), region = 32 }
   0x8   : > { %s212_s17 = smul.u32 (!%p169_p3), 96, %s1375_s12  ;;  %p205_p4 = scmp.lt.s32.totalorder (!%p169_p3), %s202_s16, 17 }
   0xa   : > { %p213_p5 = scmp.lt.s32.totalorder (!%p169_p3), %s212_s17, 287 }
   0xe   : > { %s1569_s16 = smov (!%p205_p4, %s202_s16), 17  ;;  %s1571_s17 = smov (!%p213_p5, %s212_s17), 287 }
   0xf   : > { %s1073_s18 = sshll.u32 %s1569_s16, 2  ;;  %s1184_s22 = sshll.u32 %s1571_s17, 3  ;;  %v1385_v0 = vmov (!%p1076_p6), 0.0  }
  0x10   : > { %s1431_s21 = scalar_lea.vmem %s1560_s0, %s1073_s18  ;;  %s1436_s25 = scalar_lea.vmem %s1561_s1, %s1184_s22  ;;  %228 = vst [vmem:[#allocation2] sm:$0xff] (!%p1076_p6), %v1385_v0  ;;  %229 = vst [vmem:[#allocation2 + $0x8] sm:$0xff] (!%p1076_p6), %v1385_v0 }
  0x11   : > { %227 = sbr.rel (%p1076_p6) target bundleno = 24 (0x18), region = 36 }
  0x18 PF: > { %v1211_v1 = vld [vmem:[%s1436_s25 + $0x4] ss:$8 sps:$4 sm:$0xff]   ;;  %v1215_v3 = vld [vmem:[%s1436_s25] ss:$8 sps:$4 sm:$0xff]   ;;  %v1217_v5 = vld [vmem:[%s1436_s25 + $0x14] ss:$8 sps:$4 sm:$0xff]  }
  0x19   : > { %v1213_v2 = vld [vmem:[%s1436_s25 + $0x104] ss:$8 sps:$4 sm:$0xff]   ;;  %832 = vmatprep.subr.bf16.mxu0 %v1211_v1  ;;  %v1216_v4 = vld [vmem:[%s1436_s25 + $0x100] ss:$8 sps:$4 sm:$0xff]   ;;  %v1219_v6 = vld [vmem:[%s1436_s25 + $0x114] ss:$8 sps:$4 sm:$0xff]  }
  0x1a   : > { %873 = vmatprep.subr.bf16.mxu1 %v1213_v2  ;;  %833 = vmatpush1.bf16.msra.mxu0 %v1215_v3  ;;  %v1221_v7 = vld [vmem:[%s1436_s25 + $0x10] ss:$8 sps:$4 sm:$0xff]   ;;  %v1223_v9 = vld [vmem:[%s1436_s25 + $0x24] ss:$8 sps:$4 sm:$0xff]   ;;  %v1227_v11 = vld [vmem:[%s1436_s25 + $0x20] ss:$8 sps:$4 sm:$0xff]  }
  0x1b   : > { %874 = vmatpush1.bf16.msra.mxu1 %v1216_v4  ;;  %834 = vmatprep.subr.bf16.mxu0 %v1217_v5  ;;  %v1222_v8 = vld [vmem:[%s1436_s25 + $0x110] ss:$8 sps:$4 sm:$0xff]   ;;  %v1225_v10 = vld [vmem:[%s1436_s25 + $0x124] ss:$8 sps:$4 sm:$0xff]   ;;  %v1228_v12 = vld [vmem:[%s1436_s25 + $0x120] ss:$8 sps:$4 sm:$0xff]  }
  0x1c   : > { %875 = vmatprep.subr.bf16.mxu1 %v1219_v6  ;;  %v1229_v13 = vld [vmem:[%s1436_s25 + $0x34] ss:$8 sps:$4 sm:$0xff]   ;;  %v1233_v15 = vld [vmem:[%s1436_s25 + $0x30] ss:$8 sps:$4 sm:$0xff]   ;;  %v1235_v17 = vld [vmem:[%s1436_s25 + $0x44] ss:$8 sps:$4 sm:$0xff]  }
  0x1d   : > { %v1231_v14 = vld [vmem:[%s1436_s25 + $0x134] ss:$8 sps:$4 sm:$0xff]   ;;  %v1234_v16 = vld [vmem:[%s1436_s25 + $0x130] ss:$8 sps:$4 sm:$0xff]   ;;  %v1237_v18 = vld [vmem:[%s1436_s25 + $0x144] ss:$8 sps:$4 sm:$0xff]  }
  0x1e   : > { %835 = vmatpush1.bf16.msra.mxu0 %v1221_v7  ;;  %v1239_v19 = vld [vmem:[%s1436_s25 + $0x40] ss:$8 sps:$4 sm:$0xff]   ;;  %v1241_v21 = vld [vmem:[%s1436_s25 + $0x54] ss:$8 sps:$4 sm:$0xff]   ;;  %v1245_v23 = vld [vmem:[%s1436_s25 + $0x50] ss:$8 sps:$4 sm:$0xff]  }
  0x1f   : > { %876 = vmatpush1.bf16.msra.mxu1 %v1222_v8  ;;  %836 = vmatprep.subr.bf16.mxu0 %v1223_v9  ;;  %v1240_v20 = vld [vmem:[%s1436_s25 + $0x140] ss:$8 sps:$4 sm:$0xff]   ;;  %v1243_v22 = vld [vmem:[%s1436_s25 + $0x154] ss:$8 sps:$4 sm:$0xff]   ;;  %v1246_v24 = vld [vmem:[%s1436_s25 + $0x150] ss:$8 sps:$4 sm:$0xff]  }
  0x20   : > { %877 = vmatprep.subr.bf16.mxu1 %v1225_v10  ;;  %v1247_v25 = vld [vmem:[%s1436_s25 + $0x64] ss:$8 sps:$4 sm:$0xff]   ;;  %v1251_v27 = vld [vmem:[%s1436_s25 + $0x60] ss:$8 sps:$4 sm:$0xff]   ;;  %v1253_v29 = vld [vmem:[%s1436_s25 + $0x74] ss:$8 sps:$4 sm:$0xff]  }
  0x21   : > { %v1249_v26 = vld [vmem:[%s1436_s25 + $0x164] ss:$8 sps:$4 sm:$0xff]   ;;  %v1252_v28 = vld [vmem:[%s1436_s25 + $0x160] ss:$8 sps:$4 sm:$0xff]   ;;  %v1255_v30 = vld [vmem:[%s1436_s25 + $0x174] ss:$8 sps:$4 sm:$0xff]  }
  0x22   : > { %837 = vmatpush1.bf16.msra.mxu0 %v1227_v11  ;;  %v1257_v31 = vld [vmem:[%s1436_s25 + $0x70] ss:$8 sps:$4 sm:$0xff]   ;;  %v1259_v33 = vld [vmem:[%s1436_s25 + $0x84] ss:$8 sps:$4 sm:$0xff]   ;;  %v1263_v35 = vld [vmem:[%s1436_s25 + $0x80] ss:$8 sps:$4 sm:$0xff]  }
  0x23   : > { %878 = vmatpush1.bf16.msra.mxu1 %v1228_v12  ;;  %838 = vmatprep.subr.bf16.mxu0 %v1229_v13  ;;  %v1258_v32 = vld [vmem:[%s1436_s25 + $0x170] ss:$8 sps:$4 sm:$0xff]   ;;  %v1261_v34 = vld [vmem:[%s1436_s25 + $0x184] ss:$8 sps:$4 sm:$0xff]   ;;  %v1264_v36 = vld [vmem:[%s1436_s25 + $0x180] ss:$8 sps:$4 sm:$0xff]  }
  0x24   : > { %879 = vmatprep.subr.bf16.mxu1 %v1231_v14  ;;  %v1265_v37 = vld [vmem:[%s1436_s25 + $0x94] ss:$8 sps:$4 sm:$0xff]   ;;  %v1269_v39 = vld [vmem:[%s1436_s25 + $0x90] ss:$8 sps:$4 sm:$0xff]   ;;  %v1271_v41 = vld [vmem:[%s1436_s25 + $0xa4] ss:$8 sps:$4 sm:$0xff]  }
  0x25   : > { %v1267_v38 = vld [vmem:[%s1436_s25 + $0x194] ss:$8 sps:$4 sm:$0xff]   ;;  %v1270_v40 = vld [vmem:[%s1436_s25 + $0x190] ss:$8 sps:$4 sm:$0xff]   ;;  %v1273_v42 = vld [vmem:[%s1436_s25 + $0x1a4] ss:$8 sps:$4 sm:$0xff]  }
  0x26   : > { %839 = vmatpush1.bf16.msra.mxu0 %v1233_v15  ;;  %v1275_v43 = vld [vmem:[%s1436_s25 + $0xa0] ss:$8 sps:$4 sm:$0xff]   ;;  %v1277_v45 = vld [vmem:[%s1436_s25 + $0xb4] ss:$8 sps:$4 sm:$0xff]   ;;  %v1281_v50 = vld [vmem:[%s1436_s25 + $0xb0] ss:$8 sps:$4 sm:$0xff]  }
  0x27   : > { %880 = vmatpush1.bf16.msra.mxu1 %v1234_v16  ;;  %840 = vmatprep.subr.bf16.mxu0 %v1235_v17  ;;  %v1276_v44 = vld [vmem:[%s1436_s25 + $0x1a0] ss:$8 sps:$4 sm:$0xff]   ;;  %v1279_v46 = vld [vmem:[%s1436_s25 + $0x1b4] ss:$8 sps:$4 sm:$0xff]   ;;  %v1282_v51 = vld [vmem:[%s1436_s25 + $0x1b0] ss:$8 sps:$4 sm:$0xff]  }
  0x28   : > { %881 = vmatprep.subr.bf16.mxu1 %v1237_v18  ;;  %v232_v47 = vld [vmem:[%s1431_s21] sm:$0xff]  ;;  %v233_v49 = vld [vmem:[%s1431_s21 + $0x8] sm:$0xff]  ;;  %v1289_v57 = vld [vmem:[%s1436_s25 + $0xd4] ss:$8 sps:$4 sm:$0xff]   ;;  %p1179_p7 = scmp.ne.s32.totalorder %s1375_s12, 2 }
  0x29   : > { %v1078_v48 = vcombine.high %v232_v47, %v232_v47  ;;  %v1080_v52 = vcombine.high %v233_v49, %v233_v49  ;;  %v1283_v53 = vld [vmem:[%s1436_s25 + $0xc4] ss:$8 sps:$4 sm:$0xff]   ;;  %v1287_v55 = vld [vmem:[%s1436_s25 + $0xc0] ss:$8 sps:$4 sm:$0xff]   ;;  %v1291_v58 = vld [vmem:[%s1436_s25 + $0x1d4] ss:$8 sps:$4 sm:$0xff]   ;;  %v1077_v6 = vcombine.low %v232_v47, %v232_v47  ;;  %v1079_v7 = vcombine.low %v233_v49, %v233_v49 }
  0x2a   : > { %841 = vmatpush1.bf16.msra.mxu0 %v1239_v19  ;;  %v1285_v54 = vld [vmem:[%s1436_s25 + $0x1c4] ss:$8 sps:$4 sm:$0xff]   ;;  %v1288_v56 = vld [vmem:[%s1436_s25 + $0x1c0] ss:$8 sps:$4 sm:$0xff]   ;;  %v1293_v59 = vld [vmem:[%s1436_s25 + $0xd0] ss:$8 sps:$4 sm:$0xff]  }
  0x2b   : > { %882 = vmatpush1.bf16.msra.mxu1 %v1240_v20  ;;  %842 = vmatprep.subr.bf16.mxu0 %v1241_v21  ;;  %v1294_v60 = vld [vmem:[%s1436_s25 + $0x1d0] ss:$8 sps:$4 sm:$0xff]   ;;  %v1295_v61 = vld [vmem:[%s1436_s25 + $0xe4] ss:$8 sps:$4 sm:$0xff]   ;;  %v1299_v63 = vld [vmem:[%s1436_s25 + $0xe0] ss:$8 sps:$4 sm:$0xff]  }
  0x2c   : > { %883 = vmatprep.subr.bf16.mxu1 %v1243_v22  ;;  %864 = vmatprep.mubr.bf16.mxu0 %v1078_v48  ;;  %v1297_v62 = vld [vmem:[%s1436_s25 + $0x1e4] ss:$8 sps:$4 sm:$0xff]   ;;  %v1300_v0 = vld [vmem:[%s1436_s25 + $0x1e0] ss:$8 sps:$4 sm:$0xff]   ;;  %v1301_v1 = vld [vmem:[%s1436_s25 + $0xf4] ss:$8 sps:$4 sm:$0xff]  }
  0x2d   : > { %905 = vmatprep.mubr.bf16.mxu1 %v1080_v52  ;;  %v1303_v2 = vld [vmem:[%s1436_s25 + $0x1f4] ss:$8 sps:$4 sm:$0xff]   ;;  %v1305_v3 = vld [vmem:[%s1436_s25 + $0xf0] ss:$8 sps:$4 sm:$0xff]   ;;  %v1313_v5 = vld [vmem:[%s1436_s25 + $0x204] ss:$8 sps:$4 sm:$0xff]  }
  0x2e   : > { %843 = vmatpush1.bf16.msra.mxu0 %v1245_v23  ;;  %v1306_v4 = vld [vmem:[%s1436_s25 + $0x1f0] ss:$8 sps:$4 sm:$0xff]   ;;  %v1311_v8 = vld [vmem:[%s1436_s25 + $0x200] ss:$8 sps:$4 sm:$0xff]   ;;  %v1316_v10 = vld [vmem:[%s1436_s25 + $0x214] ss:$8 sps:$4 sm:$0xff]  }
  0x2f   : > { %884 = vmatpush1.bf16.msra.mxu1 %v1246_v24  ;;  %844 = vmatprep.subr.bf16.mxu0 %v1247_v25  ;;  %v1508_v9 = vld [vmem:[%s1431_s21 + $0x10] sm:$0xff]  ;;  %v1319_v13 = vld [vmem:[%s1436_s25 + $0x224] ss:$8 sps:$4 sm:$0xff]   ;;  %v1317_v14 = vld [vmem:[%s1436_s25 + $0x220] ss:$8 sps:$4 sm:$0xff]  }
  0x30   : > { %885 = vmatprep.subr.bf16.mxu1 %v1249_v26  ;;  %v1082_v11 = vcombine.high %v1508_v9, %v1508_v9  ;;  %v1314_v12 = vld [vmem:[%s1436_s25 + $0x210] ss:$8 sps:$4 sm:$0xff]   ;;  %v1322_v15 = vld [vmem:[%s1436_s25 + $0x234] ss:$8 sps:$4 sm:$0xff]   ;;  %v1325_v17 = vld [vmem:[%s1436_s25 + $0x244] ss:$8 sps:$4 sm:$0xff]  }
  0x31   : > { %v1320_v16 = vld [vmem:[%s1436_s25 + $0x230] ss:$8 sps:$4 sm:$0xff]   ;;  %v1323_v18 = vld [vmem:[%s1436_s25 + $0x240] ss:$8 sps:$4 sm:$0xff]   ;;  %v1328_v19 = vld [vmem:[%s1436_s25 + $0x254] ss:$8 sps:$4 sm:$0xff]  }
  0x32   : > { %845 = vmatpush1.bf16.msra.mxu0 %v1251_v27  ;;  %v1326_v20 = vld [vmem:[%s1436_s25 + $0x250] ss:$8 sps:$4 sm:$0xff]   ;;  %v1331_v21 = vld [vmem:[%s1436_s25 + $0x264] ss:$8 sps:$4 sm:$0xff]   ;;  %v1329_v22 = vld [vmem:[%s1436_s25 + $0x260] ss:$8 sps:$4 sm:$0xff]  }
  0x33   : > { %886 = vmatpush1.bf16.msra.mxu1 %v1252_v28  ;;  %846 = vmatprep.subr.bf16.mxu0 %v1253_v29  ;;  %v1334_v23 = vld [vmem:[%s1436_s25 + $0x274] ss:$8 sps:$4 sm:$0xff]   ;;  %v1332_v24 = vld [vmem:[%s1436_s25 + $0x270] ss:$8 sps:$4 sm:$0xff]   ;;  %v1337_v25 = vld [vmem:[%s1436_s25 + $0x284] ss:$8 sps:$4 sm:$0xff]  }
  0x34   : > { %887 = vmatprep.subr.bf16.mxu1 %v1255_v30  ;;  %v1335_v26 = vld [vmem:[%s1436_s25 + $0x280] ss:$8 sps:$4 sm:$0xff]   ;;  %v1340_v27 = vld [vmem:[%s1436_s25 + $0x294] ss:$8 sps:$4 sm:$0xff]   ;;  %v1338_v28 = vld [vmem:[%s1436_s25 + $0x290] ss:$8 sps:$4 sm:$0xff]  }
  0x35   : > { %v1343_v29 = vld [vmem:[%s1436_s25 + $0x2a4] ss:$8 sps:$4 sm:$0xff]   ;;  %v1341_v30 = vld [vmem:[%s1436_s25 + $0x2a0] ss:$8 sps:$4 sm:$0xff]  }
  0x36   : > { %847 = vmatpush1.bf16.msra.mxu0 %v1257_v31  ;;  %v1346_v31 = vld [vmem:[%s1436_s25 + $0x2b4] ss:$8 sps:$4 sm:$0xff]   ;;  %v230_v52 = vld [vmem:[#allocation2] sm:$0xff] }
  0x37   : > { %888 = vmatpush1.bf16.msra.mxu1 %v1258_v32  ;;  %848 = vmatprep.subr.bf16.mxu0 %v1259_v33  ;;  %v1344_v32 = vld [vmem:[%s1436_s25 + $0x2b0] ss:$8 sps:$4 sm:$0xff]   ;;  %v1349_v33 = vld [vmem:[%s1436_s25 + $0x2c4] ss:$8 sps:$4 sm:$0xff]  }
  0x38   : > { %889 = vmatprep.subr.bf16.mxu1 %v1261_v34  ;;  %v1347_v34 = vld [vmem:[%s1436_s25 + $0x2c0] ss:$8 sps:$4 sm:$0xff]  }
  0x3a   : > { %849 = vmatpush1.bf16.msra.mxu0 %v1263_v35  ;;  %v1352_v35 = vld [vmem:[%s1436_s25 + $0x2d4] ss:$8 sps:$4 sm:$0xff]  }
  0x3b   : > { %890 = vmatpush1.bf16.msra.mxu1 %v1264_v36  ;;  %850 = vmatprep.subr.bf16.mxu0 %v1265_v37  ;;  %v1350_v36 = vld [vmem:[%s1436_s25 + $0x2d0] ss:$8 sps:$4 sm:$0xff]   ;;  %v1355_v37 = vld [vmem:[%s1436_s25 + $0x2e4] ss:$8 sps:$4 sm:$0xff]  }
  0x3c   : > { %891 = vmatprep.subr.bf16.mxu1 %v1267_v38  ;;  %v1353_v38 = vld [vmem:[%s1436_s25 + $0x2e0] ss:$8 sps:$4 sm:$0xff]  }
  0x3e   : > { %851 = vmatpush1.bf16.msra.mxu0 %v1269_v39  ;;  %v1358_v39 = vld [vmem:[%s1436_s25 + $0x2f4] ss:$8 sps:$4 sm:$0xff]  }
  0x3f   : > { %892 = vmatpush1.bf16.msra.mxu1 %v1270_v40  ;;  %852 = vmatprep.subr.bf16.mxu0 %v1271_v41  ;;  %v1356_v40 = vld [vmem:[%s1436_s25 + $0x2f0] ss:$8 sps:$4 sm:$0xff]   ;;  %v1081_v41 = vcombine.low %v1508_v9, %v1508_v9 }
  0x40   : > { %893 = vmatprep.subr.bf16.mxu1 %v1273_v42 }
  0x42   : > { %853 = vmatpush1.bf16.msra.mxu0 %v1275_v43 }
  0x43   : > { %894 = vmatpush1.bf16.msra.mxu1 %v1276_v44  ;;  %854 = vmatprep.subr.bf16.mxu0 %v1277_v45 }
  0x44   : > { %895 = vmatprep.subr.bf16.mxu1 %v1279_v46 }
  0x46   : > { %855 = vmatpush1.bf16.msra.mxu0 %v1281_v50 }
  0x47   : > { %896 = vmatpush1.bf16.msra.mxu1 %v1282_v51  ;;  %856 = vmatprep.subr.bf16.mxu0 %v1283_v53 }
  0x48   : > { %897 = vmatprep.subr.bf16.mxu1 %v1285_v54 }
  0x4a   : > { %857 = vmatpush1.bf16.msra.mxu0 %v1287_v55  ;;  %v231_v55 = vld [vmem:[#allocation2 + $0x8] sm:$0xff] }
  0x4b   : > { %898 = vmatpush1.bf16.msra.mxu1 %v1288_v56  ;;  %858 = vmatprep.subr.bf16.mxu0 %v1289_v57 }
  0x4c   : > { %899 = vmatprep.subr.bf16.mxu1 %v1291_v58 }
  0x4e   : > { %859 = vmatpush1.bf16.msra.mxu0 %v1293_v59 }
  0x4f   : > { %900 = vmatpush1.bf16.msra.mxu1 %v1294_v60  ;;  %860 = vmatprep.subr.bf16.mxu0 %v1295_v61 }
  0x50   : > { %901 = vmatprep.subr.bf16.mxu1 %v1297_v62  ;;  %v967_v62 = vlaneseq (!%p1179_p7) }
  0x52   : > { %861 = vmatpush1.bf16.msra.mxu0 %v1299_v63  ;;  %v968_v63 = vshrl.u32 (!%p1179_p7), %v967_v62, 7 }
  0x53   : > { %902 = vmatpush1.bf16.msra.mxu1 %v1300_v0  ;;  %862 = vmatprep.subr.bf16.mxu0 %v1301_v1  ;;  %v965_v0 = vld [vmem:[%s1562_s2] sm:$0x3] (!%p1179_p7) }
  0x54   : > { %903 = vmatprep.subr.bf16.mxu1 %v1303_v2  ;;  %v969_v1 = vsub.s32 (!%p1179_p7), 0, %v968_v63  ;;  %v973_v2 = vsub.s32 (!%p1179_p7), 1, %v968_v63 }
  0x56   : > { %863 = vmatpush1.bf16.msra.mxu0 %v1305_v3 }
  0x57   : > { %904 = vmatpush1.bf16.msra.mxu1 %v1306_v4  ;;  %914 = vmatprep.subr.bf16.mxu0 %v1313_v5  ;;  %v970_v5 = vrot.slane (!%p1179_p7), %v965_v0, %v969_v1 }
  0x59   : > { %865 = vmatmul.mubr.bf16.vlgmr.msra.gmra.mrb[0].mxu0 %v1077_v6  ;;  %v974_v6 = vrot.slane (!%p1179_p7), %v965_v0, %v973_v2 }
  0x5a   : > { %906 = vmatmul.mubr.bf16.vlgmr.msra.gmra.mrb[0].mxu1 %v1079_v7  ;;  %915 = vmatpush1.bf16.msra.mxu0 %v1311_v8 }
  0x5b   : > { %946 = vmatprep.mubr.bf16.mxu0 %v1082_v11  ;;  %916 = vmatprep.subr.bf16.mxu0 %v1316_v10 }
  0x5e   : > { %917 = vmatpush1.bf16.msra.mxu0 %v1314_v12 }
  0x5f   : > { %918 = vmatprep.subr.bf16.mxu0 %v1319_v13 }
  0x62   : > { %919 = vmatpush1.bf16.msra.mxu0 %v1317_v14 }
  0x63   : > { %920 = vmatprep.subr.bf16.mxu0 %v1322_v15 }
  0x66   : > { %921 = vmatpush1.bf16.msra.mxu0 %v1320_v16 }
  0x67   : > { %922 = vmatprep.subr.bf16.mxu0 %v1325_v17 }
  0x6a   : > { %923 = vmatpush1.bf16.msra.mxu0 %v1323_v18 }
  0x6b   : > { %924 = vmatprep.subr.bf16.mxu0 %v1328_v19 }
  0x6e   : > { %925 = vmatpush1.bf16.msra.mxu0 %v1326_v20 }
  0x6f   : > { %926 = vmatprep.subr.bf16.mxu0 %v1331_v21 }
  0x72   : > { %927 = vmatpush1.bf16.msra.mxu0 %v1329_v22 }
  0x73   : > { %928 = vmatprep.subr.bf16.mxu0 %v1334_v23 }
  0x76   : > { %929 = vmatpush1.bf16.msra.mxu0 %v1332_v24 }
  0x77   : > { %930 = vmatprep.subr.bf16.mxu0 %v1337_v25 }
  0x7a   : > { %931 = vmatpush1.bf16.msra.mxu0 %v1335_v26 }
  0x7b   : > { %932 = vmatprep.subr.bf16.mxu0 %v1340_v27 }
  0x7e   : > { %933 = vmatpush1.bf16.msra.mxu0 %v1338_v28 }
  0x7f   : > { %934 = vmatprep.subr.bf16.mxu0 %v1343_v29 }
  0x82   : > { %935 = vmatpush1.bf16.msra.mxu0 %v1341_v30 }
  0x83   : > { %936 = vmatprep.subr.bf16.mxu0 %v1346_v31 }
  0x86   : > { %937 = vmatpush1.bf16.msra.mxu0 %v1344_v32 }
  0x87   : > { %938 = vmatprep.subr.bf16.mxu0 %v1349_v33 }
  0x8a   : > { %939 = vmatpush1.bf16.msra.mxu0 %v1347_v34 }
  0x8b   : > { %940 = vmatprep.subr.bf16.mxu0 %v1352_v35 }
  0x8e   : > { %941 = vmatpush1.bf16.msra.mxu0 %v1350_v36 }
  0x8f   : > { %942 = vmatprep.subr.bf16.mxu0 %v1355_v37 }
  0x92   : > { %943 = vmatpush1.bf16.msra.mxu0 %v1353_v38 }
  0x93   : > { %944 = vmatprep.subr.bf16.mxu0 %v1358_v39 }
  0x96   : > { %945 = vmatpush1.bf16.msra.mxu0 %v1356_v40 }
  0x99   : > { %947 = vmatmul.mubr.bf16.vlgmr.msra.gmra.mrb[4].mxu0 %v1081_v41 }
 0x12c   : > { %v866_v42 = vpop.f32.mrb[0].mxu0 }
 0x12d   : > { %v907_v43 = vpop.f32.mrb[0].mxu1  ;;  %v868_v45 = vpop.f32.mrb[1].mxu0 }
 0x12e   : > { %v908_v44 = vadd.f32 %v907_v43, %v866_v42  ;;  %v909_v46 = vpop.f32.mrb[1].mxu1  ;;  %v870_v48 = vpop.f32.mrb[2].mxu0 }
 0x12f   : > { %v910_v47 = vadd.f32 %v909_v46, %v868_v45  ;;  %v911_v49 = vpop.f32.mrb[2].mxu1  ;;  %v871_v50 = vpop.f32.mrb[3].mxu0 }
 0x130   : > { %v912_v51 = vpop.f32.mrb[3].mxu1 }
 0x16c   : > { %v948_v53 = vpop.f32.mrb[4].mxu0  ;;  %962 = sbr.rel (%p1179_p7) target bundleno = 385 (0x181), region = 40 }
 0x16d   : > { %v949_v54 = vadd.f32 %v948_v53, %v908_v44  ;;  %v950_v56 = vpop.f32.mrb[5].mxu0 }
 0x16e   : > { %v951_v57 = vadd.f32 %v950_v56, %v910_v47  ;;  %v952_v58 = vpop.f32.mrb[6].mxu0 }
 0x16f   : > { %v955_v59 = vadd.f32 %v949_v54, %v230_v52  ;;  %v953_v60 = vpop.f32.mrb[7].mxu0 }
 0x170   : > { %v956_v61 = vadd.f32 %v951_v57, %v231_v55 }
 0x171   : > { %957 = vst [vmem:[#allocation2] sm:$0xff] %v955_v59 }
 0x172   : > { %958 = vst [vmem:[#allocation2 + $0x8] sm:$0xff] %v956_v61 }
 0x178   : > { %v963_v3 = vld [vmem:[#allocation2] sm:$0xff] }
 0x179   : > { %v964_v4 = vld [vmem:[#allocation2 + $0x8] sm:$0xff]  ;;  %v977_v7 = vadd.f32 %v970_v5, %v963_v3 }
 0x17a   : > { %v978_v8 = vadd.f32 %v974_v6, %v964_v4 }
 0x17b   : > { %v979_v9 = vmax.f32 %v977_v7, 0.0 }
 0x17c   : > { %v980_v10 = vmax.f32 %v978_v8, 0.0 }
 0x17e   : > { %v1185_v11 = vpack.c.bf16 %v980_v10, %v979_v9 }
 0x180   : > { %989 = vst [vmem:[%s1563_s3] sm:$0xff] %v1185_v11 }
 0x181 PF: > { %s13_s14 = sadd.s32 1, %s1383_s14   ;;  %s1564_s12 = smov %s1379_s13 }
 0x182   : > { %p10_p8 = scmp.ge.s32.totalorder %s13_s14, 5   ;;  %s1565_s13 = smov %s1567_s15 }
 0x184   :  { %12 = sbr.rel (!%p10_p8) target bundleno = 2 (0x2), region = 73 }

// kernel: tile.18
= control target key start
LH: loop header
LB: loop body
LE: loop exit
PB: predicated region body
PF: predicated region fallthrough
CT: control target
= control target key end

     0   :  { %s22_s0 = inlined_call_operand.vmem [shape: f32[128], index: 0, kind: input, shape index: {}]   ;;  %s23_s1 = inlined_call_operand.vmem [shape: f32[4,128], index: 1, kind: output, shape index: {}]  }
   0x1   :  { %v4_v0 = vld [vmem:[%s22_s0] ss:$0 sm:$0xff] }
   0x2   :  { %5 = vst [vmem:[%s23_s1] sm:$0xf] %v4_v0 }

// kernel: unet_forward.16
= control target key start
LH: loop header
LB: loop body
LE: loop exit
PB: predicated region body
PF: predicated region fallthrough
CT: control target
= control target key end

     0   :  { %s3473_s1 = inlined_call_operand.vmem [shape: bf16[1024,512], index: 1, kind: input, shape index: {}]   ;;  %s3474_s0 = inlined_call_operand.vmem [shape: bf16[8,1024], index: 0, kind: input, shape index: {}]   ;;  %s3475_s2 = inlined_call_operand.vmem [shape: f32[1,512], index: 2, kind: input, shape index: {}]   ;;  %s3476_s3 = inlined_call_operand.vmem [shape: bf16[8,512], index: 3, kind: output, shape index: {}]  }
   0x1   :  { %v2254_v0 = vld [vmem:[%s3473_s1 + $0x4] ss:$16 sps:$4 sm:$0xff]   ;;  %v2256_v1 = vld [vmem:[%s3473_s1 + $0xc] ss:$16 sps:$4 sm:$0xff]   ;;  %v2258_v2 = vld [vmem:[%s3473_s1] ss:$16 sps:$4 sm:$0xff]  }
   0x2   :  { %1604 = vmatprep.subr.bf16.mxu0 %v2254_v0  ;;  %v2259_v3 = vld [vmem:[%s3473_s1 + $0x8] ss:$16 sps:$4 sm:$0xff]   ;;  %1768 = vmatprep.subr.bf16.mxu1 %v2256_v1  ;;  %v2260_v4 = vld [vmem:[%s3473_s1 + $0x24] ss:$16 sps:$4 sm:$0xff]   ;;  %v2262_v5 = vld [vmem:[%s3473_s1 + $0x2c] ss:$16 sps:$4 sm:$0xff]  }
   0x3   :  { %1605 = vmatpush1.bf16.msra.mxu0 %v2258_v2  ;;  %1769 = vmatpush1.bf16.msra.mxu1 %v2259_v3  ;;  %v2264_v6 = vld [vmem:[%s3473_s1 + $0x20] ss:$16 sps:$4 sm:$0xff]   ;;  %v2265_v7 = vld [vmem:[%s3473_s1 + $0x28] ss:$16 sps:$4 sm:$0xff]   ;;  %v2266_v8 = vld [vmem:[%s3473_s1 + $0x44] ss:$16 sps:$4 sm:$0xff]  }
   0x4   :  { %1606 = vmatprep.subr.bf16.mxu0 %v2260_v4  ;;  %1770 = vmatprep.subr.bf16.mxu1 %v2262_v5  ;;  %v2268_v9 = vld [vmem:[%s3473_s1 + $0x4c] ss:$16 sps:$4 sm:$0xff]   ;;  %v2270_v10 = vld [vmem:[%s3473_s1 + $0x40] ss:$16 sps:$4 sm:$0xff]   ;;  %v2271_v11 = vld [vmem:[%s3473_s1 + $0x48] ss:$16 sps:$4 sm:$0xff]  }
   0x5   :  { %v2272_v12 = vld [vmem:[%s3473_s1 + $0x64] ss:$16 sps:$4 sm:$0xff]   ;;  %v2274_v13 = vld [vmem:[%s3473_s1 + $0x6c] ss:$16 sps:$4 sm:$0xff]   ;;  %v2276_v14 = vld [vmem:[%s3473_s1 + $0x60] ss:$16 sps:$4 sm:$0xff]  }
   0x6   :  { %v2277_v15 = vld [vmem:[%s3473_s1 + $0x68] ss:$16 sps:$4 sm:$0xff]   ;;  %v2278_v16 = vld [vmem:[%s3473_s1 + $0x84] ss:$16 sps:$4 sm:$0xff]   ;;  %v2280_v17 = vld [vmem:[%s3473_s1 + $0x8c] ss:$16 sps:$4 sm:$0xff]  }
   0x7   :  { %1607 = vmatpush1.bf16.msra.mxu0 %v2264_v6  ;;  %1771 = vmatpush1.bf16.msra.mxu1 %v2265_v7  ;;  %v2282_v18 = vld [vmem:[%s3473_s1 + $0x80] ss:$16 sps:$4 sm:$0xff]   ;;  %v2283_v19 = vld [vmem:[%s3473_s1 + $0x88] ss:$16 sps:$4 sm:$0xff]   ;;  %v2284_v20 = vld [vmem:[%s3473_s1 + $0xa4] ss:$16 sps:$4 sm:$0xff]  }
   0x8   :  { %1608 = vmatprep.subr.bf16.mxu0 %v2266_v8  ;;  %1772 = vmatprep.subr.bf16.mxu1 %v2268_v9  ;;  %v2286_v21 = vld [vmem:[%s3473_s1 + $0xac] ss:$16 sps:$4 sm:$0xff]   ;;  %v2288_v22 = vld [vmem:[%s3473_s1 + $0xa0] ss:$16 sps:$4 sm:$0xff]   ;;  %v2289_v23 = vld [vmem:[%s3473_s1 + $0xa8] ss:$16 sps:$4 sm:$0xff]  }
   0x9   :  { %v2290_v24 = vld [vmem:[%s3473_s1 + $0xc4] ss:$16 sps:$4 sm:$0xff]   ;;  %v2292_v25 = vld [vmem:[%s3473_s1 + $0xcc] ss:$16 sps:$4 sm:$0xff]   ;;  %v2294_v26 = vld [vmem:[%s3473_s1 + $0xc0] ss:$16 sps:$4 sm:$0xff]  }
   0xa   :  { %v2295_v27 = vld [vmem:[%s3473_s1 + $0xc8] ss:$16 sps:$4 sm:$0xff]   ;;  %v2296_v28 = vld [vmem:[%s3473_s1 + $0xe4] ss:$16 sps:$4 sm:$0xff]   ;;  %v2298_v29 = vld [vmem:[%s3473_s1 + $0xec] ss:$16 sps:$4 sm:$0xff]  }
   0xb   :  { %1609 = vmatpush1.bf16.msra.mxu0 %v2270_v10  ;;  %1773 = vmatpush1.bf16.msra.mxu1 %v2271_v11  ;;  %v2300_v30 = vld [vmem:[%s3473_s1 + $0xe0] ss:$16 sps:$4 sm:$0xff]   ;;  %v2301_v31 = vld [vmem:[%s3473_s1 + $0xe8] ss:$16 sps:$4 sm:$0xff]   ;;  %v2302_v32 = vld [vmem:[%s3473_s1 + $0x104] ss:$16 sps:$4 sm:$0xff]  }
   0xc   :  { %1610 = vmatprep.subr.bf16.mxu0 %v2272_v12  ;;  %1774 = vmatprep.subr.bf16.mxu1 %v2274_v13  ;;  %v2304_v33 = vld [vmem:[%s3473_s1 + $0x10c] ss:$16 sps:$4 sm:$0xff]   ;;  %v2306_v34 = vld [vmem:[%s3473_s1 + $0x100] ss:$16 sps:$4 sm:$0xff]   ;;  %v2307_v35 = vld [vmem:[%s3473_s1 + $0x108] ss:$16 sps:$4 sm:$0xff]  }
   0xd   :  { %v2308_v36 = vld [vmem:[%s3473_s1 + $0x124] ss:$16 sps:$4 sm:$0xff]   ;;  %v2310_v37 = vld [vmem:[%s3473_s1 + $0x12c] ss:$16 sps:$4 sm:$0xff]   ;;  %v2312_v38 = vld [vmem:[%s3473_s1 + $0x120] ss:$16 sps:$4 sm:$0xff]  }
   0xe   :  { %v2313_v39 = vld [vmem:[%s3473_s1 + $0x128] ss:$16 sps:$4 sm:$0xff]   ;;  %v2314_v40 = vld [vmem:[%s3473_s1 + $0x144] ss:$16 sps:$4 sm:$0xff]   ;;  %v2316_v41 = vld [vmem:[%s3473_s1 + $0x14c] ss:$16 sps:$4 sm:$0xff]  }
   0xf   :  { %1611 = vmatpush1.bf16.msra.mxu0 %v2276_v14  ;;  %1775 = vmatpush1.bf16.msra.mxu1 %v2277_v15  ;;  %v2318_v42 = vld [vmem:[%s3473_s1 + $0x140] ss:$16 sps:$4 sm:$0xff]   ;;  %v2319_v43 = vld [vmem:[%s3473_s1 + $0x148] ss:$16 sps:$4 sm:$0xff]   ;;  %v2320_v44 = vld [vmem:[%s3473_s1 + $0x164] ss:$16 sps:$4 sm:$0xff]  }
  0x10   :  { %1612 = vmatprep.subr.bf16.mxu0 %v2278_v16  ;;  %1776 = vmatprep.subr.bf16.mxu1 %v2280_v17  ;;  %v2322_v45 = vld [vmem:[%s3473_s1 + $0x16c] ss:$16 sps:$4 sm:$0xff]   ;;  %v14_v46 = vld [vmem:[%s3474_s0] sm:$0xff]  ;;  %v2325_v49 = vld [vmem:[%s3473_s1 + $0x168] ss:$16 sps:$4 sm:$0xff]  }
  0x11   :  { %v2324_v47 = vld [vmem:[%s3473_s1 + $0x160] ss:$16 sps:$4 sm:$0xff]   ;;  %v1959_v48 = vcombine.high %v14_v46, %v14_v46  ;;  %v2326_v50 = vld [vmem:[%s3473_s1 + $0x184] ss:$16 sps:$4 sm:$0xff]   ;;  %v2328_v51 = vld [vmem:[%s3473_s1 + $0x18c] ss:$16 sps:$4 sm:$0xff]   ;;  %v1958_v4 = vcombine.low %v14_v46, %v14_v46 }
  0x12   :  { %v2330_v52 = vld [vmem:[%s3473_s1 + $0x180] ss:$16 sps:$4 sm:$0xff]   ;;  %v2331_v53 = vld [vmem:[%s3473_s1 + $0x188] ss:$16 sps:$4 sm:$0xff]   ;;  %v2332_v54 = vld [vmem:[%s3473_s1 + $0x1a4] ss:$16 sps:$4 sm:$0xff]  }
  0x13   :  { %1613 = vmatpush1.bf16.msra.mxu0 %v2282_v18  ;;  %1777 = vmatpush1.bf16.msra.mxu1 %v2283_v19  ;;  %v2334_v55 = vld [vmem:[%s3473_s1 + $0x1ac] ss:$16 sps:$4 sm:$0xff]   ;;  %v2336_v56 = vld [vmem:[%s3473_s1 + $0x1a0] ss:$16 sps:$4 sm:$0xff]   ;;  %v2337_v57 = vld [vmem:[%s3473_s1 + $0x1a8] ss:$16 sps:$4 sm:$0xff]  }
  0x14   :  { %1614 = vmatprep.subr.bf16.mxu0 %v2284_v20  ;;  %1778 = vmatprep.subr.bf16.mxu1 %v2286_v21  ;;  %v2338_v58 = vld [vmem:[%s3473_s1 + $0x1c4] ss:$16 sps:$4 sm:$0xff]   ;;  %v2340_v59 = vld [vmem:[%s3473_s1 + $0x1cc] ss:$16 sps:$4 sm:$0xff]   ;;  %v2342_v60 = vld [vmem:[%s3473_s1 + $0x1c0] ss:$16 sps:$4 sm:$0xff]  }
  0x15   :  { %1636 = vmatprep.mubr.bf16.mxu0 %v1959_v48  ;;  %1800 = vmatprep.mubr.bf16.mxu1 %v1959_v48  ;;  %v2343_v61 = vld [vmem:[%s3473_s1 + $0x1c8] ss:$16 sps:$4 sm:$0xff]   ;;  %v2344_v62 = vld [vmem:[%s3473_s1 + $0x1e4] ss:$16 sps:$4 sm:$0xff]   ;;  %v2346_v63 = vld [vmem:[%s3473_s1 + $0x1ec] ss:$16 sps:$4 sm:$0xff]  }
  0x16   :  { %v2348_v0 = vld [vmem:[%s3473_s1 + $0x1e0] ss:$16 sps:$4 sm:$0xff]   ;;  %v2349_v1 = vld [vmem:[%s3473_s1 + $0x1e8] ss:$16 sps:$4 sm:$0xff]   ;;  %v2354_v2 = vld [vmem:[%s3473_s1 + $0x204] ss:$16 sps:$4 sm:$0xff]  }
  0x17   :  { %1615 = vmatpush1.bf16.msra.mxu0 %v2288_v22  ;;  %1779 = vmatpush1.bf16.msra.mxu1 %v2289_v23  ;;  %v2357_v3 = vld [vmem:[%s3473_s1 + $0x20c] ss:$16 sps:$4 sm:$0xff]   ;;  %v2352_v5 = vld [vmem:[%s3473_s1 + $0x200] ss:$16 sps:$4 sm:$0xff]   ;;  %v2355_v6 = vld [vmem:[%s3473_s1 + $0x208] ss:$16 sps:$4 sm:$0xff]  }
  0x18   :  { %1616 = vmatprep.subr.bf16.mxu0 %v2290_v24  ;;  %1780 = vmatprep.subr.bf16.mxu1 %v2292_v25  ;;  %v2360_v7 = vld [vmem:[%s3473_s1 + $0x224] ss:$16 sps:$4 sm:$0xff]   ;;  %v2363_v8 = vld [vmem:[%s3473_s1 + $0x22c] ss:$16 sps:$4 sm:$0xff]   ;;  %v2358_v9 = vld [vmem:[%s3473_s1 + $0x220] ss:$16 sps:$4 sm:$0xff]  }
  0x19   :  { %v2361_v10 = vld [vmem:[%s3473_s1 + $0x228] ss:$16 sps:$4 sm:$0xff]   ;;  %v2366_v11 = vld [vmem:[%s3473_s1 + $0x244] ss:$16 sps:$4 sm:$0xff]   ;;  %v2369_v12 = vld [vmem:[%s3473_s1 + $0x24c] ss:$16 sps:$4 sm:$0xff]  }
  0x1a   :  { %v2364_v13 = vld [vmem:[%s3473_s1 + $0x240] ss:$16 sps:$4 sm:$0xff]   ;;  %v2367_v14 = vld [vmem:[%s3473_s1 + $0x248] ss:$16 sps:$4 sm:$0xff]   ;;  %v2372_v15 = vld [vmem:[%s3473_s1 + $0x264] ss:$16 sps:$4 sm:$0xff]  }
  0x1b   :  { %1617 = vmatpush1.bf16.msra.mxu0 %v2294_v26  ;;  %1781 = vmatpush1.bf16.msra.mxu1 %v2295_v27  ;;  %v2375_v16 = vld [vmem:[%s3473_s1 + $0x26c] ss:$16 sps:$4 sm:$0xff]   ;;  %v2370_v17 = vld [vmem:[%s3473_s1 + $0x260] ss:$16 sps:$4 sm:$0xff]   ;;  %v2373_v18 = vld [vmem:[%s3473_s1 + $0x268] ss:$16 sps:$4 sm:$0xff]  }
  0x1c   :  { %1618 = vmatprep.subr.bf16.mxu0 %v2296_v28  ;;  %1782 = vmatprep.subr.bf16.mxu1 %v2298_v29  ;;  %v2378_v19 = vld [vmem:[%s3473_s1 + $0x284] ss:$16 sps:$4 sm:$0xff]   ;;  %v2381_v20 = vld [vmem:[%s3473_s1 + $0x28c] ss:$16 sps:$4 sm:$0xff]   ;;  %v2376_v21 = vld [vmem:[%s3473_s1 + $0x280] ss:$16 sps:$4 sm:$0xff]  }
  0x1d   :  { %v2379_v22 = vld [vmem:[%s3473_s1 + $0x288] ss:$16 sps:$4 sm:$0xff]   ;;  %v2384_v23 = vld [vmem:[%s3473_s1 + $0x2a4] ss:$16 sps:$4 sm:$0xff]   ;;  %v2387_v24 = vld [vmem:[%s3473_s1 + $0x2ac] ss:$16 sps:$4 sm:$0xff]  }
  0x1e   :  { %v2382_v25 = vld [vmem:[%s3473_s1 + $0x2a0] ss:$16 sps:$4 sm:$0xff]   ;;  %v2385_v26 = vld [vmem:[%s3473_s1 + $0x2a8] ss:$16 sps:$4 sm:$0xff]   ;;  %v2390_v27 = vld [vmem:[%s3473_s1 + $0x2c4] ss:$16 sps:$4 sm:$0xff]  }
  0x1f   :  { %1619 = vmatpush1.bf16.msra.mxu0 %v2300_v30  ;;  %1783 = vmatpush1.bf16.msra.mxu1 %v2301_v31  ;;  %v2393_v28 = vld [vmem:[%s3473_s1 + $0x2cc] ss:$16 sps:$4 sm:$0xff]   ;;  %v2388_v31 = vld [vmem:[%s3473_s1 + $0x2c0] ss:$16 sps:$4 sm:$0xff]   ;;  %v2415_v48 = vld [vmem:[%s3473_s1 + $0x348] ss:$16 sps:$4 sm:$0xff]  }
  0x20   :  { %1620 = vmatprep.subr.bf16.mxu0 %v2302_v32  ;;  %1784 = vmatprep.subr.bf16.mxu1 %v2304_v33  ;;  %v2942_v29 = vld [vmem:[%s3474_s0 + $0x8] sm:$0xff]  ;;  %v2396_v33 = vld [vmem:[%s3473_s1 + $0x2e4] ss:$16 sps:$4 sm:$0xff]  }
  0x21   :  { %v1961_v30 = vcombine.high %v2942_v29, %v2942_v29  ;;  %v2391_v32 = vld [vmem:[%s3473_s1 + $0x2c8] ss:$16 sps:$4 sm:$0xff]   ;;  %v2417_v46 = vld [vmem:[%s3473_s1 + $0x34c] ss:$16 sps:$4 sm:$0xff]  }
  0x23   :  { %1621 = vmatpush1.bf16.msra.mxu0 %v2306_v34  ;;  %1785 = vmatpush1.bf16.msra.mxu1 %v2307_v35  ;;  %v2399_v34 = vld [vmem:[%s3473_s1 + $0x2ec] ss:$16 sps:$4 sm:$0xff]   ;;  %v2394_v35 = vld [vmem:[%s3473_s1 + $0x2e0] ss:$16 sps:$4 sm:$0xff]  }
  0x24   :  { %1622 = vmatprep.subr.bf16.mxu0 %v2308_v36  ;;  %1786 = vmatprep.subr.bf16.mxu1 %v2310_v37  ;;  %v2397_v36 = vld [vmem:[%s3473_s1 + $0x2e8] ss:$16 sps:$4 sm:$0xff]   ;;  %v2402_v37 = vld [vmem:[%s3473_s1 + $0x304] ss:$16 sps:$4 sm:$0xff]  }
  0x27   :  { %1623 = vmatpush1.bf16.msra.mxu0 %v2312_v38  ;;  %1787 = vmatpush1.bf16.msra.mxu1 %v2313_v39  ;;  %v2405_v38 = vld [vmem:[%s3473_s1 + $0x30c] ss:$16 sps:$4 sm:$0xff]   ;;  %v2400_v39 = vld [vmem:[%s3473_s1 + $0x300] ss:$16 sps:$4 sm:$0xff]  }
  0x28   :  { %1624 = vmatprep.subr.bf16.mxu0 %v2314_v40  ;;  %1788 = vmatprep.subr.bf16.mxu1 %v2316_v41  ;;  %v2403_v40 = vld [vmem:[%s3473_s1 + $0x308] ss:$16 sps:$4 sm:$0xff]   ;;  %v2408_v41 = vld [vmem:[%s3473_s1 + $0x324] ss:$16 sps:$4 sm:$0xff]  }
  0x2b   :  { %1625 = vmatpush1.bf16.msra.mxu0 %v2318_v42  ;;  %1789 = vmatpush1.bf16.msra.mxu1 %v2319_v43  ;;  %v2411_v42 = vld [vmem:[%s3473_s1 + $0x32c] ss:$16 sps:$4 sm:$0xff]   ;;  %v2406_v43 = vld [vmem:[%s3473_s1 + $0x320] ss:$16 sps:$4 sm:$0xff]  }
  0x2c   :  { %1626 = vmatprep.subr.bf16.mxu0 %v2320_v44  ;;  %1790 = vmatprep.subr.bf16.mxu1 %v2322_v45  ;;  %v2409_v44 = vld [vmem:[%s3473_s1 + $0x328] ss:$16 sps:$4 sm:$0xff]   ;;  %v2414_v45 = vld [vmem:[%s3473_s1 + $0x344] ss:$16 sps:$4 sm:$0xff]  }
  0x2f   :  { %1627 = vmatpush1.bf16.msra.mxu0 %v2324_v47  ;;  %1791 = vmatpush1.bf16.msra.mxu1 %v2325_v49  ;;  %v2412_v47 = vld [vmem:[%s3473_s1 + $0x340] ss:$16 sps:$4 sm:$0xff]   ;;  %v2420_v49 = vld [vmem:[%s3473_s1 + $0x364] ss:$16 sps:$4 sm:$0xff]  }
  0x30   :  { %1628 = vmatprep.subr.bf16.mxu0 %v2326_v50  ;;  %1792 = vmatprep.subr.bf16.mxu1 %v2328_v51  ;;  %v2423_v50 = vld [vmem:[%s3473_s1 + $0x36c] ss:$16 sps:$4 sm:$0xff]   ;;  %v2418_v51 = vld [vmem:[%s3473_s1 + $0x360] ss:$16 sps:$4 sm:$0xff]  }
  0x33   :  { %1629 = vmatpush1.bf16.msra.mxu0 %v2330_v52  ;;  %1793 = vmatpush1.bf16.msra.mxu1 %v2331_v53  ;;  %v2421_v52 = vld [vmem:[%s3473_s1 + $0x368] ss:$16 sps:$4 sm:$0xff]   ;;  %v2426_v53 = vld [vmem:[%s3473_s1 + $0x384] ss:$16 sps:$4 sm:$0xff]  }
  0x34   :  { %1630 = vmatprep.subr.bf16.mxu0 %v2332_v54  ;;  %1794 = vmatprep.subr.bf16.mxu1 %v2334_v55  ;;  %v2429_v54 = vld [vmem:[%s3473_s1 + $0x38c] ss:$16 sps:$4 sm:$0xff]   ;;  %v2424_v55 = vld [vmem:[%s3473_s1 + $0x380] ss:$16 sps:$4 sm:$0xff]  }
  0x37   :  { %1631 = vmatpush1.bf16.msra.mxu0 %v2336_v56  ;;  %1795 = vmatpush1.bf16.msra.mxu1 %v2337_v57  ;;  %v2427_v56 = vld [vmem:[%s3473_s1 + $0x388] ss:$16 sps:$4 sm:$0xff]   ;;  %v2432_v57 = vld [vmem:[%s3473_s1 + $0x3a4] ss:$16 sps:$4 sm:$0xff]  }
  0x38   :  { %1632 = vmatprep.subr.bf16.mxu0 %v2338_v58  ;;  %1796 = vmatprep.subr.bf16.mxu1 %v2340_v59  ;;  %v2435_v58 = vld [vmem:[%s3473_s1 + $0x3ac] ss:$16 sps:$4 sm:$0xff]   ;;  %v2430_v59 = vld [vmem:[%s3473_s1 + $0x3a0] ss:$16 sps:$4 sm:$0xff]  }
  0x3b   :  { %1633 = vmatpush1.bf16.msra.mxu0 %v2342_v60  ;;  %1797 = vmatpush1.bf16.msra.mxu1 %v2343_v61  ;;  %v2433_v60 = vld [vmem:[%s3473_s1 + $0x3a8] ss:$16 sps:$4 sm:$0xff]   ;;  %v2438_v61 = vld [vmem:[%s3473_s1 + $0x3c4] ss:$16 sps:$4 sm:$0xff]  }
  0x3c   :  { %1634 = vmatprep.subr.bf16.mxu0 %v2344_v62  ;;  %1798 = vmatprep.subr.bf16.mxu1 %v2346_v63  ;;  %v2441_v62 = vld [vmem:[%s3473_s1 + $0x3cc] ss:$16 sps:$4 sm:$0xff]   ;;  %v2436_v63 = vld [vmem:[%s3473_s1 + $0x3c0] ss:$16 sps:$4 sm:$0xff]  }
  0x3f   :  { %1635 = vmatpush1.bf16.msra.mxu0 %v2348_v0  ;;  %1799 = vmatpush1.bf16.msra.mxu1 %v2349_v1  ;;  %v2439_v0 = vld [vmem:[%s3473_s1 + $0x3c8] ss:$16 sps:$4 sm:$0xff]   ;;  %v2444_v1 = vld [vmem:[%s3473_s1 + $0x3e4] ss:$16 sps:$4 sm:$0xff]  }
  0x40   :  { %1645 = vmatprep.subr.bf16.mxu0 %v2354_v2  ;;  %1809 = vmatprep.subr.bf16.mxu1 %v2357_v3  ;;  %v2447_v2 = vld [vmem:[%s3473_s1 + $0x3ec] ss:$16 sps:$4 sm:$0xff]   ;;  %v2442_v3 = vld [vmem:[%s3473_s1 + $0x3e0] ss:$16 sps:$4 sm:$0xff]  }
  0x42   :  { %1637 = vmatmul.mubr.bf16.vlgmr.msra.gmra.mrb[0].mxu0 %v1958_v4  ;;  %1801 = vmatmul.mubr.bf16.vlgmr.msra.gmra.mrb[0].mxu1 %v1958_v4  ;;  %v2445_v4 = vld [vmem:[%s3473_s1 + $0x3e8] ss:$16 sps:$4 sm:$0xff]  }
  0x43   :  { %1646 = vmatpush1.bf16.msra.mxu0 %v2352_v5  ;;  %1810 = vmatpush1.bf16.msra.mxu1 %v2355_v6  ;;  %v2452_v5 = vld [vmem:[%s3473_s1 + $0x404] ss:$16 sps:$4 sm:$0xff]   ;;  %v2455_v6 = vld [vmem:[%s3473_s1 + $0x40c] ss:$16 sps:$4 sm:$0xff]  }
  0x44   :  { %1647 = vmatprep.subr.bf16.mxu0 %v2360_v7  ;;  %1811 = vmatprep.subr.bf16.mxu1 %v2363_v8  ;;  %v1960_v7 = vcombine.low %v2942_v29, %v2942_v29  ;;  %v2450_v8 = vld [vmem:[%s3473_s1 + $0x400] ss:$16 sps:$4 sm:$0xff]   ;;  %v2485_v29 = vld [vmem:[%s3473_s1 + $0x4ac] ss:$16 sps:$4 sm:$0xff]  }
  0x45   :  { %1677 = vmatprep.mubr.bf16.mxu0 %v1961_v30  ;;  %1841 = vmatprep.mubr.bf16.mxu1 %v1961_v30  ;;  %v2480_v30 = vld [vmem:[%s3473_s1 + $0x4a0] ss:$16 sps:$4 sm:$0xff]  }
  0x47   :  { %1648 = vmatpush1.bf16.msra.mxu0 %v2358_v9  ;;  %1812 = vmatpush1.bf16.msra.mxu1 %v2361_v10  ;;  %v2453_v9 = vld [vmem:[%s3473_s1 + $0x408] ss:$16 sps:$4 sm:$0xff]   ;;  %v2458_v10 = vld [vmem:[%s3473_s1 + $0x424] ss:$16 sps:$4 sm:$0xff]  }
  0x48   :  { %1649 = vmatprep.subr.bf16.mxu0 %v2366_v11  ;;  %1813 = vmatprep.subr.bf16.mxu1 %v2369_v12  ;;  %v3080_v11 = vld [vmem:[%s3474_s0 + $0x10] sm:$0xff]  ;;  %v2461_v12 = vld [vmem:[%s3473_s1 + $0x42c] ss:$16 sps:$4 sm:$0xff]  }
  0x4b   :  { %1650 = vmatpush1.bf16.msra.mxu0 %v2364_v13  ;;  %1814 = vmatpush1.bf16.msra.mxu1 %v2367_v14  ;;  %v1963_v13 = vcombine.high %v3080_v11, %v3080_v11  ;;  %v2456_v14 = vld [vmem:[%s3473_s1 + $0x420] ss:$16 sps:$4 sm:$0xff]  }
  0x4c   :  { %1651 = vmatprep.subr.bf16.mxu0 %v2372_v15  ;;  %1815 = vmatprep.subr.bf16.mxu1 %v2375_v16  ;;  %v2459_v15 = vld [vmem:[%s3473_s1 + $0x428] ss:$16 sps:$4 sm:$0xff]   ;;  %v2464_v16 = vld [vmem:[%s3473_s1 + $0x444] ss:$16 sps:$4 sm:$0xff]  }
  0x4f   :  { %1652 = vmatpush1.bf16.msra.mxu0 %v2370_v17  ;;  %1816 = vmatpush1.bf16.msra.mxu1 %v2373_v18  ;;  %v2467_v17 = vld [vmem:[%s3473_s1 + $0x44c] ss:$16 sps:$4 sm:$0xff]   ;;  %v2462_v18 = vld [vmem:[%s3473_s1 + $0x440] ss:$16 sps:$4 sm:$0xff]  }
  0x50   :  { %1653 = vmatprep.subr.bf16.mxu0 %v2378_v19  ;;  %1817 = vmatprep.subr.bf16.mxu1 %v2381_v20  ;;  %v2465_v19 = vld [vmem:[%s3473_s1 + $0x448] ss:$16 sps:$4 sm:$0xff]   ;;  %v2470_v20 = vld [vmem:[%s3473_s1 + $0x464] ss:$16 sps:$4 sm:$0xff]  }
  0x53   :  { %1654 = vmatpush1.bf16.msra.mxu0 %v2376_v21  ;;  %1818 = vmatpush1.bf16.msra.mxu1 %v2379_v22  ;;  %v2473_v21 = vld [vmem:[%s3473_s1 + $0x46c] ss:$16 sps:$4 sm:$0xff]   ;;  %v2468_v22 = vld [vmem:[%s3473_s1 + $0x460] ss:$16 sps:$4 sm:$0xff]  }
  0x54   :  { %1655 = vmatprep.subr.bf16.mxu0 %v2384_v23  ;;  %1819 = vmatprep.subr.bf16.mxu1 %v2387_v24  ;;  %v2471_v23 = vld [vmem:[%s3473_s1 + $0x468] ss:$16 sps:$4 sm:$0xff]   ;;  %v2476_v24 = vld [vmem:[%s3473_s1 + $0x484] ss:$16 sps:$4 sm:$0xff]  }
  0x57   :  { %1656 = vmatpush1.bf16.msra.mxu0 %v2382_v25  ;;  %1820 = vmatpush1.bf16.msra.mxu1 %v2385_v26  ;;  %v2479_v25 = vld [vmem:[%s3473_s1 + $0x48c] ss:$16 sps:$4 sm:$0xff]   ;;  %v2474_v26 = vld [vmem:[%s3473_s1 + $0x480] ss:$16 sps:$4 sm:$0xff]  }
  0x58   :  { %1657 = vmatprep.subr.bf16.mxu0 %v2390_v27  ;;  %1821 = vmatprep.subr.bf16.mxu1 %v2393_v28  ;;  %v2477_v27 = vld [vmem:[%s3473_s1 + $0x488] ss:$16 sps:$4 sm:$0xff]   ;;  %v2482_v28 = vld [vmem:[%s3473_s1 + $0x4a4] ss:$16 sps:$4 sm:$0xff]  }
  0x5b   :  { %1658 = vmatpush1.bf16.msra.mxu0 %v2388_v31  ;;  %1822 = vmatpush1.bf16.msra.mxu1 %v2391_v32  ;;  %v2483_v31 = vld [vmem:[%s3473_s1 + $0x4a8] ss:$16 sps:$4 sm:$0xff]   ;;  %v2488_v32 = vld [vmem:[%s3473_s1 + $0x4c4] ss:$16 sps:$4 sm:$0xff]  }
  0x5c   :  { %1659 = vmatprep.subr.bf16.mxu0 %v2396_v33  ;;  %1823 = vmatprep.subr.bf16.mxu1 %v2399_v34  ;;  %v2491_v33 = vld [vmem:[%s3473_s1 + $0x4cc] ss:$16 sps:$4 sm:$0xff]   ;;  %v2486_v34 = vld [vmem:[%s3473_s1 + $0x4c0] ss:$16 sps:$4 sm:$0xff]  }
  0x5f   :  { %1660 = vmatpush1.bf16.msra.mxu0 %v2394_v35  ;;  %1824 = vmatpush1.bf16.msra.mxu1 %v2397_v36  ;;  %v2489_v35 = vld [vmem:[%s3473_s1 + $0x4c8] ss:$16 sps:$4 sm:$0xff]   ;;  %v2494_v36 = vld [vmem:[%s3473_s1 + $0x4e4] ss:$16 sps:$4 sm:$0xff]  }
  0x60   :  { %1661 = vmatprep.subr.bf16.mxu0 %v2402_v37  ;;  %1825 = vmatprep.subr.bf16.mxu1 %v2405_v38  ;;  %v2497_v37 = vld [vmem:[%s3473_s1 + $0x4ec] ss:$16 sps:$4 sm:$0xff]   ;;  %v2492_v38 = vld [vmem:[%s3473_s1 + $0x4e0] ss:$16 sps:$4 sm:$0xff]  }
  0x63   :  { %1662 = vmatpush1.bf16.msra.mxu0 %v2400_v39  ;;  %1826 = vmatpush1.bf16.msra.mxu1 %v2403_v40  ;;  %v2495_v39 = vld [vmem:[%s3473_s1 + $0x4e8] ss:$16 sps:$4 sm:$0xff]   ;;  %v2500_v40 = vld [vmem:[%s3473_s1 + $0x504] ss:$16 sps:$4 sm:$0xff]  }
  0x64   :  { %1663 = vmatprep.subr.bf16.mxu0 %v2408_v41  ;;  %1827 = vmatprep.subr.bf16.mxu1 %v2411_v42  ;;  %v2503_v41 = vld [vmem:[%s3473_s1 + $0x50c] ss:$16 sps:$4 sm:$0xff]   ;;  %v2498_v42 = vld [vmem:[%s3473_s1 + $0x500] ss:$16 sps:$4 sm:$0xff]  }
  0x67   :  { %1664 = vmatpush1.bf16.msra.mxu0 %v2406_v43  ;;  %1828 = vmatpush1.bf16.msra.mxu1 %v2409_v44  ;;  %v2501_v43 = vld [vmem:[%s3473_s1 + $0x508] ss:$16 sps:$4 sm:$0xff]   ;;  %v2506_v44 = vld [vmem:[%s3473_s1 + $0x524] ss:$16 sps:$4 sm:$0xff]  }
  0x68   :  { %1665 = vmatprep.subr.bf16.mxu0 %v2414_v45  ;;  %1829 = vmatprep.subr.bf16.mxu1 %v2417_v46  ;;  %v2509_v45 = vld [vmem:[%s3473_s1 + $0x52c] ss:$16 sps:$4 sm:$0xff]   ;;  %v2504_v46 = vld [vmem:[%s3473_s1 + $0x520] ss:$16 sps:$4 sm:$0xff]  }
  0x6b   :  { %1666 = vmatpush1.bf16.msra.mxu0 %v2412_v47  ;;  %1830 = vmatpush1.bf16.msra.mxu1 %v2415_v48  ;;  %v2507_v47 = vld [vmem:[%s3473_s1 + $0x528] ss:$16 sps:$4 sm:$0xff]   ;;  %v2512_v48 = vld [vmem:[%s3473_s1 + $0x544] ss:$16 sps:$4 sm:$0xff]  }
  0x6c   :  { %1667 = vmatprep.subr.bf16.mxu0 %v2420_v49  ;;  %1831 = vmatprep.subr.bf16.mxu1 %v2423_v50  ;;  %v2515_v49 = vld [vmem:[%s3473_s1 + $0x54c] ss:$16 sps:$4 sm:$0xff]   ;;  %v2510_v50 = vld [vmem:[%s3473_s1 + $0x540] ss:$16 sps:$4 sm:$0xff]  }
  0x6f   :  { %1668 = vmatpush1.bf16.msra.mxu0 %v2418_v51  ;;  %1832 = vmatpush1.bf16.msra.mxu1 %v2421_v52  ;;  %v2513_v51 = vld [vmem:[%s3473_s1 + $0x548] ss:$16 sps:$4 sm:$0xff]   ;;  %v2518_v52 = vld [vmem:[%s3473_s1 + $0x564] ss:$16 sps:$4 sm:$0xff]  }
  0x70   :  { %1669 = vmatprep.subr.bf16.mxu0 %v2426_v53  ;;  %1833 = vmatprep.subr.bf16.mxu1 %v2429_v54  ;;  %v2521_v53 = vld [vmem:[%s3473_s1 + $0x56c] ss:$16 sps:$4 sm:$0xff]   ;;  %v2516_v54 = vld [vmem:[%s3473_s1 + $0x560] ss:$16 sps:$4 sm:$0xff]  }
  0x73   :  { %1670 = vmatpush1.bf16.msra.mxu0 %v2424_v55  ;;  %1834 = vmatpush1.bf16.msra.mxu1 %v2427_v56  ;;  %v2519_v55 = vld [vmem:[%s3473_s1 + $0x568] ss:$16 sps:$4 sm:$0xff]   ;;  %v2524_v56 = vld [vmem:[%s3473_s1 + $0x584] ss:$16 sps:$4 sm:$0xff]  }
  0x74   :  { %1671 = vmatprep.subr.bf16.mxu0 %v2432_v57  ;;  %1835 = vmatprep.subr.bf16.mxu1 %v2435_v58  ;;  %v2527_v57 = vld [vmem:[%s3473_s1 + $0x58c] ss:$16 sps:$4 sm:$0xff]   ;;  %v2522_v58 = vld [vmem:[%s3473_s1 + $0x580] ss:$16 sps:$4 sm:$0xff]  }
  0x77   :  { %1672 = vmatpush1.bf16.msra.mxu0 %v2430_v59  ;;  %1836 = vmatpush1.bf16.msra.mxu1 %v2433_v60  ;;  %v2525_v59 = vld [vmem:[%s3473_s1 + $0x588] ss:$16 sps:$4 sm:$0xff]   ;;  %v2530_v60 = vld [vmem:[%s3473_s1 + $0x5a4] ss:$16 sps:$4 sm:$0xff]  }
  0x78   :  { %1673 = vmatprep.subr.bf16.mxu0 %v2438_v61  ;;  %1837 = vmatprep.subr.bf16.mxu1 %v2441_v62  ;;  %v2533_v61 = vld [vmem:[%s3473_s1 + $0x5ac] ss:$16 sps:$4 sm:$0xff]   ;;  %v2528_v62 = vld [vmem:[%s3473_s1 + $0x5a0] ss:$16 sps:$4 sm:$0xff]  }
  0x7b   :  { %1674 = vmatpush1.bf16.msra.mxu0 %v2436_v63  ;;  %1838 = vmatpush1.bf16.msra.mxu1 %v2439_v0  ;;  %v2531_v63 = vld [vmem:[%s3473_s1 + $0x5a8] ss:$16 sps:$4 sm:$0xff]   ;;  %v2536_v0 = vld [vmem:[%s3473_s1 + $0x5c4] ss:$16 sps:$4 sm:$0xff]  }
  0x7c   :  { %1675 = vmatprep.subr.bf16.mxu0 %v2444_v1  ;;  %1839 = vmatprep.subr.bf16.mxu1 %v2447_v2  ;;  %v2539_v1 = vld [vmem:[%s3473_s1 + $0x5cc] ss:$16 sps:$4 sm:$0xff]   ;;  %v2534_v2 = vld [vmem:[%s3473_s1 + $0x5c0] ss:$16 sps:$4 sm:$0xff]  }
  0x7f   :  { %1676 = vmatpush1.bf16.msra.mxu0 %v2442_v3  ;;  %1840 = vmatpush1.bf16.msra.mxu1 %v2445_v4  ;;  %v2537_v3 = vld [vmem:[%s3473_s1 + $0x5c8] ss:$16 sps:$4 sm:$0xff]   ;;  %v2542_v4 = vld [vmem:[%s3473_s1 + $0x5e4] ss:$16 sps:$4 sm:$0xff]  }
  0x80   :  { %1686 = vmatprep.subr.bf16.mxu0 %v2452_v5  ;;  %1850 = vmatprep.subr.bf16.mxu1 %v2455_v6  ;;  %v2545_v5 = vld [vmem:[%s3473_s1 + $0x5ec] ss:$16 sps:$4 sm:$0xff]   ;;  %v2540_v6 = vld [vmem:[%s3473_s1 + $0x5e0] ss:$16 sps:$4 sm:$0xff]  }
  0x82   :  { %1678 = vmatmul.mubr.bf16.vlgmr.msra.gmra.mrb[0].mxu0 %v1960_v7  ;;  %1842 = vmatmul.mubr.bf16.vlgmr.msra.gmra.mrb[0].mxu1 %v1960_v7  ;;  %v2543_v7 = vld [vmem:[%s3473_s1 + $0x5e8] ss:$16 sps:$4 sm:$0xff]  }
  0x83   :  { %1687 = vmatpush1.bf16.msra.mxu0 %v2450_v8  ;;  %1851 = vmatpush1.bf16.msra.mxu1 %v2453_v9  ;;  %v2550_v8 = vld [vmem:[%s3473_s1 + $0x604] ss:$16 sps:$4 sm:$0xff]   ;;  %v2553_v9 = vld [vmem:[%s3473_s1 + $0x60c] ss:$16 sps:$4 sm:$0xff]  }
  0x84   :  { %1688 = vmatprep.subr.bf16.mxu0 %v2458_v10  ;;  %1852 = vmatprep.subr.bf16.mxu1 %v2461_v12  ;;  %v1962_v10 = vcombine.low %v3080_v11, %v3080_v11  ;;  %v3272_v12 = vld [vmem:[%s3474_s0 + $0x18] sm:$0xff]  ;;  %v2556_v11 = vld [vmem:[%s3473_s1 + $0x624] ss:$16 sps:$4 sm:$0xff]  }
  0x85   :  { %1718 = vmatprep.mubr.bf16.mxu0 %v1963_v13  ;;  %1882 = vmatprep.mubr.bf16.mxu1 %v1963_v13  ;;  %v2548_v13 = vld [vmem:[%s3473_s1 + $0x600] ss:$16 sps:$4 sm:$0xff]  }
  0x87   :  { %1689 = vmatpush1.bf16.msra.mxu0 %v2456_v14  ;;  %1853 = vmatpush1.bf16.msra.mxu1 %v2459_v15  ;;  %v2551_v14 = vld [vmem:[%s3473_s1 + $0x608] ss:$16 sps:$4 sm:$0xff]   ;;  %v2559_v15 = vld [vmem:[%s3473_s1 + $0x62c] ss:$16 sps:$4 sm:$0xff]  }
  0x88   :  { %1690 = vmatprep.subr.bf16.mxu0 %v2464_v16  ;;  %1854 = vmatprep.subr.bf16.mxu1 %v2467_v17  ;;  %v1965_v16 = vcombine.high %v3272_v12, %v3272_v12  ;;  %v2554_v17 = vld [vmem:[%s3473_s1 + $0x620] ss:$16 sps:$4 sm:$0xff]  }
  0x8b   :  { %1691 = vmatpush1.bf16.msra.mxu0 %v2462_v18  ;;  %1855 = vmatpush1.bf16.msra.mxu1 %v2465_v19  ;;  %v2557_v18 = vld [vmem:[%s3473_s1 + $0x628] ss:$16 sps:$4 sm:$0xff]   ;;  %v2562_v19 = vld [vmem:[%s3473_s1 + $0x644] ss:$16 sps:$4 sm:$0xff]  }
  0x8c   :  { %1692 = vmatprep.subr.bf16.mxu0 %v2470_v20  ;;  %1856 = vmatprep.subr.bf16.mxu1 %v2473_v21  ;;  %v2565_v20 = vld [vmem:[%s3473_s1 + $0x64c] ss:$16 sps:$4 sm:$0xff]   ;;  %v2560_v21 = vld [vmem:[%s3473_s1 + $0x640] ss:$16 sps:$4 sm:$0xff]  }
  0x8f   :  { %1693 = vmatpush1.bf16.msra.mxu0 %v2468_v22  ;;  %1857 = vmatpush1.bf16.msra.mxu1 %v2471_v23  ;;  %v2563_v22 = vld [vmem:[%s3473_s1 + $0x648] ss:$16 sps:$4 sm:$0xff]   ;;  %v2568_v23 = vld [vmem:[%s3473_s1 + $0x664] ss:$16 sps:$4 sm:$0xff]  }
  0x90   :  { %1694 = vmatprep.subr.bf16.mxu0 %v2476_v24  ;;  %1858 = vmatprep.subr.bf16.mxu1 %v2479_v25  ;;  %v2571_v24 = vld [vmem:[%s3473_s1 + $0x66c] ss:$16 sps:$4 sm:$0xff]   ;;  %v2566_v25 = vld [vmem:[%s3473_s1 + $0x660] ss:$16 sps:$4 sm:$0xff]  }
  0x93   :  { %1695 = vmatpush1.bf16.msra.mxu0 %v2474_v26  ;;  %1859 = vmatpush1.bf16.msra.mxu1 %v2477_v27  ;;  %v2569_v26 = vld [vmem:[%s3473_s1 + $0x668] ss:$16 sps:$4 sm:$0xff]   ;;  %v2574_v27 = vld [vmem:[%s3473_s1 + $0x684] ss:$16 sps:$4 sm:$0xff]  }
  0x94   :  { %1696 = vmatprep.subr.bf16.mxu0 %v2482_v28  ;;  %1860 = vmatprep.subr.bf16.mxu1 %v2485_v29  ;;  %v2577_v28 = vld [vmem:[%s3473_s1 + $0x68c] ss:$16 sps:$4 sm:$0xff]   ;;  %v2572_v29 = vld [vmem:[%s3473_s1 + $0x680] ss:$16 sps:$4 sm:$0xff]  }
  0x97   :  { %1697 = vmatpush1.bf16.msra.mxu0 %v2480_v30  ;;  %1861 = vmatpush1.bf16.msra.mxu1 %v2483_v31  ;;  %v2575_v30 = vld [vmem:[%s3473_s1 + $0x688] ss:$16 sps:$4 sm:$0xff]   ;;  %v2580_v31 = vld [vmem:[%s3473_s1 + $0x6a4] ss:$16 sps:$4 sm:$0xff]  }
  0x98   :  { %1698 = vmatprep.subr.bf16.mxu0 %v2488_v32  ;;  %1862 = vmatprep.subr.bf16.mxu1 %v2491_v33  ;;  %v2583_v32 = vld [vmem:[%s3473_s1 + $0x6ac] ss:$16 sps:$4 sm:$0xff]   ;;  %v2578_v33 = vld [vmem:[%s3473_s1 + $0x6a0] ss:$16 sps:$4 sm:$0xff]  }
  0x9b   :  { %1699 = vmatpush1.bf16.msra.mxu0 %v2486_v34  ;;  %1863 = vmatpush1.bf16.msra.mxu1 %v2489_v35  ;;  %v2581_v34 = vld [vmem:[%s3473_s1 + $0x6a8] ss:$16 sps:$4 sm:$0xff]   ;;  %v2586_v35 = vld [vmem:[%s3473_s1 + $0x6c4] ss:$16 sps:$4 sm:$0xff]  }
  0x9c   :  { %1700 = vmatprep.subr.bf16.mxu0 %v2494_v36  ;;  %1864 = vmatprep.subr.bf16.mxu1 %v2497_v37  ;;  %v2589_v36 = vld [vmem:[%s3473_s1 + $0x6cc] ss:$16 sps:$4 sm:$0xff]   ;;  %v2584_v37 = vld [vmem:[%s3473_s1 + $0x6c0] ss:$16 sps:$4 sm:$0xff]  }
  0x9f   :  { %1701 = vmatpush1.bf16.msra.mxu0 %v2492_v38  ;;  %1865 = vmatpush1.bf16.msra.mxu1 %v2495_v39  ;;  %v2587_v38 = vld [vmem:[%s3473_s1 + $0x6c8] ss:$16 sps:$4 sm:$0xff]   ;;  %v2592_v39 = vld [vmem:[%s3473_s1 + $0x6e4] ss:$16 sps:$4 sm:$0xff]  }
  0xa0   :  { %1702 = vmatprep.subr.bf16.mxu0 %v2500_v40  ;;  %1866 = vmatprep.subr.bf16.mxu1 %v2503_v41  ;;  %v2595_v40 = vld [vmem:[%s3473_s1 + $0x6ec] ss:$16 sps:$4 sm:$0xff]   ;;  %v2590_v41 = vld [vmem:[%s3473_s1 + $0x6e0] ss:$16 sps:$4 sm:$0xff]  }
  0xa3   :  { %1703 = vmatpush1.bf16.msra.mxu0 %v2498_v42  ;;  %1867 = vmatpush1.bf16.msra.mxu1 %v2501_v43  ;;  %v2593_v42 = vld [vmem:[%s3473_s1 + $0x6e8] ss:$16 sps:$4 sm:$0xff]   ;;  %v2598_v43 = vld [vmem:[%s3473_s1 + $0x704] ss:$16 sps:$4 sm:$0xff]  }
  0xa4   :  { %1704 = vmatprep.subr.bf16.mxu0 %v2506_v44  ;;  %1868 = vmatprep.subr.bf16.mxu1 %v2509_v45  ;;  %v2601_v44 = vld [vmem:[%s3473_s1 + $0x70c] ss:$16 sps:$4 sm:$0xff]   ;;  %v2596_v45 = vld [vmem:[%s3473_s1 + $0x700] ss:$16 sps:$4 sm:$0xff]  }
  0xa7   :  { %1705 = vmatpush1.bf16.msra.mxu0 %v2504_v46  ;;  %1869 = vmatpush1.bf16.msra.mxu1 %v2507_v47  ;;  %v2599_v46 = vld [vmem:[%s3473_s1 + $0x708] ss:$16 sps:$4 sm:$0xff]   ;;  %v2604_v47 = vld [vmem:[%s3473_s1 + $0x724] ss:$16 sps:$4 sm:$0xff]  }
  0xa8   :  { %1706 = vmatprep.subr.bf16.mxu0 %v2512_v48  ;;  %1870 = vmatprep.subr.bf16.mxu1 %v2515_v49  ;;  %v2607_v48 = vld [vmem:[%s3473_s1 + $0x72c] ss:$16 sps:$4 sm:$0xff]   ;;  %v2602_v49 = vld [vmem:[%s3473_s1 + $0x720] ss:$16 sps:$4 sm:$0xff]  }
  0xab   :  { %1707 = vmatpush1.bf16.msra.mxu0 %v2510_v50  ;;  %1871 = vmatpush1.bf16.msra.mxu1 %v2513_v51  ;;  %v2605_v50 = vld [vmem:[%s3473_s1 + $0x728] ss:$16 sps:$4 sm:$0xff]   ;;  %v2610_v51 = vld [vmem:[%s3473_s1 + $0x744] ss:$16 sps:$4 sm:$0xff]  }
  0xac   :  { %1708 = vmatprep.subr.bf16.mxu0 %v2518_v52  ;;  %1872 = vmatprep.subr.bf16.mxu1 %v2521_v53  ;;  %v2613_v52 = vld [vmem:[%s3473_s1 + $0x74c] ss:$16 sps:$4 sm:$0xff]   ;;  %v2608_v53 = vld [vmem:[%s3473_s1 + $0x740] ss:$16 sps:$4 sm:$0xff]  }
  0xaf   :  { %1709 = vmatpush1.bf16.msra.mxu0 %v2516_v54  ;;  %1873 = vmatpush1.bf16.msra.mxu1 %v2519_v55  ;;  %v2611_v54 = vld [vmem:[%s3473_s1 + $0x748] ss:$16 sps:$4 sm:$0xff]   ;;  %v2616_v55 = vld [vmem:[%s3473_s1 + $0x764] ss:$16 sps:$4 sm:$0xff]  }
  0xb0   :  { %1710 = vmatprep.subr.bf16.mxu0 %v2524_v56  ;;  %1874 = vmatprep.subr.bf16.mxu1 %v2527_v57  ;;  %v2619_v56 = vld [vmem:[%s3473_s1 + $0x76c] ss:$16 sps:$4 sm:$0xff]   ;;  %v2614_v57 = vld [vmem:[%s3473_s1 + $0x760] ss:$16 sps:$4 sm:$0xff]  }
  0xb3   :  { %1711 = vmatpush1.bf16.msra.mxu0 %v2522_v58  ;;  %1875 = vmatpush1.bf16.msra.mxu1 %v2525_v59  ;;  %v2617_v58 = vld [vmem:[%s3473_s1 + $0x768] ss:$16 sps:$4 sm:$0xff]   ;;  %v2622_v59 = vld [vmem:[%s3473_s1 + $0x784] ss:$16 sps:$4 sm:$0xff]  }
  0xb4   :  { %1712 = vmatprep.subr.bf16.mxu0 %v2530_v60  ;;  %1876 = vmatprep.subr.bf16.mxu1 %v2533_v61  ;;  %v2625_v60 = vld [vmem:[%s3473_s1 + $0x78c] ss:$16 sps:$4 sm:$0xff]   ;;  %v2620_v61 = vld [vmem:[%s3473_s1 + $0x780] ss:$16 sps:$4 sm:$0xff]  }
  0xb7   :  { %1713 = vmatpush1.bf16.msra.mxu0 %v2528_v62  ;;  %1877 = vmatpush1.bf16.msra.mxu1 %v2531_v63  ;;  %v2623_v62 = vld [vmem:[%s3473_s1 + $0x788] ss:$16 sps:$4 sm:$0xff]   ;;  %v2628_v63 = vld [vmem:[%s3473_s1 + $0x7a4] ss:$16 sps:$4 sm:$0xff]  }
  0xb8   :  { %1714 = vmatprep.subr.bf16.mxu0 %v2536_v0  ;;  %1878 = vmatprep.subr.bf16.mxu1 %v2539_v1  ;;  %v2631_v0 = vld [vmem:[%s3473_s1 + $0x7ac] ss:$16 sps:$4 sm:$0xff]   ;;  %v2626_v1 = vld [vmem:[%s3473_s1 + $0x7a0] ss:$16 sps:$4 sm:$0xff]  }
  0xbb   :  { %1715 = vmatpush1.bf16.msra.mxu0 %v2534_v2  ;;  %1879 = vmatpush1.bf16.msra.mxu1 %v2537_v3  ;;  %v2629_v2 = vld [vmem:[%s3473_s1 + $0x7a8] ss:$16 sps:$4 sm:$0xff]   ;;  %v2634_v3 = vld [vmem:[%s3473_s1 + $0x7c4] ss:$16 sps:$4 sm:$0xff]  }
  0xbc   :  { %1716 = vmatprep.subr.bf16.mxu0 %v2542_v4  ;;  %1880 = vmatprep.subr.bf16.mxu1 %v2545_v5  ;;  %v2637_v4 = vld [vmem:[%s3473_s1 + $0x7cc] ss:$16 sps:$4 sm:$0xff]   ;;  %v2632_v5 = vld [vmem:[%s3473_s1 + $0x7c0] ss:$16 sps:$4 sm:$0xff]  }
  0xbf   :  { %1717 = vmatpush1.bf16.msra.mxu0 %v2540_v6  ;;  %1881 = vmatpush1.bf16.msra.mxu1 %v2543_v7  ;;  %v2635_v6 = vld [vmem:[%s3473_s1 + $0x7c8] ss:$16 sps:$4 sm:$0xff]   ;;  %v2640_v7 = vld [vmem:[%s3473_s1 + $0x7e4] ss:$16 sps:$4 sm:$0xff]  }
  0xc0   :  { %1727 = vmatprep.subr.bf16.mxu0 %v2550_v8  ;;  %1891 = vmatprep.subr.bf16.mxu1 %v2553_v9  ;;  %v2643_v8 = vld [vmem:[%s3473_s1 + $0x7ec] ss:$16 sps:$4 sm:$0xff]   ;;  %v2638_v9 = vld [vmem:[%s3473_s1 + $0x7e0] ss:$16 sps:$4 sm:$0xff]  }
  0xc2   :  { %1719 = vmatmul.mubr.bf16.vlgmr.msra.gmra.mrb[0].mxu0 %v1962_v10  ;;  %1883 = vmatmul.mubr.bf16.vlgmr.msra.gmra.mrb[0].mxu1 %v1962_v10  ;;  %v2641_v10 = vld [vmem:[%s3473_s1 + $0x7e8] ss:$16 sps:$4 sm:$0xff]  }
  0xc3   :  { %1728 = vmatpush1.bf16.msra.mxu0 %v2548_v13  ;;  %1892 = vmatpush1.bf16.msra.mxu1 %v2551_v14  ;;  %v1964_v13 = vcombine.low %v3272_v12, %v3272_v12  ;;  %v276_v14 = vlaneseq }
  0xc4   :  { %1729 = vmatprep.subr.bf16.mxu0 %v2556_v11  ;;  %1893 = vmatprep.subr.bf16.mxu1 %v2559_v15 }
  0xc5   :  { %1759 = vmatprep.mubr.bf16.mxu0 %v1965_v16  ;;  %1923 = vmatprep.mubr.bf16.mxu1 %v1965_v16  ;;  %v277_v11 = vshrl.u32 %v276_v14, 7 }
  0xc7   :  { %1730 = vmatpush1.bf16.msra.mxu0 %v2554_v17  ;;  %1894 = vmatpush1.bf16.msra.mxu1 %v2557_v18  ;;  %v278_v15 = vsub.s32 0, %v277_v11  ;;  %v286_v16 = vsub.s32 2, %v277_v11  ;;  %v274_v17 = vld [vmem:[%s3475_s2] sm:$0xf]  ;;  %v282_v18 = vsub.s32 1, %v277_v11 }
  0xc8   :  { %1731 = vmatprep.subr.bf16.mxu0 %v2562_v19  ;;  %1895 = vmatprep.subr.bf16.mxu1 %v2565_v20  ;;  %v290_v19 = vsub.s32 3, %v277_v11 }
  0xc9   :  { %v279_v20 = vrot.slane %v274_v17, %v278_v15 }
  0xcb   :  { %1732 = vmatpush1.bf16.msra.mxu0 %v2560_v21  ;;  %1896 = vmatpush1.bf16.msra.mxu1 %v2563_v22  ;;  %v287_v21 = vrot.slane %v274_v17, %v286_v16  ;;  %v283_v22 = vrot.slane %v274_v17, %v282_v18 }
  0xcc   :  { %1733 = vmatprep.subr.bf16.mxu0 %v2568_v23  ;;  %1897 = vmatprep.subr.bf16.mxu1 %v2571_v24  ;;  %v291_v23 = vrot.slane %v274_v17, %v290_v19 }
  0xcf   :  { %1734 = vmatpush1.bf16.msra.mxu0 %v2566_v25  ;;  %1898 = vmatpush1.bf16.msra.mxu1 %v2569_v26 }
  0xd0   :  { %1735 = vmatprep.subr.bf16.mxu0 %v2574_v27  ;;  %1899 = vmatprep.subr.bf16.mxu1 %v2577_v28 }
  0xd3   :  { %1736 = vmatpush1.bf16.msra.mxu0 %v2572_v29  ;;  %1900 = vmatpush1.bf16.msra.mxu1 %v2575_v30 }
  0xd4   :  { %1737 = vmatprep.subr.bf16.mxu0 %v2580_v31  ;;  %1901 = vmatprep.subr.bf16.mxu1 %v2583_v32 }
  0xd7   :  { %1738 = vmatpush1.bf16.msra.mxu0 %v2578_v33  ;;  %1902 = vmatpush1.bf16.msra.mxu1 %v2581_v34 }
  0xd8   :  { %1739 = vmatprep.subr.bf16.mxu0 %v2586_v35  ;;  %1903 = vmatprep.subr.bf16.mxu1 %v2589_v36 }
  0xdb   :  { %1740 = vmatpush1.bf16.msra.mxu0 %v2584_v37  ;;  %1904 = vmatpush1.bf16.msra.mxu1 %v2587_v38 }
  0xdc   :  { %1741 = vmatprep.subr.bf16.mxu0 %v2592_v39  ;;  %1905 = vmatprep.subr.bf16.mxu1 %v2595_v40 }
  0xdf   :  { %1742 = vmatpush1.bf16.msra.mxu0 %v2590_v41  ;;  %1906 = vmatpush1.bf16.msra.mxu1 %v2593_v42 }
  0xe0   :  { %1743 = vmatprep.subr.bf16.mxu0 %v2598_v43  ;;  %1907 = vmatprep.subr.bf16.mxu1 %v2601_v44 }
  0xe3   :  { %1744 = vmatpush1.bf16.msra.mxu0 %v2596_v45  ;;  %1908 = vmatpush1.bf16.msra.mxu1 %v2599_v46 }
  0xe4   :  { %1745 = vmatprep.subr.bf16.mxu0 %v2604_v47  ;;  %1909 = vmatprep.subr.bf16.mxu1 %v2607_v48 }
  0xe7   :  { %1746 = vmatpush1.bf16.msra.mxu0 %v2602_v49  ;;  %1910 = vmatpush1.bf16.msra.mxu1 %v2605_v50 }
  0xe8   :  { %1747 = vmatprep.subr.bf16.mxu0 %v2610_v51  ;;  %1911 = vmatprep.subr.bf16.mxu1 %v2613_v52 }
  0xeb   :  { %1748 = vmatpush1.bf16.msra.mxu0 %v2608_v53  ;;  %1912 = vmatpush1.bf16.msra.mxu1 %v2611_v54 }
  0xec   :  { %1749 = vmatprep.subr.bf16.mxu0 %v2616_v55  ;;  %1913 = vmatprep.subr.bf16.mxu1 %v2619_v56 }
  0xef   :  { %1750 = vmatpush1.bf16.msra.mxu0 %v2614_v57  ;;  %1914 = vmatpush1.bf16.msra.mxu1 %v2617_v58 }
  0xf0   :  { %1751 = vmatprep.subr.bf16.mxu0 %v2622_v59  ;;  %1915 = vmatprep.subr.bf16.mxu1 %v2625_v60 }
  0xf3   :  { %1752 = vmatpush1.bf16.msra.mxu0 %v2620_v61  ;;  %1916 = vmatpush1.bf16.msra.mxu1 %v2623_v62 }
  0xf4   :  { %1753 = vmatprep.subr.bf16.mxu0 %v2628_v63  ;;  %1917 = vmatprep.subr.bf16.mxu1 %v2631_v0 }
  0xf7   :  { %1754 = vmatpush1.bf16.msra.mxu0 %v2626_v1  ;;  %1918 = vmatpush1.bf16.msra.mxu1 %v2629_v2 }
  0xf8   :  { %1755 = vmatprep.subr.bf16.mxu0 %v2634_v3  ;;  %1919 = vmatprep.subr.bf16.mxu1 %v2637_v4 }
  0xfb   :  { %1756 = vmatpush1.bf16.msra.mxu0 %v2632_v5  ;;  %1920 = vmatpush1.bf16.msra.mxu1 %v2635_v6 }
  0xfc   :  { %1757 = vmatprep.subr.bf16.mxu0 %v2640_v7  ;;  %1921 = vmatprep.subr.bf16.mxu1 %v2643_v8 }
  0xff   :  { %1758 = vmatpush1.bf16.msra.mxu0 %v2638_v9  ;;  %1922 = vmatpush1.bf16.msra.mxu1 %v2641_v10 }
 0x102   :  { %1760 = vmatmul.mubr.bf16.vlgmr.msra.gmra.mrb[0].mxu0 %v1964_v13  ;;  %1924 = vmatmul.mubr.bf16.vlgmr.msra.gmra.mrb[0].mxu1 %v1964_v13 }
 0x1d5   :  { %v1761_v24 = vpop.f32.mrb[0].mxu0  ;;  %v1925_v12 = vpop.f32.mrb[0].mxu1 }
 0x1d6   :  { %v2226_v25 = vadd.f32 %v1761_v24, %v279_v20  ;;  %v2228_v26 = vadd.f32 %v1925_v12, %v287_v21  ;;  %v1763_v27 = vpop.f32.mrb[1].mxu0  ;;  %v1927_v28 = vpop.f32.mrb[1].mxu1 }
 0x1d7   :  { %v2227_v29 = vadd.f32 %v1763_v27, %v283_v22  ;;  %v2229_v30 = vadd.f32 %v1927_v28, %v291_v23  ;;  %v1765_v31 = vpop.f32.mrb[2].mxu0  ;;  %v1929_v32 = vpop.f32.mrb[2].mxu1 }
 0x1d8   :  { %v1932_v33 = vmax.f32 %v2226_v25, 0.0  ;;  %v1934_v34 = vmax.f32 %v2228_v26, 0.0  ;;  %v1766_v35 = vpop.f32.mrb[3].mxu0  ;;  %v1930_v36 = vpop.f32.mrb[3].mxu1 }
 0x1d9   :  { %v1933_v37 = vmax.f32 %v2227_v29, 0.0  ;;  %v1935_v38 = vmax.f32 %v2229_v30, 0.0 }
 0x1db   :  { %v2224_v39 = vpack.c.bf16 %v1933_v37, %v1932_v33  ;;  %v2225_v40 = vpack.c.bf16 %v1935_v38, %v1934_v34 }
 0x1dd   :  { %1952 = vst [vmem:[%s3476_s3] sm:$0xff] %v2224_v39  ;;  %1953 = vst [vmem:[%s3476_s3 + $0x8] sm:$0xff] %v2225_v40 }

// kernel: unet_forward.17
= control target key start
LH: loop header
LB: loop body
LE: loop exit
PB: predicated region body
PF: predicated region fallthrough
CT: control target
= control target key end

     0   :  { %s3791_s1 = inlined_call_operand.vmem [shape: bf16[1024,512], index: 1, kind: input, shape index: {}]   ;;  %s3792_s0 = inlined_call_operand.vmem [shape: bf16[32,1024], index: 0, kind: input, shape index: {}]   ;;  %s3793_s2 = inlined_call_operand.vmem [shape: f32[1,512], index: 2, kind: input, shape index: {}]   ;;  %s3794_s3 = inlined_call_operand.vmem [shape: bf16[32,512], index: 3, kind: output, shape index: {}]  }
   0x1   :  { %v2520_v0 = vld [vmem:[%s3791_s1 + $0x4] ss:$16 sps:$4 sm:$0xff]   ;;  %v2522_v1 = vld [vmem:[%s3791_s1 + $0xc] ss:$16 sps:$4 sm:$0xff]   ;;  %v2524_v2 = vld [vmem:[%s3791_s1] ss:$16 sps:$4 sm:$0xff]  }
   0x2   :  { %1668 = vmatprep.subr.bf16.mxu0 %v2520_v0  ;;  %v2525_v3 = vld [vmem:[%s3791_s1 + $0x8] ss:$16 sps:$4 sm:$0xff]   ;;  %1880 = vmatprep.subr.bf16.mxu1 %v2522_v1  ;;  %v2526_v4 = vld [vmem:[%s3791_s1 + $0x24] ss:$16 sps:$4 sm:$0xff]   ;;  %v2528_v5 = vld [vmem:[%s3791_s1 + $0x2c] ss:$16 sps:$4 sm:$0xff]  }
   0x3   :  { %1669 = vmatpush1.bf16.msra.mxu0 %v2524_v2  ;;  %1881 = vmatpush1.bf16.msra.mxu1 %v2525_v3  ;;  %v2530_v6 = vld [vmem:[%s3791_s1 + $0x20] ss:$16 sps:$4 sm:$0xff]   ;;  %v2531_v7 = vld [vmem:[%s3791_s1 + $0x28] ss:$16 sps:$4 sm:$0xff]   ;;  %v2532_v8 = vld [vmem:[%s3791_s1 + $0x44] ss:$16 sps:$4 sm:$0xff]  }
   0x4   :  { %1670 = vmatprep.subr.bf16.mxu0 %v2526_v4  ;;  %1882 = vmatprep.subr.bf16.mxu1 %v2528_v5  ;;  %v2534_v9 = vld [vmem:[%s3791_s1 + $0x4c] ss:$16 sps:$4 sm:$0xff]   ;;  %v2536_v10 = vld [vmem:[%s3791_s1 + $0x40] ss:$16 sps:$4 sm:$0xff]   ;;  %v2537_v11 = vld [vmem:[%s3791_s1 + $0x48] ss:$16 sps:$4 sm:$0xff]  }
   0x5   :  { %v2538_v12 = vld [vmem:[%s3791_s1 + $0x64] ss:$16 sps:$4 sm:$0xff]   ;;  %v2540_v13 = vld [vmem:[%s3791_s1 + $0x6c] ss:$16 sps:$4 sm:$0xff]   ;;  %v2542_v14 = vld [vmem:[%s3791_s1 + $0x60] ss:$16 sps:$4 sm:$0xff]  }
   0x6   :  { %v2543_v15 = vld [vmem:[%s3791_s1 + $0x68] ss:$16 sps:$4 sm:$0xff]   ;;  %v2544_v16 = vld [vmem:[%s3791_s1 + $0x84] ss:$16 sps:$4 sm:$0xff]   ;;  %v2546_v17 = vld [vmem:[%s3791_s1 + $0x8c] ss:$16 sps:$4 sm:$0xff]  }
   0x7   :  { %1671 = vmatpush1.bf16.msra.mxu0 %v2530_v6  ;;  %1883 = vmatpush1.bf16.msra.mxu1 %v2531_v7  ;;  %v2548_v18 = vld [vmem:[%s3791_s1 + $0x80] ss:$16 sps:$4 sm:$0xff]   ;;  %v2549_v19 = vld [vmem:[%s3791_s1 + $0x88] ss:$16 sps:$4 sm:$0xff]   ;;  %v2550_v20 = vld [vmem:[%s3791_s1 + $0xa4] ss:$16 sps:$4 sm:$0xff]  }
   0x8   :  { %1672 = vmatprep.subr.bf16.mxu0 %v2532_v8  ;;  %1884 = vmatprep.subr.bf16.mxu1 %v2534_v9  ;;  %v2552_v21 = vld [vmem:[%s3791_s1 + $0xac] ss:$16 sps:$4 sm:$0xff]   ;;  %v2554_v22 = vld [vmem:[%s3791_s1 + $0xa0] ss:$16 sps:$4 sm:$0xff]   ;;  %v2555_v23 = vld [vmem:[%s3791_s1 + $0xa8] ss:$16 sps:$4 sm:$0xff]  }
   0x9   :  { %v2556_v24 = vld [vmem:[%s3791_s1 + $0xc4] ss:$16 sps:$4 sm:$0xff]   ;;  %v2558_v25 = vld [vmem:[%s3791_s1 + $0xcc] ss:$16 sps:$4 sm:$0xff]   ;;  %v2560_v26 = vld [vmem:[%s3791_s1 + $0xc0] ss:$16 sps:$4 sm:$0xff]  }
   0xa   :  { %v2561_v27 = vld [vmem:[%s3791_s1 + $0xc8] ss:$16 sps:$4 sm:$0xff]   ;;  %v2562_v28 = vld [vmem:[%s3791_s1 + $0xe4] ss:$16 sps:$4 sm:$0xff]   ;;  %v2564_v29 = vld [vmem:[%s3791_s1 + $0xec] ss:$16 sps:$4 sm:$0xff]  }
   0xb   :  { %1673 = vmatpush1.bf16.msra.mxu0 %v2536_v10  ;;  %1885 = vmatpush1.bf16.msra.mxu1 %v2537_v11  ;;  %v2566_v30 = vld [vmem:[%s3791_s1 + $0xe0] ss:$16 sps:$4 sm:$0xff]   ;;  %v2567_v31 = vld [vmem:[%s3791_s1 + $0xe8] ss:$16 sps:$4 sm:$0xff]   ;;  %v2568_v32 = vld [vmem:[%s3791_s1 + $0x104] ss:$16 sps:$4 sm:$0xff]  }
   0xc   :  { %1674 = vmatprep.subr.bf16.mxu0 %v2538_v12  ;;  %1886 = vmatprep.subr.bf16.mxu1 %v2540_v13  ;;  %v2570_v33 = vld [vmem:[%s3791_s1 + $0x10c] ss:$16 sps:$4 sm:$0xff]   ;;  %v2572_v34 = vld [vmem:[%s3791_s1 + $0x100] ss:$16 sps:$4 sm:$0xff]   ;;  %v2573_v35 = vld [vmem:[%s3791_s1 + $0x108] ss:$16 sps:$4 sm:$0xff]  }
   0xd   :  { %v2574_v36 = vld [vmem:[%s3791_s1 + $0x124] ss:$16 sps:$4 sm:$0xff]   ;;  %v2576_v37 = vld [vmem:[%s3791_s1 + $0x12c] ss:$16 sps:$4 sm:$0xff]   ;;  %v2578_v38 = vld [vmem:[%s3791_s1 + $0x120] ss:$16 sps:$4 sm:$0xff]  }
   0xe   :  { %v2579_v39 = vld [vmem:[%s3791_s1 + $0x128] ss:$16 sps:$4 sm:$0xff]   ;;  %v2580_v40 = vld [vmem:[%s3791_s1 + $0x144] ss:$16 sps:$4 sm:$0xff]   ;;  %v2582_v41 = vld [vmem:[%s3791_s1 + $0x14c] ss:$16 sps:$4 sm:$0xff]  }
   0xf   :  { %1675 = vmatpush1.bf16.msra.mxu0 %v2542_v14  ;;  %1887 = vmatpush1.bf16.msra.mxu1 %v2543_v15  ;;  %v2584_v42 = vld [vmem:[%s3791_s1 + $0x140] ss:$16 sps:$4 sm:$0xff]   ;;  %v2585_v43 = vld [vmem:[%s3791_s1 + $0x148] ss:$16 sps:$4 sm:$0xff]   ;;  %v2586_v44 = vld [vmem:[%s3791_s1 + $0x164] ss:$16 sps:$4 sm:$0xff]  }
  0x10   :  { %1676 = vmatprep.subr.bf16.mxu0 %v2544_v16  ;;  %1888 = vmatprep.subr.bf16.mxu1 %v2546_v17  ;;  %v2588_v45 = vld [vmem:[%s3791_s1 + $0x16c] ss:$16 sps:$4 sm:$0xff]   ;;  %v14_v46 = vld [vmem:[%s3792_s0] sm:$0xff]  ;;  %v2591_v49 = vld [vmem:[%s3791_s1 + $0x168] ss:$16 sps:$4 sm:$0xff]  }
  0x11   :  { %v18_v47 = vld [vmem:[%s3792_s0 + $0x20] sm:$0xff]  ;;  %v2594_v52 = vld [vmem:[%s3791_s1 + $0x18c] ss:$16 sps:$4 sm:$0xff]   ;;  %v2597_v54 = vld [vmem:[%s3791_s1 + $0x188] ss:$16 sps:$4 sm:$0xff]  }
  0x12   :  { %v2590_v48 = vld [vmem:[%s3791_s1 + $0x160] ss:$16 sps:$4 sm:$0xff]   ;;  %v2169_v50 = vcombine.high %v14_v46, %v18_v47  ;;  %v2592_v51 = vld [vmem:[%s3791_s1 + $0x184] ss:$16 sps:$4 sm:$0xff]   ;;  %v2600_v56 = vld [vmem:[%s3791_s1 + $0x1ac] ss:$16 sps:$4 sm:$0xff]   ;;  %v2168_v5 = vcombine.low %v14_v46, %v18_v47 }
  0x13   :  { %1677 = vmatpush1.bf16.msra.mxu0 %v2548_v18  ;;  %1889 = vmatpush1.bf16.msra.mxu1 %v2549_v19  ;;  %v2596_v53 = vld [vmem:[%s3791_s1 + $0x180] ss:$16 sps:$4 sm:$0xff]   ;;  %v2598_v55 = vld [vmem:[%s3791_s1 + $0x1a4] ss:$16 sps:$4 sm:$0xff]   ;;  %v2603_v58 = vld [vmem:[%s3791_s1 + $0x1a8] ss:$16 sps:$4 sm:$0xff]  }
  0x14   :  { %1678 = vmatprep.subr.bf16.mxu0 %v2550_v20  ;;  %1890 = vmatprep.subr.bf16.mxu1 %v2552_v21  ;;  %v2602_v57 = vld [vmem:[%s3791_s1 + $0x1a0] ss:$16 sps:$4 sm:$0xff]   ;;  %v2604_v59 = vld [vmem:[%s3791_s1 + $0x1c4] ss:$16 sps:$4 sm:$0xff]   ;;  %v2606_v60 = vld [vmem:[%s3791_s1 + $0x1cc] ss:$16 sps:$4 sm:$0xff]  }
  0x15   :  { %1700 = vmatprep.mubr.bf16.mxu0 %v2169_v50  ;;  %1912 = vmatprep.mubr.bf16.mxu1 %v2169_v50  ;;  %v2608_v61 = vld [vmem:[%s3791_s1 + $0x1c0] ss:$16 sps:$4 sm:$0xff]   ;;  %v2609_v62 = vld [vmem:[%s3791_s1 + $0x1c8] ss:$16 sps:$4 sm:$0xff]   ;;  %v2610_v63 = vld [vmem:[%s3791_s1 + $0x1e4] ss:$16 sps:$4 sm:$0xff]  }
  0x16   :  { %v2612_v0 = vld [vmem:[%s3791_s1 + $0x1ec] ss:$16 sps:$4 sm:$0xff]   ;;  %v2614_v1 = vld [vmem:[%s3791_s1 + $0x1e0] ss:$16 sps:$4 sm:$0xff]   ;;  %v2615_v2 = vld [vmem:[%s3791_s1 + $0x1e8] ss:$16 sps:$4 sm:$0xff]  }
  0x17   :  { %1679 = vmatpush1.bf16.msra.mxu0 %v2554_v22  ;;  %1891 = vmatpush1.bf16.msra.mxu1 %v2555_v23  ;;  %v2618_v3 = vld [vmem:[%s3791_s1 + $0x204] ss:$16 sps:$4 sm:$0xff]   ;;  %v2621_v4 = vld [vmem:[%s3791_s1 + $0x20c] ss:$16 sps:$4 sm:$0xff]   ;;  %v2616_v6 = vld [vmem:[%s3791_s1 + $0x200] ss:$16 sps:$4 sm:$0xff]  }
  0x18   :  { %1680 = vmatprep.subr.bf16.mxu0 %v2556_v24  ;;  %1892 = vmatprep.subr.bf16.mxu1 %v2558_v25  ;;  %v2619_v7 = vld [vmem:[%s3791_s1 + $0x208] ss:$16 sps:$4 sm:$0xff]   ;;  %v2624_v8 = vld [vmem:[%s3791_s1 + $0x224] ss:$16 sps:$4 sm:$0xff]   ;;  %v2627_v9 = vld [vmem:[%s3791_s1 + $0x22c] ss:$16 sps:$4 sm:$0xff]  }
  0x19   :  { %v2622_v10 = vld [vmem:[%s3791_s1 + $0x220] ss:$16 sps:$4 sm:$0xff]   ;;  %v2625_v11 = vld [vmem:[%s3791_s1 + $0x228] ss:$16 sps:$4 sm:$0xff]   ;;  %v2630_v12 = vld [vmem:[%s3791_s1 + $0x244] ss:$16 sps:$4 sm:$0xff]  }
  0x1a   :  { %v2633_v13 = vld [vmem:[%s3791_s1 + $0x24c] ss:$16 sps:$4 sm:$0xff]   ;;  %v2628_v14 = vld [vmem:[%s3791_s1 + $0x240] ss:$16 sps:$4 sm:$0xff]   ;;  %v2631_v15 = vld [vmem:[%s3791_s1 + $0x248] ss:$16 sps:$4 sm:$0xff]  }
  0x1b   :  { %1681 = vmatpush1.bf16.msra.mxu0 %v2560_v26  ;;  %1893 = vmatpush1.bf16.msra.mxu1 %v2561_v27  ;;  %v2636_v16 = vld [vmem:[%s3791_s1 + $0x264] ss:$16 sps:$4 sm:$0xff]   ;;  %v2639_v17 = vld [vmem:[%s3791_s1 + $0x26c] ss:$16 sps:$4 sm:$0xff]   ;;  %v2634_v18 = vld [vmem:[%s3791_s1 + $0x260] ss:$16 sps:$4 sm:$0xff]  }
  0x1c   :  { %1682 = vmatprep.subr.bf16.mxu0 %v2562_v28  ;;  %1894 = vmatprep.subr.bf16.mxu1 %v2564_v29  ;;  %v2637_v19 = vld [vmem:[%s3791_s1 + $0x268] ss:$16 sps:$4 sm:$0xff]   ;;  %v2642_v20 = vld [vmem:[%s3791_s1 + $0x284] ss:$16 sps:$4 sm:$0xff]   ;;  %v2645_v21 = vld [vmem:[%s3791_s1 + $0x28c] ss:$16 sps:$4 sm:$0xff]  }
  0x1d   :  { %v2640_v22 = vld [vmem:[%s3791_s1 + $0x280] ss:$16 sps:$4 sm:$0xff]   ;;  %v2643_v23 = vld [vmem:[%s3791_s1 + $0x288] ss:$16 sps:$4 sm:$0xff]   ;;  %v2648_v24 = vld [vmem:[%s3791_s1 + $0x2a4] ss:$16 sps:$4 sm:$0xff]  }
  0x1e   :  { %v2651_v25 = vld [vmem:[%s3791_s1 + $0x2ac] ss:$16 sps:$4 sm:$0xff]   ;;  %v22_v26 = vld [vmem:[%s3792_s0 + $0x40] sm:$0xff]  ;;  %v2667_v46 = vld [vmem:[%s3791_s1 + $0x308] ss:$16 sps:$4 sm:$0xff]  }
  0x1f   :  { %1683 = vmatpush1.bf16.msra.mxu0 %v2566_v30  ;;  %1895 = vmatpush1.bf16.msra.mxu1 %v2567_v31  ;;  %v26_v27 = vld [vmem:[%s3792_s0 + $0x60] sm:$0xff]  ;;  %v2649_v30 = vld [vmem:[%s3791_s1 + $0x2a8] ss:$16 sps:$4 sm:$0xff]  }
  0x20   :  { %1684 = vmatprep.subr.bf16.mxu0 %v2568_v32  ;;  %1896 = vmatprep.subr.bf16.mxu1 %v2570_v33  ;;  %v2177_v28 = vcombine.high %v22_v26, %v26_v27  ;;  %v2646_v29 = vld [vmem:[%s3791_s1 + $0x2a0] ss:$16 sps:$4 sm:$0xff]   ;;  %v2176_v31 = vcombine.low %v22_v26, %v26_v27  ;;  %v2654_v32 = vld [vmem:[%s3791_s1 + $0x2c4] ss:$16 sps:$4 sm:$0xff]   ;;  %v2657_v33 = vld [vmem:[%s3791_s1 + $0x2cc] ss:$16 sps:$4 sm:$0xff]  }
  0x21   :  { %v2672_v47 = vld [vmem:[%s3791_s1 + $0x324] ss:$16 sps:$4 sm:$0xff]   ;;  %v2673_v50 = vld [vmem:[%s3791_s1 + $0x328] ss:$16 sps:$4 sm:$0xff]  }
  0x22   :  { %v3378_v27 = vld [vmem:[%s3792_s0 + $0x30] sm:$0xff] }
  0x23   :  { %1685 = vmatpush1.bf16.msra.mxu0 %v2572_v34  ;;  %1897 = vmatpush1.bf16.msra.mxu1 %v2573_v35  ;;  %v3209_v34 = vld [vmem:[%s3792_s0 + $0x8] sm:$0xff] }
  0x24   :  { %1686 = vmatprep.subr.bf16.mxu0 %v2574_v36  ;;  %1898 = vmatprep.subr.bf16.mxu1 %v2576_v37  ;;  %v3214_v35 = vld [vmem:[%s3792_s0 + $0x28] sm:$0xff]  ;;  %v2652_v36 = vld [vmem:[%s3791_s1 + $0x2c0] ss:$16 sps:$4 sm:$0xff]  }
  0x25   :  { %v2655_v37 = vld [vmem:[%s3791_s1 + $0x2c8] ss:$16 sps:$4 sm:$0xff]  }
  0x27   :  { %1687 = vmatpush1.bf16.msra.mxu0 %v2578_v38  ;;  %1899 = vmatpush1.bf16.msra.mxu1 %v2579_v39  ;;  %v2171_v38 = vcombine.high %v3209_v34, %v3214_v35  ;;  %v2660_v39 = vld [vmem:[%s3791_s1 + $0x2e4] ss:$16 sps:$4 sm:$0xff]  }
  0x28   :  { %1688 = vmatprep.subr.bf16.mxu0 %v2580_v40  ;;  %1900 = vmatprep.subr.bf16.mxu1 %v2582_v41  ;;  %v2663_v40 = vld [vmem:[%s3791_s1 + $0x2ec] ss:$16 sps:$4 sm:$0xff]   ;;  %v2658_v41 = vld [vmem:[%s3791_s1 + $0x2e0] ss:$16 sps:$4 sm:$0xff]  }
  0x2b   :  { %1689 = vmatpush1.bf16.msra.mxu0 %v2584_v42  ;;  %1901 = vmatpush1.bf16.msra.mxu1 %v2585_v43  ;;  %v2661_v42 = vld [vmem:[%s3791_s1 + $0x2e8] ss:$16 sps:$4 sm:$0xff]   ;;  %v2666_v43 = vld [vmem:[%s3791_s1 + $0x304] ss:$16 sps:$4 sm:$0xff]  }
  0x2c   :  { %1690 = vmatprep.subr.bf16.mxu0 %v2586_v44  ;;  %1902 = vmatprep.subr.bf16.mxu1 %v2588_v45  ;;  %v2669_v44 = vld [vmem:[%s3791_s1 + $0x30c] ss:$16 sps:$4 sm:$0xff]   ;;  %v2664_v45 = vld [vmem:[%s3791_s1 + $0x300] ss:$16 sps:$4 sm:$0xff]  }
  0x2f   :  { %1691 = vmatpush1.bf16.msra.mxu0 %v2590_v48  ;;  %1903 = vmatpush1.bf16.msra.mxu1 %v2591_v49  ;;  %v2675_v48 = vld [vmem:[%s3791_s1 + $0x32c] ss:$16 sps:$4 sm:$0xff]   ;;  %v2670_v49 = vld [vmem:[%s3791_s1 + $0x320] ss:$16 sps:$4 sm:$0xff]  }
  0x30   :  { %1692 = vmatprep.subr.bf16.mxu0 %v2592_v51  ;;  %1904 = vmatprep.subr.bf16.mxu1 %v2594_v52  ;;  %v2678_v51 = vld [vmem:[%s3791_s1 + $0x344] ss:$16 sps:$4 sm:$0xff]   ;;  %v2681_v52 = vld [vmem:[%s3791_s1 + $0x34c] ss:$16 sps:$4 sm:$0xff]  }
  0x33   :  { %1693 = vmatpush1.bf16.msra.mxu0 %v2596_v53  ;;  %1905 = vmatpush1.bf16.msra.mxu1 %v2597_v54  ;;  %v2676_v53 = vld [vmem:[%s3791_s1 + $0x340] ss:$16 sps:$4 sm:$0xff]   ;;  %v2679_v54 = vld [vmem:[%s3791_s1 + $0x348] ss:$16 sps:$4 sm:$0xff]  }
  0x34   :  { %1694 = vmatprep.subr.bf16.mxu0 %v2598_v55  ;;  %1906 = vmatprep.subr.bf16.mxu1 %v2600_v56  ;;  %v2684_v55 = vld [vmem:[%s3791_s1 + $0x364] ss:$16 sps:$4 sm:$0xff]   ;;  %v2687_v56 = vld [vmem:[%s3791_s1 + $0x36c] ss:$16 sps:$4 sm:$0xff]  }
  0x37   :  { %1695 = vmatpush1.bf16.msra.mxu0 %v2602_v57  ;;  %1907 = vmatpush1.bf16.msra.mxu1 %v2603_v58  ;;  %v2682_v57 = vld [vmem:[%s3791_s1 + $0x360] ss:$16 sps:$4 sm:$0xff]   ;;  %v2685_v58 = vld [vmem:[%s3791_s1 + $0x368] ss:$16 sps:$4 sm:$0xff]  }
  0x38   :  { %1696 = vmatprep.subr.bf16.mxu0 %v2604_v59  ;;  %1908 = vmatprep.subr.bf16.mxu1 %v2606_v60  ;;  %v2690_v59 = vld [vmem:[%s3791_s1 + $0x384] ss:$16 sps:$4 sm:$0xff]   ;;  %v2693_v60 = vld [vmem:[%s3791_s1 + $0x38c] ss:$16 sps:$4 sm:$0xff]  }
  0x3b   :  { %1697 = vmatpush1.bf16.msra.mxu0 %v2608_v61  ;;  %1909 = vmatpush1.bf16.msra.mxu1 %v2609_v62  ;;  %v2688_v61 = vld [vmem:[%s3791_s1 + $0x380] ss:$16 sps:$4 sm:$0xff]   ;;  %v2691_v62 = vld [vmem:[%s3791_s1 + $0x388] ss:$16 sps:$4 sm:$0xff]  }
  0x3c   :  { %1698 = vmatprep.subr.bf16.mxu0 %v2610_v63  ;;  %1910 = vmatprep.subr.bf16.mxu1 %v2612_v0  ;;  %v2696_v63 = vld [vmem:[%s3791_s1 + $0x3a4] ss:$16 sps:$4 sm:$0xff]   ;;  %v2699_v0 = vld [vmem:[%s3791_s1 + $0x3ac] ss:$16 sps:$4 sm:$0xff]  }
  0x3f   :  { %1699 = vmatpush1.bf16.msra.mxu0 %v2614_v1  ;;  %1911 = vmatpush1.bf16.msra.mxu1 %v2615_v2  ;;  %v2694_v1 = vld [vmem:[%s3791_s1 + $0x3a0] ss:$16 sps:$4 sm:$0xff]   ;;  %v2697_v2 = vld [vmem:[%s3791_s1 + $0x3a8] ss:$16 sps:$4 sm:$0xff]  }
  0x40   :  { %1721 = vmatprep.subr.bf16.mxu0 %v2618_v3  ;;  %1933 = vmatprep.subr.bf16.mxu1 %v2621_v4  ;;  %v2702_v3 = vld [vmem:[%s3791_s1 + $0x3c4] ss:$16 sps:$4 sm:$0xff]   ;;  %v2705_v4 = vld [vmem:[%s3791_s1 + $0x3cc] ss:$16 sps:$4 sm:$0xff]  }
  0x42   :  { %1701 = vmatmul.mubr.bf16.vlgmr.msra.gmra.mrb[0].mxu0 %v2168_v5  ;;  %1913 = vmatmul.mubr.bf16.vlgmr.msra.gmra.mrb[0].mxu1 %v2168_v5  ;;  %v2700_v5 = vld [vmem:[%s3791_s1 + $0x3c0] ss:$16 sps:$4 sm:$0xff]  }
  0x43   :  { %1722 = vmatpush1.bf16.msra.mxu0 %v2616_v6  ;;  %1934 = vmatpush1.bf16.msra.mxu1 %v2619_v7  ;;  %v2703_v6 = vld [vmem:[%s3791_s1 + $0x3c8] ss:$16 sps:$4 sm:$0xff]   ;;  %v2708_v7 = vld [vmem:[%s3791_s1 + $0x3e4] ss:$16 sps:$4 sm:$0xff]  }
  0x44   :  { %1723 = vmatprep.subr.bf16.mxu0 %v2624_v8  ;;  %1935 = vmatprep.subr.bf16.mxu1 %v2627_v9  ;;  %v2711_v8 = vld [vmem:[%s3791_s1 + $0x3ec] ss:$16 sps:$4 sm:$0xff]   ;;  %v2706_v9 = vld [vmem:[%s3791_s1 + $0x3e0] ss:$16 sps:$4 sm:$0xff]  }
  0x45   :  { %1710 = vmatprep.mubr.bf16.mxu0 %v2177_v28  ;;  %1922 = vmatprep.mubr.bf16.mxu1 %v2177_v28  ;;  %v2724_v28 = vld [vmem:[%s3791_s1 + $0x440] ss:$16 sps:$4 sm:$0xff]  }
  0x47   :  { %1724 = vmatpush1.bf16.msra.mxu0 %v2622_v10  ;;  %1936 = vmatpush1.bf16.msra.mxu1 %v2625_v11  ;;  %v2709_v10 = vld [vmem:[%s3791_s1 + $0x3e8] ss:$16 sps:$4 sm:$0xff]   ;;  %v2714_v11 = vld [vmem:[%s3791_s1 + $0x404] ss:$16 sps:$4 sm:$0xff]  }
  0x48   :  { %1725 = vmatprep.subr.bf16.mxu0 %v2630_v12  ;;  %1937 = vmatprep.subr.bf16.mxu1 %v2633_v13  ;;  %v2717_v12 = vld [vmem:[%s3791_s1 + $0x40c] ss:$16 sps:$4 sm:$0xff]   ;;  %v2712_v13 = vld [vmem:[%s3791_s1 + $0x400] ss:$16 sps:$4 sm:$0xff]  }
  0x4a   :  { %1711 = vmatmul.mubr.bf16.gmra.mrb[4].mxu0 %v2176_v31  ;;  %1923 = vmatmul.mubr.bf16.gmra.mrb[4].mxu1 %v2176_v31  ;;  %v2735_v31 = vld [vmem:[%s3791_s1 + $0x46c] ss:$16 sps:$4 sm:$0xff]  }
  0x4b   :  { %1726 = vmatpush1.bf16.msra.mxu0 %v2628_v14  ;;  %1938 = vmatpush1.bf16.msra.mxu1 %v2631_v15  ;;  %v2715_v14 = vld [vmem:[%s3791_s1 + $0x408] ss:$16 sps:$4 sm:$0xff]   ;;  %v2170_v15 = vcombine.low %v3209_v34, %v3214_v35  ;;  %v2738_v35 = vld [vmem:[%s3791_s1 + $0x484] ss:$16 sps:$4 sm:$0xff]  }
  0x4c   :  { %1727 = vmatprep.subr.bf16.mxu0 %v2636_v16  ;;  %1939 = vmatprep.subr.bf16.mxu1 %v2639_v17  ;;  %v23_v16 = vld [vmem:[%s3792_s0 + $0x48] sm:$0xff] }
  0x4d   :  { %1753 = vmatprep.mubr.bf16.mxu0 %v2171_v38  ;;  %1965 = vmatprep.mubr.bf16.mxu1 %v2171_v38  ;;  %v27_v17 = vld [vmem:[%s3792_s0 + $0x68] sm:$0xff] }
  0x4e   :  { %v2178_v26 = vcombine.low %v23_v16, %v27_v17  ;;  %v2733_v34 = vld [vmem:[%s3791_s1 + $0x468] ss:$16 sps:$4 sm:$0xff]  }
  0x4f   :  { %1728 = vmatpush1.bf16.msra.mxu0 %v2634_v18  ;;  %1940 = vmatpush1.bf16.msra.mxu1 %v2637_v19  ;;  %v2720_v18 = vld [vmem:[%s3791_s1 + $0x424] ss:$16 sps:$4 sm:$0xff]   ;;  %v2723_v19 = vld [vmem:[%s3791_s1 + $0x42c] ss:$16 sps:$4 sm:$0xff]   ;;  %v2739_v38 = vld [vmem:[%s3791_s1 + $0x488] ss:$16 sps:$4 sm:$0xff]  }
  0x50   :  { %1729 = vmatprep.subr.bf16.mxu0 %v2642_v20  ;;  %1941 = vmatprep.subr.bf16.mxu1 %v2645_v21  ;;  %v2179_v20 = vcombine.high %v23_v16, %v27_v17  ;;  %v2718_v21 = vld [vmem:[%s3791_s1 + $0x420] ss:$16 sps:$4 sm:$0xff]   ;;  %v2807_v16 = vld [vmem:[%s3791_s1 + $0x5ec] ss:$16 sps:$4 sm:$0xff]  }
  0x51   :  { %v2802_v17 = vld [vmem:[%s3791_s1 + $0x5e0] ss:$16 sps:$4 sm:$0xff]  }
  0x53   :  { %1730 = vmatpush1.bf16.msra.mxu0 %v2640_v22  ;;  %1942 = vmatpush1.bf16.msra.mxu1 %v2643_v23  ;;  %v2721_v22 = vld [vmem:[%s3791_s1 + $0x428] ss:$16 sps:$4 sm:$0xff]   ;;  %v2726_v23 = vld [vmem:[%s3791_s1 + $0x444] ss:$16 sps:$4 sm:$0xff]  }
  0x54   :  { %1731 = vmatprep.subr.bf16.mxu0 %v2648_v24  ;;  %1943 = vmatprep.subr.bf16.mxu1 %v2651_v25  ;;  %v2729_v24 = vld [vmem:[%s3791_s1 + $0x44c] ss:$16 sps:$4 sm:$0xff]   ;;  %v3373_v25 = vld [vmem:[%s3792_s0 + $0x10] sm:$0xff] }
  0x57   :  { %1732 = vmatpush1.bf16.msra.mxu0 %v2646_v29  ;;  %1944 = vmatpush1.bf16.msra.mxu1 %v2649_v30  ;;  %v2727_v29 = vld [vmem:[%s3791_s1 + $0x448] ss:$16 sps:$4 sm:$0xff]   ;;  %v2732_v30 = vld [vmem:[%s3791_s1 + $0x464] ss:$16 sps:$4 sm:$0xff]  }
  0x58   :  { %1733 = vmatprep.subr.bf16.mxu0 %v2654_v32  ;;  %1945 = vmatprep.subr.bf16.mxu1 %v2657_v33  ;;  %v2173_v32 = vcombine.high %v3373_v25, %v3378_v27  ;;  %v2730_v33 = vld [vmem:[%s3791_s1 + $0x460] ss:$16 sps:$4 sm:$0xff]  }
  0x5b   :  { %1734 = vmatpush1.bf16.msra.mxu0 %v2652_v36  ;;  %1946 = vmatpush1.bf16.msra.mxu1 %v2655_v37  ;;  %v2741_v36 = vld [vmem:[%s3791_s1 + $0x48c] ss:$16 sps:$4 sm:$0xff]   ;;  %v2736_v37 = vld [vmem:[%s3791_s1 + $0x480] ss:$16 sps:$4 sm:$0xff]  }
  0x5c   :  { %1735 = vmatprep.subr.bf16.mxu0 %v2660_v39  ;;  %1947 = vmatprep.subr.bf16.mxu1 %v2663_v40  ;;  %v2744_v39 = vld [vmem:[%s3791_s1 + $0x4a4] ss:$16 sps:$4 sm:$0xff]   ;;  %v2747_v40 = vld [vmem:[%s3791_s1 + $0x4ac] ss:$16 sps:$4 sm:$0xff]  }
  0x5f   :  { %1736 = vmatpush1.bf16.msra.mxu0 %v2658_v41  ;;  %1948 = vmatpush1.bf16.msra.mxu1 %v2661_v42  ;;  %v2742_v41 = vld [vmem:[%s3791_s1 + $0x4a0] ss:$16 sps:$4 sm:$0xff]   ;;  %v2745_v42 = vld [vmem:[%s3791_s1 + $0x4a8] ss:$16 sps:$4 sm:$0xff]  }
  0x60   :  { %1737 = vmatprep.subr.bf16.mxu0 %v2666_v43  ;;  %1949 = vmatprep.subr.bf16.mxu1 %v2669_v44  ;;  %v2750_v43 = vld [vmem:[%s3791_s1 + $0x4c4] ss:$16 sps:$4 sm:$0xff]   ;;  %v2753_v44 = vld [vmem:[%s3791_s1 + $0x4cc] ss:$16 sps:$4 sm:$0xff]  }
  0x63   :  { %1738 = vmatpush1.bf16.msra.mxu0 %v2664_v45  ;;  %1950 = vmatpush1.bf16.msra.mxu1 %v2667_v46  ;;  %v2748_v45 = vld [vmem:[%s3791_s1 + $0x4c0] ss:$16 sps:$4 sm:$0xff]   ;;  %v2751_v46 = vld [vmem:[%s3791_s1 + $0x4c8] ss:$16 sps:$4 sm:$0xff]  }
  0x64   :  { %1739 = vmatprep.subr.bf16.mxu0 %v2672_v47  ;;  %1951 = vmatprep.subr.bf16.mxu1 %v2675_v48  ;;  %v2756_v47 = vld [vmem:[%s3791_s1 + $0x4e4] ss:$16 sps:$4 sm:$0xff]   ;;  %v2759_v48 = vld [vmem:[%s3791_s1 + $0x4ec] ss:$16 sps:$4 sm:$0xff]  }
  0x67   :  { %1740 = vmatpush1.bf16.msra.mxu0 %v2670_v49  ;;  %1952 = vmatpush1.bf16.msra.mxu1 %v2673_v50  ;;  %v2754_v49 = vld [vmem:[%s3791_s1 + $0x4e0] ss:$16 sps:$4 sm:$0xff]   ;;  %v2757_v50 = vld [vmem:[%s3791_s1 + $0x4e8] ss:$16 sps:$4 sm:$0xff]  }
  0x68   :  { %1741 = vmatprep.subr.bf16.mxu0 %v2678_v51  ;;  %1953 = vmatprep.subr.bf16.mxu1 %v2681_v52  ;;  %v2762_v51 = vld [vmem:[%s3791_s1 + $0x504] ss:$16 sps:$4 sm:$0xff]   ;;  %v2765_v52 = vld [vmem:[%s3791_s1 + $0x50c] ss:$16 sps:$4 sm:$0xff]  }
  0x6b   :  { %1742 = vmatpush1.bf16.msra.mxu0 %v2676_v53  ;;  %1954 = vmatpush1.bf16.msra.mxu1 %v2679_v54  ;;  %v2760_v53 = vld [vmem:[%s3791_s1 + $0x500] ss:$16 sps:$4 sm:$0xff]   ;;  %v2763_v54 = vld [vmem:[%s3791_s1 + $0x508] ss:$16 sps:$4 sm:$0xff]  }
  0x6c   :  { %1743 = vmatprep.subr.bf16.mxu0 %v2684_v55  ;;  %1955 = vmatprep.subr.bf16.mxu1 %v2687_v56  ;;  %v2768_v55 = vld [vmem:[%s3791_s1 + $0x524] ss:$16 sps:$4 sm:$0xff]   ;;  %v2771_v56 = vld [vmem:[%s3791_s1 + $0x52c] ss:$16 sps:$4 sm:$0xff]  }
  0x6f   :  { %1744 = vmatpush1.bf16.msra.mxu0 %v2682_v57  ;;  %1956 = vmatpush1.bf16.msra.mxu1 %v2685_v58  ;;  %v2766_v57 = vld [vmem:[%s3791_s1 + $0x520] ss:$16 sps:$4 sm:$0xff]   ;;  %v2769_v58 = vld [vmem:[%s3791_s1 + $0x528] ss:$16 sps:$4 sm:$0xff]  }
  0x70   :  { %1745 = vmatprep.subr.bf16.mxu0 %v2690_v59  ;;  %1957 = vmatprep.subr.bf16.mxu1 %v2693_v60  ;;  %v2774_v59 = vld [vmem:[%s3791_s1 + $0x544] ss:$16 sps:$4 sm:$0xff]   ;;  %v2777_v60 = vld [vmem:[%s3791_s1 + $0x54c] ss:$16 sps:$4 sm:$0xff]  }
  0x73   :  { %1746 = vmatpush1.bf16.msra.mxu0 %v2688_v61  ;;  %1958 = vmatpush1.bf16.msra.mxu1 %v2691_v62  ;;  %v2772_v61 = vld [vmem:[%s3791_s1 + $0x540] ss:$16 sps:$4 sm:$0xff]   ;;  %v2775_v62 = vld [vmem:[%s3791_s1 + $0x548] ss:$16 sps:$4 sm:$0xff]  }
  0x74   :  { %1747 = vmatprep.subr.bf16.mxu0 %v2696_v63  ;;  %1959 = vmatprep.subr.bf16.mxu1 %v2699_v0  ;;  %v2780_v63 = vld [vmem:[%s3791_s1 + $0x564] ss:$16 sps:$4 sm:$0xff]   ;;  %v2783_v0 = vld [vmem:[%s3791_s1 + $0x56c] ss:$16 sps:$4 sm:$0xff]  }
  0x77   :  { %1748 = vmatpush1.bf16.msra.mxu0 %v2694_v1  ;;  %1960 = vmatpush1.bf16.msra.mxu1 %v2697_v2  ;;  %v2778_v1 = vld [vmem:[%s3791_s1 + $0x560] ss:$16 sps:$4 sm:$0xff]   ;;  %v2781_v2 = vld [vmem:[%s3791_s1 + $0x568] ss:$16 sps:$4 sm:$0xff]  }
  0x78   :  { %1749 = vmatprep.subr.bf16.mxu0 %v2702_v3  ;;  %1961 = vmatprep.subr.bf16.mxu1 %v2705_v4  ;;  %v2786_v3 = vld [vmem:[%s3791_s1 + $0x584] ss:$16 sps:$4 sm:$0xff]   ;;  %v2789_v4 = vld [vmem:[%s3791_s1 + $0x58c] ss:$16 sps:$4 sm:$0xff]  }
  0x7b   :  { %1750 = vmatpush1.bf16.msra.mxu0 %v2700_v5  ;;  %1962 = vmatpush1.bf16.msra.mxu1 %v2703_v6  ;;  %v2784_v5 = vld [vmem:[%s3791_s1 + $0x580] ss:$16 sps:$4 sm:$0xff]   ;;  %v2787_v6 = vld [vmem:[%s3791_s1 + $0x588] ss:$16 sps:$4 sm:$0xff]  }
  0x7c   :  { %1751 = vmatprep.subr.bf16.mxu0 %v2708_v7  ;;  %1963 = vmatprep.subr.bf16.mxu1 %v2711_v8  ;;  %v2792_v7 = vld [vmem:[%s3791_s1 + $0x5a4] ss:$16 sps:$4 sm:$0xff]   ;;  %v2795_v8 = vld [vmem:[%s3791_s1 + $0x5ac] ss:$16 sps:$4 sm:$0xff]  }
  0x7f   :  { %1752 = vmatpush1.bf16.msra.mxu0 %v2706_v9  ;;  %1964 = vmatpush1.bf16.msra.mxu1 %v2709_v10  ;;  %v2790_v9 = vld [vmem:[%s3791_s1 + $0x5a0] ss:$16 sps:$4 sm:$0xff]   ;;  %v2793_v10 = vld [vmem:[%s3791_s1 + $0x5a8] ss:$16 sps:$4 sm:$0xff]  }
  0x80   :  { %1774 = vmatprep.subr.bf16.mxu0 %v2714_v11  ;;  %1986 = vmatprep.subr.bf16.mxu1 %v2717_v12  ;;  %v2798_v11 = vld [vmem:[%s3791_s1 + $0x5c4] ss:$16 sps:$4 sm:$0xff]   ;;  %v2801_v12 = vld [vmem:[%s3791_s1 + $0x5cc] ss:$16 sps:$4 sm:$0xff]  }
  0x82   :  { %1754 = vmatmul.mubr.bf16.vlgmr.msra.gmra.mrb[0].mxu0 %v2170_v15  ;;  %1966 = vmatmul.mubr.bf16.vlgmr.msra.gmra.mrb[0].mxu1 %v2170_v15  ;;  %v2804_v15 = vld [vmem:[%s3791_s1 + $0x5e4] ss:$16 sps:$4 sm:$0xff]  }
  0x83   :  { %1775 = vmatpush1.bf16.msra.mxu0 %v2712_v13  ;;  %1987 = vmatpush1.bf16.msra.mxu1 %v2715_v14  ;;  %v2796_v13 = vld [vmem:[%s3791_s1 + $0x5c0] ss:$16 sps:$4 sm:$0xff]   ;;  %v2799_v14 = vld [vmem:[%s3791_s1 + $0x5c8] ss:$16 sps:$4 sm:$0xff]  }
  0x84   :  { %1776 = vmatprep.subr.bf16.mxu0 %v2720_v18  ;;  %1988 = vmatprep.subr.bf16.mxu1 %v2723_v19  ;;  %v2805_v18 = vld [vmem:[%s3791_s1 + $0x5e8] ss:$16 sps:$4 sm:$0xff]   ;;  %v2810_v19 = vld [vmem:[%s3791_s1 + $0x604] ss:$16 sps:$4 sm:$0xff]  }
  0x85   :  { %1763 = vmatprep.mubr.bf16.mxu0 %v2179_v20  ;;  %1975 = vmatprep.mubr.bf16.mxu1 %v2179_v20  ;;  %v2813_v20 = vld [vmem:[%s3791_s1 + $0x60c] ss:$16 sps:$4 sm:$0xff]  }
  0x87   :  { %1777 = vmatpush1.bf16.msra.mxu0 %v2718_v21  ;;  %1989 = vmatpush1.bf16.msra.mxu1 %v2721_v22  ;;  %v2172_v21 = vcombine.low %v3373_v25, %v3378_v27  ;;  %v24_v22 = vld [vmem:[%s3792_s0 + $0x50] sm:$0xff]  ;;  %v2819_v27 = vld [vmem:[%s3791_s1 + $0x62c] ss:$16 sps:$4 sm:$0xff]  }
  0x88   :  { %1778 = vmatprep.subr.bf16.mxu0 %v2726_v23  ;;  %1990 = vmatprep.subr.bf16.mxu1 %v2729_v24  ;;  %v28_v23 = vld [vmem:[%s3792_s0 + $0x70] sm:$0xff] }
  0x89   :  { %v2808_v24 = vld [vmem:[%s3791_s1 + $0x600] ss:$16 sps:$4 sm:$0xff]   ;;  %v2816_v25 = vld [vmem:[%s3791_s1 + $0x624] ss:$16 sps:$4 sm:$0xff]  }
  0x8a   :  { %1764 = vmatmul.mubr.bf16.gmra.mrb[4].mxu0 %v2178_v26  ;;  %1976 = vmatmul.mubr.bf16.gmra.mrb[4].mxu1 %v2178_v26  ;;  %v2811_v26 = vld [vmem:[%s3791_s1 + $0x608] ss:$16 sps:$4 sm:$0xff]  }
  0x8b   :  { %1779 = vmatpush1.bf16.msra.mxu0 %v2724_v28  ;;  %1991 = vmatpush1.bf16.msra.mxu1 %v2727_v29  ;;  %v2181_v28 = vcombine.high %v24_v22, %v28_v23  ;;  %v2814_v29 = vld [vmem:[%s3791_s1 + $0x620] ss:$16 sps:$4 sm:$0xff]  }
  0x8c   :  { %1780 = vmatprep.subr.bf16.mxu0 %v2732_v30  ;;  %1992 = vmatprep.subr.bf16.mxu1 %v2735_v31  ;;  %v2817_v30 = vld [vmem:[%s3791_s1 + $0x628] ss:$16 sps:$4 sm:$0xff]   ;;  %v2822_v31 = vld [vmem:[%s3791_s1 + $0x644] ss:$16 sps:$4 sm:$0xff]  }
  0x8d   :  { %1806 = vmatprep.mubr.bf16.mxu0 %v2173_v32  ;;  %2018 = vmatprep.mubr.bf16.mxu1 %v2173_v32  ;;  %v2825_v32 = vld [vmem:[%s3791_s1 + $0x64c] ss:$16 sps:$4 sm:$0xff]  }
  0x8f   :  { %1781 = vmatpush1.bf16.msra.mxu0 %v2730_v33  ;;  %1993 = vmatpush1.bf16.msra.mxu1 %v2733_v34  ;;  %v2180_v33 = vcombine.low %v24_v22, %v28_v23  ;;  %v3585_v34 = vld [vmem:[%s3792_s0 + $0x18] sm:$0xff]  ;;  %v2900_v23 = vld [vmem:[%s3791_s1 + $0x7e4] ss:$16 sps:$4 sm:$0xff]  }
  0x90   :  { %1782 = vmatprep.subr.bf16.mxu0 %v2738_v35  ;;  %1994 = vmatprep.subr.bf16.mxu1 %v2741_v36  ;;  %v3590_v35 = vld [vmem:[%s3792_s0 + $0x38] sm:$0xff]  ;;  %v2820_v36 = vld [vmem:[%s3791_s1 + $0x640] ss:$16 sps:$4 sm:$0xff]  }
  0x91   :  { %v2895_v22 = vld [vmem:[%s3791_s1 + $0x7c8] ss:$16 sps:$4 sm:$0xff]  }
  0x93   :  { %1783 = vmatpush1.bf16.msra.mxu0 %v2736_v37  ;;  %1995 = vmatpush1.bf16.msra.mxu1 %v2739_v38  ;;  %v2823_v37 = vld [vmem:[%s3791_s1 + $0x648] ss:$16 sps:$4 sm:$0xff]   ;;  %v2828_v38 = vld [vmem:[%s3791_s1 + $0x664] ss:$16 sps:$4 sm:$0xff]  }
  0x94   :  { %1784 = vmatprep.subr.bf16.mxu0 %v2744_v39  ;;  %1996 = vmatprep.subr.bf16.mxu1 %v2747_v40  ;;  %v2831_v39 = vld [vmem:[%s3791_s1 + $0x66c] ss:$16 sps:$4 sm:$0xff]   ;;  %v2175_v40 = vcombine.high %v3585_v34, %v3590_v35 }
  0x97   :  { %1785 = vmatpush1.bf16.msra.mxu0 %v2742_v41  ;;  %1997 = vmatpush1.bf16.msra.mxu1 %v2745_v42  ;;  %v2826_v41 = vld [vmem:[%s3791_s1 + $0x660] ss:$16 sps:$4 sm:$0xff]   ;;  %v2829_v42 = vld [vmem:[%s3791_s1 + $0x668] ss:$16 sps:$4 sm:$0xff]  }
  0x98   :  { %1786 = vmatprep.subr.bf16.mxu0 %v2750_v43  ;;  %1998 = vmatprep.subr.bf16.mxu1 %v2753_v44  ;;  %v2834_v43 = vld [vmem:[%s3791_s1 + $0x684] ss:$16 sps:$4 sm:$0xff]   ;;  %v2837_v44 = vld [vmem:[%s3791_s1 + $0x68c] ss:$16 sps:$4 sm:$0xff]  }
  0x9b   :  { %1787 = vmatpush1.bf16.msra.mxu0 %v2748_v45  ;;  %1999 = vmatpush1.bf16.msra.mxu1 %v2751_v46  ;;  %v2832_v45 = vld [vmem:[%s3791_s1 + $0x680] ss:$16 sps:$4 sm:$0xff]   ;;  %v2835_v46 = vld [vmem:[%s3791_s1 + $0x688] ss:$16 sps:$4 sm:$0xff]  }
  0x9c   :  { %1788 = vmatprep.subr.bf16.mxu0 %v2756_v47  ;;  %2000 = vmatprep.subr.bf16.mxu1 %v2759_v48  ;;  %v2840_v47 = vld [vmem:[%s3791_s1 + $0x6a4] ss:$16 sps:$4 sm:$0xff]   ;;  %v2843_v48 = vld [vmem:[%s3791_s1 + $0x6ac] ss:$16 sps:$4 sm:$0xff]  }
  0x9f   :  { %1789 = vmatpush1.bf16.msra.mxu0 %v2754_v49  ;;  %2001 = vmatpush1.bf16.msra.mxu1 %v2757_v50  ;;  %v2838_v49 = vld [vmem:[%s3791_s1 + $0x6a0] ss:$16 sps:$4 sm:$0xff]   ;;  %v2841_v50 = vld [vmem:[%s3791_s1 + $0x6a8] ss:$16 sps:$4 sm:$0xff]  }
  0xa0   :  { %1790 = vmatprep.subr.bf16.mxu0 %v2762_v51  ;;  %2002 = vmatprep.subr.bf16.mxu1 %v2765_v52  ;;  %v2846_v51 = vld [vmem:[%s3791_s1 + $0x6c4] ss:$16 sps:$4 sm:$0xff]   ;;  %v2849_v52 = vld [vmem:[%s3791_s1 + $0x6cc] ss:$16 sps:$4 sm:$0xff]  }
  0xa3   :  { %1791 = vmatpush1.bf16.msra.mxu0 %v2760_v53  ;;  %2003 = vmatpush1.bf16.msra.mxu1 %v2763_v54  ;;  %v2844_v53 = vld [vmem:[%s3791_s1 + $0x6c0] ss:$16 sps:$4 sm:$0xff]   ;;  %v2847_v54 = vld [vmem:[%s3791_s1 + $0x6c8] ss:$16 sps:$4 sm:$0xff]  }
  0xa4   :  { %1792 = vmatprep.subr.bf16.mxu0 %v2768_v55  ;;  %2004 = vmatprep.subr.bf16.mxu1 %v2771_v56  ;;  %v2852_v55 = vld [vmem:[%s3791_s1 + $0x6e4] ss:$16 sps:$4 sm:$0xff]   ;;  %v2855_v56 = vld [vmem:[%s3791_s1 + $0x6ec] ss:$16 sps:$4 sm:$0xff]  }
  0xa7   :  { %1793 = vmatpush1.bf16.msra.mxu0 %v2766_v57  ;;  %2005 = vmatpush1.bf16.msra.mxu1 %v2769_v58  ;;  %v2850_v57 = vld [vmem:[%s3791_s1 + $0x6e0] ss:$16 sps:$4 sm:$0xff]   ;;  %v2853_v58 = vld [vmem:[%s3791_s1 + $0x6e8] ss:$16 sps:$4 sm:$0xff]  }
  0xa8   :  { %1794 = vmatprep.subr.bf16.mxu0 %v2774_v59  ;;  %2006 = vmatprep.subr.bf16.mxu1 %v2777_v60  ;;  %v2858_v59 = vld [vmem:[%s3791_s1 + $0x704] ss:$16 sps:$4 sm:$0xff]   ;;  %v2861_v60 = vld [vmem:[%s3791_s1 + $0x70c] ss:$16 sps:$4 sm:$0xff]  }
  0xab   :  { %1795 = vmatpush1.bf16.msra.mxu0 %v2772_v61  ;;  %2007 = vmatpush1.bf16.msra.mxu1 %v2775_v62  ;;  %v2856_v61 = vld [vmem:[%s3791_s1 + $0x700] ss:$16 sps:$4 sm:$0xff]   ;;  %v2859_v62 = vld [vmem:[%s3791_s1 + $0x708] ss:$16 sps:$4 sm:$0xff]  }
  0xac   :  { %1796 = vmatprep.subr.bf16.mxu0 %v2780_v63  ;;  %2008 = vmatprep.subr.bf16.mxu1 %v2783_v0  ;;  %v2864_v63 = vld [vmem:[%s3791_s1 + $0x724] ss:$16 sps:$4 sm:$0xff]   ;;  %v2867_v0 = vld [vmem:[%s3791_s1 + $0x72c] ss:$16 sps:$4 sm:$0xff]  }
  0xaf   :  { %1797 = vmatpush1.bf16.msra.mxu0 %v2778_v1  ;;  %2009 = vmatpush1.bf16.msra.mxu1 %v2781_v2  ;;  %v2862_v1 = vld [vmem:[%s3791_s1 + $0x720] ss:$16 sps:$4 sm:$0xff]   ;;  %v2865_v2 = vld [vmem:[%s3791_s1 + $0x728] ss:$16 sps:$4 sm:$0xff]  }
  0xb0   :  { %1798 = vmatprep.subr.bf16.mxu0 %v2786_v3  ;;  %2010 = vmatprep.subr.bf16.mxu1 %v2789_v4  ;;  %v2870_v3 = vld [vmem:[%s3791_s1 + $0x744] ss:$16 sps:$4 sm:$0xff]   ;;  %v2873_v4 = vld [vmem:[%s3791_s1 + $0x74c] ss:$16 sps:$4 sm:$0xff]  }
  0xb3   :  { %1799 = vmatpush1.bf16.msra.mxu0 %v2784_v5  ;;  %2011 = vmatpush1.bf16.msra.mxu1 %v2787_v6  ;;  %v2868_v5 = vld [vmem:[%s3791_s1 + $0x740] ss:$16 sps:$4 sm:$0xff]   ;;  %v2871_v6 = vld [vmem:[%s3791_s1 + $0x748] ss:$16 sps:$4 sm:$0xff]  }
  0xb4   :  { %1800 = vmatprep.subr.bf16.mxu0 %v2792_v7  ;;  %2012 = vmatprep.subr.bf16.mxu1 %v2795_v8  ;;  %v2876_v7 = vld [vmem:[%s3791_s1 + $0x764] ss:$16 sps:$4 sm:$0xff]   ;;  %v2879_v8 = vld [vmem:[%s3791_s1 + $0x76c] ss:$16 sps:$4 sm:$0xff]  }
  0xb7   :  { %1801 = vmatpush1.bf16.msra.mxu0 %v2790_v9  ;;  %2013 = vmatpush1.bf16.msra.mxu1 %v2793_v10  ;;  %v2874_v9 = vld [vmem:[%s3791_s1 + $0x760] ss:$16 sps:$4 sm:$0xff]   ;;  %v2877_v10 = vld [vmem:[%s3791_s1 + $0x768] ss:$16 sps:$4 sm:$0xff]  }
  0xb8   :  { %1802 = vmatprep.subr.bf16.mxu0 %v2798_v11  ;;  %2014 = vmatprep.subr.bf16.mxu1 %v2801_v12  ;;  %v2882_v11 = vld [vmem:[%s3791_s1 + $0x784] ss:$16 sps:$4 sm:$0xff]   ;;  %v2885_v12 = vld [vmem:[%s3791_s1 + $0x78c] ss:$16 sps:$4 sm:$0xff]  }
  0xbb   :  { %1803 = vmatpush1.bf16.msra.mxu0 %v2796_v13  ;;  %2015 = vmatpush1.bf16.msra.mxu1 %v2799_v14  ;;  %v2880_v13 = vld [vmem:[%s3791_s1 + $0x780] ss:$16 sps:$4 sm:$0xff]   ;;  %v2883_v14 = vld [vmem:[%s3791_s1 + $0x788] ss:$16 sps:$4 sm:$0xff]  }
  0xbc   :  { %1804 = vmatprep.subr.bf16.mxu0 %v2804_v15  ;;  %2016 = vmatprep.subr.bf16.mxu1 %v2807_v16  ;;  %v2888_v15 = vld [vmem:[%s3791_s1 + $0x7a4] ss:$16 sps:$4 sm:$0xff]   ;;  %v2891_v16 = vld [vmem:[%s3791_s1 + $0x7ac] ss:$16 sps:$4 sm:$0xff]  }
  0xbf   :  { %1805 = vmatpush1.bf16.msra.mxu0 %v2802_v17  ;;  %2017 = vmatpush1.bf16.msra.mxu1 %v2805_v18  ;;  %v2886_v17 = vld [vmem:[%s3791_s1 + $0x7a0] ss:$16 sps:$4 sm:$0xff]   ;;  %v2889_v18 = vld [vmem:[%s3791_s1 + $0x7a8] ss:$16 sps:$4 sm:$0xff]  }
  0xc0   :  { %1827 = vmatprep.subr.bf16.mxu0 %v2810_v19  ;;  %2039 = vmatprep.subr.bf16.mxu1 %v2813_v20  ;;  %v2894_v19 = vld [vmem:[%s3791_s1 + $0x7c4] ss:$16 sps:$4 sm:$0xff]   ;;  %v2897_v20 = vld [vmem:[%s3791_s1 + $0x7cc] ss:$16 sps:$4 sm:$0xff]  }
  0xc2   :  { %1807 = vmatmul.mubr.bf16.vlgmr.msra.gmra.mrb[0].mxu0 %v2172_v21  ;;  %2019 = vmatmul.mubr.bf16.vlgmr.msra.gmra.mrb[0].mxu1 %v2172_v21  ;;  %v2892_v21 = vld [vmem:[%s3791_s1 + $0x7c0] ss:$16 sps:$4 sm:$0xff]  }
  0xc3   :  { %1828 = vmatpush1.bf16.msra.mxu0 %v2808_v24  ;;  %2040 = vmatpush1.bf16.msra.mxu1 %v2811_v26  ;;  %v2903_v24 = vld [vmem:[%s3791_s1 + $0x7ec] ss:$16 sps:$4 sm:$0xff]   ;;  %v2898_v26 = vld [vmem:[%s3791_s1 + $0x7e0] ss:$16 sps:$4 sm:$0xff]  }
  0xc4   :  { %1829 = vmatprep.subr.bf16.mxu0 %v2816_v25  ;;  %2041 = vmatprep.subr.bf16.mxu1 %v2819_v27  ;;  %v2901_v25 = vld [vmem:[%s3791_s1 + $0x7e8] ss:$16 sps:$4 sm:$0xff]  }
  0xc5   :  { %1816 = vmatprep.mubr.bf16.mxu0 %v2181_v28  ;;  %2028 = vmatprep.mubr.bf16.mxu1 %v2181_v28  ;;  %v25_v27 = vld [vmem:[%s3792_s0 + $0x58] sm:$0xff] }
  0xc6   :  { %v29_v28 = vld [vmem:[%s3792_s0 + $0x78] sm:$0xff] }
  0xc7   :  { %1830 = vmatpush1.bf16.msra.mxu0 %v2814_v29  ;;  %2042 = vmatpush1.bf16.msra.mxu1 %v2817_v30  ;;  %v2174_v29 = vcombine.low %v3585_v34, %v3590_v35  ;;  %v2183_v30 = vcombine.high %v25_v27, %v29_v28 }
  0xc8   :  { %1831 = vmatprep.subr.bf16.mxu0 %v2822_v31  ;;  %2043 = vmatprep.subr.bf16.mxu1 %v2825_v32  ;;  %v2182_v31 = vcombine.low %v25_v27, %v29_v28  ;;  %v288_v32 = vlaneseq }
  0xca   :  { %1817 = vmatmul.mubr.bf16.gmra.mrb[4].mxu0 %v2180_v33  ;;  %2029 = vmatmul.mubr.bf16.gmra.mrb[4].mxu1 %v2180_v33  ;;  %v289_v33 = vshrl.u32 %v288_v32, 7 }
  0xcb   :  { %1832 = vmatpush1.bf16.msra.mxu0 %v2820_v36  ;;  %2044 = vmatpush1.bf16.msra.mxu1 %v2823_v37 }
  0xcc   :  { %1833 = vmatprep.subr.bf16.mxu0 %v2828_v38  ;;  %2045 = vmatprep.subr.bf16.mxu1 %v2831_v39  ;;  %v290_v36 = vsub.s32 0, %v289_v33  ;;  %v298_v37 = vsub.s32 2, %v289_v33  ;;  %v286_v38 = vld [vmem:[%s3793_s2] sm:$0xf]  ;;  %v294_v39 = vsub.s32 1, %v289_v33  ;;  %v302_v34 = vsub.s32 3, %v289_v33 }
  0xcd   :  { %1859 = vmatprep.mubr.bf16.mxu0 %v2175_v40  ;;  %2071 = vmatprep.mubr.bf16.mxu1 %v2175_v40 }
  0xce   :  { %v291_v35 = vrot.slane %v286_v38, %v290_v36  ;;  %v299_v40 = vrot.slane %v286_v38, %v298_v37 }
  0xcf   :  { %1834 = vmatpush1.bf16.msra.mxu0 %v2826_v41  ;;  %2046 = vmatpush1.bf16.msra.mxu1 %v2829_v42  ;;  %v295_v41 = vrot.slane %v286_v38, %v294_v39  ;;  %v303_v42 = vrot.slane %v286_v38, %v302_v34 }
  0xd0   :  { %1835 = vmatprep.subr.bf16.mxu0 %v2834_v43  ;;  %2047 = vmatprep.subr.bf16.mxu1 %v2837_v44 }
  0xd3   :  { %1836 = vmatpush1.bf16.msra.mxu0 %v2832_v45  ;;  %2048 = vmatpush1.bf16.msra.mxu1 %v2835_v46 }
  0xd4   :  { %1837 = vmatprep.subr.bf16.mxu0 %v2840_v47  ;;  %2049 = vmatprep.subr.bf16.mxu1 %v2843_v48 }
  0xd7   :  { %1838 = vmatpush1.bf16.msra.mxu0 %v2838_v49  ;;  %2050 = vmatpush1.bf16.msra.mxu1 %v2841_v50 }
  0xd8   :  { %1839 = vmatprep.subr.bf16.mxu0 %v2846_v51  ;;  %2051 = vmatprep.subr.bf16.mxu1 %v2849_v52 }
  0xdb   :  { %1840 = vmatpush1.bf16.msra.mxu0 %v2844_v53  ;;  %2052 = vmatpush1.bf16.msra.mxu1 %v2847_v54 }
  0xdc   :  { %1841 = vmatprep.subr.bf16.mxu0 %v2852_v55  ;;  %2053 = vmatprep.subr.bf16.mxu1 %v2855_v56 }
  0xdf   :  { %1842 = vmatpush1.bf16.msra.mxu0 %v2850_v57  ;;  %2054 = vmatpush1.bf16.msra.mxu1 %v2853_v58 }
  0xe0   :  { %1843 = vmatprep.subr.bf16.mxu0 %v2858_v59  ;;  %2055 = vmatprep.subr.bf16.mxu1 %v2861_v60 }
  0xe3   :  { %1844 = vmatpush1.bf16.msra.mxu0 %v2856_v61  ;;  %2056 = vmatpush1.bf16.msra.mxu1 %v2859_v62 }
  0xe4   :  { %1845 = vmatprep.subr.bf16.mxu0 %v2864_v63  ;;  %2057 = vmatprep.subr.bf16.mxu1 %v2867_v0 }
  0xe7   :  { %1846 = vmatpush1.bf16.msra.mxu0 %v2862_v1  ;;  %2058 = vmatpush1.bf16.msra.mxu1 %v2865_v2 }
  0xe8   :  { %1847 = vmatprep.subr.bf16.mxu0 %v2870_v3  ;;  %2059 = vmatprep.subr.bf16.mxu1 %v2873_v4 }
  0xeb   :  { %1848 = vmatpush1.bf16.msra.mxu0 %v2868_v5  ;;  %2060 = vmatpush1.bf16.msra.mxu1 %v2871_v6 }
  0xec   :  { %1849 = vmatprep.subr.bf16.mxu0 %v2876_v7  ;;  %2061 = vmatprep.subr.bf16.mxu1 %v2879_v8 }
  0xef   :  { %1850 = vmatpush1.bf16.msra.mxu0 %v2874_v9  ;;  %2062 = vmatpush1.bf16.msra.mxu1 %v2877_v10 }
  0xf0   :  { %1851 = vmatprep.subr.bf16.mxu0 %v2882_v11  ;;  %2063 = vmatprep.subr.bf16.mxu1 %v2885_v12 }
  0xf3   :  { %1852 = vmatpush1.bf16.msra.mxu0 %v2880_v13  ;;  %2064 = vmatpush1.bf16.msra.mxu1 %v2883_v14 }
  0xf4   :  { %1853 = vmatprep.subr.bf16.mxu0 %v2888_v15  ;;  %2065 = vmatprep.subr.bf16.mxu1 %v2891_v16 }
  0xf7   :  { %1854 = vmatpush1.bf16.msra.mxu0 %v2886_v17  ;;  %2066 = vmatpush1.bf16.msra.mxu1 %v2889_v18 }
  0xf8   :  { %1855 = vmatprep.subr.bf16.mxu0 %v2894_v19  ;;  %2067 = vmatprep.subr.bf16.mxu1 %v2897_v20 }
  0xfb   :  { %1856 = vmatpush1.bf16.msra.mxu0 %v2892_v21  ;;  %2068 = vmatpush1.bf16.msra.mxu1 %v2895_v22 }
  0xfc   :  { %1857 = vmatprep.subr.bf16.mxu0 %v2900_v23  ;;  %2069 = vmatprep.subr.bf16.mxu1 %v2903_v24 }
  0xff   :  { %1858 = vmatpush1.bf16.msra.mxu0 %v2898_v26  ;;  %2070 = vmatpush1.bf16.msra.mxu1 %v2901_v25 }
 0x102   :  { %1860 = vmatmul.mubr.bf16.vlgmr.msra.gmra.mrb[0].mxu0 %v2174_v29  ;;  %2072 = vmatmul.mubr.bf16.vlgmr.msra.gmra.mrb[0].mxu1 %v2174_v29 }
 0x103   :  { %1869 = vmatprep.mubr.bf16.mxu0 %v2183_v30  ;;  %2081 = vmatprep.mubr.bf16.mxu1 %v2183_v30 }
 0x10a   :  { %1870 = vmatmul.mubr.bf16.gmra.mrb[4].mxu0 %v2182_v31  ;;  %2082 = vmatmul.mubr.bf16.gmra.mrb[4].mxu1 %v2182_v31 }
 0x1d5   :  { %v1861_v43 = vpop.f32.mrb[0].mxu0  ;;  %v2073_v44 = vpop.f32.mrb[0].mxu1 }
 0x1d6   :  { %v2456_v45 = vadd.f32 %v1861_v43, %v291_v35  ;;  %v2464_v46 = vadd.f32 %v2073_v44, %v299_v40  ;;  %v1863_v47 = vpop.f32.mrb[1].mxu0  ;;  %v2075_v48 = vpop.f32.mrb[1].mxu1 }
 0x1d7   :  { %v2457_v49 = vadd.f32 %v1863_v47, %v295_v41  ;;  %v2465_v50 = vadd.f32 %v2075_v48, %v303_v42  ;;  %v1865_v51 = vpop.f32.mrb[2].mxu0  ;;  %v2077_v52 = vpop.f32.mrb[2].mxu1 }
 0x1d8   :  { %v2092_v53 = vmax.f32 %v2456_v45, 0.0  ;;  %v2094_v54 = vmax.f32 %v2464_v46, 0.0  ;;  %v2458_v55 = vadd.f32 %v1865_v51, %v291_v35  ;;  %v2466_v56 = vadd.f32 %v2077_v52, %v299_v40  ;;  %v1867_v57 = vpop.f32.mrb[3].mxu0  ;;  %v2079_v58 = vpop.f32.mrb[3].mxu1 }
 0x1d9   :  { %v2093_v59 = vmax.f32 %v2457_v49, 0.0  ;;  %v2095_v60 = vmax.f32 %v2465_v50, 0.0  ;;  %v2459_v61 = vadd.f32 %v1867_v57, %v295_v41  ;;  %v2467_v62 = vadd.f32 %v2079_v58, %v303_v42 }
 0x1da   :  { %v2096_v63 = vmax.f32 %v2458_v55, 0.0  ;;  %v2098_v0 = vmax.f32 %v2466_v56, 0.0 }
 0x1db   :  { %v2448_v1 = vpack.c.bf16 %v2093_v59, %v2092_v53  ;;  %v2449_v2 = vpack.c.bf16 %v2095_v60, %v2094_v54  ;;  %v2097_v3 = vmax.f32 %v2459_v61, 0.0  ;;  %v2099_v4 = vmax.f32 %v2467_v62, 0.0 }
 0x1dd   :  { %2156 = vst [vmem:[%s3794_s3] sm:$0xff] %v2448_v1  ;;  %2157 = vst [vmem:[%s3794_s3 + $0x8] sm:$0xff] %v2449_v2  ;;  %v2450_v5 = vpack.c.bf16 %v2097_v3, %v2096_v63  ;;  %v2451_v6 = vpack.c.bf16 %v2099_v4, %v2098_v0  ;;  %v1871_v7 = vpop.f32.mrb[4].mxu0  ;;  %v2083_v8 = vpop.f32.mrb[4].mxu1 }
 0x1de   :  { %v2460_v9 = vadd.f32 %v1871_v7, %v291_v35  ;;  %v2468_v10 = vadd.f32 %v2083_v8, %v299_v40  ;;  %v1873_v11 = vpop.f32.mrb[5].mxu0  ;;  %v2085_v12 = vpop.f32.mrb[5].mxu1 }
 0x1df   :  { %2158 = vst [vmem:[%s3794_s3 + $0x10] sm:$0xff] %v2450_v5  ;;  %2159 = vst [vmem:[%s3794_s3 + $0x18] sm:$0xff] %v2451_v6  ;;  %v2461_v13 = vadd.f32 %v1873_v11, %v295_v41  ;;  %v2469_v14 = vadd.f32 %v2085_v12, %v303_v42  ;;  %v1875_v15 = vpop.f32.mrb[6].mxu0  ;;  %v2087_v16 = vpop.f32.mrb[6].mxu1 }
 0x1e0   :  { %v2100_v17 = vmax.f32 %v2460_v9, 0.0  ;;  %v2102_v18 = vmax.f32 %v2468_v10, 0.0  ;;  %v2462_v19 = vadd.f32 %v1875_v15, %v291_v35  ;;  %v2470_v20 = vadd.f32 %v2087_v16, %v299_v40  ;;  %v1877_v21 = vpop.f32.mrb[7].mxu0  ;;  %v2089_v22 = vpop.f32.mrb[7].mxu1 }
 0x1e1   :  { %v2101_v23 = vmax.f32 %v2461_v13, 0.0  ;;  %v2103_v24 = vmax.f32 %v2469_v14, 0.0  ;;  %v2463_v26 = vadd.f32 %v1877_v21, %v295_v41  ;;  %v2471_v25 = vadd.f32 %v2089_v22, %v303_v42 }
 0x1e2   :  { %v2104_v27 = vmax.f32 %v2462_v19, 0.0  ;;  %v2106_v28 = vmax.f32 %v2470_v20, 0.0 }
 0x1e3   :  { %v2452_v29 = vpack.c.bf16 %v2101_v23, %v2100_v17  ;;  %v2453_v30 = vpack.c.bf16 %v2103_v24, %v2102_v18  ;;  %v2105_v31 = vmax.f32 %v2463_v26, 0.0  ;;  %v2107_v32 = vmax.f32 %v2471_v25, 0.0 }
 0x1e5   :  { %2160 = vst [vmem:[%s3794_s3 + $0x20] sm:$0xff] %v2452_v29  ;;  %2161 = vst [vmem:[%s3794_s3 + $0x28] sm:$0xff] %v2453_v30  ;;  %v2454_v33 = vpack.c.bf16 %v2105_v31, %v2104_v27  ;;  %v2455_v36 = vpack.c.bf16 %v2107_v32, %v2106_v28 }
 0x1e7   :  { %2162 = vst [vmem:[%s3794_s3 + $0x30] sm:$0xff] %v2454_v33  ;;  %2163 = vst [vmem:[%s3794_s3 + $0x38] sm:$0xff] %v2455_v36 }

// kernel: unet_forward.19
= control target key start
LH: loop header
LB: loop body
LE: loop exit
PB: predicated region body
PF: predicated region fallthrough
CT: control target
= control target key end

     0   :  { %s807_s12 = smov 0   ;;  %s941_s0 = inlined_call_operand.vmem [shape: bf16[512,128], index: 0, kind: input, shape index: {}]   ;;  %s942_s1 = inlined_call_operand.vmem [shape: bf16[128,128], index: 1, kind: input, shape index: {}]   ;;  %s943_s2 = inlined_call_operand.vmem [shape: f32[1,128], index: 2, kind: input, shape index: {}]   ;;  %s944_s3 = inlined_call_operand.vmem [shape: f32[512,128], index: 3, kind: output, shape index: {}]  }
   0x1 LB: > { %s623_s13 = sadd.s32 4294967295, %s785_s12   ;;  %p627_p0 = scmp.ge.s32.totalorder %s785_s12, 1  ;;  %s785_s12 = sphi %s807_s12, %s13_s12  }
   0x2   : > { %p138_p1 = scmp.lt.s32.totalorder %s785_s12, 3 }
   0x4   : > { %p139_p2 = pnand %p627_p0, %p138_p1 }
   0x5   : > { %v755_v0 = vld [vmem:[%s942_s1] sm:$0xff] (!%p139_p2)   ;;  %s628_s16 = sshll.u32 (!%p139_p2), %s623_s13, 5  ;;  %v756_v1 = vld [vmem:[%s942_s1 + $0x8] sm:$0xff] (!%p139_p2)   ;;  %v757_v2 = vld [vmem:[%s942_s1 + $0x10] sm:$0xff] (!%p139_p2)  }
   0x6   : > { %142 = sbr.rel (%p139_p2) target bundleno = 280 (0x118), region = 32  ;;  %p163_p3 = scmp.lt.s32.totalorder (!%p139_p2), %s628_s16, 63  ;;  %683 = vmatprep.subr.bf16.mxu0 (!%p139_p2), %v755_v0  ;;  %731 = vmatprep.subr.bf16.mxu1 (!%p139_p2), %v755_v0  ;;  %v758_v3 = vld [vmem:[%s942_s1 + $0x18] sm:$0xff] (!%p139_p2)   ;;  %v759_v6 = vld [vmem:[%s942_s1 + $0x20] sm:$0xff] (!%p139_p2)   ;;  %v760_v7 = vld [vmem:[%s942_s1 + $0x28] sm:$0xff] (!%p139_p2)  }
   0x7   : > { %684 = vmatpush3.bf16.msra.mxu0 (!%p139_p2), %v755_v0  ;;  %739 = vmatpush3.bf16.msra.mxu1 (!%p139_p2), %v755_v0  ;;  %v761_v8 = vld [vmem:[%s942_s1 + $0x30] sm:$0xff] (!%p139_p2)   ;;  %v762_v9 = vld [vmem:[%s942_s1 + $0x38] sm:$0xff] (!%p139_p2)   ;;  %v867_v24 = vld [vmem:[%s943_s2] ss:$0 sm:$0xff] (!%p139_p2) }
   0x8   : > { %685 = vmatprep.subr.bf16.mxu0 (!%p139_p2), %v756_v1  ;;  %732 = vmatprep.subr.bf16.mxu1 (!%p139_p2), %v756_v1 }
   0xb   : > { %686 = vmatpush3.bf16.msra.mxu0 (!%p139_p2), %v756_v1  ;;  %740 = vmatpush3.bf16.msra.mxu1 (!%p139_p2), %v756_v1 }
   0xc   : > { %687 = vmatprep.subr.bf16.mxu0 (!%p139_p2), %v757_v2  ;;  %733 = vmatprep.subr.bf16.mxu1 (!%p139_p2), %v757_v2 }
   0xd   : > { %s946_s16 = smov (!%p163_p3, %s628_s16), 63 }
   0xe   : > { %s629_s21 = sshll.u32 %s946_s16, 2  ;;  %s631_s8 = sshll.u32 %s946_s16, 3 }
   0xf   : > { %s830_s24 = scalar_lea.vmem %s941_s0, %s629_s21  ;;  %688 = vmatpush3.bf16.msra.mxu0 %v757_v2  ;;  %741 = vmatpush3.bf16.msra.mxu1 %v757_v2  ;;  %s872_s14 = scalar_lea.vmem %s944_s3, %s631_s8 }
  0x10   : > { %v763_v4 = vld [vmem:[%s830_s24] sm:$0xff]   ;;  %689 = vmatprep.subr.bf16.mxu0 %v758_v3  ;;  %734 = vmatprep.subr.bf16.mxu1 %v758_v3  ;;  %v765_v10 = vld [vmem:[%s830_s24 + $0x8] sm:$0xff]   ;;  %v767_v12 = vld [vmem:[%s830_s24 + $0x10] sm:$0xff]  }
  0x11   : > { %v764_v5 = vld [vmem:[%s830_s24 + $0x40] sm:$0xff]   ;;  %699 = vmatprep.mubr.bf16.mxu0 %v763_v4  ;;  %v766_v11 = vld [vmem:[%s830_s24 + $0x48] sm:$0xff]   ;;  %v768_v13 = vld [vmem:[%s830_s24 + $0x50] sm:$0xff]  }
  0x12   : > { %715 = vmatprep.mubr.bf16.mxu1 %v764_v5  ;;  %v769_v14 = vld [vmem:[%s830_s24 + $0x18] sm:$0xff]   ;;  %v771_v16 = vld [vmem:[%s830_s24 + $0x20] sm:$0xff]   ;;  %v773_v18 = vld [vmem:[%s830_s24 + $0x28] sm:$0xff]  }
  0x13   : > { %690 = vmatpush3.bf16.msra.mxu0 %v758_v3  ;;  %742 = vmatpush3.bf16.msra.mxu1 %v758_v3  ;;  %v770_v15 = vld [vmem:[%s830_s24 + $0x58] sm:$0xff]   ;;  %v772_v17 = vld [vmem:[%s830_s24 + $0x60] sm:$0xff]   ;;  %v774_v19 = vld [vmem:[%s830_s24 + $0x68] sm:$0xff]  }
  0x14   : > { %691 = vmatprep.subr.bf16.mxu0 %v759_v6  ;;  %735 = vmatprep.subr.bf16.mxu1 %v759_v6  ;;  %v775_v20 = vld [vmem:[%s830_s24 + $0x30] sm:$0xff]   ;;  %v777_v22 = vld [vmem:[%s830_s24 + $0x38] sm:$0xff]  }
  0x15   : > { %v776_v21 = vld [vmem:[%s830_s24 + $0x70] sm:$0xff]   ;;  %v778_v23 = vld [vmem:[%s830_s24 + $0x78] sm:$0xff]  }
  0x17   : > { %692 = vmatpush3.bf16.msra.mxu0 %v759_v6  ;;  %743 = vmatpush3.bf16.msra.mxu1 %v759_v6 }
  0x18   : > { %693 = vmatprep.subr.bf16.mxu0 %v760_v7  ;;  %736 = vmatprep.subr.bf16.mxu1 %v760_v7 }
  0x1b   : > { %694 = vmatpush3.bf16.msra.mxu0 %v760_v7  ;;  %744 = vmatpush3.bf16.msra.mxu1 %v760_v7 }
  0x1c   : > { %695 = vmatprep.subr.bf16.mxu0 %v761_v8  ;;  %737 = vmatprep.subr.bf16.mxu1 %v761_v8 }
  0x1f   : > { %696 = vmatpush3.bf16.msra.mxu0 %v761_v8  ;;  %745 = vmatpush3.bf16.msra.mxu1 %v761_v8 }
  0x20   : > { %697 = vmatprep.subr.bf16.mxu0 %v762_v9  ;;  %738 = vmatprep.subr.bf16.mxu1 %v762_v9 }
  0x23   : > { %698 = vmatpush3.bf16.msra.mxu0 %v762_v9  ;;  %746 = vmatpush3.bf16.msra.mxu1 %v762_v9 }
  0x26   : > { %700 = vmatmul.mubr.bf16.vlgmr.msra.gmra.mrb[0].mxu0 %v765_v10  ;;  %716 = vmatmul.mubr.bf16.vlgmr.msra.gmra.mrb[0].mxu1 %v766_v11 }
  0x27   : > { %703 = vmatprep.mubr.bf16.mxu0 %v767_v12  ;;  %719 = vmatprep.mubr.bf16.mxu1 %v768_v13 }
  0x2e   : > { %704 = vmatmul.mubr.bf16.gmra.mrb[4].mxu0 %v769_v14  ;;  %720 = vmatmul.mubr.bf16.gmra.mrb[4].mxu1 %v770_v15 }
  0x2f   : > { %707 = vmatprep.mubr.bf16.mxu0 %v771_v16  ;;  %723 = vmatprep.mubr.bf16.mxu1 %v772_v17 }
  0x36   : > { %708 = vmatmul.mubr.bf16.gmra.mrb[8].mxu0 %v773_v18  ;;  %724 = vmatmul.mubr.bf16.gmra.mrb[8].mxu1 %v774_v19 }
  0x37   : > { %711 = vmatprep.mubr.bf16.mxu0 %v775_v20  ;;  %727 = vmatprep.mubr.bf16.mxu1 %v776_v21 }
  0x3e   : > { %712 = vmatmul.mubr.bf16.gmra.mrb[12].mxu0 %v777_v22  ;;  %728 = vmatmul.mubr.bf16.gmra.mrb[12].mxu1 %v778_v23 }
  0xf9   : > { %v701_v25 = vpop.f32.mrb[0].mxu0  ;;  %v717_v26 = vpop.f32.mrb[0].mxu1 }
  0xfa   : > { %v417_v27 = vadd.f32 %v701_v25, %v867_v24  ;;  %v481_v28 = vadd.f32 %v717_v26, %v867_v24  ;;  %v408_v29 = vpop.f32.mrb[1].mxu0  ;;  %v472_v30 = vpop.f32.mrb[1].mxu1 }
  0xfb   : > { %v409_v31 = vadd.f32 %v867_v24, %v408_v29  ;;  %v473_v32 = vadd.f32 %v867_v24, %v472_v30  ;;  %v702_v33 = vpop.f32.mrb[2].mxu0  ;;  %v718_v34 = vpop.f32.mrb[2].mxu1 }
  0xfc   : > { %537 = vst [vmem:[%s872_s14 + $0x10] sm:$0xff] %v417_v27  ;;  %553 = vst [vmem:[%s872_s14 + $0x90] sm:$0xff] %v481_v28  ;;  %v420_v35 = vadd.f32 %v702_v33, %v867_v24  ;;  %v484_v36 = vadd.f32 %v718_v34, %v867_v24  ;;  %v411_v37 = vpop.f32.mrb[3].mxu0  ;;  %v475_v38 = vpop.f32.mrb[3].mxu1 }
  0xfd   : > { %535 = vst [vmem:[%s872_s14] sm:$0xff] %v409_v31  ;;  %551 = vst [vmem:[%s872_s14 + $0x80] sm:$0xff] %v473_v32  ;;  %v412_v39 = vadd.f32 %v867_v24, %v411_v37  ;;  %v476_v40 = vadd.f32 %v867_v24, %v475_v38 }
  0xfe   : > { %538 = vst [vmem:[%s872_s14 + $0x18] sm:$0xff] %v420_v35  ;;  %554 = vst [vmem:[%s872_s14 + $0x98] sm:$0xff] %v484_v36 }
  0xff   : > { %536 = vst [vmem:[%s872_s14 + $0x8] sm:$0xff] %v412_v39  ;;  %552 = vst [vmem:[%s872_s14 + $0x88] sm:$0xff] %v476_v40 }
 0x101   : > { %v705_v41 = vpop.f32.mrb[4].mxu0  ;;  %v721_v42 = vpop.f32.mrb[4].mxu1 }
 0x102   : > { %v433_v43 = vadd.f32 %v705_v41, %v867_v24  ;;  %v497_v44 = vadd.f32 %v721_v42, %v867_v24  ;;  %v424_v45 = vpop.f32.mrb[5].mxu0  ;;  %v488_v46 = vpop.f32.mrb[5].mxu1 }
 0x103   : > { %v425_v47 = vadd.f32 %v867_v24, %v424_v45  ;;  %v489_v48 = vadd.f32 %v867_v24, %v488_v46  ;;  %v706_v49 = vpop.f32.mrb[6].mxu0  ;;  %v722_v50 = vpop.f32.mrb[6].mxu1 }
 0x104   : > { %541 = vst [vmem:[%s872_s14 + $0x30] sm:$0xff] %v433_v43  ;;  %557 = vst [vmem:[%s872_s14 + $0xb0] sm:$0xff] %v497_v44  ;;  %v436_v51 = vadd.f32 %v706_v49, %v867_v24  ;;  %v500_v52 = vadd.f32 %v722_v50, %v867_v24  ;;  %v427_v53 = vpop.f32.mrb[7].mxu0  ;;  %v491_v54 = vpop.f32.mrb[7].mxu1 }
 0x105   : > { %539 = vst [vmem:[%s872_s14 + $0x20] sm:$0xff] %v425_v47  ;;  %555 = vst [vmem:[%s872_s14 + $0xa0] sm:$0xff] %v489_v48  ;;  %v428_v55 = vadd.f32 %v867_v24, %v427_v53  ;;  %v492_v56 = vadd.f32 %v867_v24, %v491_v54 }
 0x106   : > { %542 = vst [vmem:[%s872_s14 + $0x38] sm:$0xff] %v436_v51  ;;  %558 = vst [vmem:[%s872_s14 + $0xb8] sm:$0xff] %v500_v52 }
 0x107   : > { %540 = vst [vmem:[%s872_s14 + $0x28] sm:$0xff] %v428_v55  ;;  %556 = vst [vmem:[%s872_s14 + $0xa8] sm:$0xff] %v492_v56 }
 0x109   : > { %v709_v57 = vpop.f32.mrb[8].mxu0  ;;  %v725_v58 = vpop.f32.mrb[8].mxu1 }
 0x10a   : > { %v449_v59 = vadd.f32 %v709_v57, %v867_v24  ;;  %v513_v60 = vadd.f32 %v725_v58, %v867_v24  ;;  %v440_v61 = vpop.f32.mrb[9].mxu0  ;;  %v504_v62 = vpop.f32.mrb[9].mxu1 }
 0x10b   : > { %v441_v63 = vadd.f32 %v867_v24, %v440_v61  ;;  %v505_v0 = vadd.f32 %v867_v24, %v504_v62  ;;  %v710_v1 = vpop.f32.mrb[10].mxu0  ;;  %v726_v2 = vpop.f32.mrb[10].mxu1 }
 0x10c   : > { %545 = vst [vmem:[%s872_s14 + $0x50] sm:$0xff] %v449_v59  ;;  %561 = vst [vmem:[%s872_s14 + $0xd0] sm:$0xff] %v513_v60  ;;  %v452_v3 = vadd.f32 %v710_v1, %v867_v24  ;;  %v516_v4 = vadd.f32 %v726_v2, %v867_v24  ;;  %v443_v5 = vpop.f32.mrb[11].mxu0  ;;  %v507_v6 = vpop.f32.mrb[11].mxu1 }
 0x10d   : > { %543 = vst [vmem:[%s872_s14 + $0x40] sm:$0xff] %v441_v63  ;;  %559 = vst [vmem:[%s872_s14 + $0xc0] sm:$0xff] %v505_v0  ;;  %v444_v7 = vadd.f32 %v867_v24, %v443_v5  ;;  %v508_v8 = vadd.f32 %v867_v24, %v507_v6 }
 0x10e   : > { %546 = vst [vmem:[%s872_s14 + $0x58] sm:$0xff] %v452_v3  ;;  %562 = vst [vmem:[%s872_s14 + $0xd8] sm:$0xff] %v516_v4 }
 0x10f   : > { %544 = vst [vmem:[%s872_s14 + $0x48] sm:$0xff] %v444_v7  ;;  %560 = vst [vmem:[%s872_s14 + $0xc8] sm:$0xff] %v508_v8 }
 0x111   : > { %v713_v9 = vpop.f32.mrb[12].mxu0  ;;  %v729_v10 = vpop.f32.mrb[12].mxu1 }
 0x112   : > { %v465_v11 = vadd.f32 %v713_v9, %v867_v24  ;;  %v529_v12 = vadd.f32 %v729_v10, %v867_v24  ;;  %v456_v13 = vpop.f32.mrb[13].mxu0  ;;  %v520_v14 = vpop.f32.mrb[13].mxu1 }
 0x113   : > { %v457_v15 = vadd.f32 %v867_v24, %v456_v13  ;;  %v521_v16 = vadd.f32 %v867_v24, %v520_v14  ;;  %v714_v17 = vpop.f32.mrb[14].mxu0  ;;  %v730_v18 = vpop.f32.mrb[14].mxu1 }
 0x114   : > { %549 = vst [vmem:[%s872_s14 + $0x70] sm:$0xff] %v465_v11  ;;  %565 = vst [vmem:[%s872_s14 + $0xf0] sm:$0xff] %v529_v12  ;;  %v468_v19 = vadd.f32 %v714_v17, %v867_v24  ;;  %v532_v20 = vadd.f32 %v730_v18, %v867_v24  ;;  %v459_v21 = vpop.f32.mrb[15].mxu0  ;;  %v523_v22 = vpop.f32.mrb[15].mxu1 }
 0x115   : > { %547 = vst [vmem:[%s872_s14 + $0x60] sm:$0xff] %v457_v15  ;;  %563 = vst [vmem:[%s872_s14 + $0xe0] sm:$0xff] %v521_v16  ;;  %v460_v23 = vadd.f32 %v867_v24, %v459_v21  ;;  %v524_v25 = vadd.f32 %v867_v24, %v523_v22 }
 0x116   : > { %550 = vst [vmem:[%s872_s14 + $0x78] sm:$0xff] %v468_v19  ;;  %566 = vst [vmem:[%s872_s14 + $0xf8] sm:$0xff] %v532_v20 }
 0x117   : > { %548 = vst [vmem:[%s872_s14 + $0x68] sm:$0xff] %v460_v23  ;;  %564 = vst [vmem:[%s872_s14 + $0xe8] sm:$0xff] %v524_v25 }
 0x118 PF: > { %s13_s12 = sadd.s32 1, %s785_s12  }
 0x119   : > { %p10_p4 = scmp.ge.s32.totalorder %s13_s12, 4  }
 0x11b   :  { %12 = sbr.rel (!%p10_p4) target bundleno = 1 (0x1), region = 62 }

// kernel: unet_forward.18
= control target key start
LH: loop header
LB: loop body
LE: loop exit
PB: predicated region body
PF: predicated region fallthrough
CT: control target
= control target key end

     0   :  { %s5327_s1 = inlined_call_operand.vmem [shape: bf16[1024,512], index: 1, kind: input, shape index: {}]   ;;  %s5328_s0 = inlined_call_operand.vmem [shape: bf16[128,1024], index: 0, kind: input, shape index: {}]   ;;  %s5329_s2 = inlined_call_operand.vmem [shape: f32[1,512], index: 2, kind: input, shape index: {}]   ;;  %s5330_s3 = inlined_call_operand.vmem [shape: bf16[128,512], index: 3, kind: output, shape index: {}]  }
   0x1   :  { %v3792_v0 = vld [vmem:[%s5327_s1 + $0x4] ss:$16 sps:$4 sm:$0xff]   ;;  %v3794_v1 = vld [vmem:[%s5327_s1 + $0xc] ss:$16 sps:$4 sm:$0xff]   ;;  %v3796_v2 = vld [vmem:[%s5327_s1] ss:$16 sps:$4 sm:$0xff]  }
   0x2   :  { %1956 = vmatprep.subr.bf16.mxu0 %v3792_v0  ;;  %v3797_v3 = vld [vmem:[%s5327_s1 + $0x8] ss:$16 sps:$4 sm:$0xff]   ;;  %2408 = vmatprep.subr.bf16.mxu1 %v3794_v1  ;;  %v3798_v4 = vld [vmem:[%s5327_s1 + $0x24] ss:$16 sps:$4 sm:$0xff]   ;;  %v3800_v5 = vld [vmem:[%s5327_s1 + $0x2c] ss:$16 sps:$4 sm:$0xff]  }
   0x3   :  { %1957 = vmatpush1.bf16.msra.mxu0 %v3796_v2  ;;  %2409 = vmatpush1.bf16.msra.mxu1 %v3797_v3  ;;  %v3802_v6 = vld [vmem:[%s5327_s1 + $0x20] ss:$16 sps:$4 sm:$0xff]   ;;  %v3803_v7 = vld [vmem:[%s5327_s1 + $0x28] ss:$16 sps:$4 sm:$0xff]   ;;  %v3804_v8 = vld [vmem:[%s5327_s1 + $0x44] ss:$16 sps:$4 sm:$0xff]  }
   0x4   :  { %1958 = vmatprep.subr.bf16.mxu0 %v3798_v4  ;;  %2410 = vmatprep.subr.bf16.mxu1 %v3800_v5  ;;  %v3806_v9 = vld [vmem:[%s5327_s1 + $0x4c] ss:$16 sps:$4 sm:$0xff]   ;;  %v3808_v10 = vld [vmem:[%s5327_s1 + $0x40] ss:$16 sps:$4 sm:$0xff]   ;;  %v3809_v11 = vld [vmem:[%s5327_s1 + $0x48] ss:$16 sps:$4 sm:$0xff]  }
   0x5   :  { %v3810_v12 = vld [vmem:[%s5327_s1 + $0x64] ss:$16 sps:$4 sm:$0xff]   ;;  %v3812_v13 = vld [vmem:[%s5327_s1 + $0x6c] ss:$16 sps:$4 sm:$0xff]   ;;  %v3814_v14 = vld [vmem:[%s5327_s1 + $0x60] ss:$16 sps:$4 sm:$0xff]  }
   0x6   :  { %v3815_v15 = vld [vmem:[%s5327_s1 + $0x68] ss:$16 sps:$4 sm:$0xff]   ;;  %v3816_v16 = vld [vmem:[%s5327_s1 + $0x84] ss:$16 sps:$4 sm:$0xff]   ;;  %v3818_v17 = vld [vmem:[%s5327_s1 + $0x8c] ss:$16 sps:$4 sm:$0xff]  }
   0x7   :  { %1959 = vmatpush1.bf16.msra.mxu0 %v3802_v6  ;;  %2411 = vmatpush1.bf16.msra.mxu1 %v3803_v7  ;;  %v3820_v18 = vld [vmem:[%s5327_s1 + $0x80] ss:$16 sps:$4 sm:$0xff]   ;;  %v3821_v19 = vld [vmem:[%s5327_s1 + $0x88] ss:$16 sps:$4 sm:$0xff]   ;;  %v3822_v20 = vld [vmem:[%s5327_s1 + $0xa4] ss:$16 sps:$4 sm:$0xff]  }
   0x8   :  { %1960 = vmatprep.subr.bf16.mxu0 %v3804_v8  ;;  %2412 = vmatprep.subr.bf16.mxu1 %v3806_v9  ;;  %v3824_v21 = vld [vmem:[%s5327_s1 + $0xac] ss:$16 sps:$4 sm:$0xff]   ;;  %v3826_v22 = vld [vmem:[%s5327_s1 + $0xa0] ss:$16 sps:$4 sm:$0xff]   ;;  %v3827_v23 = vld [vmem:[%s5327_s1 + $0xa8] ss:$16 sps:$4 sm:$0xff]  }
   0x9   :  { %v3828_v24 = vld [vmem:[%s5327_s1 + $0xc4] ss:$16 sps:$4 sm:$0xff]   ;;  %v3830_v25 = vld [vmem:[%s5327_s1 + $0xcc] ss:$16 sps:$4 sm:$0xff]   ;;  %v3832_v26 = vld [vmem:[%s5327_s1 + $0xc0] ss:$16 sps:$4 sm:$0xff]  }
   0xa   :  { %v3833_v27 = vld [vmem:[%s5327_s1 + $0xc8] ss:$16 sps:$4 sm:$0xff]   ;;  %v3834_v28 = vld [vmem:[%s5327_s1 + $0xe4] ss:$16 sps:$4 sm:$0xff]   ;;  %v3836_v29 = vld [vmem:[%s5327_s1 + $0xec] ss:$16 sps:$4 sm:$0xff]  }
   0xb   :  { %1961 = vmatpush1.bf16.msra.mxu0 %v3808_v10  ;;  %2413 = vmatpush1.bf16.msra.mxu1 %v3809_v11  ;;  %v3838_v30 = vld [vmem:[%s5327_s1 + $0xe0] ss:$16 sps:$4 sm:$0xff]   ;;  %v3839_v31 = vld [vmem:[%s5327_s1 + $0xe8] ss:$16 sps:$4 sm:$0xff]   ;;  %v3840_v32 = vld [vmem:[%s5327_s1 + $0x104] ss:$16 sps:$4 sm:$0xff]  }
   0xc   :  { %1962 = vmatprep.subr.bf16.mxu0 %v3810_v12  ;;  %2414 = vmatprep.subr.bf16.mxu1 %v3812_v13  ;;  %v3842_v33 = vld [vmem:[%s5327_s1 + $0x10c] ss:$16 sps:$4 sm:$0xff]   ;;  %v3844_v34 = vld [vmem:[%s5327_s1 + $0x100] ss:$16 sps:$4 sm:$0xff]   ;;  %v3845_v35 = vld [vmem:[%s5327_s1 + $0x108] ss:$16 sps:$4 sm:$0xff]  }
   0xd   :  { %v3846_v36 = vld [vmem:[%s5327_s1 + $0x124] ss:$16 sps:$4 sm:$0xff]   ;;  %v3848_v37 = vld [vmem:[%s5327_s1 + $0x12c] ss:$16 sps:$4 sm:$0xff]   ;;  %v3850_v38 = vld [vmem:[%s5327_s1 + $0x120] ss:$16 sps:$4 sm:$0xff]  }
   0xe   :  { %v3851_v39 = vld [vmem:[%s5327_s1 + $0x128] ss:$16 sps:$4 sm:$0xff]   ;;  %v3852_v40 = vld [vmem:[%s5327_s1 + $0x144] ss:$16 sps:$4 sm:$0xff]   ;;  %v3854_v41 = vld [vmem:[%s5327_s1 + $0x14c] ss:$16 sps:$4 sm:$0xff]  }
   0xf   :  { %1963 = vmatpush1.bf16.msra.mxu0 %v3814_v14  ;;  %2415 = vmatpush1.bf16.msra.mxu1 %v3815_v15  ;;  %v3856_v42 = vld [vmem:[%s5327_s1 + $0x140] ss:$16 sps:$4 sm:$0xff]   ;;  %v3857_v43 = vld [vmem:[%s5327_s1 + $0x148] ss:$16 sps:$4 sm:$0xff]   ;;  %v3858_v44 = vld [vmem:[%s5327_s1 + $0x164] ss:$16 sps:$4 sm:$0xff]  }
  0x10   :  { %1964 = vmatprep.subr.bf16.mxu0 %v3816_v16  ;;  %2416 = vmatprep.subr.bf16.mxu1 %v3818_v17  ;;  %v3860_v45 = vld [vmem:[%s5327_s1 + $0x16c] ss:$16 sps:$4 sm:$0xff]   ;;  %v14_v46 = vld [vmem:[%s5328_s0] sm:$0xff]  ;;  %v3863_v49 = vld [vmem:[%s5327_s1 + $0x168] ss:$16 sps:$4 sm:$0xff]  }
  0x11   :  { %v18_v47 = vld [vmem:[%s5328_s0 + $0x20] sm:$0xff]  ;;  %v3866_v52 = vld [vmem:[%s5327_s1 + $0x18c] ss:$16 sps:$4 sm:$0xff]   ;;  %v3869_v54 = vld [vmem:[%s5327_s1 + $0x188] ss:$16 sps:$4 sm:$0xff]  }
  0x12   :  { %v3862_v48 = vld [vmem:[%s5327_s1 + $0x160] ss:$16 sps:$4 sm:$0xff]   ;;  %v3153_v50 = vcombine.high %v14_v46, %v18_v47  ;;  %v3864_v51 = vld [vmem:[%s5327_s1 + $0x184] ss:$16 sps:$4 sm:$0xff]   ;;  %v3872_v56 = vld [vmem:[%s5327_s1 + $0x1ac] ss:$16 sps:$4 sm:$0xff]   ;;  %v3152_v7 = vcombine.low %v14_v46, %v18_v47 }
  0x13   :  { %1965 = vmatpush1.bf16.msra.mxu0 %v3820_v18  ;;  %2417 = vmatpush1.bf16.msra.mxu1 %v3821_v19  ;;  %v3868_v53 = vld [vmem:[%s5327_s1 + $0x180] ss:$16 sps:$4 sm:$0xff]   ;;  %v3870_v55 = vld [vmem:[%s5327_s1 + $0x1a4] ss:$16 sps:$4 sm:$0xff]   ;;  %v3875_v58 = vld [vmem:[%s5327_s1 + $0x1a8] ss:$16 sps:$4 sm:$0xff]  }
  0x14   :  { %1966 = vmatprep.subr.bf16.mxu0 %v3822_v20  ;;  %2418 = vmatprep.subr.bf16.mxu1 %v3824_v21  ;;  %v3874_v57 = vld [vmem:[%s5327_s1 + $0x1a0] ss:$16 sps:$4 sm:$0xff]   ;;  %v3876_v59 = vld [vmem:[%s5327_s1 + $0x1c4] ss:$16 sps:$4 sm:$0xff]   ;;  %v3878_v60 = vld [vmem:[%s5327_s1 + $0x1cc] ss:$16 sps:$4 sm:$0xff]  }
  0x15   :  { %1988 = vmatprep.mubr.bf16.mxu0 %v3153_v50  ;;  %2440 = vmatprep.mubr.bf16.mxu1 %v3153_v50  ;;  %v3880_v61 = vld [vmem:[%s5327_s1 + $0x1c0] ss:$16 sps:$4 sm:$0xff]   ;;  %v3881_v62 = vld [vmem:[%s5327_s1 + $0x1c8] ss:$16 sps:$4 sm:$0xff]   ;;  %v3882_v63 = vld [vmem:[%s5327_s1 + $0x1e4] ss:$16 sps:$4 sm:$0xff]  }
  0x16   :  { %v3884_v0 = vld [vmem:[%s5327_s1 + $0x1ec] ss:$16 sps:$4 sm:$0xff]   ;;  %v3886_v1 = vld [vmem:[%s5327_s1 + $0x1e0] ss:$16 sps:$4 sm:$0xff]   ;;  %v3887_v2 = vld [vmem:[%s5327_s1 + $0x1e8] ss:$16 sps:$4 sm:$0xff]  }
  0x17   :  { %1967 = vmatpush1.bf16.msra.mxu0 %v3826_v22  ;;  %2419 = vmatpush1.bf16.msra.mxu1 %v3827_v23  ;;  %v3890_v3 = vld [vmem:[%s5327_s1 + $0x204] ss:$16 sps:$4 sm:$0xff]   ;;  %v3893_v4 = vld [vmem:[%s5327_s1 + $0x20c] ss:$16 sps:$4 sm:$0xff]   ;;  %v3888_v5 = vld [vmem:[%s5327_s1 + $0x200] ss:$16 sps:$4 sm:$0xff]  }
  0x18   :  { %1968 = vmatprep.subr.bf16.mxu0 %v3828_v24  ;;  %2420 = vmatprep.subr.bf16.mxu1 %v3830_v25  ;;  %v3891_v6 = vld [vmem:[%s5327_s1 + $0x208] ss:$16 sps:$4 sm:$0xff]   ;;  %v22_v8 = vld [vmem:[%s5328_s0 + $0x40] sm:$0xff]  ;;  %v3899_v11 = vld [vmem:[%s5327_s1 + $0x22c] ss:$16 sps:$4 sm:$0xff]  }
  0x19   :  { %v26_v9 = vld [vmem:[%s5328_s0 + $0x60] sm:$0xff]  ;;  %v3897_v14 = vld [vmem:[%s5327_s1 + $0x228] ss:$16 sps:$4 sm:$0xff]   ;;  %v3905_v16 = vld [vmem:[%s5327_s1 + $0x24c] ss:$16 sps:$4 sm:$0xff]  }
  0x1a   :  { %v3896_v10 = vld [vmem:[%s5327_s1 + $0x224] ss:$16 sps:$4 sm:$0xff]   ;;  %v3161_v12 = vcombine.high %v22_v8, %v26_v9  ;;  %v3894_v13 = vld [vmem:[%s5327_s1 + $0x220] ss:$16 sps:$4 sm:$0xff]   ;;  %v3160_v18 = vcombine.low %v22_v8, %v26_v9  ;;  %v3903_v21 = vld [vmem:[%s5327_s1 + $0x248] ss:$16 sps:$4 sm:$0xff]  }
  0x1b   :  { %1969 = vmatpush1.bf16.msra.mxu0 %v3832_v26  ;;  %2421 = vmatpush1.bf16.msra.mxu1 %v3833_v27  ;;  %v3902_v15 = vld [vmem:[%s5327_s1 + $0x244] ss:$16 sps:$4 sm:$0xff]   ;;  %v3900_v20 = vld [vmem:[%s5327_s1 + $0x240] ss:$16 sps:$4 sm:$0xff]   ;;  %v3911_v23 = vld [vmem:[%s5327_s1 + $0x26c] ss:$16 sps:$4 sm:$0xff]  }
  0x1c   :  { %1970 = vmatprep.subr.bf16.mxu0 %v3834_v28  ;;  %2422 = vmatprep.subr.bf16.mxu1 %v3836_v29  ;;  %v30_v17 = vld [vmem:[%s5328_s0 + $0x80] sm:$0xff]  ;;  %v3909_v26 = vld [vmem:[%s5327_s1 + $0x268] ss:$16 sps:$4 sm:$0xff]   ;;  %v3917_v28 = vld [vmem:[%s5327_s1 + $0x28c] ss:$16 sps:$4 sm:$0xff]  }
  0x1d   :  { %v34_v19 = vld [vmem:[%s5328_s0 + $0xa0] sm:$0xff]  ;;  %v3935_v47 = vld [vmem:[%s5327_s1 + $0x2ec] ss:$16 sps:$4 sm:$0xff]   ;;  %v3933_v50 = vld [vmem:[%s5327_s1 + $0x2e8] ss:$16 sps:$4 sm:$0xff]  }
  0x1e   :  { %v3908_v22 = vld [vmem:[%s5327_s1 + $0x264] ss:$16 sps:$4 sm:$0xff]   ;;  %v3169_v24 = vcombine.high %v30_v17, %v34_v19  ;;  %v3906_v25 = vld [vmem:[%s5327_s1 + $0x260] ss:$16 sps:$4 sm:$0xff]  }
  0x1f   :  { %1971 = vmatpush1.bf16.msra.mxu0 %v3838_v30  ;;  %2423 = vmatpush1.bf16.msra.mxu1 %v3839_v31  ;;  %v3914_v27 = vld [vmem:[%s5327_s1 + $0x284] ss:$16 sps:$4 sm:$0xff]   ;;  %v3168_v30 = vcombine.low %v30_v17, %v34_v19  ;;  %v3954_v9 = vld [vmem:[%s5327_s1 + $0x360] ss:$16 sps:$4 sm:$0xff]   ;;  %v3971_v19 = vld [vmem:[%s5327_s1 + $0x3ac] ss:$16 sps:$4 sm:$0xff]  }
  0x20   :  { %1972 = vmatprep.subr.bf16.mxu0 %v3840_v32  ;;  %2424 = vmatprep.subr.bf16.mxu1 %v3842_v33  ;;  %v38_v29 = vld [vmem:[%s5328_s0 + $0xc0] sm:$0xff]  ;;  %v3915_v33 = vld [vmem:[%s5327_s1 + $0x288] ss:$16 sps:$4 sm:$0xff]  }
  0x21   :  { %v42_v31 = vld [vmem:[%s5328_s0 + $0xe0] sm:$0xff] }
  0x22   :  { %v3912_v32 = vld [vmem:[%s5327_s1 + $0x280] ss:$16 sps:$4 sm:$0xff]   ;;  %v3932_v46 = vld [vmem:[%s5327_s1 + $0x2e4] ss:$16 sps:$4 sm:$0xff]  }
  0x23   :  { %1973 = vmatpush1.bf16.msra.mxu0 %v3844_v34  ;;  %2425 = vmatpush1.bf16.msra.mxu1 %v3845_v35  ;;  %v3920_v34 = vld [vmem:[%s5327_s1 + $0x2a4] ss:$16 sps:$4 sm:$0xff]   ;;  %v3923_v35 = vld [vmem:[%s5327_s1 + $0x2ac] ss:$16 sps:$4 sm:$0xff]  }
  0x24   :  { %1974 = vmatprep.subr.bf16.mxu0 %v3846_v36  ;;  %2426 = vmatprep.subr.bf16.mxu1 %v3848_v37  ;;  %v3177_v36 = vcombine.high %v38_v29, %v42_v31  ;;  %v3918_v37 = vld [vmem:[%s5327_s1 + $0x2a0] ss:$16 sps:$4 sm:$0xff]  }
  0x25   :  { %v74_v17 = vld [vmem:[%s5328_s0 + $0x1e0] sm:$0xff] }
  0x27   :  { %1975 = vmatpush1.bf16.msra.mxu0 %v3850_v38  ;;  %2427 = vmatpush1.bf16.msra.mxu1 %v3851_v39  ;;  %v3921_v38 = vld [vmem:[%s5327_s1 + $0x2a8] ss:$16 sps:$4 sm:$0xff]   ;;  %v3926_v39 = vld [vmem:[%s5327_s1 + $0x2c4] ss:$16 sps:$4 sm:$0xff]  }
  0x28   :  { %1976 = vmatprep.subr.bf16.mxu0 %v3852_v40  ;;  %2428 = vmatprep.subr.bf16.mxu1 %v3854_v41  ;;  %v3929_v40 = vld [vmem:[%s5327_s1 + $0x2cc] ss:$16 sps:$4 sm:$0xff]   ;;  %v3924_v41 = vld [vmem:[%s5327_s1 + $0x2c0] ss:$16 sps:$4 sm:$0xff]  }
  0x2b   :  { %1977 = vmatpush1.bf16.msra.mxu0 %v3856_v42  ;;  %2429 = vmatpush1.bf16.msra.mxu1 %v3857_v43  ;;  %v3927_v42 = vld [vmem:[%s5327_s1 + $0x2c8] ss:$16 sps:$4 sm:$0xff]   ;;  %v3176_v43 = vcombine.low %v38_v29, %v42_v31  ;;  %v3983_v31 = vld [vmem:[%s5327_s1 + $0x3ec] ss:$16 sps:$4 sm:$0xff]  }
  0x2c   :  { %1978 = vmatprep.subr.bf16.mxu0 %v3858_v44  ;;  %2430 = vmatprep.subr.bf16.mxu1 %v3860_v45  ;;  %v46_v44 = vld [vmem:[%s5328_s0 + $0x100] sm:$0xff]  ;;  %v3975_v29 = vld [vmem:[%s5327_s1 + $0x3c8] ss:$16 sps:$4 sm:$0xff]  }
  0x2d   :  { %v50_v45 = vld [vmem:[%s5328_s0 + $0x120] sm:$0xff] }
  0x2f   :  { %1979 = vmatpush1.bf16.msra.mxu0 %v3862_v48  ;;  %2431 = vmatpush1.bf16.msra.mxu1 %v3863_v49  ;;  %v3185_v48 = vcombine.high %v46_v44, %v50_v45  ;;  %v3930_v49 = vld [vmem:[%s5327_s1 + $0x2e0] ss:$16 sps:$4 sm:$0xff]  }
  0x30   :  { %1980 = vmatprep.subr.bf16.mxu0 %v3864_v51  ;;  %2432 = vmatprep.subr.bf16.mxu1 %v3866_v52  ;;  %v3938_v51 = vld [vmem:[%s5327_s1 + $0x304] ss:$16 sps:$4 sm:$0xff]   ;;  %v3941_v52 = vld [vmem:[%s5327_s1 + $0x30c] ss:$16 sps:$4 sm:$0xff]  }
  0x33   :  { %1981 = vmatpush1.bf16.msra.mxu0 %v3868_v53  ;;  %2433 = vmatpush1.bf16.msra.mxu1 %v3869_v54  ;;  %v54_v53 = vld [vmem:[%s5328_s0 + $0x140] sm:$0xff]  ;;  %v3184_v54 = vcombine.low %v46_v44, %v50_v45 }
  0x34   :  { %1982 = vmatprep.subr.bf16.mxu0 %v3870_v55  ;;  %2434 = vmatprep.subr.bf16.mxu1 %v3872_v56  ;;  %v58_v55 = vld [vmem:[%s5328_s0 + $0x160] sm:$0xff] }
  0x35   :  { %v3936_v56 = vld [vmem:[%s5327_s1 + $0x300] ss:$16 sps:$4 sm:$0xff]  }
  0x36   :  { %v3990_v45 = vld [vmem:[%s5327_s1 + $0x420] ss:$16 sps:$4 sm:$0xff]  }
  0x37   :  { %1983 = vmatpush1.bf16.msra.mxu0 %v3874_v57  ;;  %2435 = vmatpush1.bf16.msra.mxu1 %v3875_v58  ;;  %v3939_v57 = vld [vmem:[%s5327_s1 + $0x308] ss:$16 sps:$4 sm:$0xff]   ;;  %v3944_v58 = vld [vmem:[%s5327_s1 + $0x324] ss:$16 sps:$4 sm:$0xff]  }
  0x38   :  { %1984 = vmatprep.subr.bf16.mxu0 %v3876_v59  ;;  %2436 = vmatprep.subr.bf16.mxu1 %v3878_v60  ;;  %v3947_v59 = vld [vmem:[%s5327_s1 + $0x32c] ss:$16 sps:$4 sm:$0xff]   ;;  %v3193_v60 = vcombine.high %v54_v53, %v58_v55 }
  0x3b   :  { %1985 = vmatpush1.bf16.msra.mxu0 %v3880_v61  ;;  %2437 = vmatpush1.bf16.msra.mxu1 %v3881_v62  ;;  %v3942_v61 = vld [vmem:[%s5327_s1 + $0x320] ss:$16 sps:$4 sm:$0xff]   ;;  %v3945_v62 = vld [vmem:[%s5327_s1 + $0x328] ss:$16 sps:$4 sm:$0xff]  }
  0x3c   :  { %1986 = vmatprep.subr.bf16.mxu0 %v3882_v63  ;;  %2438 = vmatprep.subr.bf16.mxu1 %v3884_v0  ;;  %v3950_v63 = vld [vmem:[%s5327_s1 + $0x344] ss:$16 sps:$4 sm:$0xff]   ;;  %v3953_v0 = vld [vmem:[%s5327_s1 + $0x34c] ss:$16 sps:$4 sm:$0xff]  }
  0x3f   :  { %1987 = vmatpush1.bf16.msra.mxu0 %v3886_v1  ;;  %2439 = vmatpush1.bf16.msra.mxu1 %v3887_v2  ;;  %v62_v1 = vld [vmem:[%s5328_s0 + $0x180] sm:$0xff]  ;;  %v3192_v2 = vcombine.low %v54_v53, %v58_v55  ;;  %v35_v53 = vld [vmem:[%s5328_s0 + $0xa8] sm:$0xff] }
  0x40   :  { %2069 = vmatprep.subr.bf16.mxu0 %v3890_v3  ;;  %2521 = vmatprep.subr.bf16.mxu1 %v3893_v4  ;;  %v66_v3 = vld [vmem:[%s5328_s0 + $0x1a0] sm:$0xff]  ;;  %v4007_v55 = vld [vmem:[%s5327_s1 + $0x46c] ss:$16 sps:$4 sm:$0xff]  }
  0x41   :  { %v3948_v4 = vld [vmem:[%s5327_s1 + $0x340] ss:$16 sps:$4 sm:$0xff]   ;;  %v3201_v8 = vcombine.high %v62_v1, %v66_v3 }
  0x42   :  { %1989 = vmatmul.mubr.bf16.vlgmr.msra.gmra.mrb[0].mxu0 %v3152_v7  ;;  %2441 = vmatmul.mubr.bf16.vlgmr.msra.gmra.mrb[0].mxu1 %v3152_v7  ;;  %v3959_v7 = vld [vmem:[%s5327_s1 + $0x36c] ss:$16 sps:$4 sm:$0xff]  }
  0x43   :  { %2070 = vmatpush1.bf16.msra.mxu0 %v3888_v5  ;;  %2522 = vmatpush1.bf16.msra.mxu1 %v3891_v6  ;;  %v3951_v5 = vld [vmem:[%s5327_s1 + $0x348] ss:$16 sps:$4 sm:$0xff]   ;;  %v3956_v6 = vld [vmem:[%s5327_s1 + $0x364] ss:$16 sps:$4 sm:$0xff]  }
  0x44   :  { %2071 = vmatprep.subr.bf16.mxu0 %v3896_v10  ;;  %2523 = vmatprep.subr.bf16.mxu1 %v3899_v11  ;;  %v3957_v10 = vld [vmem:[%s5327_s1 + $0x368] ss:$16 sps:$4 sm:$0xff]   ;;  %v3962_v11 = vld [vmem:[%s5327_s1 + $0x384] ss:$16 sps:$4 sm:$0xff]  }
  0x45   :  { %1998 = vmatprep.mubr.bf16.mxu0 %v3161_v12  ;;  %2450 = vmatprep.mubr.bf16.mxu1 %v3161_v12  ;;  %v3965_v12 = vld [vmem:[%s5327_s1 + $0x38c] ss:$16 sps:$4 sm:$0xff]  }
  0x47   :  { %2072 = vmatpush1.bf16.msra.mxu0 %v3894_v13  ;;  %2524 = vmatpush1.bf16.msra.mxu1 %v3897_v14  ;;  %v3960_v13 = vld [vmem:[%s5327_s1 + $0x380] ss:$16 sps:$4 sm:$0xff]   ;;  %v3963_v14 = vld [vmem:[%s5327_s1 + $0x388] ss:$16 sps:$4 sm:$0xff]  }
  0x48   :  { %2073 = vmatprep.subr.bf16.mxu0 %v3902_v15  ;;  %2525 = vmatprep.subr.bf16.mxu1 %v3905_v16  ;;  %v3200_v15 = vcombine.low %v62_v1, %v66_v3  ;;  %v70_v16 = vld [vmem:[%s5328_s0 + $0x1c0] sm:$0xff]  ;;  %v4011_v1 = vld [vmem:[%s5327_s1 + $0x488] ss:$16 sps:$4 sm:$0xff]   ;;  %v4019_v3 = vld [vmem:[%s5327_s1 + $0x4ac] ss:$16 sps:$4 sm:$0xff]  }
  0x4a   :  { %1999 = vmatmul.mubr.bf16.gmra.mrb[4].mxu0 %v3160_v18  ;;  %2451 = vmatmul.mubr.bf16.gmra.mrb[4].mxu1 %v3160_v18  ;;  %v3968_v18 = vld [vmem:[%s5327_s1 + $0x3a4] ss:$16 sps:$4 sm:$0xff]  }
  0x4b   :  { %2074 = vmatpush1.bf16.msra.mxu0 %v3900_v20  ;;  %2526 = vmatpush1.bf16.msra.mxu1 %v3903_v21  ;;  %v3209_v20 = vcombine.high %v70_v16, %v74_v17  ;;  %v3966_v21 = vld [vmem:[%s5327_s1 + $0x3a0] ss:$16 sps:$4 sm:$0xff]  }
  0x4c   :  { %2075 = vmatprep.subr.bf16.mxu0 %v3908_v22  ;;  %2527 = vmatprep.subr.bf16.mxu1 %v3911_v23  ;;  %v3969_v22 = vld [vmem:[%s5327_s1 + $0x3a8] ss:$16 sps:$4 sm:$0xff]   ;;  %v3974_v23 = vld [vmem:[%s5327_s1 + $0x3c4] ss:$16 sps:$4 sm:$0xff]  }
  0x4d   :  { %2008 = vmatprep.mubr.bf16.mxu0 %v3169_v24  ;;  %2460 = vmatprep.mubr.bf16.mxu1 %v3169_v24  ;;  %v3977_v24 = vld [vmem:[%s5327_s1 + $0x3cc] ss:$16 sps:$4 sm:$0xff]  }
  0x4f   :  { %2076 = vmatpush1.bf16.msra.mxu0 %v3906_v25  ;;  %2528 = vmatpush1.bf16.msra.mxu1 %v3909_v26  ;;  %v15_v25 = vld [vmem:[%s5328_s0 + $0x8] sm:$0xff]  ;;  %v3208_v26 = vcombine.low %v70_v16, %v74_v17  ;;  %v4026_v17 = vld [vmem:[%s5327_s1 + $0x4e0] ss:$16 sps:$4 sm:$0xff]  }
  0x50   :  { %2077 = vmatprep.subr.bf16.mxu0 %v3914_v27  ;;  %2529 = vmatprep.subr.bf16.mxu1 %v3917_v28  ;;  %v19_v27 = vld [vmem:[%s5328_s0 + $0x28] sm:$0xff]  ;;  %v3972_v28 = vld [vmem:[%s5327_s1 + $0x3c0] ss:$16 sps:$4 sm:$0xff]  }
  0x52   :  { %2009 = vmatmul.mubr.bf16.gmra.mrb[8].mxu0 %v3168_v30  ;;  %2461 = vmatmul.mubr.bf16.gmra.mrb[8].mxu1 %v3168_v30  ;;  %v3980_v30 = vld [vmem:[%s5327_s1 + $0x3e4] ss:$16 sps:$4 sm:$0xff]  }
  0x53   :  { %2078 = vmatpush1.bf16.msra.mxu0 %v3912_v32  ;;  %2530 = vmatpush1.bf16.msra.mxu1 %v3915_v33  ;;  %v3155_v32 = vcombine.high %v15_v25, %v19_v27  ;;  %v3978_v33 = vld [vmem:[%s5327_s1 + $0x3e0] ss:$16 sps:$4 sm:$0xff]  }
  0x54   :  { %2079 = vmatprep.subr.bf16.mxu0 %v3920_v34  ;;  %2531 = vmatprep.subr.bf16.mxu1 %v3923_v35  ;;  %v3981_v34 = vld [vmem:[%s5327_s1 + $0x3e8] ss:$16 sps:$4 sm:$0xff]   ;;  %v3986_v35 = vld [vmem:[%s5327_s1 + $0x404] ss:$16 sps:$4 sm:$0xff]  }
  0x55   :  { %2018 = vmatprep.mubr.bf16.mxu0 %v3177_v36  ;;  %2470 = vmatprep.mubr.bf16.mxu1 %v3177_v36  ;;  %v3989_v36 = vld [vmem:[%s5327_s1 + $0x40c] ss:$16 sps:$4 sm:$0xff]  }
  0x57   :  { %2080 = vmatpush1.bf16.msra.mxu0 %v3918_v37  ;;  %2532 = vmatpush1.bf16.msra.mxu1 %v3921_v38  ;;  %v23_v37 = vld [vmem:[%s5328_s0 + $0x48] sm:$0xff]  ;;  %v3154_v38 = vcombine.low %v15_v25, %v19_v27 }
  0x58   :  { %2081 = vmatprep.subr.bf16.mxu0 %v3926_v39  ;;  %2533 = vmatprep.subr.bf16.mxu1 %v3929_v40  ;;  %v27_v39 = vld [vmem:[%s5328_s0 + $0x68] sm:$0xff]  ;;  %v3984_v40 = vld [vmem:[%s5327_s1 + $0x400] ss:$16 sps:$4 sm:$0xff]  }
  0x59   :  { %v3163_v44 = vcombine.high %v23_v37, %v27_v39  ;;  %v59_v25 = vld [vmem:[%s5328_s0 + $0x168] sm:$0xff] }
  0x5a   :  { %2019 = vmatmul.mubr.bf16.gmra.mrb[12].mxu0 %v3176_v43  ;;  %2471 = vmatmul.mubr.bf16.gmra.mrb[12].mxu1 %v3176_v43  ;;  %v3995_v43 = vld [vmem:[%s5327_s1 + $0x42c] ss:$16 sps:$4 sm:$0xff]  }
  0x5b   :  { %2082 = vmatpush1.bf16.msra.mxu0 %v3924_v41  ;;  %2534 = vmatpush1.bf16.msra.mxu1 %v3927_v42  ;;  %v3987_v41 = vld [vmem:[%s5327_s1 + $0x408] ss:$16 sps:$4 sm:$0xff]   ;;  %v3992_v42 = vld [vmem:[%s5327_s1 + $0x424] ss:$16 sps:$4 sm:$0xff]   ;;  %v4043_v27 = vld [vmem:[%s5327_s1 + $0x52c] ss:$16 sps:$4 sm:$0xff]  }
  0x5c   :  { %2083 = vmatprep.subr.bf16.mxu0 %v3932_v46  ;;  %2535 = vmatprep.subr.bf16.mxu1 %v3935_v47  ;;  %v3993_v46 = vld [vmem:[%s5327_s1 + $0x428] ss:$16 sps:$4 sm:$0xff]   ;;  %v3998_v47 = vld [vmem:[%s5327_s1 + $0x444] ss:$16 sps:$4 sm:$0xff]  }
  0x5d   :  { %2028 = vmatprep.mubr.bf16.mxu0 %v3185_v48  ;;  %2480 = vmatprep.mubr.bf16.mxu1 %v3185_v48  ;;  %v4001_v48 = vld [vmem:[%s5327_s1 + $0x44c] ss:$16 sps:$4 sm:$0xff]  }
  0x5f   :  { %2084 = vmatpush1.bf16.msra.mxu0 %v3930_v49  ;;  %2536 = vmatpush1.bf16.msra.mxu1 %v3933_v50  ;;  %v3996_v49 = vld [vmem:[%s5327_s1 + $0x440] ss:$16 sps:$4 sm:$0xff]   ;;  %v3999_v50 = vld [vmem:[%s5327_s1 + $0x448] ss:$16 sps:$4 sm:$0xff]  }
  0x60   :  { %2085 = vmatprep.subr.bf16.mxu0 %v3938_v51  ;;  %2537 = vmatprep.subr.bf16.mxu1 %v3941_v52  ;;  %v3162_v51 = vcombine.low %v23_v37, %v27_v39  ;;  %v31_v52 = vld [vmem:[%s5328_s0 + $0x88] sm:$0xff] }
  0x61   :  { %v4047_v37 = vld [vmem:[%s5327_s1 + $0x548] ss:$16 sps:$4 sm:$0xff]   ;;  %v4055_v39 = vld [vmem:[%s5327_s1 + $0x56c] ss:$16 sps:$4 sm:$0xff]  }
  0x62   :  { %2029 = vmatmul.mubr.bf16.gmra.mrb[16].mxu0 %v3184_v54  ;;  %2481 = vmatmul.mubr.bf16.gmra.mrb[16].mxu1 %v3184_v54  ;;  %v4004_v54 = vld [vmem:[%s5327_s1 + $0x464] ss:$16 sps:$4 sm:$0xff]  }
  0x63   :  { %2086 = vmatpush1.bf16.msra.mxu0 %v3936_v56  ;;  %2538 = vmatpush1.bf16.msra.mxu1 %v3939_v57  ;;  %v3171_v56 = vcombine.high %v31_v52, %v35_v53  ;;  %v4002_v57 = vld [vmem:[%s5327_s1 + $0x460] ss:$16 sps:$4 sm:$0xff]  }
  0x64   :  { %2087 = vmatprep.subr.bf16.mxu0 %v3944_v58  ;;  %2539 = vmatprep.subr.bf16.mxu1 %v3947_v59  ;;  %v4005_v58 = vld [vmem:[%s5327_s1 + $0x468] ss:$16 sps:$4 sm:$0xff]   ;;  %v4010_v59 = vld [vmem:[%s5327_s1 + $0x484] ss:$16 sps:$4 sm:$0xff]  }
  0x65   :  { %2038 = vmatprep.mubr.bf16.mxu0 %v3193_v60  ;;  %2490 = vmatprep.mubr.bf16.mxu1 %v3193_v60  ;;  %v4013_v60 = vld [vmem:[%s5327_s1 + $0x48c] ss:$16 sps:$4 sm:$0xff]  }
  0x67   :  { %2088 = vmatpush1.bf16.msra.mxu0 %v3942_v61  ;;  %2540 = vmatpush1.bf16.msra.mxu1 %v3945_v62  ;;  %v39_v61 = vld [vmem:[%s5328_s0 + $0xc8] sm:$0xff]  ;;  %v3170_v62 = vcombine.low %v31_v52, %v35_v53  ;;  %v4062_v53 = vld [vmem:[%s5327_s1 + $0x5a0] ss:$16 sps:$4 sm:$0xff]  }
  0x68   :  { %2089 = vmatprep.subr.bf16.mxu0 %v3950_v63  ;;  %2541 = vmatprep.subr.bf16.mxu1 %v3953_v0  ;;  %v43_v63 = vld [vmem:[%s5328_s0 + $0xe8] sm:$0xff]  ;;  %v4008_v0 = vld [vmem:[%s5327_s1 + $0x480] ss:$16 sps:$4 sm:$0xff]  }
  0x6a   :  { %2039 = vmatmul.mubr.bf16.gmra.mrb[20].mxu0 %v3192_v2  ;;  %2491 = vmatmul.mubr.bf16.gmra.mrb[20].mxu1 %v3192_v2  ;;  %v4016_v2 = vld [vmem:[%s5327_s1 + $0x4a4] ss:$16 sps:$4 sm:$0xff]  }
  0x6b   :  { %2090 = vmatpush1.bf16.msra.mxu0 %v3948_v4  ;;  %2542 = vmatpush1.bf16.msra.mxu1 %v3951_v5  ;;  %v3179_v4 = vcombine.high %v39_v61, %v43_v63  ;;  %v4014_v5 = vld [vmem:[%s5327_s1 + $0x4a0] ss:$16 sps:$4 sm:$0xff]  }
  0x6c   :  { %2091 = vmatprep.subr.bf16.mxu0 %v3956_v6  ;;  %2543 = vmatprep.subr.bf16.mxu1 %v3959_v7  ;;  %v4017_v6 = vld [vmem:[%s5327_s1 + $0x4a8] ss:$16 sps:$4 sm:$0xff]   ;;  %v4022_v7 = vld [vmem:[%s5327_s1 + $0x4c4] ss:$16 sps:$4 sm:$0xff]  }
  0x6d   :  { %2048 = vmatprep.mubr.bf16.mxu0 %v3201_v8  ;;  %2500 = vmatprep.mubr.bf16.mxu1 %v3201_v8  ;;  %v4025_v8 = vld [vmem:[%s5327_s1 + $0x4cc] ss:$16 sps:$4 sm:$0xff]  }
  0x6f   :  { %2092 = vmatpush1.bf16.msra.mxu0 %v3954_v9  ;;  %2544 = vmatpush1.bf16.msra.mxu1 %v3957_v10  ;;  %v47_v9 = vld [vmem:[%s5328_s0 + $0x108] sm:$0xff]  ;;  %v3178_v10 = vcombine.low %v39_v61, %v43_v63  ;;  %v20_v61 = vld [vmem:[%s5328_s0 + $0x30] sm:$0xff] }
  0x70   :  { %2093 = vmatprep.subr.bf16.mxu0 %v3962_v11  ;;  %2545 = vmatprep.subr.bf16.mxu1 %v3965_v12  ;;  %v51_v11 = vld [vmem:[%s5328_s0 + $0x128] sm:$0xff]  ;;  %v4020_v12 = vld [vmem:[%s5327_s1 + $0x4c0] ss:$16 sps:$4 sm:$0xff]  }
  0x71   :  { %v3187_v16 = vcombine.high %v47_v9, %v51_v11  ;;  %v4079_v63 = vld [vmem:[%s5327_s1 + $0x5ec] ss:$16 sps:$4 sm:$0xff]  }
  0x72   :  { %2049 = vmatmul.mubr.bf16.gmra.mrb[24].mxu0 %v3200_v15  ;;  %2501 = vmatmul.mubr.bf16.gmra.mrb[24].mxu1 %v3200_v15  ;;  %v4031_v15 = vld [vmem:[%s5327_s1 + $0x4ec] ss:$16 sps:$4 sm:$0xff]  }
  0x73   :  { %2094 = vmatpush1.bf16.msra.mxu0 %v3960_v13  ;;  %2546 = vmatpush1.bf16.msra.mxu1 %v3963_v14  ;;  %v4023_v13 = vld [vmem:[%s5327_s1 + $0x4c8] ss:$16 sps:$4 sm:$0xff]   ;;  %v4028_v14 = vld [vmem:[%s5327_s1 + $0x4e4] ss:$16 sps:$4 sm:$0xff]  }
  0x74   :  { %2095 = vmatprep.subr.bf16.mxu0 %v3968_v18  ;;  %2547 = vmatprep.subr.bf16.mxu1 %v3971_v19  ;;  %v4029_v18 = vld [vmem:[%s5327_s1 + $0x4e8] ss:$16 sps:$4 sm:$0xff]   ;;  %v4034_v19 = vld [vmem:[%s5327_s1 + $0x504] ss:$16 sps:$4 sm:$0xff]  }
  0x75   :  { %2058 = vmatprep.mubr.bf16.mxu0 %v3209_v20  ;;  %2510 = vmatprep.mubr.bf16.mxu1 %v3209_v20  ;;  %v4037_v20 = vld [vmem:[%s5327_s1 + $0x50c] ss:$16 sps:$4 sm:$0xff]  }
  0x77   :  { %2096 = vmatpush1.bf16.msra.mxu0 %v3966_v21  ;;  %2548 = vmatpush1.bf16.msra.mxu1 %v3969_v22  ;;  %v4032_v21 = vld [vmem:[%s5327_s1 + $0x500] ss:$16 sps:$4 sm:$0xff]   ;;  %v4035_v22 = vld [vmem:[%s5327_s1 + $0x508] ss:$16 sps:$4 sm:$0xff]  }
  0x78   :  { %2097 = vmatprep.subr.bf16.mxu0 %v3974_v23  ;;  %2549 = vmatprep.subr.bf16.mxu1 %v3977_v24  ;;  %v3186_v23 = vcombine.low %v47_v9, %v51_v11  ;;  %v55_v24 = vld [vmem:[%s5328_s0 + $0x148] sm:$0xff] }
  0x79   :  { %v4083_v9 = vld [vmem:[%s5327_s1 + $0x608] ss:$16 sps:$4 sm:$0xff]   ;;  %v4091_v11 = vld [vmem:[%s5327_s1 + $0x62c] ss:$16 sps:$4 sm:$0xff]  }
  0x7a   :  { %2059 = vmatmul.mubr.bf16.gmra.mrb[28].mxu0 %v3208_v26  ;;  %2511 = vmatmul.mubr.bf16.gmra.mrb[28].mxu1 %v3208_v26  ;;  %v4040_v26 = vld [vmem:[%s5327_s1 + $0x524] ss:$16 sps:$4 sm:$0xff]  }
  0x7b   :  { %2098 = vmatpush1.bf16.msra.mxu0 %v3972_v28  ;;  %2550 = vmatpush1.bf16.msra.mxu1 %v3975_v29  ;;  %v3195_v28 = vcombine.high %v55_v24, %v59_v25  ;;  %v4038_v29 = vld [vmem:[%s5327_s1 + $0x520] ss:$16 sps:$4 sm:$0xff]  }
  0x7c   :  { %2099 = vmatprep.subr.bf16.mxu0 %v3980_v30  ;;  %2551 = vmatprep.subr.bf16.mxu1 %v3983_v31  ;;  %v4041_v30 = vld [vmem:[%s5327_s1 + $0x528] ss:$16 sps:$4 sm:$0xff]   ;;  %v4046_v31 = vld [vmem:[%s5327_s1 + $0x544] ss:$16 sps:$4 sm:$0xff]  }
  0x7d   :  { %2101 = vmatprep.mubr.bf16.mxu0 %v3155_v32  ;;  %2553 = vmatprep.mubr.bf16.mxu1 %v3155_v32  ;;  %v4049_v32 = vld [vmem:[%s5327_s1 + $0x54c] ss:$16 sps:$4 sm:$0xff]  }
  0x7f   :  { %2100 = vmatpush1.bf16.msra.mxu0 %v3978_v33  ;;  %2552 = vmatpush1.bf16.msra.mxu1 %v3981_v34  ;;  %v63_v33 = vld [vmem:[%s5328_s0 + $0x188] sm:$0xff]  ;;  %v3194_v34 = vcombine.low %v55_v24, %v59_v25  ;;  %v4098_v25 = vld [vmem:[%s5327_s1 + $0x660] ss:$16 sps:$4 sm:$0xff]  }
  0x80   :  { %2182 = vmatprep.subr.bf16.mxu0 %v3986_v35  ;;  %2634 = vmatprep.subr.bf16.mxu1 %v3989_v36  ;;  %v67_v35 = vld [vmem:[%s5328_s0 + $0x1a8] sm:$0xff]  ;;  %v4044_v36 = vld [vmem:[%s5327_s1 + $0x540] ss:$16 sps:$4 sm:$0xff]  }
  0x82   :  { %2102 = vmatmul.mubr.bf16.vlgmr.msra.gmra.mrb[0].mxu0 %v3154_v38  ;;  %2554 = vmatmul.mubr.bf16.vlgmr.msra.gmra.mrb[0].mxu1 %v3154_v38  ;;  %v4052_v38 = vld [vmem:[%s5327_s1 + $0x564] ss:$16 sps:$4 sm:$0xff]  }
  0x83   :  { %2183 = vmatpush1.bf16.msra.mxu0 %v3984_v40  ;;  %2635 = vmatpush1.bf16.msra.mxu1 %v3987_v41  ;;  %v3203_v40 = vcombine.high %v63_v33, %v67_v35  ;;  %v4050_v41 = vld [vmem:[%s5327_s1 + $0x560] ss:$16 sps:$4 sm:$0xff]  }
  0x84   :  { %2184 = vmatprep.subr.bf16.mxu0 %v3992_v42  ;;  %2636 = vmatprep.subr.bf16.mxu1 %v3995_v43  ;;  %v4053_v42 = vld [vmem:[%s5327_s1 + $0x568] ss:$16 sps:$4 sm:$0xff]   ;;  %v4058_v43 = vld [vmem:[%s5327_s1 + $0x584] ss:$16 sps:$4 sm:$0xff]  }
  0x85   :  { %2111 = vmatprep.mubr.bf16.mxu0 %v3163_v44  ;;  %2563 = vmatprep.mubr.bf16.mxu1 %v3163_v44  ;;  %v4061_v44 = vld [vmem:[%s5327_s1 + $0x58c] ss:$16 sps:$4 sm:$0xff]  }
  0x87   :  { %2185 = vmatpush1.bf16.msra.mxu0 %v3990_v45  ;;  %2637 = vmatpush1.bf16.msra.mxu1 %v3993_v46  ;;  %v71_v45 = vld [vmem:[%s5328_s0 + $0x1c8] sm:$0xff]  ;;  %v3202_v46 = vcombine.low %v63_v33, %v67_v35 }
  0x88   :  { %2186 = vmatprep.subr.bf16.mxu0 %v3998_v47  ;;  %2638 = vmatprep.subr.bf16.mxu1 %v4001_v48  ;;  %v75_v47 = vld [vmem:[%s5328_s0 + $0x1e8] sm:$0xff]  ;;  %v4056_v48 = vld [vmem:[%s5327_s1 + $0x580] ss:$16 sps:$4 sm:$0xff]  }
  0x89   :  { %v3211_v52 = vcombine.high %v71_v45, %v75_v47  ;;  %v4107_v33 = vld [vmem:[%s5327_s1 + $0x688] ss:$16 sps:$4 sm:$0xff]   ;;  %v4115_v35 = vld [vmem:[%s5327_s1 + $0x6ac] ss:$16 sps:$4 sm:$0xff]  }
  0x8a   :  { %2112 = vmatmul.mubr.bf16.gmra.mrb[4].mxu0 %v3162_v51  ;;  %2564 = vmatmul.mubr.bf16.gmra.mrb[4].mxu1 %v3162_v51  ;;  %v4067_v51 = vld [vmem:[%s5327_s1 + $0x5ac] ss:$16 sps:$4 sm:$0xff]  }
  0x8b   :  { %2187 = vmatpush1.bf16.msra.mxu0 %v3996_v49  ;;  %2639 = vmatpush1.bf16.msra.mxu1 %v3999_v50  ;;  %v4059_v49 = vld [vmem:[%s5327_s1 + $0x588] ss:$16 sps:$4 sm:$0xff]   ;;  %v4064_v50 = vld [vmem:[%s5327_s1 + $0x5a4] ss:$16 sps:$4 sm:$0xff]  }
  0x8c   :  { %2188 = vmatprep.subr.bf16.mxu0 %v4004_v54  ;;  %2640 = vmatprep.subr.bf16.mxu1 %v4007_v55  ;;  %v4065_v54 = vld [vmem:[%s5327_s1 + $0x5a8] ss:$16 sps:$4 sm:$0xff]   ;;  %v4070_v55 = vld [vmem:[%s5327_s1 + $0x5c4] ss:$16 sps:$4 sm:$0xff]  }
  0x8d   :  { %2121 = vmatprep.mubr.bf16.mxu0 %v3171_v56  ;;  %2573 = vmatprep.mubr.bf16.mxu1 %v3171_v56  ;;  %v4073_v56 = vld [vmem:[%s5327_s1 + $0x5cc] ss:$16 sps:$4 sm:$0xff]  }
  0x8f   :  { %2189 = vmatpush1.bf16.msra.mxu0 %v4002_v57  ;;  %2641 = vmatpush1.bf16.msra.mxu1 %v4005_v58  ;;  %v4068_v57 = vld [vmem:[%s5327_s1 + $0x5c0] ss:$16 sps:$4 sm:$0xff]   ;;  %v4071_v58 = vld [vmem:[%s5327_s1 + $0x5c8] ss:$16 sps:$4 sm:$0xff]  }
  0x90   :  { %2190 = vmatprep.subr.bf16.mxu0 %v4010_v59  ;;  %2642 = vmatprep.subr.bf16.mxu1 %v4013_v60  ;;  %v3210_v59 = vcombine.low %v71_v45, %v75_v47  ;;  %v16_v60 = vld [vmem:[%s5328_s0 + $0x10] sm:$0xff]  ;;  %v4119_v45 = vld [vmem:[%s5327_s1 + $0x6c8] ss:$16 sps:$4 sm:$0xff]   ;;  %v4127_v47 = vld [vmem:[%s5327_s1 + $0x6ec] ss:$16 sps:$4 sm:$0xff]  }
  0x92   :  { %2122 = vmatmul.mubr.bf16.gmra.mrb[8].mxu0 %v3170_v62  ;;  %2574 = vmatmul.mubr.bf16.gmra.mrb[8].mxu1 %v3170_v62  ;;  %v4076_v62 = vld [vmem:[%s5327_s1 + $0x5e4] ss:$16 sps:$4 sm:$0xff]  }
  0x93   :  { %2191 = vmatpush1.bf16.msra.mxu0 %v4008_v0  ;;  %2643 = vmatpush1.bf16.msra.mxu1 %v4011_v1  ;;  %v3157_v0 = vcombine.high %v16_v60, %v20_v61  ;;  %v4074_v1 = vld [vmem:[%s5327_s1 + $0x5e0] ss:$16 sps:$4 sm:$0xff]  }
  0x94   :  { %2192 = vmatprep.subr.bf16.mxu0 %v4016_v2  ;;  %2644 = vmatprep.subr.bf16.mxu1 %v4019_v3  ;;  %v4077_v2 = vld [vmem:[%s5327_s1 + $0x5e8] ss:$16 sps:$4 sm:$0xff]   ;;  %v4082_v3 = vld [vmem:[%s5327_s1 + $0x604] ss:$16 sps:$4 sm:$0xff]  }
  0x95   :  { %2131 = vmatprep.mubr.bf16.mxu0 %v3179_v4  ;;  %2583 = vmatprep.mubr.bf16.mxu1 %v3179_v4  ;;  %v4085_v4 = vld [vmem:[%s5327_s1 + $0x60c] ss:$16 sps:$4 sm:$0xff]  }
  0x97   :  { %2193 = vmatpush1.bf16.msra.mxu0 %v4014_v5  ;;  %2645 = vmatpush1.bf16.msra.mxu1 %v4017_v6  ;;  %v3156_v5 = vcombine.low %v16_v60, %v20_v61  ;;  %v24_v6 = vld [vmem:[%s5328_s0 + $0x50] sm:$0xff] }
  0x98   :  { %2194 = vmatprep.subr.bf16.mxu0 %v4022_v7  ;;  %2646 = vmatprep.subr.bf16.mxu1 %v4025_v8  ;;  %v28_v7 = vld [vmem:[%s5328_s0 + $0x70] sm:$0xff] }
  0x99   :  { %v4080_v8 = vld [vmem:[%s5327_s1 + $0x600] ss:$16 sps:$4 sm:$0xff]  }
  0x9a   :  { %2132 = vmatmul.mubr.bf16.gmra.mrb[12].mxu0 %v3178_v10  ;;  %2584 = vmatmul.mubr.bf16.gmra.mrb[12].mxu1 %v3178_v10  ;;  %v4088_v10 = vld [vmem:[%s5327_s1 + $0x624] ss:$16 sps:$4 sm:$0xff]   ;;  %v4134_v61 = vld [vmem:[%s5327_s1 + $0x720] ss:$16 sps:$4 sm:$0xff]  }
  0x9b   :  { %2195 = vmatpush1.bf16.msra.mxu0 %v4020_v12  ;;  %2647 = vmatpush1.bf16.msra.mxu1 %v4023_v13  ;;  %v3165_v12 = vcombine.high %v24_v6, %v28_v7  ;;  %v4086_v13 = vld [vmem:[%s5327_s1 + $0x620] ss:$16 sps:$4 sm:$0xff]  }
  0x9c   :  { %2196 = vmatprep.subr.bf16.mxu0 %v4028_v14  ;;  %2648 = vmatprep.subr.bf16.mxu1 %v4031_v15  ;;  %v4089_v14 = vld [vmem:[%s5327_s1 + $0x628] ss:$16 sps:$4 sm:$0xff]   ;;  %v4094_v15 = vld [vmem:[%s5327_s1 + $0x644] ss:$16 sps:$4 sm:$0xff]  }
  0x9d   :  { %2141 = vmatprep.mubr.bf16.mxu0 %v3187_v16  ;;  %2593 = vmatprep.mubr.bf16.mxu1 %v3187_v16  ;;  %v4097_v16 = vld [vmem:[%s5327_s1 + $0x64c] ss:$16 sps:$4 sm:$0xff]  }
  0x9f   :  { %2197 = vmatpush1.bf16.msra.mxu0 %v4026_v17  ;;  %2649 = vmatpush1.bf16.msra.mxu1 %v4029_v18  ;;  %v3164_v17 = vcombine.low %v24_v6, %v28_v7  ;;  %v32_v18 = vld [vmem:[%s5328_s0 + $0x90] sm:$0xff]  ;;  %v4151_v7 = vld [vmem:[%s5327_s1 + $0x76c] ss:$16 sps:$4 sm:$0xff]  }
  0xa0   :  { %2198 = vmatprep.subr.bf16.mxu0 %v4034_v19  ;;  %2650 = vmatprep.subr.bf16.mxu1 %v4037_v20  ;;  %v36_v19 = vld [vmem:[%s5328_s0 + $0xb0] sm:$0xff] }
  0xa1   :  { %v4092_v20 = vld [vmem:[%s5327_s1 + $0x640] ss:$16 sps:$4 sm:$0xff]   ;;  %v3173_v24 = vcombine.high %v32_v18, %v36_v19  ;;  %v4148_v6 = vld [vmem:[%s5327_s1 + $0x764] ss:$16 sps:$4 sm:$0xff]  }
  0xa2   :  { %2142 = vmatmul.mubr.bf16.gmra.mrb[16].mxu0 %v3186_v23  ;;  %2594 = vmatmul.mubr.bf16.gmra.mrb[16].mxu1 %v3186_v23  ;;  %v4103_v23 = vld [vmem:[%s5327_s1 + $0x66c] ss:$16 sps:$4 sm:$0xff]  }
  0xa3   :  { %2199 = vmatpush1.bf16.msra.mxu0 %v4032_v21  ;;  %2651 = vmatpush1.bf16.msra.mxu1 %v4035_v22  ;;  %v4095_v21 = vld [vmem:[%s5327_s1 + $0x648] ss:$16 sps:$4 sm:$0xff]   ;;  %v4100_v22 = vld [vmem:[%s5327_s1 + $0x664] ss:$16 sps:$4 sm:$0xff]  }
  0xa4   :  { %2200 = vmatprep.subr.bf16.mxu0 %v4040_v26  ;;  %2652 = vmatprep.subr.bf16.mxu1 %v4043_v27  ;;  %v4101_v26 = vld [vmem:[%s5327_s1 + $0x668] ss:$16 sps:$4 sm:$0xff]   ;;  %v4106_v27 = vld [vmem:[%s5327_s1 + $0x684] ss:$16 sps:$4 sm:$0xff]  }
  0xa5   :  { %2151 = vmatprep.mubr.bf16.mxu0 %v3195_v28  ;;  %2603 = vmatprep.mubr.bf16.mxu1 %v3195_v28  ;;  %v4109_v28 = vld [vmem:[%s5327_s1 + $0x68c] ss:$16 sps:$4 sm:$0xff]  }
  0xa7   :  { %2201 = vmatpush1.bf16.msra.mxu0 %v4038_v29  ;;  %2653 = vmatpush1.bf16.msra.mxu1 %v4041_v30  ;;  %v3172_v29 = vcombine.low %v32_v18, %v36_v19  ;;  %v40_v30 = vld [vmem:[%s5328_s0 + $0xd0] sm:$0xff]  ;;  %v4163_v19 = vld [vmem:[%s5327_s1 + $0x7ac] ss:$16 sps:$4 sm:$0xff]  }
  0xa8   :  { %2202 = vmatprep.subr.bf16.mxu0 %v4046_v31  ;;  %2654 = vmatprep.subr.bf16.mxu1 %v4049_v32  ;;  %v44_v31 = vld [vmem:[%s5328_s0 + $0xf0] sm:$0xff] }
  0xa9   :  { %v4104_v32 = vld [vmem:[%s5327_s1 + $0x680] ss:$16 sps:$4 sm:$0xff]   ;;  %v4160_v18 = vld [vmem:[%s5327_s1 + $0x7a4] ss:$16 sps:$4 sm:$0xff]  }
  0xaa   :  { %2152 = vmatmul.mubr.bf16.gmra.mrb[20].mxu0 %v3194_v34  ;;  %2604 = vmatmul.mubr.bf16.gmra.mrb[20].mxu1 %v3194_v34  ;;  %v4112_v34 = vld [vmem:[%s5327_s1 + $0x6a4] ss:$16 sps:$4 sm:$0xff]  }
  0xab   :  { %2203 = vmatpush1.bf16.msra.mxu0 %v4044_v36  ;;  %2655 = vmatpush1.bf16.msra.mxu1 %v4047_v37  ;;  %v3181_v36 = vcombine.high %v40_v30, %v44_v31  ;;  %v4110_v37 = vld [vmem:[%s5327_s1 + $0x6a0] ss:$16 sps:$4 sm:$0xff]  }
  0xac   :  { %2204 = vmatprep.subr.bf16.mxu0 %v4052_v38  ;;  %2656 = vmatprep.subr.bf16.mxu1 %v4055_v39  ;;  %v4113_v38 = vld [vmem:[%s5327_s1 + $0x6a8] ss:$16 sps:$4 sm:$0xff]   ;;  %v4118_v39 = vld [vmem:[%s5327_s1 + $0x6c4] ss:$16 sps:$4 sm:$0xff]  }
  0xad   :  { %2161 = vmatprep.mubr.bf16.mxu0 %v3203_v40  ;;  %2613 = vmatprep.mubr.bf16.mxu1 %v3203_v40  ;;  %v4121_v40 = vld [vmem:[%s5327_s1 + $0x6cc] ss:$16 sps:$4 sm:$0xff]  }
  0xaf   :  { %2205 = vmatpush1.bf16.msra.mxu0 %v4050_v41  ;;  %2657 = vmatpush1.bf16.msra.mxu1 %v4053_v42  ;;  %v3180_v41 = vcombine.low %v40_v30, %v44_v31  ;;  %v48_v42 = vld [vmem:[%s5328_s0 + $0x110] sm:$0xff]  ;;  %v4175_v31 = vld [vmem:[%s5327_s1 + $0x7ec] ss:$16 sps:$4 sm:$0xff]  }
  0xb0   :  { %2206 = vmatprep.subr.bf16.mxu0 %v4058_v43  ;;  %2658 = vmatprep.subr.bf16.mxu1 %v4061_v44  ;;  %v52_v43 = vld [vmem:[%s5328_s0 + $0x130] sm:$0xff] }
  0xb1   :  { %v4116_v44 = vld [vmem:[%s5327_s1 + $0x6c0] ss:$16 sps:$4 sm:$0xff]   ;;  %v4172_v30 = vld [vmem:[%s5327_s1 + $0x7e4] ss:$16 sps:$4 sm:$0xff]  }
  0xb2   :  { %2162 = vmatmul.mubr.bf16.gmra.mrb[24].mxu0 %v3202_v46  ;;  %2614 = vmatmul.mubr.bf16.gmra.mrb[24].mxu1 %v3202_v46  ;;  %v4124_v46 = vld [vmem:[%s5327_s1 + $0x6e4] ss:$16 sps:$4 sm:$0xff]  }
  0xb3   :  { %2207 = vmatpush1.bf16.msra.mxu0 %v4056_v48  ;;  %2659 = vmatpush1.bf16.msra.mxu1 %v4059_v49  ;;  %v3189_v48 = vcombine.high %v48_v42, %v52_v43  ;;  %v4122_v49 = vld [vmem:[%s5327_s1 + $0x6e0] ss:$16 sps:$4 sm:$0xff]  }
  0xb4   :  { %2208 = vmatprep.subr.bf16.mxu0 %v4064_v50  ;;  %2660 = vmatprep.subr.bf16.mxu1 %v4067_v51  ;;  %v4125_v50 = vld [vmem:[%s5327_s1 + $0x6e8] ss:$16 sps:$4 sm:$0xff]   ;;  %v4130_v51 = vld [vmem:[%s5327_s1 + $0x704] ss:$16 sps:$4 sm:$0xff]  }
  0xb5   :  { %2171 = vmatprep.mubr.bf16.mxu0 %v3211_v52  ;;  %2623 = vmatprep.mubr.bf16.mxu1 %v3211_v52  ;;  %v4133_v52 = vld [vmem:[%s5327_s1 + $0x70c] ss:$16 sps:$4 sm:$0xff]  }
  0xb7   :  { %2209 = vmatpush1.bf16.msra.mxu0 %v4062_v53  ;;  %2661 = vmatpush1.bf16.msra.mxu1 %v4065_v54  ;;  %v3188_v53 = vcombine.low %v48_v42, %v52_v43  ;;  %v56_v54 = vld [vmem:[%s5328_s0 + $0x150] sm:$0xff]  ;;  %v41_v43 = vld [vmem:[%s5328_s0 + $0xd8] sm:$0xff] }
  0xb8   :  { %2210 = vmatprep.subr.bf16.mxu0 %v4070_v55  ;;  %2662 = vmatprep.subr.bf16.mxu1 %v4073_v56  ;;  %v60_v55 = vld [vmem:[%s5328_s0 + $0x170] sm:$0xff] }
  0xb9   :  { %v4128_v56 = vld [vmem:[%s5327_s1 + $0x700] ss:$16 sps:$4 sm:$0xff]   ;;  %v3197_v60 = vcombine.high %v56_v54, %v60_v55 }
  0xba   :  { %2172 = vmatmul.mubr.bf16.gmra.mrb[28].mxu0 %v3210_v59  ;;  %2624 = vmatmul.mubr.bf16.gmra.mrb[28].mxu1 %v3210_v59  ;;  %v4139_v59 = vld [vmem:[%s5327_s1 + $0x72c] ss:$16 sps:$4 sm:$0xff]  }
  0xbb   :  { %2211 = vmatpush1.bf16.msra.mxu0 %v4068_v57  ;;  %2663 = vmatpush1.bf16.msra.mxu1 %v4071_v58  ;;  %v4131_v57 = vld [vmem:[%s5327_s1 + $0x708] ss:$16 sps:$4 sm:$0xff]   ;;  %v4136_v58 = vld [vmem:[%s5327_s1 + $0x724] ss:$16 sps:$4 sm:$0xff]  }
  0xbc   :  { %2212 = vmatprep.subr.bf16.mxu0 %v4076_v62  ;;  %2664 = vmatprep.subr.bf16.mxu1 %v4079_v63  ;;  %v4137_v62 = vld [vmem:[%s5327_s1 + $0x728] ss:$16 sps:$4 sm:$0xff]   ;;  %v4142_v63 = vld [vmem:[%s5327_s1 + $0x744] ss:$16 sps:$4 sm:$0xff]  }
  0xbd   :  { %2214 = vmatprep.mubr.bf16.mxu0 %v3157_v0  ;;  %2666 = vmatprep.mubr.bf16.mxu1 %v3157_v0  ;;  %v4145_v0 = vld [vmem:[%s5327_s1 + $0x74c] ss:$16 sps:$4 sm:$0xff]  }
  0xbf   :  { %2213 = vmatpush1.bf16.msra.mxu0 %v4074_v1  ;;  %2665 = vmatpush1.bf16.msra.mxu1 %v4077_v2  ;;  %v3196_v1 = vcombine.low %v56_v54, %v60_v55  ;;  %v64_v2 = vld [vmem:[%s5328_s0 + $0x190] sm:$0xff]  ;;  %v65_v55 = vld [vmem:[%s5328_s0 + $0x198] sm:$0xff] }
  0xc0   :  { %2295 = vmatprep.subr.bf16.mxu0 %v4082_v3  ;;  %2747 = vmatprep.subr.bf16.mxu1 %v4085_v4  ;;  %v68_v3 = vld [vmem:[%s5328_s0 + $0x1b0] sm:$0xff] }
  0xc1   :  { %v4140_v4 = vld [vmem:[%s5327_s1 + $0x740] ss:$16 sps:$4 sm:$0xff]  }
  0xc2   :  { %2215 = vmatmul.mubr.bf16.vlgmr.msra.gmra.mrb[0].mxu0 %v3156_v5  ;;  %2667 = vmatmul.mubr.bf16.vlgmr.msra.gmra.mrb[0].mxu1 %v3156_v5  ;;  %v4143_v5 = vld [vmem:[%s5327_s1 + $0x748] ss:$16 sps:$4 sm:$0xff]  }
  0xc3   :  { %2296 = vmatpush1.bf16.msra.mxu0 %v4080_v8  ;;  %2748 = vmatpush1.bf16.msra.mxu1 %v4083_v9  ;;  %v3205_v8 = vcombine.high %v64_v2, %v68_v3  ;;  %v4146_v9 = vld [vmem:[%s5327_s1 + $0x760] ss:$16 sps:$4 sm:$0xff]  }
  0xc4   :  { %2297 = vmatprep.subr.bf16.mxu0 %v4088_v10  ;;  %2749 = vmatprep.subr.bf16.mxu1 %v4091_v11  ;;  %v4149_v10 = vld [vmem:[%s5327_s1 + $0x768] ss:$16 sps:$4 sm:$0xff]   ;;  %v4154_v11 = vld [vmem:[%s5327_s1 + $0x784] ss:$16 sps:$4 sm:$0xff]  }
  0xc5   :  { %2224 = vmatprep.mubr.bf16.mxu0 %v3165_v12  ;;  %2676 = vmatprep.mubr.bf16.mxu1 %v3165_v12  ;;  %v4157_v12 = vld [vmem:[%s5327_s1 + $0x78c] ss:$16 sps:$4 sm:$0xff]  }
  0xc7   :  { %2298 = vmatpush1.bf16.msra.mxu0 %v4086_v13  ;;  %2750 = vmatpush1.bf16.msra.mxu1 %v4089_v14  ;;  %v3204_v13 = vcombine.low %v64_v2, %v68_v3  ;;  %v72_v14 = vld [vmem:[%s5328_s0 + $0x1d0] sm:$0xff] }
  0xc8   :  { %2299 = vmatprep.subr.bf16.mxu0 %v4094_v15  ;;  %2751 = vmatprep.subr.bf16.mxu1 %v4097_v16  ;;  %v76_v15 = vld [vmem:[%s5328_s0 + $0x1f0] sm:$0xff] }
  0xc9   :  { %v4152_v16 = vld [vmem:[%s5327_s1 + $0x780] ss:$16 sps:$4 sm:$0xff]  }
  0xca   :  { %2225 = vmatmul.mubr.bf16.gmra.mrb[4].mxu0 %v3164_v17  ;;  %2677 = vmatmul.mubr.bf16.gmra.mrb[4].mxu1 %v3164_v17  ;;  %v4155_v17 = vld [vmem:[%s5327_s1 + $0x788] ss:$16 sps:$4 sm:$0xff]  }
  0xcb   :  { %2300 = vmatpush1.bf16.msra.mxu0 %v4092_v20  ;;  %2752 = vmatpush1.bf16.msra.mxu1 %v4095_v21  ;;  %v3213_v20 = vcombine.high %v72_v14, %v76_v15  ;;  %v4158_v21 = vld [vmem:[%s5327_s1 + $0x7a0] ss:$16 sps:$4 sm:$0xff]  }
  0xcc   :  { %2301 = vmatprep.subr.bf16.mxu0 %v4100_v22  ;;  %2753 = vmatprep.subr.bf16.mxu1 %v4103_v23  ;;  %v4161_v22 = vld [vmem:[%s5327_s1 + $0x7a8] ss:$16 sps:$4 sm:$0xff]   ;;  %v4166_v23 = vld [vmem:[%s5327_s1 + $0x7c4] ss:$16 sps:$4 sm:$0xff]  }
  0xcd   :  { %2234 = vmatprep.mubr.bf16.mxu0 %v3173_v24  ;;  %2686 = vmatprep.mubr.bf16.mxu1 %v3173_v24  ;;  %v4169_v24 = vld [vmem:[%s5327_s1 + $0x7cc] ss:$16 sps:$4 sm:$0xff]  }
  0xcf   :  { %2302 = vmatpush1.bf16.msra.mxu0 %v4098_v25  ;;  %2754 = vmatpush1.bf16.msra.mxu1 %v4101_v26  ;;  %v3212_v25 = vcombine.low %v72_v14, %v76_v15  ;;  %v17_v26 = vld [vmem:[%s5328_s0 + $0x18] sm:$0xff] }
  0xd0   :  { %2303 = vmatprep.subr.bf16.mxu0 %v4106_v27  ;;  %2755 = vmatprep.subr.bf16.mxu1 %v4109_v28  ;;  %v21_v27 = vld [vmem:[%s5328_s0 + $0x38] sm:$0xff]  ;;  %v4164_v28 = vld [vmem:[%s5327_s1 + $0x7c0] ss:$16 sps:$4 sm:$0xff]  }
  0xd2   :  { %2235 = vmatmul.mubr.bf16.gmra.mrb[8].mxu0 %v3172_v29  ;;  %2687 = vmatmul.mubr.bf16.gmra.mrb[8].mxu1 %v3172_v29  ;;  %v4167_v29 = vld [vmem:[%s5327_s1 + $0x7c8] ss:$16 sps:$4 sm:$0xff]  }
  0xd3   :  { %2304 = vmatpush1.bf16.msra.mxu0 %v4104_v32  ;;  %2756 = vmatpush1.bf16.msra.mxu1 %v4107_v33  ;;  %v3159_v32 = vcombine.high %v17_v26, %v21_v27  ;;  %v4170_v33 = vld [vmem:[%s5327_s1 + $0x7e0] ss:$16 sps:$4 sm:$0xff]  }
  0xd4   :  { %2305 = vmatprep.subr.bf16.mxu0 %v4112_v34  ;;  %2757 = vmatprep.subr.bf16.mxu1 %v4115_v35  ;;  %v4173_v34 = vld [vmem:[%s5327_s1 + $0x7e8] ss:$16 sps:$4 sm:$0xff]  }
  0xd5   :  { %2244 = vmatprep.mubr.bf16.mxu0 %v3181_v36  ;;  %2696 = vmatprep.mubr.bf16.mxu1 %v3181_v36  ;;  %v25_v35 = vld [vmem:[%s5328_s0 + $0x58] sm:$0xff] }
  0xd6   :  { %v29_v36 = vld [vmem:[%s5328_s0 + $0x78] sm:$0xff] }
  0xd7   :  { %2306 = vmatpush1.bf16.msra.mxu0 %v4110_v37  ;;  %2758 = vmatpush1.bf16.msra.mxu1 %v4113_v38  ;;  %v3158_v37 = vcombine.low %v17_v26, %v21_v27  ;;  %v3167_v38 = vcombine.high %v25_v35, %v29_v36 }
  0xd8   :  { %2307 = vmatprep.subr.bf16.mxu0 %v4118_v39  ;;  %2759 = vmatprep.subr.bf16.mxu1 %v4121_v40  ;;  %v33_v39 = vld [vmem:[%s5328_s0 + $0x98] sm:$0xff] }
  0xd9   :  { %v37_v40 = vld [vmem:[%s5328_s0 + $0xb8] sm:$0xff] }
  0xda   :  { %2245 = vmatmul.mubr.bf16.gmra.mrb[12].mxu0 %v3180_v41  ;;  %2697 = vmatmul.mubr.bf16.gmra.mrb[12].mxu1 %v3180_v41  ;;  %v3166_v41 = vcombine.low %v25_v35, %v29_v36  ;;  %v3175_v42 = vcombine.high %v33_v39, %v37_v40 }
  0xdb   :  { %2308 = vmatpush1.bf16.msra.mxu0 %v4116_v44  ;;  %2760 = vmatpush1.bf16.msra.mxu1 %v4119_v45  ;;  %v45_v44 = vld [vmem:[%s5328_s0 + $0xf8] sm:$0xff]  ;;  %v3174_v45 = vcombine.low %v33_v39, %v37_v40 }
  0xdc   :  { %2309 = vmatprep.subr.bf16.mxu0 %v4124_v46  ;;  %2761 = vmatprep.subr.bf16.mxu1 %v4127_v47  ;;  %v3183_v46 = vcombine.high %v41_v43, %v45_v44  ;;  %v49_v47 = vld [vmem:[%s5328_s0 + $0x118] sm:$0xff] }
  0xdd   :  { %2254 = vmatprep.mubr.bf16.mxu0 %v3189_v48  ;;  %2706 = vmatprep.mubr.bf16.mxu1 %v3189_v48  ;;  %v53_v48 = vld [vmem:[%s5328_s0 + $0x138] sm:$0xff] }
  0xdf   :  { %2310 = vmatpush1.bf16.msra.mxu0 %v4122_v49  ;;  %2762 = vmatpush1.bf16.msra.mxu1 %v4125_v50  ;;  %v3182_v49 = vcombine.low %v41_v43, %v45_v44  ;;  %v3191_v50 = vcombine.high %v49_v47, %v53_v48 }
  0xe0   :  { %2311 = vmatprep.subr.bf16.mxu0 %v4130_v51  ;;  %2763 = vmatprep.subr.bf16.mxu1 %v4133_v52  ;;  %v57_v51 = vld [vmem:[%s5328_s0 + $0x158] sm:$0xff] }
  0xe1   :  { %v61_v52 = vld [vmem:[%s5328_s0 + $0x178] sm:$0xff] }
  0xe2   :  { %2255 = vmatmul.mubr.bf16.gmra.mrb[16].mxu0 %v3188_v53  ;;  %2707 = vmatmul.mubr.bf16.gmra.mrb[16].mxu1 %v3188_v53  ;;  %v3190_v53 = vcombine.low %v49_v47, %v53_v48  ;;  %v3199_v54 = vcombine.high %v57_v51, %v61_v52 }
  0xe3   :  { %2312 = vmatpush1.bf16.msra.mxu0 %v4128_v56  ;;  %2764 = vmatpush1.bf16.msra.mxu1 %v4131_v57  ;;  %v69_v56 = vld [vmem:[%s5328_s0 + $0x1b8] sm:$0xff]  ;;  %v3198_v57 = vcombine.low %v57_v51, %v61_v52 }
  0xe4   :  { %2313 = vmatprep.subr.bf16.mxu0 %v4136_v58  ;;  %2765 = vmatprep.subr.bf16.mxu1 %v4139_v59  ;;  %v3207_v58 = vcombine.high %v65_v55, %v69_v56  ;;  %v73_v59 = vld [vmem:[%s5328_s0 + $0x1d8] sm:$0xff] }
  0xe5   :  { %2264 = vmatprep.mubr.bf16.mxu0 %v3197_v60  ;;  %2716 = vmatprep.mubr.bf16.mxu1 %v3197_v60  ;;  %v77_v60 = vld [vmem:[%s5328_s0 + $0x1f8] sm:$0xff] }
  0xe7   :  { %2314 = vmatpush1.bf16.msra.mxu0 %v4134_v61  ;;  %2766 = vmatpush1.bf16.msra.mxu1 %v4137_v62  ;;  %v3206_v61 = vcombine.low %v65_v55, %v69_v56  ;;  %v3215_v62 = vcombine.high %v73_v59, %v77_v60 }
  0xe8   :  { %2315 = vmatprep.subr.bf16.mxu0 %v4142_v63  ;;  %2767 = vmatprep.subr.bf16.mxu1 %v4145_v0  ;;  %v3214_v63 = vcombine.low %v73_v59, %v77_v60  ;;  %v336_v0 = vlaneseq }
  0xea   :  { %2265 = vmatmul.mubr.bf16.gmra.mrb[20].mxu0 %v3196_v1  ;;  %2717 = vmatmul.mubr.bf16.gmra.mrb[20].mxu1 %v3196_v1  ;;  %v337_v1 = vshrl.u32 %v336_v0, 7 }
  0xeb   :  { %2316 = vmatpush1.bf16.msra.mxu0 %v4140_v4  ;;  %2768 = vmatpush1.bf16.msra.mxu1 %v4143_v5  ;;  %v334_v4 = vld [vmem:[%s5329_s2] sm:$0xf] }
  0xec   :  { %2317 = vmatprep.subr.bf16.mxu0 %v4148_v6  ;;  %2769 = vmatprep.subr.bf16.mxu1 %v4151_v7  ;;  %v338_v2 = vsub.s32 0, %v337_v1  ;;  %v346_v3 = vsub.s32 2, %v337_v1  ;;  %v342_v5 = vsub.s32 1, %v337_v1  ;;  %v350_v6 = vsub.s32 3, %v337_v1 }
  0xed   :  { %2274 = vmatprep.mubr.bf16.mxu0 %v3205_v8  ;;  %2726 = vmatprep.mubr.bf16.mxu1 %v3205_v8 }
  0xee   :  { %v5159_v7 = vrot.slane %v334_v4, %v338_v2  ;;  %v5161_v8 = vrot.slane %v334_v4, %v346_v3 }
  0xef   :  { %2318 = vmatpush1.bf16.msra.mxu0 %v4146_v9  ;;  %2770 = vmatpush1.bf16.msra.mxu1 %v4149_v10  ;;  %v5163_v9 = vrot.slane %v334_v4, %v342_v5  ;;  %v5165_v10 = vrot.slane %v334_v4, %v350_v6 }
  0xf0   :  { %2319 = vmatprep.subr.bf16.mxu0 %v4154_v11  ;;  %2771 = vmatprep.subr.bf16.mxu1 %v4157_v12 }
  0xf2   :  { %2275 = vmatmul.mubr.bf16.gmra.mrb[24].mxu0 %v3204_v13  ;;  %2727 = vmatmul.mubr.bf16.gmra.mrb[24].mxu1 %v3204_v13 }
  0xf3   :  { %2320 = vmatpush1.bf16.msra.mxu0 %v4152_v16  ;;  %2772 = vmatpush1.bf16.msra.mxu1 %v4155_v17 }
  0xf4   :  { %2321 = vmatprep.subr.bf16.mxu0 %v4160_v18  ;;  %2773 = vmatprep.subr.bf16.mxu1 %v4163_v19 }
  0xf5   :  { %2284 = vmatprep.mubr.bf16.mxu0 %v3213_v20  ;;  %2736 = vmatprep.mubr.bf16.mxu1 %v3213_v20 }
  0xf7   :  { %2322 = vmatpush1.bf16.msra.mxu0 %v4158_v21  ;;  %2774 = vmatpush1.bf16.msra.mxu1 %v4161_v22 }
  0xf8   :  { %2323 = vmatprep.subr.bf16.mxu0 %v4166_v23  ;;  %2775 = vmatprep.subr.bf16.mxu1 %v4169_v24 }
  0xfa   :  { %2285 = vmatmul.mubr.bf16.gmra.mrb[28].mxu0 %v3212_v25  ;;  %2737 = vmatmul.mubr.bf16.gmra.mrb[28].mxu1 %v3212_v25 }
  0xfb   :  { %2324 = vmatpush1.bf16.msra.mxu0 %v4164_v28  ;;  %2776 = vmatpush1.bf16.msra.mxu1 %v4167_v29 }
  0xfc   :  { %2325 = vmatprep.subr.bf16.mxu0 %v4172_v30  ;;  %2777 = vmatprep.subr.bf16.mxu1 %v4175_v31 }
  0xfd   :  { %2327 = vmatprep.mubr.bf16.mxu0 %v3159_v32  ;;  %2779 = vmatprep.mubr.bf16.mxu1 %v3159_v32 }
  0xff   :  { %2326 = vmatpush1.bf16.msra.mxu0 %v4170_v33  ;;  %2778 = vmatpush1.bf16.msra.mxu1 %v4173_v34 }
 0x102   :  { %2328 = vmatmul.mubr.bf16.vlgmr.msra.gmra.mrb[0].mxu0 %v3158_v37  ;;  %2780 = vmatmul.mubr.bf16.vlgmr.msra.gmra.mrb[0].mxu1 %v3158_v37 }
 0x103   :  { %2337 = vmatprep.mubr.bf16.mxu0 %v3167_v38  ;;  %2789 = vmatprep.mubr.bf16.mxu1 %v3167_v38 }
 0x10a   :  { %2338 = vmatmul.mubr.bf16.gmra.mrb[4].mxu0 %v3166_v41  ;;  %2790 = vmatmul.mubr.bf16.gmra.mrb[4].mxu1 %v3166_v41 }
 0x10b   :  { %2347 = vmatprep.mubr.bf16.mxu0 %v3175_v42  ;;  %2799 = vmatprep.mubr.bf16.mxu1 %v3175_v42 }
 0x112   :  { %2348 = vmatmul.mubr.bf16.gmra.mrb[8].mxu0 %v3174_v45  ;;  %2800 = vmatmul.mubr.bf16.gmra.mrb[8].mxu1 %v3174_v45 }
 0x113   :  { %2357 = vmatprep.mubr.bf16.mxu0 %v3183_v46  ;;  %2809 = vmatprep.mubr.bf16.mxu1 %v3183_v46 }
 0x11a   :  { %2358 = vmatmul.mubr.bf16.gmra.mrb[12].mxu0 %v3182_v49  ;;  %2810 = vmatmul.mubr.bf16.gmra.mrb[12].mxu1 %v3182_v49 }
 0x11b   :  { %2367 = vmatprep.mubr.bf16.mxu0 %v3191_v50  ;;  %2819 = vmatprep.mubr.bf16.mxu1 %v3191_v50 }
 0x122   :  { %2368 = vmatmul.mubr.bf16.gmra.mrb[16].mxu0 %v3190_v53  ;;  %2820 = vmatmul.mubr.bf16.gmra.mrb[16].mxu1 %v3190_v53 }
 0x123   :  { %2377 = vmatprep.mubr.bf16.mxu0 %v3199_v54  ;;  %2829 = vmatprep.mubr.bf16.mxu1 %v3199_v54 }
 0x12a   :  { %2378 = vmatmul.mubr.bf16.gmra.mrb[20].mxu0 %v3198_v57  ;;  %2830 = vmatmul.mubr.bf16.gmra.mrb[20].mxu1 %v3198_v57 }
 0x12b   :  { %2387 = vmatprep.mubr.bf16.mxu0 %v3207_v58  ;;  %2839 = vmatprep.mubr.bf16.mxu1 %v3207_v58 }
 0x132   :  { %2388 = vmatmul.mubr.bf16.gmra.mrb[24].mxu0 %v3206_v61  ;;  %2840 = vmatmul.mubr.bf16.gmra.mrb[24].mxu1 %v3206_v61 }
 0x133   :  { %2397 = vmatprep.mubr.bf16.mxu0 %v3215_v62  ;;  %2849 = vmatprep.mubr.bf16.mxu1 %v3215_v62 }
 0x13a   :  { %2398 = vmatmul.mubr.bf16.gmra.mrb[28].mxu0 %v3214_v63  ;;  %2850 = vmatmul.mubr.bf16.gmra.mrb[28].mxu1 %v3214_v63 }
 0x1d5   :  { %v2329_v11 = vpop.f32.mrb[0].mxu0  ;;  %v2781_v12 = vpop.f32.mrb[0].mxu1 }
 0x1d6   :  { %v3536_v13 = vadd.f32 %v2329_v11, %v5159_v7  ;;  %v3568_v14 = vadd.f32 %v2781_v12, %v5161_v8  ;;  %v2331_v15 = vpop.f32.mrb[1].mxu0  ;;  %v2783_v16 = vpop.f32.mrb[1].mxu1 }
 0x1d7   :  { %v3537_v17 = vadd.f32 %v2331_v15, %v5163_v9  ;;  %v3569_v18 = vadd.f32 %v2783_v16, %v5165_v10  ;;  %v2333_v19 = vpop.f32.mrb[2].mxu0  ;;  %v2785_v20 = vpop.f32.mrb[2].mxu1 }
 0x1d8   :  { %v2860_v21 = vmax.f32 %v3536_v13, 0.0  ;;  %v2862_v22 = vmax.f32 %v3568_v14, 0.0  ;;  %v3538_v23 = vadd.f32 %v2333_v19, %v5159_v7  ;;  %v3570_v24 = vadd.f32 %v2785_v20, %v5161_v8  ;;  %v2335_v25 = vpop.f32.mrb[3].mxu0  ;;  %v2787_v26 = vpop.f32.mrb[3].mxu1 }
 0x1d9   :  { %v2861_v27 = vmax.f32 %v3537_v17, 0.0  ;;  %v2863_v28 = vmax.f32 %v3569_v18, 0.0  ;;  %v3539_v29 = vadd.f32 %v2335_v25, %v5163_v9  ;;  %v3571_v30 = vadd.f32 %v2787_v26, %v5165_v10 }
 0x1da   :  { %v2864_v31 = vmax.f32 %v3538_v23, 0.0  ;;  %v2866_v32 = vmax.f32 %v3570_v24, 0.0 }
 0x1db   :  { %v3504_v33 = vpack.c.bf16 %v2861_v27, %v2860_v21  ;;  %v3505_v34 = vpack.c.bf16 %v2863_v28, %v2862_v22  ;;  %v2865_v35 = vmax.f32 %v3539_v29, 0.0  ;;  %v2867_v36 = vmax.f32 %v3571_v30, 0.0 }
 0x1dd   :  { %3116 = vst [vmem:[%s5330_s3] sm:$0xff] %v3504_v33  ;;  %3117 = vst [vmem:[%s5330_s3 + $0x8] sm:$0xff] %v3505_v34  ;;  %v3506_v37 = vpack.c.bf16 %v2865_v35, %v2864_v31  ;;  %v3507_v38 = vpack.c.bf16 %v2867_v36, %v2866_v32  ;;  %v2339_v39 = vpop.f32.mrb[4].mxu0  ;;  %v2791_v40 = vpop.f32.mrb[4].mxu1 }
 0x1de   :  { %v3540_v41 = vadd.f32 %v2339_v39, %v5159_v7  ;;  %v3572_v42 = vadd.f32 %v2791_v40, %v5161_v8  ;;  %v2341_v43 = vpop.f32.mrb[5].mxu0  ;;  %v2793_v44 = vpop.f32.mrb[5].mxu1 }
 0x1df   :  { %3118 = vst [vmem:[%s5330_s3 + $0x10] sm:$0xff] %v3506_v37  ;;  %3119 = vst [vmem:[%s5330_s3 + $0x18] sm:$0xff] %v3507_v38  ;;  %v3541_v45 = vadd.f32 %v2341_v43, %v5163_v9  ;;  %v3573_v46 = vadd.f32 %v2793_v44, %v5165_v10  ;;  %v2343_v47 = vpop.f32.mrb[6].mxu0  ;;  %v2795_v48 = vpop.f32.mrb[6].mxu1 }
 0x1e0   :  { %v2868_v49 = vmax.f32 %v3540_v41, 0.0  ;;  %v2870_v50 = vmax.f32 %v3572_v42, 0.0  ;;  %v3542_v51 = vadd.f32 %v2343_v47, %v5159_v7  ;;  %v3574_v52 = vadd.f32 %v2795_v48, %v5161_v8  ;;  %v2345_v53 = vpop.f32.mrb[7].mxu0  ;;  %v2797_v54 = vpop.f32.mrb[7].mxu1 }
 0x1e1   :  { %v2869_v55 = vmax.f32 %v3541_v45, 0.0  ;;  %v2871_v56 = vmax.f32 %v3573_v46, 0.0  ;;  %v3543_v57 = vadd.f32 %v2345_v53, %v5163_v9  ;;  %v3575_v58 = vadd.f32 %v2797_v54, %v5165_v10 }
 0x1e2   :  { %v2872_v59 = vmax.f32 %v3542_v51, 0.0  ;;  %v2874_v60 = vmax.f32 %v3574_v52, 0.0 }
 0x1e3   :  { %v3508_v61 = vpack.c.bf16 %v2869_v55, %v2868_v49  ;;  %v3509_v62 = vpack.c.bf16 %v2871_v56, %v2870_v50  ;;  %v2873_v63 = vmax.f32 %v3543_v57, 0.0  ;;  %v2875_v0 = vmax.f32 %v3575_v58, 0.0 }
 0x1e5   :  { %3120 = vst [vmem:[%s5330_s3 + $0x20] sm:$0xff] %v3508_v61  ;;  %3121 = vst [vmem:[%s5330_s3 + $0x28] sm:$0xff] %v3509_v62  ;;  %v3510_v1 = vpack.c.bf16 %v2873_v63, %v2872_v59  ;;  %v3511_v2 = vpack.c.bf16 %v2875_v0, %v2874_v60  ;;  %v2349_v3 = vpop.f32.mrb[8].mxu0  ;;  %v2801_v4 = vpop.f32.mrb[8].mxu1 }
 0x1e6   :  { %v3544_v5 = vadd.f32 %v2349_v3, %v5159_v7  ;;  %v3576_v6 = vadd.f32 %v2801_v4, %v5161_v8  ;;  %v2351_v11 = vpop.f32.mrb[9].mxu0  ;;  %v2803_v12 = vpop.f32.mrb[9].mxu1 }
 0x1e7   :  { %3122 = vst [vmem:[%s5330_s3 + $0x30] sm:$0xff] %v3510_v1  ;;  %3123 = vst [vmem:[%s5330_s3 + $0x38] sm:$0xff] %v3511_v2  ;;  %v3545_v13 = vadd.f32 %v2351_v11, %v5163_v9  ;;  %v3577_v14 = vadd.f32 %v2803_v12, %v5165_v10  ;;  %v2353_v15 = vpop.f32.mrb[10].mxu0  ;;  %v2805_v16 = vpop.f32.mrb[10].mxu1 }
 0x1e8   :  { %v2876_v17 = vmax.f32 %v3544_v5, 0.0  ;;  %v2878_v18 = vmax.f32 %v3576_v6, 0.0  ;;  %v3546_v19 = vadd.f32 %v2353_v15, %v5159_v7  ;;  %v3578_v20 = vadd.f32 %v2805_v16, %v5161_v8  ;;  %v2355_v21 = vpop.f32.mrb[11].mxu0  ;;  %v2807_v22 = vpop.f32.mrb[11].mxu1 }
 0x1e9   :  { %v2877_v23 = vmax.f32 %v3545_v13, 0.0  ;;  %v2879_v24 = vmax.f32 %v3577_v14, 0.0  ;;  %v3547_v25 = vadd.f32 %v2355_v21, %v5163_v9  ;;  %v3579_v26 = vadd.f32 %v2807_v22, %v5165_v10 }
 0x1ea   :  { %v2880_v27 = vmax.f32 %v3546_v19, 0.0  ;;  %v2882_v28 = vmax.f32 %v3578_v20, 0.0 }
 0x1eb   :  { %v3512_v29 = vpack.c.bf16 %v2877_v23, %v2876_v17  ;;  %v3513_v30 = vpack.c.bf16 %v2879_v24, %v2878_v18  ;;  %v2881_v31 = vmax.f32 %v3547_v25, 0.0  ;;  %v2883_v32 = vmax.f32 %v3579_v26, 0.0 }
 0x1ed   :  { %3124 = vst [vmem:[%s5330_s3 + $0x40] sm:$0xff] %v3512_v29  ;;  %3125 = vst [vmem:[%s5330_s3 + $0x48] sm:$0xff] %v3513_v30  ;;  %v3514_v33 = vpack.c.bf16 %v2881_v31, %v2880_v27  ;;  %v3515_v34 = vpack.c.bf16 %v2883_v32, %v2882_v28  ;;  %v2359_v35 = vpop.f32.mrb[12].mxu0  ;;  %v2811_v36 = vpop.f32.mrb[12].mxu1 }
 0x1ee   :  { %v3548_v37 = vadd.f32 %v2359_v35, %v5159_v7  ;;  %v3580_v38 = vadd.f32 %v2811_v36, %v5161_v8  ;;  %v2361_v39 = vpop.f32.mrb[13].mxu0  ;;  %v2813_v40 = vpop.f32.mrb[13].mxu1 }
 0x1ef   :  { %3126 = vst [vmem:[%s5330_s3 + $0x50] sm:$0xff] %v3514_v33  ;;  %3127 = vst [vmem:[%s5330_s3 + $0x58] sm:$0xff] %v3515_v34  ;;  %v3549_v41 = vadd.f32 %v2361_v39, %v5163_v9  ;;  %v3581_v42 = vadd.f32 %v2813_v40, %v5165_v10  ;;  %v2363_v43 = vpop.f32.mrb[14].mxu0  ;;  %v2815_v44 = vpop.f32.mrb[14].mxu1 }
 0x1f0   :  { %v2884_v45 = vmax.f32 %v3548_v37, 0.0  ;;  %v2886_v46 = vmax.f32 %v3580_v38, 0.0  ;;  %v3550_v47 = vadd.f32 %v2363_v43, %v5159_v7  ;;  %v3582_v48 = vadd.f32 %v2815_v44, %v5161_v8  ;;  %v2365_v49 = vpop.f32.mrb[15].mxu0  ;;  %v2817_v50 = vpop.f32.mrb[15].mxu1 }
 0x1f1   :  { %v2885_v51 = vmax.f32 %v3549_v41, 0.0  ;;  %v2887_v52 = vmax.f32 %v3581_v42, 0.0  ;;  %v3551_v53 = vadd.f32 %v2365_v49, %v5163_v9  ;;  %v3583_v54 = vadd.f32 %v2817_v50, %v5165_v10 }
 0x1f2   :  { %v2888_v55 = vmax.f32 %v3550_v47, 0.0  ;;  %v2890_v56 = vmax.f32 %v3582_v48, 0.0 }
 0x1f3   :  { %v3516_v57 = vpack.c.bf16 %v2885_v51, %v2884_v45  ;;  %v3517_v58 = vpack.c.bf16 %v2887_v52, %v2886_v46  ;;  %v2889_v59 = vmax.f32 %v3551_v53, 0.0  ;;  %v2891_v60 = vmax.f32 %v3583_v54, 0.0 }
 0x1f5   :  { %3128 = vst [vmem:[%s5330_s3 + $0x60] sm:$0xff] %v3516_v57  ;;  %3129 = vst [vmem:[%s5330_s3 + $0x68] sm:$0xff] %v3517_v58  ;;  %v3518_v61 = vpack.c.bf16 %v2889_v59, %v2888_v55  ;;  %v3519_v62 = vpack.c.bf16 %v2891_v60, %v2890_v56  ;;  %v2369_v63 = vpop.f32.mrb[16].mxu0  ;;  %v2821_v0 = vpop.f32.mrb[16].mxu1 }
 0x1f6   :  { %v3552_v1 = vadd.f32 %v2369_v63, %v5159_v7  ;;  %v3584_v2 = vadd.f32 %v2821_v0, %v5161_v8  ;;  %v2371_v3 = vpop.f32.mrb[17].mxu0  ;;  %v2823_v4 = vpop.f32.mrb[17].mxu1 }
 0x1f7   :  { %3130 = vst [vmem:[%s5330_s3 + $0x70] sm:$0xff] %v3518_v61  ;;  %3131 = vst [vmem:[%s5330_s3 + $0x78] sm:$0xff] %v3519_v62  ;;  %v3553_v5 = vadd.f32 %v2371_v3, %v5163_v9  ;;  %v3585_v6 = vadd.f32 %v2823_v4, %v5165_v10  ;;  %v2373_v11 = vpop.f32.mrb[18].mxu0  ;;  %v2825_v12 = vpop.f32.mrb[18].mxu1 }
 0x1f8   :  { %v2892_v13 = vmax.f32 %v3552_v1, 0.0  ;;  %v2894_v14 = vmax.f32 %v3584_v2, 0.0  ;;  %v3554_v15 = vadd.f32 %v2373_v11, %v5159_v7  ;;  %v3586_v16 = vadd.f32 %v2825_v12, %v5161_v8  ;;  %v2375_v17 = vpop.f32.mrb[19].mxu0  ;;  %v2827_v18 = vpop.f32.mrb[19].mxu1 }
 0x1f9   :  { %v2893_v19 = vmax.f32 %v3553_v5, 0.0  ;;  %v2895_v20 = vmax.f32 %v3585_v6, 0.0  ;;  %v3555_v21 = vadd.f32 %v2375_v17, %v5163_v9  ;;  %v3587_v22 = vadd.f32 %v2827_v18, %v5165_v10 }
 0x1fa   :  { %v2896_v23 = vmax.f32 %v3554_v15, 0.0  ;;  %v2898_v24 = vmax.f32 %v3586_v16, 0.0 }
 0x1fb   :  { %v3520_v25 = vpack.c.bf16 %v2893_v19, %v2892_v13  ;;  %v3521_v26 = vpack.c.bf16 %v2895_v20, %v2894_v14  ;;  %v2897_v27 = vmax.f32 %v3555_v21, 0.0  ;;  %v2899_v28 = vmax.f32 %v3587_v22, 0.0 }
 0x1fd   :  { %3132 = vst [vmem:[%s5330_s3 + $0x80] sm:$0xff] %v3520_v25  ;;  %3133 = vst [vmem:[%s5330_s3 + $0x88] sm:$0xff] %v3521_v26  ;;  %v3522_v29 = vpack.c.bf16 %v2897_v27, %v2896_v23  ;;  %v3523_v30 = vpack.c.bf16 %v2899_v28, %v2898_v24  ;;  %v2379_v31 = vpop.f32.mrb[20].mxu0  ;;  %v2831_v32 = vpop.f32.mrb[20].mxu1 }
 0x1fe   :  { %v3556_v33 = vadd.f32 %v2379_v31, %v5159_v7  ;;  %v3588_v34 = vadd.f32 %v2831_v32, %v5161_v8  ;;  %v2381_v35 = vpop.f32.mrb[21].mxu0  ;;  %v2833_v36 = vpop.f32.mrb[21].mxu1 }
 0x1ff   :  { %3134 = vst [vmem:[%s5330_s3 + $0x90] sm:$0xff] %v3522_v29  ;;  %3135 = vst [vmem:[%s5330_s3 + $0x98] sm:$0xff] %v3523_v30  ;;  %v3557_v37 = vadd.f32 %v2381_v35, %v5163_v9  ;;  %v3589_v38 = vadd.f32 %v2833_v36, %v5165_v10  ;;  %v2383_v39 = vpop.f32.mrb[22].mxu0  ;;  %v2835_v40 = vpop.f32.mrb[22].mxu1 }
 0x200   :  { %v2900_v41 = vmax.f32 %v3556_v33, 0.0  ;;  %v2902_v42 = vmax.f32 %v3588_v34, 0.0  ;;  %v3558_v43 = vadd.f32 %v2383_v39, %v5159_v7  ;;  %v3590_v44 = vadd.f32 %v2835_v40, %v5161_v8  ;;  %v2385_v45 = vpop.f32.mrb[23].mxu0  ;;  %v2837_v46 = vpop.f32.mrb[23].mxu1 }
 0x201   :  { %v2901_v47 = vmax.f32 %v3557_v37, 0.0  ;;  %v2903_v48 = vmax.f32 %v3589_v38, 0.0  ;;  %v3559_v49 = vadd.f32 %v2385_v45, %v5163_v9  ;;  %v3591_v50 = vadd.f32 %v2837_v46, %v5165_v10 }
 0x202   :  { %v2904_v51 = vmax.f32 %v3558_v43, 0.0  ;;  %v2906_v52 = vmax.f32 %v3590_v44, 0.0 }
 0x203   :  { %v3524_v53 = vpack.c.bf16 %v2901_v47, %v2900_v41  ;;  %v3525_v54 = vpack.c.bf16 %v2903_v48, %v2902_v42  ;;  %v2905_v55 = vmax.f32 %v3559_v49, 0.0  ;;  %v2907_v56 = vmax.f32 %v3591_v50, 0.0 }
 0x205   :  { %3136 = vst [vmem:[%s5330_s3 + $0xa0] sm:$0xff] %v3524_v53  ;;  %3137 = vst [vmem:[%s5330_s3 + $0xa8] sm:$0xff] %v3525_v54  ;;  %v3526_v57 = vpack.c.bf16 %v2905_v55, %v2904_v51  ;;  %v3527_v58 = vpack.c.bf16 %v2907_v56, %v2906_v52  ;;  %v2389_v59 = vpop.f32.mrb[24].mxu0  ;;  %v2841_v60 = vpop.f32.mrb[24].mxu1 }
 0x206   :  { %v3560_v61 = vadd.f32 %v2389_v59, %v5159_v7  ;;  %v3592_v62 = vadd.f32 %v2841_v60, %v5161_v8  ;;  %v2391_v63 = vpop.f32.mrb[25].mxu0  ;;  %v2843_v0 = vpop.f32.mrb[25].mxu1 }
 0x207   :  { %3138 = vst [vmem:[%s5330_s3 + $0xb0] sm:$0xff] %v3526_v57  ;;  %3139 = vst [vmem:[%s5330_s3 + $0xb8] sm:$0xff] %v3527_v58  ;;  %v3561_v1 = vadd.f32 %v2391_v63, %v5163_v9  ;;  %v3593_v2 = vadd.f32 %v2843_v0, %v5165_v10  ;;  %v2393_v3 = vpop.f32.mrb[26].mxu0  ;;  %v2845_v4 = vpop.f32.mrb[26].mxu1 }
 0x208   :  { %v2908_v5 = vmax.f32 %v3560_v61, 0.0  ;;  %v2910_v6 = vmax.f32 %v3592_v62, 0.0  ;;  %v3562_v11 = vadd.f32 %v2393_v3, %v5159_v7  ;;  %v3594_v12 = vadd.f32 %v2845_v4, %v5161_v8  ;;  %v2395_v13 = vpop.f32.mrb[27].mxu0  ;;  %v2847_v14 = vpop.f32.mrb[27].mxu1 }
 0x209   :  { %v2909_v15 = vmax.f32 %v3561_v1, 0.0  ;;  %v2911_v16 = vmax.f32 %v3593_v2, 0.0  ;;  %v3563_v17 = vadd.f32 %v2395_v13, %v5163_v9  ;;  %v3595_v18 = vadd.f32 %v2847_v14, %v5165_v10 }
 0x20a   :  { %v2912_v19 = vmax.f32 %v3562_v11, 0.0  ;;  %v2914_v20 = vmax.f32 %v3594_v12, 0.0 }
 0x20b   :  { %v3528_v21 = vpack.c.bf16 %v2909_v15, %v2908_v5  ;;  %v3529_v22 = vpack.c.bf16 %v2911_v16, %v2910_v6  ;;  %v2913_v23 = vmax.f32 %v3563_v17, 0.0  ;;  %v2915_v24 = vmax.f32 %v3595_v18, 0.0 }
 0x20d   :  { %3140 = vst [vmem:[%s5330_s3 + $0xc0] sm:$0xff] %v3528_v21  ;;  %3141 = vst [vmem:[%s5330_s3 + $0xc8] sm:$0xff] %v3529_v22  ;;  %v3530_v25 = vpack.c.bf16 %v2913_v23, %v2912_v19  ;;  %v3531_v26 = vpack.c.bf16 %v2915_v24, %v2914_v20  ;;  %v2399_v27 = vpop.f32.mrb[28].mxu0  ;;  %v2851_v28 = vpop.f32.mrb[28].mxu1 }
 0x20e   :  { %v3564_v29 = vadd.f32 %v2399_v27, %v5159_v7  ;;  %v3596_v30 = vadd.f32 %v2851_v28, %v5161_v8  ;;  %v2401_v31 = vpop.f32.mrb[29].mxu0  ;;  %v2853_v32 = vpop.f32.mrb[29].mxu1 }
 0x20f   :  { %3142 = vst [vmem:[%s5330_s3 + $0xd0] sm:$0xff] %v3530_v25  ;;  %3143 = vst [vmem:[%s5330_s3 + $0xd8] sm:$0xff] %v3531_v26  ;;  %v3565_v33 = vadd.f32 %v2401_v31, %v5163_v9  ;;  %v3597_v34 = vadd.f32 %v2853_v32, %v5165_v10  ;;  %v2403_v35 = vpop.f32.mrb[30].mxu0  ;;  %v2855_v36 = vpop.f32.mrb[30].mxu1 }
 0x210   :  { %v2916_v37 = vmax.f32 %v3564_v29, 0.0  ;;  %v2918_v38 = vmax.f32 %v3596_v30, 0.0  ;;  %v3566_v39 = vadd.f32 %v2403_v35, %v5159_v7  ;;  %v3598_v40 = vadd.f32 %v2855_v36, %v5161_v8  ;;  %v2405_v41 = vpop.f32.mrb[31].mxu0  ;;  %v2857_v42 = vpop.f32.mrb[31].mxu1 }
 0x211   :  { %v2917_v43 = vmax.f32 %v3565_v33, 0.0  ;;  %v2919_v44 = vmax.f32 %v3597_v34, 0.0  ;;  %v3567_v45 = vadd.f32 %v2405_v41, %v5163_v9  ;;  %v3599_v46 = vadd.f32 %v2857_v42, %v5165_v10 }
 0x212   :  { %v2920_v47 = vmax.f32 %v3566_v39, 0.0  ;;  %v2922_v48 = vmax.f32 %v3598_v40, 0.0 }
 0x213   :  { %v3532_v49 = vpack.c.bf16 %v2917_v43, %v2916_v37  ;;  %v3533_v50 = vpack.c.bf16 %v2919_v44, %v2918_v38  ;;  %v2921_v51 = vmax.f32 %v3567_v45, 0.0  ;;  %v2923_v52 = vmax.f32 %v3599_v46, 0.0 }
 0x215   :  { %3144 = vst [vmem:[%s5330_s3 + $0xe0] sm:$0xff] %v3532_v49  ;;  %3145 = vst [vmem:[%s5330_s3 + $0xe8] sm:$0xff] %v3533_v50  ;;  %v3534_v7 = vpack.c.bf16 %v2921_v51, %v2920_v47  ;;  %v3535_v8 = vpack.c.bf16 %v2923_v52, %v2922_v48 }
 0x217   :  { %3146 = vst [vmem:[%s5330_s3 + $0xf0] sm:$0xff] %v3534_v7  ;;  %3147 = vst [vmem:[%s5330_s3 + $0xf8] sm:$0xff] %v3535_v8 }

</bundles_post_ra>
